<compile_context>
chip_gen: v7x
topology: tpu7x:2x2x1
jax: 0.10.0
libtpu: 0.0.40
codegen_flags: <defaults>
</compile_context>

<pallas_src>
import functools

import jax
import jax.numpy as jnp
import numpy as np
from jax.experimental import pallas as pl
from jax.experimental.pallas import tpu as pltpu

VMEM_LIMIT = 32 * 1024 * 1024  # explicit scoped-VMEM budget (safe on v5e/v6e/v7x)


# ----------------- parameter folding (shared by kernel & reference) ----------

def fold_conv_block(blk, eps=1e-5):
    """Fold eval-mode BatchNorm + conv bias into the conv weights.

    Returns (w_mat bf16 (9*cin_pad, Cout), b_fold f32 (1, Cout), cin_pad) where
    w_mat rows are ordered (kh, kw, cin) and cin is zero-padded to >= 8 so the
    per-tap weight slices are sublane aligned.
    """
    w = blk["w"]                                   # (Cout, Cin, 3, 3)
    cout, cin = w.shape[0], w.shape[1]
    cin_pad = cin if cin >= 8 else 8
    scale = blk["gamma"] / jnp.sqrt(blk["var"] + eps)
    shift = blk["beta"] - blk["mean"] * scale
    w_k = jnp.transpose(w, (2, 3, 1, 0))           # (3, 3, Cin, Cout)
    if cin_pad != cin:
        w_k = jnp.pad(w_k, ((0, 0), (0, 0), (0, cin_pad - cin), (0, 0)))
    w_mat = w_k.reshape(9 * cin_pad, cout) * scale[None, :]
    b_fold = (blk["b"] * scale + shift).reshape(1, cout)
    return w_mat.astype(jnp.bfloat16), b_fold.astype(jnp.float32), cin_pad


def prep_lstm(lp):
    """Both directions' input projections (bf16) + recurrent weights (f32)."""
    wih = jnp.concatenate([lp["w_ih_f"].T, lp["w_ih_b"].T], axis=1)        # (D, 8H)
    bias = jnp.concatenate([lp["b_ih_f"] + lp["b_hh_f"],
                            lp["b_ih_b"] + lp["b_hh_b"]]).reshape(1, -1)   # (1, 8H)
    whh = jnp.stack([lp["w_hh_f"].T, lp["w_hh_b"].T])                      # (2, H, 4H)
    return wih.astype(jnp.bfloat16), bias.astype(jnp.float32), whh.astype(jnp.float32)


# ----------------------------- Pallas kernels --------------------------------

def _conv_bn_relu_pool_kernel(x_ref, w_ref, b_ref, o_ref, *, H, Wo, cin, cout):
    """Fused 3x3 conv (BN folded) + ReLU + 2x2 max-pool for one batch element.

    x_ref: (1, 2*(H+2), Wo+1, cin) bf16 -- spatially padded input, even columns
           in rows [0, H+2), odd columns in rows [H+2, 2*(H+2)).
    w_ref: (9*cin, cout) bf16 -- folded weights, tap-major (kh, kw, cin).
    b_ref: (1, cout) f32 -- folded bias.
    o_ref: (1, H//2, Wo, cout) bf16 -- pooled output.
    """
    Ho = H // 2
    odd0 = H + 2
    bias = jnp.broadcast_to(b_ref[...], (Wo, cout)).astype(jnp.float32)  # hoisted

    def body(i, carry):
        best = None
        for ph in range(2):                       # the two conv rows pooled into row i
            acc_e = bias                          # even output columns (2j)
            acc_o = bias                          # odd output columns (2j+1)
            for kh in range(3):
                r = 2 * i + ph + kh               # padded input row
                e0 = x_ref[0, r, 0:Wo, :]
                e1 = x_ref[0, r, 1:Wo + 1, :]
                o0 = x_ref[0, odd0 + r, 0:Wo, :]
                o1 = x_ref[0, odd0 + r, 1:Wo + 1, :]
                even_taps = (e0, o0, e1)          # input col 2j+kw,   kw = 0, 1, 2
                odd_taps = (o0, e1, o1)           # input col 2j+1+kw, kw = 0, 1, 2
                for kw in range(3):
                    t = kh * 3 + kw
                    wk = w_ref[t * cin:(t + 1) * cin, :]
                    acc_e = acc_e + jnp.dot(even_taps[kw], wk,
                                            preferred_element_type=jnp.float32)
                    acc_o = acc_o + jnp.dot(odd_taps[kw], wk,
                                            preferred_element_type=jnp.float32)
            m = jnp.maximum(acc_e, acc_o)                         # pool over W pairs
            best = m if ph == 0 else jnp.maximum(best, m)         # pool over H pair
        # ReLU commutes with max, so applying it after the pool is exact.
        o_ref[0, i] = jnp.maximum(best, 0.0).astype(o_ref.dtype)
        return carry

    jax.lax.fori_loop(0, Ho, body, 0)


def conv_block(x_nhwc, blk):
    """Conv2d(3x3, pad=1) + BatchNorm(eval) + ReLU + MaxPool(2,2), fully fused."""
    w_bf, b_fold, cin_pad = fold_conv_block(blk)
    B, H, W, Cin = x_nhwc.shape
    Cout = blk["w"].shape[0]
    Ho, Wo = H // 2, W // 2
    x = x_nhwc
    if cin_pad != Cin:
        x = jnp.pad(x, ((0, 0), (0, 0), (0, 0), (0, cin_pad - Cin)))
    xp = jnp.pad(x, ((0, 0), (1, 1), (1, 1), (0, 0)))
    # Layout plumbing: split the padded columns into even/odd phases so the fused
    # 2x2 pool only needs contiguous slices inside the kernel (no strided access).
    xps = jnp.concatenate([xp[:, :, 0::2, :], xp[:, :, 1::2, :]], axis=1)
    xps = xps.astype(jnp.bfloat16)                 # bf16 MXU inputs, f32 accumulation

    kern = functools.partial(_conv_bn_relu_pool_kernel, H=H, Wo=Wo,
                             cin=cin_pad, cout=Cout)
    return pl.pallas_call(
        kern,
        out_shape=jax.ShapeDtypeStruct((B, Ho, Wo, Cout), jnp.bfloat16),
        grid=(B,),
        in_specs=[
            pl.BlockSpec((1, 2 * (H + 2), Wo + 1, cin_pad), lambda b: (b, 0, 0, 0)),
            pl.BlockSpec((9 * cin_pad, Cout), lambda b: (0, 0)),
            pl.BlockSpec((1, Cout), lambda b: (0, 0)),
        ],
        out_specs=pl.BlockSpec((1, Ho, Wo, Cout), lambda b: (b, 0, 0, 0)),
        compiler_params=pltpu.CompilerParams(
            dimension_semantics=("parallel",),
            vmem_limit_bytes=VMEM_LIMIT),
    )(xps, w_bf, b_fold)


def _matmul_bias_kernel(x_ref, w_ref, b_ref, o_ref):
    acc = jnp.dot(x_ref[...], w_ref[...], preferred_element_type=jnp.float32)
    o_ref[...] = (acc + b_ref[...]).astype(o_ref.dtype)


def matmul_bias(x, w, b):
    """(M, K) @ (K, N) + bias(1, N) -> f32.  Row-tiled with a capped tile."""
    M, K = x.shape
    K2, N = w.shape
    assert K == K2 and b.shape == (1, N)
    tm = M if M <= 512 else 512            # fixed tile for large M, ragged edge masked
    grid = (pl.cdiv(M, tm),)
    return pl.pallas_call(
        _matmul_bias_kernel,
        out_shape=jax.ShapeDtypeStruct((M, N), jnp.float32),
        grid=grid,
        in_specs=[
            pl.BlockSpec((tm, K), lambda i: (i, 0)),
            pl.BlockSpec((K, N), lambda i: (0, 0)),
            pl.BlockSpec((1, N), lambda i: (0, 0)),
        ],
        out_specs=pl.BlockSpec((tm, N), lambda i: (i, 0)),
        compiler_params=pltpu.CompilerParams(
            dimension_semantics=("parallel",),
            vmem_limit_bytes=VMEM_LIMIT),
    )(x, w, b)


def _bilstm_kernel(xp_ref, whh_ref, o_ref, *, T, B, H):
    """One LSTM direction per grid step (grid=(2,), 'parallel').

    xp_ref: (1, T, B, 4H) f32 -- precomputed x @ W_ih^T + (b_ih + b_hh).
    whh_ref: (1, H, 4H) f32.
    o_ref:  (1, T, B, H) f32 -- hidden states indexed by sequence POSITION, so
            o_ref[:, T-1] matches PyTorch's output[:, -1] for both directions.
    """
    d = pl.program_id(0)                   # 0 = forward, 1 = backward

    def step(t, carry):
        h, c = carry
        pos = jnp.where(d == 0, t, T - 1 - t)
        gates = xp_ref[0, pos] + jnp.dot(h, whh_ref[0],
                                         preferred_element_type=jnp.float32)
        i = jax.nn.sigmoid(gates[:, 0:H])
        f = jax.nn.sigmoid(gates[:, H:2 * H])
        g = jnp.tanh(gates[:, 2 * H:3 * H])
        o = jax.nn.sigmoid(gates[:, 3 * H:4 * H])
        c = f * c + i * g
        h = o * jnp.tanh(c)
        o_ref[0, pos] = h.astype(o_ref.dtype)
        return (h, c)

    h0 = jnp.zeros((B, H), jnp.float32)
    c0 = jnp.zeros((B, H), jnp.float32)
    jax.lax.fori_loop(0, T, step, (h0, c0))
    # TODO(synk): at B >~ 128, keep h/c in VMEM scratch refs instead of loop carries.


def bilstm(xproj, whh):
    """xproj: (2, T, B, 4H) f32; whh: (2, H, 4H) f32 -> (2, T, B, H) f32."""
    _, T, B, G = xproj.shape
    H = G // 4
    return pl.pallas_call(
        functools.partial(_bilstm_kernel, T=T, B=B, H=H),
        out_shape=jax.ShapeDtypeStruct((2, T, B, H), jnp.float32),
        grid=(2,),
        in_specs=[
            pl.BlockSpec((1, T, B, 4 * H), lambda d: (d, 0, 0, 0)),
            pl.BlockSpec((1, H, 4 * H), lambda d: (d, 0, 0)),
        ],
        out_specs=pl.BlockSpec((1, T, B, H), lambda d: (d, 0, 0, 0)),
        compiler_params=pltpu.CompilerParams(
            dimension_semantics=("parallel",),      # 2 directions -> 2 TCs on v7x
            vmem_limit_bytes=VMEM_LIMIT),
    )(xproj, whh)


# ------------------------------- glue (JAX) ----------------------------------

def crnn_ser_forward(x_nchw, params):
    x = jnp.transpose(x_nchw, (0, 2, 3, 1))                 # NCHW -> NHWC
    for blk in params["cnn"]:
        x = conv_block(x, blk)                              # fused conv+BN+ReLU+pool
    B, T, Fr, C = x.shape
    # PyTorch: (B,C,T,F) -> permute(0,2,1,3) -> (B, T, C*F)
    feats = jnp.transpose(x, (0, 1, 3, 2)).reshape(B, T, C * Fr)
    x_tbd = jnp.transpose(feats, (1, 0, 2))                 # (T, B, D)
    D = C * Fr

    wih_bf, bias_both, whh_both = prep_lstm(params["lstm"])
    H = whh_both.shape[1]
    # Hoisted input projection for both directions: one lane-dense (T*B, 8H) matmul.
    xproj = matmul_bias(x_tbd.reshape(T * B, D).astype(jnp.bfloat16), wih_bf, bias_both)
    xproj = xproj.reshape(T, B, 2, 4 * H).transpose(2, 0, 1, 3)     # (2, T, B, 4H)
    hidden = bilstm(xproj, whh_both)                        # (2, T, B, H)
    # PyTorch bi-LSTM output[:, -1, :] = [fwd h after T steps, bwd h at position T-1].
    last = jnp.concatenate([hidden[0, T - 1], hidden[1, T - 1]], axis=-1)   # (B, 2H)

    fw, fb = params["fc"]["w"], params["fc"]["b"]
    return matmul_bias(last, jnp.transpose(fw), fb.reshape(1, -1))


# ----------------------- deterministic parameter init ------------------------

def init_params(key, num_classes):
    keys = iter(jax.random.split(key, 64))

    def u(shape, scale):
        return jax.random.uniform(next(keys), shape, jnp.float32, -scale, scale)

    cnn = []
    for cin, cout in [(1, 32), (32, 64), (64, 128), (128, 256)]:
        s = 1.0 / np.sqrt(cin * 9)
        cnn.append(dict(
            w=u((cout, cin, 3, 3), s),
            b=u((cout,), s),
            gamma=1.0 + 0.1 * u((cout,), 1.0),
            beta=0.1 * u((cout,), 1.0),
            mean=0.1 * u((cout,), 1.0),
            var=jnp.abs(u((cout,), 1.0)) + 0.5,
        ))
    H, D = 128, 512
    s = 1.0 / np.sqrt(H)
    lstm = dict(
        w_ih_f=u((4 * H, D), s), w_hh_f=u((4 * H, H), s),
        b_ih_f=u((4 * H,), s), b_hh_f=u((4 * H,), s),
        w_ih_b=u((4 * H, D), s), w_hh_b=u((4 * H, H), s),
        b_ih_b=u((4 * H,), s), b_hh_b=u((4 * H,), s),
    )
    s = 1.0 / np.sqrt(256)
    fc = dict(w=u((num_classes, 256), s), b=u((num_classes,), s))
    return dict(cnn=cnn, lstm=lstm, fc=fc)


# --------------------------- pure-JAX reference -------------------------------
# Uses the same folded/bf16-cast weights and the same cast points as the kernel
# path, so only accumulation order differs.

def reference_forward(x_nchw, params):
    x = jnp.transpose(x_nchw, (0, 2, 3, 1)).astype(jnp.float32)
    for blk in params["cnn"]:
        w_bf, b_fold, cin_pad = fold_conv_block(blk)
        B, H, W, Cin = x.shape
        Cout = blk["w"].shape[0]
        if cin_pad != Cin:
            x = jnp.pad(x, ((0, 0), (0, 0), (0, 0), (0, cin_pad - Cin)))
        xp = jnp.pad(x, ((0, 0), (1, 1), (1, 1), (0, 0))).astype(jnp.bfloat16)
        cols = [xp[:, kh:kh + H, kw:kw + W, :] for kh in range(3) for kw in range(3)]
        patches = jnp.concatenate(cols, axis=-1).reshape(B * H * W, 9 * cin_pad)
        y = jnp.dot(patches, w_bf, preferred_element_type=jnp.float32) + b_fold
        y = jnp.maximum(y, 0.0).reshape(B, H, W, Cout)
        x = y.reshape(B, H // 2, 2, W // 2, 2, Cout).max(axis=(2, 4))

    B, T, Fr, C = x.shape
    feats = jnp.transpose(x, (0, 1, 3, 2)).reshape(B, T, C * Fr)
    x_tbd = jnp.transpose(feats, (1, 0, 2))

    wih_bf, bias_both, whh_both = prep_lstm(params["lstm"])
    Hh = params["lstm"]["w_hh_f"].shape[1]
    xproj = jnp.dot(x_tbd.reshape(T * B, -1).astype(jnp.bfloat16), wih_bf,
                    preferred_element_type=jnp.float32) + bias_both
    xproj = xproj.reshape(T, B, 2, 4 * Hh).transpose(2, 0, 1, 3)    # (2, T, B, 4H)

    def run_dir(xp_d, whh, reverse):
        h = jnp.zeros((B, Hh), jnp.float32)
        c = jnp.zeros_like(h)
        hist = [None] * T
        order = range(T - 1, -1, -1) if reverse else range(T)
        for t in order:
            gates = xp_d[t] + h @ whh
            i = jax.nn.sigmoid(gates[:, :Hh]); f = jax.nn.sigmoid(gates[:, Hh:2 * Hh])
            g = jnp.tanh(gates[:, 2 * Hh:3 * Hh]); o = jax.nn.sigmoid(gates[:, 3 * Hh:])
            c = f * c + i * g
            h = o * jnp.tanh(c)
            hist[t] = h
        return hist

    hf = run_dir(xproj[0], whh_both[0], reverse=False)
    hb = run_dir(xproj[1], whh_both[1], reverse=True)
    last = jnp.concatenate([hf[T - 1], hb[T - 1]], axis=-1)
    return last @ params["fc"]["w"].T + params["fc"]["b"]


# ---------------------------------- main --------------------------------------

if __name__ == "__main__":
    num_classes = 8
    key = jax.random.PRNGKey(0)
    kx, kp = jax.random.split(key)
    # PyTorch-style NCHW input: (B=2, 1, time=32, freq=32). freq=32 -> 2 after
    # four 2x pools, matching the LSTM input size 256*2=512; time=32 -> T=2.
    x = jax.random.normal(kx, (2, 1, 32, 32), jnp.float32)
    params = init_params(kp, num_classes)

    fwd = jax.jit(crnn_ser_forward)
    logits = jax.block_until_ready(fwd(x, params))
    assert logits.shape == (2, num_classes)

    ref = jax.block_until_ready(reference_forward(x, params))
    # bf16 matmul inputs with f32 accumulation; reference uses the same cast points.
    np.testing.assert_allclose(np.asarray(logits), np.asarray(ref),
                               rtol=5e-3, atol=5e-3)
    print("KERNEL_OK")
</pallas_src>

<mosaic_0001>
module attributes {stable_mosaic.version = 11 : i64} {
  func.func @_conv_bn_relu_pool_kernel(%arg0: i32, %arg1: memref<1x68x17x8xbf16, #tpu.memory_space<vmem>>, %arg2: memref<72x32xbf16, #tpu.memory_space<vmem>>, %arg3: memref<1x32xf32, #tpu.memory_space<vmem>>, %arg4: memref<1x16x16x32xbf16, #tpu.memory_space<vmem>>) attributes {dimension_semantics = [#tpu.dimension_semantics<parallel>], iteration_bounds = array<i64: 2>, scalar_prefetch = 0 : i64, scratch_operands = 0 : i64, tpu.core_type = #tpu.core_type<tc>, window_params = [{transform_indices = @transform_0, window_bounds = array<i64: 1, 68, 17, 8>}, {pipeline_mode = #tpu.pipeline_mode<synchronous>, transform_indices = @transform_1, window_bounds = array<i64: 72, 32>}, {pipeline_mode = #tpu.pipeline_mode<synchronous>, transform_indices = @transform_2, window_bounds = array<i64: 1, 32>}, {transform_indices = @transform_3, window_bounds = array<i64: 1, 16, 16, 32>}]} {
    %c0 = arith.constant 0 : index
    %c0_0 = arith.constant 0 : index
    %0 = vector.load %arg3[%c0, %c0_0] : memref<1x32xf32, #tpu.memory_space<vmem>>, vector<1x32xf32>
    %1 = vector.shape_cast %0 : vector<1x32xf32> to vector<1x32xf32>
    %2 = vector.broadcast %1 : vector<1x32xf32> to vector<16x32xf32>
    %c0_i32 = arith.constant 0 : i32
    %c16_i32 = arith.constant 16 : i32
    %3 = arith.addi %c0_i32, %c16_i32 : i32
    %c1_i32 = arith.constant 1 : i32
    scf.for %arg5 = %c0_i32 to %3 step %c1_i32  : i32 {
      %c2_i32 = arith.constant 2 : i32
      %4 = arith.muli %c2_i32, %arg5 : i32
      %c0_i32_2 = arith.constant 0 : i32
      %5 = arith.addi %4, %c0_i32_2 : i32
      %c0_i32_3 = arith.constant 0 : i32
      %6 = arith.addi %5, %c0_i32_3 : i32
      %c0_4 = arith.constant 0 : index
      %7 = arith.index_cast %6 : i32 to index
      %c0_5 = arith.constant 0 : index
      %c0_6 = arith.constant 0 : index
      %8 = vector.load %arg1[%c0_4, %7, %c0_5, %c0_6] : memref<1x68x17x8xbf16, #tpu.memory_space<vmem>>, vector<1x1x16x8xbf16>
      %9 = vector.shape_cast %8 : vector<1x1x16x8xbf16> to vector<16x8xbf16>
      %c0_7 = arith.constant 0 : index
      %10 = arith.index_cast %6 : i32 to index
      %c1 = arith.constant 1 : index
      %c0_8 = arith.constant 0 : index
      %11 = vector.load %arg1[%c0_7, %10, %c1, %c0_8] : memref<1x68x17x8xbf16, #tpu.memory_space<vmem>>, vector<1x1x16x8xbf16>
      %12 = vector.shape_cast %11 : vector<1x1x16x8xbf16> to vector<16x8xbf16>
      %c34_i32 = arith.constant 34 : i32
      %13 = arith.addi %c34_i32, %6 : i32
      %c0_9 = arith.constant 0 : index
      %14 = arith.index_cast %13 : i32 to index
      %c0_10 = arith.constant 0 : index
      %c0_11 = arith.constant 0 : index
      %15 = vector.load %arg1[%c0_9, %14, %c0_10, %c0_11] : memref<1x68x17x8xbf16, #tpu.memory_space<vmem>>, vector<1x1x16x8xbf16>
      %16 = vector.shape_cast %15 : vector<1x1x16x8xbf16> to vector<16x8xbf16>
      %c34_i32_12 = arith.constant 34 : i32
      %17 = arith.addi %c34_i32_12, %6 : i32
      %c0_13 = arith.constant 0 : index
      %18 = arith.index_cast %17 : i32 to index
      %c1_14 = arith.constant 1 : index
      %c0_15 = arith.constant 0 : index
      %19 = vector.load %arg1[%c0_13, %18, %c1_14, %c0_15] : memref<1x68x17x8xbf16, #tpu.memory_space<vmem>>, vector<1x1x16x8xbf16>
      %20 = vector.shape_cast %19 : vector<1x1x16x8xbf16> to vector<16x8xbf16>
      %c0_16 = arith.constant 0 : index
      %c0_17 = arith.constant 0 : index
      %21 = vector.load %arg2[%c0_16, %c0_17] : memref<72x32xbf16, #tpu.memory_space<vmem>>, vector<8x32xbf16>
      %cst = arith.constant dense<0.000000e+00> : vector<16x32xf32>
      %22 = tpu.matmul %9, %21, %cst {dimension_numbers = #tpu.dot_dimension_numbers<[1], [0], [0], [1], [0, 0, 1, 1], [], []>} : vector<16x8xbf16>, vector<8x32xbf16>, vector<16x32xf32> -> vector<16x32xf32>
      %23 = arith.addf %2, %22 : vector<16x32xf32>
      %cst_18 = arith.constant dense<0.000000e+00> : vector<16x32xf32>
      %24 = tpu.matmul %16, %21, %cst_18 {dimension_numbers = #tpu.dot_dimension_numbers<[1], [0], [0], [1], [0, 0, 1, 1], [], []>} : vector<16x8xbf16>, vector<8x32xbf16>, vector<16x32xf32> -> vector<16x32xf32>
      %25 = arith.addf %2, %24 : vector<16x32xf32>
      %c8 = arith.constant 8 : index
      %c0_19 = arith.constant 0 : index
      %26 = vector.load %arg2[%c8, %c0_19] : memref<72x32xbf16, #tpu.memory_space<vmem>>, vector<8x32xbf16>
      %cst_20 = arith.constant dense<0.000000e+00> : vector<16x32xf32>
      %27 = tpu.matmul %16, %26, %cst_20 {dimension_numbers = #tpu.dot_dimension_numbers<[1], [0], [0], [1], [0, 0, 1, 1], [], []>} : vector<16x8xbf16>, vector<8x32xbf16>, vector<16x32xf32> -> vector<16x32xf32>
      %28 = arith.addf %23, %27 : vector<16x32xf32>
      %cst_21 = arith.constant dense<0.000000e+00> : vector<16x32xf32>
      %29 = tpu.matmul %12, %26, %cst_21 {dimension_numbers = #tpu.dot_dimension_numbers<[1], [0], [0], [1], [0, 0, 1, 1], [], []>} : vector<16x8xbf16>, vector<8x32xbf16>, vector<16x32xf32> -> vector<16x32xf32>
      %30 = arith.addf %25, %29 : vector<16x32xf32>
      %c16 = arith.constant 16 : index
      %c0_22 = arith.constant 0 : index
      %31 = vector.load %arg2[%c16, %c0_22] : memref<72x32xbf16, #tpu.memory_space<vmem>>, vector<8x32xbf16>
      %cst_23 = arith.constant dense<0.000000e+00> : vector<16x32xf32>
      %32 = tpu.matmul %12, %31, %cst_23 {dimension_numbers = #tpu.dot_dimension_numbers<[1], [0], [0], [1], [0, 0, 1, 1], [], []>} : vector<16x8xbf16>, vector<8x32xbf16>, vector<16x32xf32> -> vector<16x32xf32>
      %33 = arith.addf %28, %32 : vector<16x32xf32>
      %cst_24 = arith.constant dense<0.000000e+00> : vector<16x32xf32>
      %34 = tpu.matmul %20, %31, %cst_24 {dimension_numbers = #tpu.dot_dimension_numbers<[1], [0], [0], [1], [0, 0, 1, 1], [], []>} : vector<16x8xbf16>, vector<8x32xbf16>, vector<16x32xf32> -> vector<16x32xf32>
      %35 = arith.addf %30, %34 : vector<16x32xf32>
      %c2_i32_25 = arith.constant 2 : i32
      %36 = arith.muli %c2_i32_25, %arg5 : i32
      %c0_i32_26 = arith.constant 0 : i32
      %37 = arith.addi %36, %c0_i32_26 : i32
      %c1_i32_27 = arith.constant 1 : i32
      %38 = arith.addi %37, %c1_i32_27 : i32
      %c0_28 = arith.constant 0 : index
      %39 = arith.index_cast %38 : i32 to index
      %c0_29 = arith.constant 0 : index
      %c0_30 = arith.constant 0 : index
      %40 = vector.load %arg1[%c0_28, %39, %c0_29, %c0_30] : memref<1x68x17x8xbf16, #tpu.memory_space<vmem>>, vector<1x1x16x8xbf16>
      %41 = vector.shape_cast %40 : vector<1x1x16x8xbf16> to vector<16x8xbf16>
      %c0_31 = arith.constant 0 : index
      %42 = arith.index_cast %38 : i32 to index
      %c1_32 = arith.constant 1 : index
      %c0_33 = arith.constant 0 : index
      %43 = vector.load %arg1[%c0_31, %42, %c1_32, %c0_33] : memref<1x68x17x8xbf16, #tpu.memory_space<vmem>>, vector<1x1x16x8xbf16>
      %44 = vector.shape_cast %43 : vector<1x1x16x8xbf16> to vector<16x8xbf16>
      %c34_i32_34 = arith.constant 34 : i32
      %45 = arith.addi %c34_i32_34, %38 : i32
      %c0_35 = arith.constant 0 : index
      %46 = arith.index_cast %45 : i32 to index
      %c0_36 = arith.constant 0 : index
      %c0_37 = arith.constant 0 : index
      %47 = vector.load %arg1[%c0_35, %46, %c0_36, %c0_37] : memref<1x68x17x8xbf16, #tpu.memory_space<vmem>>, vector<1x1x16x8xbf16>
      %48 = vector.shape_cast %47 : vector<1x1x16x8xbf16> to vector<16x8xbf16>
      %c34_i32_38 = arith.constant 34 : i32
      %49 = arith.addi %c34_i32_38, %38 : i32
      %c0_39 = arith.constant 0 : index
      %50 = arith.index_cast %49 : i32 to index
      %c1_40 = arith.constant 1 : index
      %c0_41 = arith.constant 0 : index
      %51 = vector.load %arg1[%c0_39, %50, %c1_40, %c0_41] : memref<1x68x17x8xbf16, #tpu.memory_space<vmem>>, vector<1x1x16x8xbf16>
      %52 = vector.shape_cast %51 : vector<1x1x16x8xbf16> to vector<16x8xbf16>
      %c24 = arith.constant 24 : index
      %c0_42 = arith.constant 0 : index
      %53 = vector.load %arg2[%c24, %c0_42] : memref<72x32xbf16, #tpu.memory_space<vmem>>, vector<8x32xbf16>
      %cst_43 = arith.constant dense<0.000000e+00> : vector<16x32xf32>
      %54 = tpu.matmul %41, %53, %cst_43 {dimension_numbers = #tpu.dot_dimension_numbers<[1], [0], [0], [1], [0, 0, 1, 1], [], []>} : vector<16x8xbf16>, vector<8x32xbf16>, vector<16x32xf32> -> vector<16x32xf32>
      %55 = arith.addf %33, %54 : vector<16x32xf32>
      %cst_44 = arith.constant dense<0.000000e+00> : vector<16x32xf32>
      %56 = tpu.matmul %48, %53, %cst_44 {dimension_numbers = #tpu.dot_dimension_numbers<[1], [0], [0], [1], [0, 0, 1, 1], [], []>} : vector<16x8xbf16>, vector<8x32xbf16>, vector<16x32xf32> -> vector<16x32xf32>
      %57 = arith.addf %35, %56 : vector<16x32xf32>
      %c32 = arith.constant 32 : index
      %c0_45 = arith.constant 0 : index
      %58 = vector.load %arg2[%c32, %c0_45] : memref<72x32xbf16, #tpu.memory_space<vmem>>, vector<8x32xbf16>
      %cst_46 = arith.constant dense<0.000000e+00> : vector<16x32xf32>
      %59 = tpu.matmul %48, %58, %cst_46 {dimension_numbers = #tpu.dot_dimension_numbers<[1], [0], [0], [1], [0, 0, 1, 1], [], []>} : vector<16x8xbf16>, vector<8x32xbf16>, vector<16x32xf32> -> vector<16x32xf32>
      %60 = arith.addf %55, %59 : vector<16x32xf32>
      %cst_47 = arith.constant dense<0.000000e+00> : vector<16x32xf32>
      %61 = tpu.matmul %44, %58, %cst_47 {dimension_numbers = #tpu.dot_dimension_numbers<[1], [0], [0], [1], [0, 0, 1, 1], [], []>} : vector<16x8xbf16>, vector<8x32xbf16>, vector<16x32xf32> -> vector<16x32xf32>
      %62 = arith.addf %57, %61 : vector<16x32xf32>
      %c40 = arith.constant 40 : index
      %c0_48 = arith.constant 0 : index
      %63 = vector.load %arg2[%c40, %c0_48] : memref<72x32xbf16, #tpu.memory_space<vmem>>, vector<8x32xbf16>
      %cst_49 = arith.constant dense<0.000000e+00> : vector<16x32xf32>
      %64 = tpu.matmul %44, %63, %cst_49 {dimension_numbers = #tpu.dot_dimension_numbers<[1], [0], [0], [1], [0, 0, 1, 1], [], []>} : vector<16x8xbf16>, vector<8x32xbf16>, vector<16x32xf32> -> vector<16x32xf32>
      %65 = arith.addf %60, %64 : vector<16x32xf32>
      %cst_50 = arith.constant dense<0.000000e+00> : vector<16x32xf32>
      %66 = tpu.matmul %52, %63, %cst_50 {dimension_numbers = #tpu.dot_dimension_numbers<[1], [0], [0], [1], [0, 0, 1, 1], [], []>} : vector<16x8xbf16>, vector<8x32xbf16>, vector<16x32xf32> -> vector<16x32xf32>
      %67 = arith.addf %62, %66 : vector<16x32xf32>
      %c2_i32_51 = arith.constant 2 : i32
      %68 = arith.muli %c2_i32_51, %arg5 : i32
      %c0_i32_52 = arith.constant 0 : i32
      %69 = arith.addi %68, %c0_i32_52 : i32
      %c2_i32_53 = arith.constant 2 : i32
      %70 = arith.addi %69, %c2_i32_53 : i32
      %c0_54 = arith.constant 0 : index
      %71 = arith.index_cast %70 : i32 to index
      %c0_55 = arith.constant 0 : index
      %c0_56 = arith.constant 0 : index
      %72 = vector.load %arg1[%c0_54, %71, %c0_55, %c0_56] : memref<1x68x17x8xbf16, #tpu.memory_space<vmem>>, vector<1x1x16x8xbf16>
      %73 = vector.shape_cast %72 : vector<1x1x16x8xbf16> to vector<16x8xbf16>
      %c0_57 = arith.constant 0 : index
      %74 = arith.index_cast %70 : i32 to index
      %c1_58 = arith.constant 1 : index
      %c0_59 = arith.constant 0 : index
      %75 = vector.load %arg1[%c0_57, %74, %c1_58, %c0_59] : memref<1x68x17x8xbf16, #tpu.memory_space<vmem>>, vector<1x1x16x8xbf16>
      %76 = vector.shape_cast %75 : vector<1x1x16x8xbf16> to vector<16x8xbf16>
      %c34_i32_60 = arith.constant 34 : i32
      %77 = arith.addi %c34_i32_60, %70 : i32
      %c0_61 = arith.constant 0 : index
      %78 = arith.index_cast %77 : i32 to index
      %c0_62 = arith.constant 0 : index
      %c0_63 = arith.constant 0 : index
      %79 = vector.load %arg1[%c0_61, %78, %c0_62, %c0_63] : memref<1x68x17x8xbf16, #tpu.memory_space<vmem>>, vector<1x1x16x8xbf16>
      %80 = vector.shape_cast %79 : vector<1x1x16x8xbf16> to vector<16x8xbf16>
      %c34_i32_64 = arith.constant 34 : i32
      %81 = arith.addi %c34_i32_64, %70 : i32
      %c0_65 = arith.constant 0 : index
      %82 = arith.index_cast %81 : i32 to index
      %c1_66 = arith.constant 1 : index
      %c0_67 = arith.constant 0 : index
      %83 = vector.load %arg1[%c0_65, %82, %c1_66, %c0_67] : memref<1x68x17x8xbf16, #tpu.memory_space<vmem>>, vector<1x1x16x8xbf16>
      %84 = vector.shape_cast %83 : vector<1x1x16x8xbf16> to vector<16x8xbf16>
      %c48 = arith.constant 48 : index
      %c0_68 = arith.constant 0 : index
      %85 = vector.load %arg2[%c48, %c0_68] : memref<72x32xbf16, #tpu.memory_space<vmem>>, vector<8x32xbf16>
      %cst_69 = arith.constant dense<0.000000e+00> : vector<16x32xf32>
      %86 = tpu.matmul %73, %85, %cst_69 {dimension_numbers = #tpu.dot_dimension_numbers<[1], [0], [0], [1], [0, 0, 1, 1], [], []>} : vector<16x8xbf16>, vector<8x32xbf16>, vector<16x32xf32> -> vector<16x32xf32>
      %87 = arith.addf %65, %86 : vector<16x32xf32>
      %cst_70 = arith.constant dense<0.000000e+00> : vector<16x32xf32>
      %88 = tpu.matmul %80, %85, %cst_70 {dimension_numbers = #tpu.dot_dimension_numbers<[1], [0], [0], [1], [0, 0, 1, 1], [], []>} : vector<16x8xbf16>, vector<8x32xbf16>, vector<16x32xf32> -> vector<16x32xf32>
      %89 = arith.addf %67, %88 : vector<16x32xf32>
      %c56 = arith.constant 56 : index
      %c0_71 = arith.constant 0 : index
      %90 = vector.load %arg2[%c56, %c0_71] : memref<72x32xbf16, #tpu.memory_space<vmem>>, vector<8x32xbf16>
      %cst_72 = arith.constant dense<0.000000e+00> : vector<16x32xf32>
      %91 = tpu.matmul %80, %90, %cst_72 {dimension_numbers = #tpu.dot_dimension_numbers<[1], [0], [0], [1], [0, 0, 1, 1], [], []>} : vector<16x8xbf16>, vector<8x32xbf16>, vector<16x32xf32> -> vector<16x32xf32>
      %92 = arith.addf %87, %91 : vector<16x32xf32>
      %cst_73 = arith.constant dense<0.000000e+00> : vector<16x32xf32>
      %93 = tpu.matmul %76, %90, %cst_73 {dimension_numbers = #tpu.dot_dimension_numbers<[1], [0], [0], [1], [0, 0, 1, 1], [], []>} : vector<16x8xbf16>, vector<8x32xbf16>, vector<16x32xf32> -> vector<16x32xf32>
      %94 = arith.addf %89, %93 : vector<16x32xf32>
      %c64 = arith.constant 64 : index
      %c0_74 = arith.constant 0 : index
      %95 = vector.load %arg2[%c64, %c0_74] : memref<72x32xbf16, #tpu.memory_space<vmem>>, vector<8x32xbf16>
      %cst_75 = arith.constant dense<0.000000e+00> : vector<16x32xf32>
      %96 = tpu.matmul %76, %95, %cst_75 {dimension_numbers = #tpu.dot_dimension_numbers<[1], [0], [0], [1], [0, 0, 1, 1], [], []>} : vector<16x8xbf16>, vector<8x32xbf16>, vector<16x32xf32> -> vector<16x32xf32>
      %97 = arith.addf %92, %96 : vector<16x32xf32>
      %cst_76 = arith.constant dense<0.000000e+00> : vector<16x32xf32>
      %98 = tpu.matmul %84, %95, %cst_76 {dimension_numbers = #tpu.dot_dimension_numbers<[1], [0], [0], [1], [0, 0, 1, 1], [], []>} : vector<16x8xbf16>, vector<8x32xbf16>, vector<16x32xf32> -> vector<16x32xf32>
      %99 = arith.addf %94, %98 : vector<16x32xf32>
      %100 = arith.maximumf %97, %99 : vector<16x32xf32>
      %c2_i32_77 = arith.constant 2 : i32
      %101 = arith.muli %c2_i32_77, %arg5 : i32
      %c1_i32_78 = arith.constant 1 : i32
      %102 = arith.addi %101, %c1_i32_78 : i32
      %c0_i32_79 = arith.constant 0 : i32
      %103 = arith.addi %102, %c0_i32_79 : i32
      %c0_80 = arith.constant 0 : index
      %104 = arith.index_cast %103 : i32 to index
      %c0_81 = arith.constant 0 : index
      %c0_82 = arith.constant 0 : index
      %105 = vector.load %arg1[%c0_80, %104, %c0_81, %c0_82] : memref<1x68x17x8xbf16, #tpu.memory_space<vmem>>, vector<1x1x16x8xbf16>
      %106 = vector.shape_cast %105 : vector<1x1x16x8xbf16> to vector<16x8xbf16>
      %c0_83 = arith.constant 0 : index
      %107 = arith.index_cast %103 : i32 to index
      %c1_84 = arith.constant 1 : index
      %c0_85 = arith.constant 0 : index
      %108 = vector.load %arg1[%c0_83, %107, %c1_84, %c0_85] : memref<1x68x17x8xbf16, #tpu.memory_space<vmem>>, vector<1x1x16x8xbf16>
      %109 = vector.shape_cast %108 : vector<1x1x16x8xbf16> to vector<16x8xbf16>
      %c34_i32_86 = arith.constant 34 : i32
      %110 = arith.addi %c34_i32_86, %103 : i32
      %c0_87 = arith.constant 0 : index
      %111 = arith.index_cast %110 : i32 to index
      %c0_88 = arith.constant 0 : index
      %c0_89 = arith.constant 0 : index
      %112 = vector.load %arg1[%c0_87, %111, %c0_88, %c0_89] : memref<1x68x17x8xbf16, #tpu.memory_space<vmem>>, vector<1x1x16x8xbf16>
      %113 = vector.shape_cast %112 : vector<1x1x16x8xbf16> to vector<16x8xbf16>
      %c34_i32_90 = arith.constant 34 : i32
      %114 = arith.addi %c34_i32_90, %103 : i32
      %c0_91 = arith.constant 0 : index
      %115 = arith.index_cast %114 : i32 to index
      %c1_92 = arith.constant 1 : index
      %c0_93 = arith.constant 0 : index
      %116 = vector.load %arg1[%c0_91, %115, %c1_92, %c0_93] : memref<1x68x17x8xbf16, #tpu.memory_space<vmem>>, vector<1x1x16x8xbf16>
      %117 = vector.shape_cast %116 : vector<1x1x16x8xbf16> to vector<16x8xbf16>
      %c0_94 = arith.constant 0 : index
      %c0_95 = arith.constant 0 : index
      %118 = vector.load %arg2[%c0_94, %c0_95] : memref<72x32xbf16, #tpu.memory_space<vmem>>, vector<8x32xbf16>
      %cst_96 = arith.constant dense<0.000000e+00> : vector<16x32xf32>
      %119 = tpu.matmul %106, %118, %cst_96 {dimension_numbers = #tpu.dot_dimension_numbers<[1], [0], [0], [1], [0, 0, 1, 1], [], []>} : vector<16x8xbf16>, vector<8x32xbf16>, vector<16x32xf32> -> vector<16x32xf32>
      %120 = arith.addf %2, %119 : vector<16x32xf32>
      %cst_97 = arith.constant dense<0.000000e+00> : vector<16x32xf32>
      %121 = tpu.matmul %113, %118, %cst_97 {dimension_numbers = #tpu.dot_dimension_numbers<[1], [0], [0], [1], [0, 0, 1, 1], [], []>} : vector<16x8xbf16>, vector<8x32xbf16>, vector<16x32xf32> -> vector<16x32xf32>
      %122 = arith.addf %2, %121 : vector<16x32xf32>
      %c8_98 = arith.constant 8 : index
      %c0_99 = arith.constant 0 : index
      %123 = vector.load %arg2[%c8_98, %c0_99] : memref<72x32xbf16, #tpu.memory_space<vmem>>, vector<8x32xbf16>
      %cst_100 = arith.constant dense<0.000000e+00> : vector<16x32xf32>
      %124 = tpu.matmul %113, %123, %cst_100 {dimension_numbers = #tpu.dot_dimension_numbers<[1], [0], [0], [1], [0, 0, 1, 1], [], []>} : vector<16x8xbf16>, vector<8x32xbf16>, vector<16x32xf32> -> vector<16x32xf32>
      %125 = arith.addf %120, %124 : vector<16x32xf32>
      %cst_101 = arith.constant dense<0.000000e+00> : vector<16x32xf32>
      %126 = tpu.matmul %109, %123, %cst_101 {dimension_numbers = #tpu.dot_dimension_numbers<[1], [0], [0], [1], [0, 0, 1, 1], [], []>} : vector<16x8xbf16>, vector<8x32xbf16>, vector<16x32xf32> -> vector<16x32xf32>
      %127 = arith.addf %122, %126 : vector<16x32xf32>
      %c16_102 = arith.constant 16 : index
      %c0_103 = arith.constant 0 : index
      %128 = vector.load %arg2[%c16_102, %c0_103] : memref<72x32xbf16, #tpu.memory_space<vmem>>, vector<8x32xbf16>
      %cst_104 = arith.constant dense<0.000000e+00> : vector<16x32xf32>
      %129 = tpu.matmul %109, %128, %cst_104 {dimension_numbers = #tpu.dot_dimension_numbers<[1], [0], [0], [1], [0, 0, 1, 1], [], []>} : vector<16x8xbf16>, vector<8x32xbf16>, vector<16x32xf32> -> vector<16x32xf32>
      %130 = arith.addf %125, %129 : vector<16x32xf32>
      %cst_105 = arith.constant dense<0.000000e+00> : vector<16x32xf32>
      %131 = tpu.matmul %117, %128, %cst_105 {dimension_numbers = #tpu.dot_dimension_numbers<[1], [0], [0], [1], [0, 0, 1, 1], [], []>} : vector<16x8xbf16>, vector<8x32xbf16>, vector<16x32xf32> -> vector<16x32xf32>
      %132 = arith.addf %127, %131 : vector<16x32xf32>
      %c2_i32_106 = arith.constant 2 : i32
      %133 = arith.muli %c2_i32_106, %arg5 : i32
      %c1_i32_107 = arith.constant 1 : i32
      %134 = arith.addi %133, %c1_i32_107 : i32
      %c1_i32_108 = arith.constant 1 : i32
      %135 = arith.addi %134, %c1_i32_108 : i32
      %c0_109 = arith.constant 0 : index
      %136 = arith.index_cast %135 : i32 to index
      %c0_110 = arith.constant 0 : index
      %c0_111 = arith.constant 0 : index
      %137 = vector.load %arg1[%c0_109, %136, %c0_110, %c0_111] : memref<1x68x17x8xbf16, #tpu.memory_space<vmem>>, vector<1x1x16x8xbf16>
      %138 = vector.shape_cast %137 : vector<1x1x16x8xbf16> to vector<16x8xbf16>
      %c0_112 = arith.constant 0 : index
      %139 = arith.index_cast %135 : i32 to index
      %c1_113 = arith.constant 1 : index
      %c0_114 = arith.constant 0 : index
      %140 = vector.load %arg1[%c0_112, %139, %c1_113, %c0_114] : memref<1x68x17x8xbf16, #tpu.memory_space<vmem>>, vector<1x1x16x8xbf16>
      %141 = vector.shape_cast %140 : vector<1x1x16x8xbf16> to vector<16x8xbf16>
      %c34_i32_115 = arith.constant 34 : i32
      %142 = arith.addi %c34_i32_115, %135 : i32
      %c0_116 = arith.constant 0 : index
      %143 = arith.index_cast %142 : i32 to index
      %c0_117 = arith.constant 0 : index
      %c0_118 = arith.constant 0 : index
      %144 = vector.load %arg1[%c0_116, %143, %c0_117, %c0_118] : memref<1x68x17x8xbf16, #tpu.memory_space<vmem>>, vector<1x1x16x8xbf16>
      %145 = vector.shape_cast %144 : vector<1x1x16x8xbf16> to vector<16x8xbf16>
      %c34_i32_119 = arith.constant 34 : i32
      %146 = arith.addi %c34_i32_119, %135 : i32
      %c0_120 = arith.constant 0 : index
      %147 = arith.index_cast %146 : i32 to index
      %c1_121 = arith.constant 1 : index
      %c0_122 = arith.constant 0 : index
      %148 = vector.load %arg1[%c0_120, %147, %c1_121, %c0_122] : memref<1x68x17x8xbf16, #tpu.memory_space<vmem>>, vector<1x1x16x8xbf16>
      %149 = vector.shape_cast %148 : vector<1x1x16x8xbf16> to vector<16x8xbf16>
      %c24_123 = arith.constant 24 : index
      %c0_124 = arith.constant 0 : index
      %150 = vector.load %arg2[%c24_123, %c0_124] : memref<72x32xbf16, #tpu.memory_space<vmem>>, vector<8x32xbf16>
      %cst_125 = arith.constant dense<0.000000e+00> : vector<16x32xf32>
      %151 = tpu.matmul %138, %150, %cst_125 {dimension_numbers = #tpu.dot_dimension_numbers<[1], [0], [0], [1], [0, 0, 1, 1], [], []>} : vector<16x8xbf16>, vector<8x32xbf16>, vector<16x32xf32> -> vector<16x32xf32>
      %152 = arith.addf %130, %151 : vector<16x32xf32>
      %cst_126 = arith.constant dense<0.000000e+00> : vector<16x32xf32>
      %153 = tpu.matmul %145, %150, %cst_126 {dimension_numbers = #tpu.dot_dimension_numbers<[1], [0], [0], [1], [0, 0, 1, 1], [], []>} : vector<16x8xbf16>, vector<8x32xbf16>, vector<16x32xf32> -> vector<16x32xf32>
      %154 = arith.addf %132, %153 : vector<16x32xf32>
      %c32_127 = arith.constant 32 : index
      %c0_128 = arith.constant 0 : index
      %155 = vector.load %arg2[%c32_127, %c0_128] : memref<72x32xbf16, #tpu.memory_space<vmem>>, vector<8x32xbf16>
      %cst_129 = arith.constant dense<0.000000e+00> : vector<16x32xf32>
      %156 = tpu.matmul %145, %155, %cst_129 {dimension_numbers = #tpu.dot_dimension_numbers<[1], [0], [0], [1], [0, 0, 1, 1], [], []>} : vector<16x8xbf16>, vector<8x32xbf16>, vector<16x32xf32> -> vector<16x32xf32>
      %157 = arith.addf %152, %156 : vector<16x32xf32>
      %cst_130 = arith.constant dense<0.000000e+00> : vector<16x32xf32>
      %158 = tpu.matmul %141, %155, %cst_130 {dimension_numbers = #tpu.dot_dimension_numbers<[1], [0], [0], [1], [0, 0, 1, 1], [], []>} : vector<16x8xbf16>, vector<8x32xbf16>, vector<16x32xf32> -> vector<16x32xf32>
      %159 = arith.addf %154, %158 : vector<16x32xf32>
      %c40_131 = arith.constant 40 : index
      %c0_132 = arith.constant 0 : index
      %160 = vector.load %arg2[%c40_131, %c0_132] : memref<72x32xbf16, #tpu.memory_space<vmem>>, vector<8x32xbf16>
      %cst_133 = arith.constant dense<0.000000e+00> : vector<16x32xf32>
      %161 = tpu.matmul %141, %160, %cst_133 {dimension_numbers = #tpu.dot_dimension_numbers<[1], [0], [0], [1], [0, 0, 1, 1], [], []>} : vector<16x8xbf16>, vector<8x32xbf16>, vector<16x32xf32> -> vector<16x32xf32>
      %162 = arith.addf %157, %161 : vector<16x32xf32>
      %cst_134 = arith.constant dense<0.000000e+00> : vector<16x32xf32>
      %163 = tpu.matmul %149, %160, %cst_134 {dimension_numbers = #tpu.dot_dimension_numbers<[1], [0], [0], [1], [0, 0, 1, 1], [], []>} : vector<16x8xbf16>, vector<8x32xbf16>, vector<16x32xf32> -> vector<16x32xf32>
      %164 = arith.addf %159, %163 : vector<16x32xf32>
      %c2_i32_135 = arith.constant 2 : i32
      %165 = arith.muli %c2_i32_135, %arg5 : i32
      %c1_i32_136 = arith.constant 1 : i32
      %166 = arith.addi %165, %c1_i32_136 : i32
      %c2_i32_137 = arith.constant 2 : i32
      %167 = arith.addi %166, %c2_i32_137 : i32
      %c0_138 = arith.constant 0 : index
      %168 = arith.index_cast %167 : i32 to index
      %c0_139 = arith.constant 0 : index
      %c0_140 = arith.constant 0 : index
      %169 = vector.load %arg1[%c0_138, %168, %c0_139, %c0_140] : memref<1x68x17x8xbf16, #tpu.memory_space<vmem>>, vector<1x1x16x8xbf16>
      %170 = vector.shape_cast %169 : vector<1x1x16x8xbf16> to vector<16x8xbf16>
      %c0_141 = arith.constant 0 : index
      %171 = arith.index_cast %167 : i32 to index
      %c1_142 = arith.constant 1 : index
      %c0_143 = arith.constant 0 : index
      %172 = vector.load %arg1[%c0_141, %171, %c1_142, %c0_143] : memref<1x68x17x8xbf16, #tpu.memory_space<vmem>>, vector<1x1x16x8xbf16>
      %173 = vector.shape_cast %172 : vector<1x1x16x8xbf16> to vector<16x8xbf16>
      %c34_i32_144 = arith.constant 34 : i32
      %174 = arith.addi %c34_i32_144, %167 : i32
      %c0_145 = arith.constant 0 : index
      %175 = arith.index_cast %174 : i32 to index
      %c0_146 = arith.constant 0 : index
      %c0_147 = arith.constant 0 : index
      %176 = vector.load %arg1[%c0_145, %175, %c0_146, %c0_147] : memref<1x68x17x8xbf16, #tpu.memory_space<vmem>>, vector<1x1x16x8xbf16>
      %177 = vector.shape_cast %176 : vector<1x1x16x8xbf16> to vector<16x8xbf16>
      %c34_i32_148 = arith.constant 34 : i32
      %178 = arith.addi %c34_i32_148, %167 : i32
      %c0_149 = arith.constant 0 : index
      %179 = arith.index_cast %178 : i32 to index
      %c1_150 = arith.constant 1 : index
      %c0_151 = arith.constant 0 : index
      %180 = vector.load %arg1[%c0_149, %179, %c1_150, %c0_151] : memref<1x68x17x8xbf16, #tpu.memory_space<vmem>>, vector<1x1x16x8xbf16>
      %181 = vector.shape_cast %180 : vector<1x1x16x8xbf16> to vector<16x8xbf16>
      %c48_152 = arith.constant 48 : index
      %c0_153 = arith.constant 0 : index
      %182 = vector.load %arg2[%c48_152, %c0_153] : memref<72x32xbf16, #tpu.memory_space<vmem>>, vector<8x32xbf16>
      %cst_154 = arith.constant dense<0.000000e+00> : vector<16x32xf32>
      %183 = tpu.matmul %170, %182, %cst_154 {dimension_numbers = #tpu.dot_dimension_numbers<[1], [0], [0], [1], [0, 0, 1, 1], [], []>} : vector<16x8xbf16>, vector<8x32xbf16>, vector<16x32xf32> -> vector<16x32xf32>
      %184 = arith.addf %162, %183 : vector<16x32xf32>
      %cst_155 = arith.constant dense<0.000000e+00> : vector<16x32xf32>
      %185 = tpu.matmul %177, %182, %cst_155 {dimension_numbers = #tpu.dot_dimension_numbers<[1], [0], [0], [1], [0, 0, 1, 1], [], []>} : vector<16x8xbf16>, vector<8x32xbf16>, vector<16x32xf32> -> vector<16x32xf32>
      %186 = arith.addf %164, %185 : vector<16x32xf32>
      %c56_156 = arith.constant 56 : index
      %c0_157 = arith.constant 0 : index
      %187 = vector.load %arg2[%c56_156, %c0_157] : memref<72x32xbf16, #tpu.memory_space<vmem>>, vector<8x32xbf16>
      %cst_158 = arith.constant dense<0.000000e+00> : vector<16x32xf32>
      %188 = tpu.matmul %177, %187, %cst_158 {dimension_numbers = #tpu.dot_dimension_numbers<[1], [0], [0], [1], [0, 0, 1, 1], [], []>} : vector<16x8xbf16>, vector<8x32xbf16>, vector<16x32xf32> -> vector<16x32xf32>
      %189 = arith.addf %184, %188 : vector<16x32xf32>
      %cst_159 = arith.constant dense<0.000000e+00> : vector<16x32xf32>
      %190 = tpu.matmul %173, %187, %cst_159 {dimension_numbers = #tpu.dot_dimension_numbers<[1], [0], [0], [1], [0, 0, 1, 1], [], []>} : vector<16x8xbf16>, vector<8x32xbf16>, vector<16x32xf32> -> vector<16x32xf32>
      %191 = arith.addf %186, %190 : vector<16x32xf32>
      %c64_160 = arith.constant 64 : index
      %c0_161 = arith.constant 0 : index
      %192 = vector.load %arg2[%c64_160, %c0_161] : memref<72x32xbf16, #tpu.memory_space<vmem>>, vector<8x32xbf16>
      %cst_162 = arith.constant dense<0.000000e+00> : vector<16x32xf32>
      %193 = tpu.matmul %173, %192, %cst_162 {dimension_numbers = #tpu.dot_dimension_numbers<[1], [0], [0], [1], [0, 0, 1, 1], [], []>} : vector<16x8xbf16>, vector<8x32xbf16>, vector<16x32xf32> -> vector<16x32xf32>
      %194 = arith.addf %189, %193 : vector<16x32xf32>
      %cst_163 = arith.constant dense<0.000000e+00> : vector<16x32xf32>
      %195 = tpu.matmul %181, %192, %cst_163 {dimension_numbers = #tpu.dot_dimension_numbers<[1], [0], [0], [1], [0, 0, 1, 1], [], []>} : vector<16x8xbf16>, vector<8x32xbf16>, vector<16x32xf32> -> vector<16x32xf32>
      %196 = arith.addf %191, %195 : vector<16x32xf32>
      %197 = arith.maximumf %194, %196 : vector<16x32xf32>
      %198 = arith.maximumf %100, %197 : vector<16x32xf32>
      %cst_164 = arith.constant 0.000000e+00 : f32
      %199 = vector.broadcast %cst_164 : f32 to vector<16x32xf32>
      %200 = arith.maximumf %198, %199 : vector<16x32xf32>
      %201 = arith.truncf %200 : vector<16x32xf32> to vector<16x32xbf16>
      %c0_165 = arith.constant 0 : index
      %202 = arith.index_cast %arg5 : i32 to index
      %c0_166 = arith.constant 0 : index
      %c0_167 = arith.constant 0 : index
      %203 = vector.load %arg4[%c0_165, %202, %c0_166, %c0_167] : memref<1x16x16x32xbf16, #tpu.memory_space<vmem>>, vector<1x1x16x32xbf16>
      %204 = vector.shape_cast %203 : vector<1x1x16x32xbf16> to vector<16x32xbf16>
      %205 = vector.shape_cast %201 : vector<16x32xbf16> to vector<1x1x16x32xbf16>
      tpu.vector_store %arg4[%c0_165, %202, %c0_166, %c0_167], %205 {strides = array<i32>} : memref<1x16x16x32xbf16, #tpu.memory_space<vmem>>, vector<1x1x16x32xbf16>,
    }
    %c16_i32_1 = arith.constant 16 : i32
    return
  }
  func.func @transform_0(%arg0: i32) -> (i32, i32, i32, i32) {
    %c0_i32 = arith.constant 0 : i32
    %c0_i32_0 = arith.constant 0 : i32
    %c0_i32_1 = arith.constant 0 : i32
    %c0_i32_2 = arith.constant 0 : i32
    return %arg0, %c0_i32, %c0_i32_0, %c0_i32_1 : i32, i32, i32, i32
  }
  func.func @transform_1(%arg0: i32) -> (i32, i32) {
    %c0_i32 = arith.constant 0 : i32
    %c0_i32_0 = arith.constant 0 : i32
    %c0_i32_1 = arith.constant 0 : i32
    return %c0_i32, %c0_i32_0 : i32, i32
  }
  func.func @transform_2(%arg0: i32) -> (i32, i32) {
    %c0_i32 = arith.constant 0 : i32
    %c0_i32_0 = arith.constant 0 : i32
    %c0_i32_1 = arith.constant 0 : i32
    return %c0_i32, %c0_i32_0 : i32, i32
  }
  func.func @transform_3(%arg0: i32) -> (i32, i32, i32, i32) {
    %c0_i32 = arith.constant 0 : i32
    %c0_i32_0 = arith.constant 0 : i32
    %c0_i32_1 = arith.constant 0 : i32
    %c0_i32_2 = arith.constant 0 : i32
    return %arg0, %c0_i32, %c0_i32_0, %c0_i32_1 : i32, i32, i32, i32
  }
}

module attributes {stable_mosaic.version = 11 : i64} {
  func.func @_conv_bn_relu_pool_kernel(%arg0: i32, %arg1: memref<1x36x9x32xbf16, #tpu.memory_space<vmem>>, %arg2: memref<288x64xbf16, #tpu.memory_space<vmem>>, %arg3: memref<1x64xf32, #tpu.memory_space<vmem>>, %arg4: memref<1x8x8x64xbf16, #tpu.memory_space<vmem>>) attributes {dimension_semantics = [#tpu.dimension_semantics<parallel>], iteration_bounds = array<i64: 2>, scalar_prefetch = 0 : i64, scratch_operands = 0 : i64, tpu.core_type = #tpu.core_type<tc>, window_params = [{transform_indices = @transform_0, window_bounds = array<i64: 1, 36, 9, 32>}, {pipeline_mode = #tpu.pipeline_mode<synchronous>, transform_indices = @transform_1, window_bounds = array<i64: 288, 64>}, {pipeline_mode = #tpu.pipeline_mode<synchronous>, transform_indices = @transform_2, window_bounds = array<i64: 1, 64>}, {transform_indices = @transform_3, window_bounds = array<i64: 1, 8, 8, 64>}]} {
    %c0 = arith.constant 0 : index
    %c0_0 = arith.constant 0 : index
    %0 = vector.load %arg3[%c0, %c0_0] : memref<1x64xf32, #tpu.memory_space<vmem>>, vector<1x64xf32>
    %1 = vector.shape_cast %0 : vector<1x64xf32> to vector<1x64xf32>
    %2 = vector.broadcast %1 : vector<1x64xf32> to vector<8x64xf32>
    %c0_i32 = arith.constant 0 : i32
    %c8_i32 = arith.constant 8 : i32
    %3 = arith.addi %c0_i32, %c8_i32 : i32
    %c1_i32 = arith.constant 1 : i32
    scf.for %arg5 = %c0_i32 to %3 step %c1_i32  : i32 {
      %c2_i32 = arith.constant 2 : i32
      %4 = arith.muli %c2_i32, %arg5 : i32
      %c0_i32_2 = arith.constant 0 : i32
      %5 = arith.addi %4, %c0_i32_2 : i32
      %c0_i32_3 = arith.constant 0 : i32
      %6 = arith.addi %5, %c0_i32_3 : i32
      %c0_4 = arith.constant 0 : index
      %7 = arith.index_cast %6 : i32 to index
      %c0_5 = arith.constant 0 : index
      %c0_6 = arith.constant 0 : index
      %8 = vector.load %arg1[%c0_4, %7, %c0_5, %c0_6] : memref<1x36x9x32xbf16, #tpu.memory_space<vmem>>, vector<1x1x8x32xbf16>
      %9 = vector.shape_cast %8 : vector<1x1x8x32xbf16> to vector<8x32xbf16>
      %c0_7 = arith.constant 0 : index
      %10 = arith.index_cast %6 : i32 to index
      %c1 = arith.constant 1 : index
      %c0_8 = arith.constant 0 : index
      %11 = vector.load %arg1[%c0_7, %10, %c1, %c0_8] : memref<1x36x9x32xbf16, #tpu.memory_space<vmem>>, vector<1x1x8x32xbf16>
      %12 = vector.shape_cast %11 : vector<1x1x8x32xbf16> to vector<8x32xbf16>
      %c18_i32 = arith.constant 18 : i32
      %13 = arith.addi %c18_i32, %6 : i32
      %c0_9 = arith.constant 0 : index
      %14 = arith.index_cast %13 : i32 to index
      %c0_10 = arith.constant 0 : index
      %c0_11 = arith.constant 0 : index
      %15 = vector.load %arg1[%c0_9, %14, %c0_10, %c0_11] : memref<1x36x9x32xbf16, #tpu.memory_space<vmem>>, vector<1x1x8x32xbf16>
      %16 = vector.shape_cast %15 : vector<1x1x8x32xbf16> to vector<8x32xbf16>
      %c18_i32_12 = arith.constant 18 : i32
      %17 = arith.addi %c18_i32_12, %6 : i32
      %c0_13 = arith.constant 0 : index
      %18 = arith.index_cast %17 : i32 to index
      %c1_14 = arith.constant 1 : index
      %c0_15 = arith.constant 0 : index
      %19 = vector.load %arg1[%c0_13, %18, %c1_14, %c0_15] : memref<1x36x9x32xbf16, #tpu.memory_space<vmem>>, vector<1x1x8x32xbf16>
      %20 = vector.shape_cast %19 : vector<1x1x8x32xbf16> to vector<8x32xbf16>
      %c0_16 = arith.constant 0 : index
      %c0_17 = arith.constant 0 : index
      %21 = vector.load %arg2[%c0_16, %c0_17] : memref<288x64xbf16, #tpu.memory_space<vmem>>, vector<32x64xbf16>
      %cst = arith.constant dense<0.000000e+00> : vector<8x64xf32>
      %22 = tpu.matmul %9, %21, %cst {dimension_numbers = #tpu.dot_dimension_numbers<[1], [0], [0], [1], [0, 0, 1, 1], [], []>} : vector<8x32xbf16>, vector<32x64xbf16>, vector<8x64xf32> -> vector<8x64xf32>
      %23 = arith.addf %2, %22 : vector<8x64xf32>
      %cst_18 = arith.constant dense<0.000000e+00> : vector<8x64xf32>
      %24 = tpu.matmul %16, %21, %cst_18 {dimension_numbers = #tpu.dot_dimension_numbers<[1], [0], [0], [1], [0, 0, 1, 1], [], []>} : vector<8x32xbf16>, vector<32x64xbf16>, vector<8x64xf32> -> vector<8x64xf32>
      %25 = arith.addf %2, %24 : vector<8x64xf32>
      %c32 = arith.constant 32 : index
      %c0_19 = arith.constant 0 : index
      %26 = vector.load %arg2[%c32, %c0_19] : memref<288x64xbf16, #tpu.memory_space<vmem>>, vector<32x64xbf16>
      %cst_20 = arith.constant dense<0.000000e+00> : vector<8x64xf32>
      %27 = tpu.matmul %16, %26, %cst_20 {dimension_numbers = #tpu.dot_dimension_numbers<[1], [0], [0], [1], [0, 0, 1, 1], [], []>} : vector<8x32xbf16>, vector<32x64xbf16>, vector<8x64xf32> -> vector<8x64xf32>
      %28 = arith.addf %23, %27 : vector<8x64xf32>
      %cst_21 = arith.constant dense<0.000000e+00> : vector<8x64xf32>
      %29 = tpu.matmul %12, %26, %cst_21 {dimension_numbers = #tpu.dot_dimension_numbers<[1], [0], [0], [1], [0, 0, 1, 1], [], []>} : vector<8x32xbf16>, vector<32x64xbf16>, vector<8x64xf32> -> vector<8x64xf32>
      %30 = arith.addf %25, %29 : vector<8x64xf32>
      %c64 = arith.constant 64 : index
      %c0_22 = arith.constant 0 : index
      %31 = vector.load %arg2[%c64, %c0_22] : memref<288x64xbf16, #tpu.memory_space<vmem>>, vector<32x64xbf16>
      %cst_23 = arith.constant dense<0.000000e+00> : vector<8x64xf32>
      %32 = tpu.matmul %12, %31, %cst_23 {dimension_numbers = #tpu.dot_dimension_numbers<[1], [0], [0], [1], [0, 0, 1, 1], [], []>} : vector<8x32xbf16>, vector<32x64xbf16>, vector<8x64xf32> -> vector<8x64xf32>
      %33 = arith.addf %28, %32 : vector<8x64xf32>
      %cst_24 = arith.constant dense<0.000000e+00> : vector<8x64xf32>
      %34 = tpu.matmul %20, %31, %cst_24 {dimension_numbers = #tpu.dot_dimension_numbers<[1], [0], [0], [1], [0, 0, 1, 1], [], []>} : vector<8x32xbf16>, vector<32x64xbf16>, vector<8x64xf32> -> vector<8x64xf32>
      %35 = arith.addf %30, %34 : vector<8x64xf32>
      %c2_i32_25 = arith.constant 2 : i32
      %36 = arith.muli %c2_i32_25, %arg5 : i32
      %c0_i32_26 = arith.constant 0 : i32
      %37 = arith.addi %36, %c0_i32_26 : i32
      %c1_i32_27 = arith.constant 1 : i32
      %38 = arith.addi %37, %c1_i32_27 : i32
      %c0_28 = arith.constant 0 : index
      %39 = arith.index_cast %38 : i32 to index
      %c0_29 = arith.constant 0 : index
      %c0_30 = arith.constant 0 : index
      %40 = vector.load %arg1[%c0_28, %39, %c0_29, %c0_30] : memref<1x36x9x32xbf16, #tpu.memory_space<vmem>>, vector<1x1x8x32xbf16>
      %41 = vector.shape_cast %40 : vector<1x1x8x32xbf16> to vector<8x32xbf16>
      %c0_31 = arith.constant 0 : index
      %42 = arith.index_cast %38 : i32 to index
      %c1_32 = arith.constant 1 : index
      %c0_33 = arith.constant 0 : index
      %43 = vector.load %arg1[%c0_31, %42, %c1_32, %c0_33] : memref<1x36x9x32xbf16, #tpu.memory_space<vmem>>, vector<1x1x8x32xbf16>
      %44 = vector.shape_cast %43 : vector<1x1x8x32xbf16> to vector<8x32xbf16>
      %c18_i32_34 = arith.constant 18 : i32
      %45 = arith.addi %c18_i32_34, %38 : i32
      %c0_35 = arith.constant 0 : index
      %46 = arith.index_cast %45 : i32 to index
      %c0_36 = arith.constant 0 : index
      %c0_37 = arith.constant 0 : index
      %47 = vector.load %arg1[%c0_35, %46, %c0_36, %c0_37] : memref<1x36x9x32xbf16, #tpu.memory_space<vmem>>, vector<1x1x8x32xbf16>
      %48 = vector.shape_cast %47 : vector<1x1x8x32xbf16> to vector<8x32xbf16>
      %c18_i32_38 = arith.constant 18 : i32
      %49 = arith.addi %c18_i32_38, %38 : i32
      %c0_39 = arith.constant 0 : index
      %50 = arith.index_cast %49 : i32 to index
      %c1_40 = arith.constant 1 : index
      %c0_41 = arith.constant 0 : index
      %51 = vector.load %arg1[%c0_39, %50, %c1_40, %c0_41] : memref<1x36x9x32xbf16, #tpu.memory_space<vmem>>, vector<1x1x8x32xbf16>
      %52 = vector.shape_cast %51 : vector<1x1x8x32xbf16> to vector<8x32xbf16>
      %c96 = arith.constant 96 : index
      %c0_42 = arith.constant 0 : index
      %53 = vector.load %arg2[%c96, %c0_42] : memref<288x64xbf16, #tpu.memory_space<vmem>>, vector<32x64xbf16>
      %cst_43 = arith.constant dense<0.000000e+00> : vector<8x64xf32>
      %54 = tpu.matmul %41, %53, %cst_43 {dimension_numbers = #tpu.dot_dimension_numbers<[1], [0], [0], [1], [0, 0, 1, 1], [], []>} : vector<8x32xbf16>, vector<32x64xbf16>, vector<8x64xf32> -> vector<8x64xf32>
      %55 = arith.addf %33, %54 : vector<8x64xf32>
      %cst_44 = arith.constant dense<0.000000e+00> : vector<8x64xf32>
      %56 = tpu.matmul %48, %53, %cst_44 {dimension_numbers = #tpu.dot_dimension_numbers<[1], [0], [0], [1], [0, 0, 1, 1], [], []>} : vector<8x32xbf16>, vector<32x64xbf16>, vector<8x64xf32> -> vector<8x64xf32>
      %57 = arith.addf %35, %56 : vector<8x64xf32>
      %c128 = arith.constant 128 : index
      %c0_45 = arith.constant 0 : index
      %58 = vector.load %arg2[%c128, %c0_45] : memref<288x64xbf16, #tpu.memory_space<vmem>>, vector<32x64xbf16>
      %cst_46 = arith.constant dense<0.000000e+00> : vector<8x64xf32>
      %59 = tpu.matmul %48, %58, %cst_46 {dimension_numbers = #tpu.dot_dimension_numbers<[1], [0], [0], [1], [0, 0, 1, 1], [], []>} : vector<8x32xbf16>, vector<32x64xbf16>, vector<8x64xf32> -> vector<8x64xf32>
      %60 = arith.addf %55, %59 : vector<8x64xf32>
      %cst_47 = arith.constant dense<0.000000e+00> : vector<8x64xf32>
      %61 = tpu.matmul %44, %58, %cst_47 {dimension_numbers = #tpu.dot_dimension_numbers<[1], [0], [0], [1], [0, 0, 1, 1], [], []>} : vector<8x32xbf16>, vector<32x64xbf16>, vector<8x64xf32> -> vector<8x64xf32>
      %62 = arith.addf %57, %61 : vector<8x64xf32>
      %c160 = arith.constant 160 : index
      %c0_48 = arith.constant 0 : index
      %63 = vector.load %arg2[%c160, %c0_48] : memref<288x64xbf16, #tpu.memory_space<vmem>>, vector<32x64xbf16>
      %cst_49 = arith.constant dense<0.000000e+00> : vector<8x64xf32>
      %64 = tpu.matmul %44, %63, %cst_49 {dimension_numbers = #tpu.dot_dimension_numbers<[1], [0], [0], [1], [0, 0, 1, 1], [], []>} : vector<8x32xbf16>, vector<32x64xbf16>, vector<8x64xf32> -> vector<8x64xf32>
      %65 = arith.addf %60, %64 : vector<8x64xf32>
      %cst_50 = arith.constant dense<0.000000e+00> : vector<8x64xf32>
      %66 = tpu.matmul %52, %63, %cst_50 {dimension_numbers = #tpu.dot_dimension_numbers<[1], [0], [0], [1], [0, 0, 1, 1], [], []>} : vector<8x32xbf16>, vector<32x64xbf16>, vector<8x64xf32> -> vector<8x64xf32>
      %67 = arith.addf %62, %66 : vector<8x64xf32>
      %c2_i32_51 = arith.constant 2 : i32
      %68 = arith.muli %c2_i32_51, %arg5 : i32
      %c0_i32_52 = arith.constant 0 : i32
      %69 = arith.addi %68, %c0_i32_52 : i32
      %c2_i32_53 = arith.constant 2 : i32
      %70 = arith.addi %69, %c2_i32_53 : i32
      %c0_54 = arith.constant 0 : index
      %71 = arith.index_cast %70 : i32 to index
      %c0_55 = arith.constant 0 : index
      %c0_56 = arith.constant 0 : index
      %72 = vector.load %arg1[%c0_54, %71, %c0_55, %c0_56] : memref<1x36x9x32xbf16, #tpu.memory_space<vmem>>, vector<1x1x8x32xbf16>
      %73 = vector.shape_cast %72 : vector<1x1x8x32xbf16> to vector<8x32xbf16>
      %c0_57 = arith.constant 0 : index
      %74 = arith.index_cast %70 : i32 to index
      %c1_58 = arith.constant 1 : index
      %c0_59 = arith.constant 0 : index
      %75 = vector.load %arg1[%c0_57, %74, %c1_58, %c0_59] : memref<1x36x9x32xbf16, #tpu.memory_space<vmem>>, vector<1x1x8x32xbf16>
      %76 = vector.shape_cast %75 : vector<1x1x8x32xbf16> to vector<8x32xbf16>
      %c18_i32_60 = arith.constant 18 : i32
      %77 = arith.addi %c18_i32_60, %70 : i32
      %c0_61 = arith.constant 0 : index
      %78 = arith.index_cast %77 : i32 to index
      %c0_62 = arith.constant 0 : index
      %c0_63 = arith.constant 0 : index
      %79 = vector.load %arg1[%c0_61, %78, %c0_62, %c0_63] : memref<1x36x9x32xbf16, #tpu.memory_space<vmem>>, vector<1x1x8x32xbf16>
      %80 = vector.shape_cast %79 : vector<1x1x8x32xbf16> to vector<8x32xbf16>
      %c18_i32_64 = arith.constant 18 : i32
      %81 = arith.addi %c18_i32_64, %70 : i32
      %c0_65 = arith.constant 0 : index
      %82 = arith.index_cast %81 : i32 to index
      %c1_66 = arith.constant 1 : index
      %c0_67 = arith.constant 0 : index
      %83 = vector.load %arg1[%c0_65, %82, %c1_66, %c0_67] : memref<1x36x9x32xbf16, #tpu.memory_space<vmem>>, vector<1x1x8x32xbf16>
      %84 = vector.shape_cast %83 : vector<1x1x8x32xbf16> to vector<8x32xbf16>
      %c192 = arith.constant 192 : index
      %c0_68 = arith.constant 0 : index
      %85 = vector.load %arg2[%c192, %c0_68] : memref<288x64xbf16, #tpu.memory_space<vmem>>, vector<32x64xbf16>
      %cst_69 = arith.constant dense<0.000000e+00> : vector<8x64xf32>
      %86 = tpu.matmul %73, %85, %cst_69 {dimension_numbers = #tpu.dot_dimension_numbers<[1], [0], [0], [1], [0, 0, 1, 1], [], []>} : vector<8x32xbf16>, vector<32x64xbf16>, vector<8x64xf32> -> vector<8x64xf32>
      %87 = arith.addf %65, %86 : vector<8x64xf32>
      %cst_70 = arith.constant dense<0.000000e+00> : vector<8x64xf32>
      %88 = tpu.matmul %80, %85, %cst_70 {dimension_numbers = #tpu.dot_dimension_numbers<[1], [0], [0], [1], [0, 0, 1, 1], [], []>} : vector<8x32xbf16>, vector<32x64xbf16>, vector<8x64xf32> -> vector<8x64xf32>
      %89 = arith.addf %67, %88 : vector<8x64xf32>
      %c224 = arith.constant 224 : index
      %c0_71 = arith.constant 0 : index
      %90 = vector.load %arg2[%c224, %c0_71] : memref<288x64xbf16, #tpu.memory_space<vmem>>, vector<32x64xbf16>
      %cst_72 = arith.constant dense<0.000000e+00> : vector<8x64xf32>
      %91 = tpu.matmul %80, %90, %cst_72 {dimension_numbers = #tpu.dot_dimension_numbers<[1], [0], [0], [1], [0, 0, 1, 1], [], []>} : vector<8x32xbf16>, vector<32x64xbf16>, vector<8x64xf32> -> vector<8x64xf32>
      %92 = arith.addf %87, %91 : vector<8x64xf32>
      %cst_73 = arith.constant dense<0.000000e+00> : vector<8x64xf32>
      %93 = tpu.matmul %76, %90, %cst_73 {dimension_numbers = #tpu.dot_dimension_numbers<[1], [0], [0], [1], [0, 0, 1, 1], [], []>} : vector<8x32xbf16>, vector<32x64xbf16>, vector<8x64xf32> -> vector<8x64xf32>
      %94 = arith.addf %89, %93 : vector<8x64xf32>
      %c256 = arith.constant 256 : index
      %c0_74 = arith.constant 0 : index
      %95 = vector.load %arg2[%c256, %c0_74] : memref<288x64xbf16, #tpu.memory_space<vmem>>, vector<32x64xbf16>
      %cst_75 = arith.constant dense<0.000000e+00> : vector<8x64xf32>
      %96 = tpu.matmul %76, %95, %cst_75 {dimension_numbers = #tpu.dot_dimension_numbers<[1], [0], [0], [1], [0, 0, 1, 1], [], []>} : vector<8x32xbf16>, vector<32x64xbf16>, vector<8x64xf32> -> vector<8x64xf32>
      %97 = arith.addf %92, %96 : vector<8x64xf32>
      %cst_76 = arith.constant dense<0.000000e+00> : vector<8x64xf32>
      %98 = tpu.matmul %84, %95, %cst_76 {dimension_numbers = #tpu.dot_dimension_numbers<[1], [0], [0], [1], [0, 0, 1, 1], [], []>} : vector<8x32xbf16>, vector<32x64xbf16>, vector<8x64xf32> -> vector<8x64xf32>
      %99 = arith.addf %94, %98 : vector<8x64xf32>
      %100 = arith.maximumf %97, %99 : vector<8x64xf32>
      %c2_i32_77 = arith.constant 2 : i32
      %101 = arith.muli %c2_i32_77, %arg5 : i32
      %c1_i32_78 = arith.constant 1 : i32
      %102 = arith.addi %101, %c1_i32_78 : i32
      %c0_i32_79 = arith.constant 0 : i32
      %103 = arith.addi %102, %c0_i32_79 : i32
      %c0_80 = arith.constant 0 : index
      %104 = arith.index_cast %103 : i32 to index
      %c0_81 = arith.constant 0 : index
      %c0_82 = arith.constant 0 : index
      %105 = vector.load %arg1[%c0_80, %104, %c0_81, %c0_82] : memref<1x36x9x32xbf16, #tpu.memory_space<vmem>>, vector<1x1x8x32xbf16>
      %106 = vector.shape_cast %105 : vector<1x1x8x32xbf16> to vector<8x32xbf16>
      %c0_83 = arith.constant 0 : index
      %107 = arith.index_cast %103 : i32 to index
      %c1_84 = arith.constant 1 : index
      %c0_85 = arith.constant 0 : index
      %108 = vector.load %arg1[%c0_83, %107, %c1_84, %c0_85] : memref<1x36x9x32xbf16, #tpu.memory_space<vmem>>, vector<1x1x8x32xbf16>
      %109 = vector.shape_cast %108 : vector<1x1x8x32xbf16> to vector<8x32xbf16>
      %c18_i32_86 = arith.constant 18 : i32
      %110 = arith.addi %c18_i32_86, %103 : i32
      %c0_87 = arith.constant 0 : index
      %111 = arith.index_cast %110 : i32 to index
      %c0_88 = arith.constant 0 : index
      %c0_89 = arith.constant 0 : index
      %112 = vector.load %arg1[%c0_87, %111, %c0_88, %c0_89] : memref<1x36x9x32xbf16, #tpu.memory_space<vmem>>, vector<1x1x8x32xbf16>
      %113 = vector.shape_cast %112 : vector<1x1x8x32xbf16> to vector<8x32xbf16>
      %c18_i32_90 = arith.constant 18 : i32
      %114 = arith.addi %c18_i32_90, %103 : i32
      %c0_91 = arith.constant 0 : index
      %115 = arith.index_cast %114 : i32 to index
      %c1_92 = arith.constant 1 : index
      %c0_93 = arith.constant 0 : index
      %116 = vector.load %arg1[%c0_91, %115, %c1_92, %c0_93] : memref<1x36x9x32xbf16, #tpu.memory_space<vmem>>, vector<1x1x8x32xbf16>
      %117 = vector.shape_cast %116 : vector<1x1x8x32xbf16> to vector<8x32xbf16>
      %c0_94 = arith.constant 0 : index
      %c0_95 = arith.constant 0 : index
      %118 = vector.load %arg2[%c0_94, %c0_95] : memref<288x64xbf16, #tpu.memory_space<vmem>>, vector<32x64xbf16>
      %cst_96 = arith.constant dense<0.000000e+00> : vector<8x64xf32>
      %119 = tpu.matmul %106, %118, %cst_96 {dimension_numbers = #tpu.dot_dimension_numbers<[1], [0], [0], [1], [0, 0, 1, 1], [], []>} : vector<8x32xbf16>, vector<32x64xbf16>, vector<8x64xf32> -> vector<8x64xf32>
      %120 = arith.addf %2, %119 : vector<8x64xf32>
      %cst_97 = arith.constant dense<0.000000e+00> : vector<8x64xf32>
      %121 = tpu.matmul %113, %118, %cst_97 {dimension_numbers = #tpu.dot_dimension_numbers<[1], [0], [0], [1], [0, 0, 1, 1], [], []>} : vector<8x32xbf16>, vector<32x64xbf16>, vector<8x64xf32> -> vector<8x64xf32>
      %122 = arith.addf %2, %121 : vector<8x64xf32>
      %c32_98 = arith.constant 32 : index
      %c0_99 = arith.constant 0 : index
      %123 = vector.load %arg2[%c32_98, %c0_99] : memref<288x64xbf16, #tpu.memory_space<vmem>>, vector<32x64xbf16>
      %cst_100 = arith.constant dense<0.000000e+00> : vector<8x64xf32>
      %124 = tpu.matmul %113, %123, %cst_100 {dimension_numbers = #tpu.dot_dimension_numbers<[1], [0], [0], [1], [0, 0, 1, 1], [], []>} : vector<8x32xbf16>, vector<32x64xbf16>, vector<8x64xf32> -> vector<8x64xf32>
      %125 = arith.addf %120, %124 : vector<8x64xf32>
      %cst_101 = arith.constant dense<0.000000e+00> : vector<8x64xf32>
      %126 = tpu.matmul %109, %123, %cst_101 {dimension_numbers = #tpu.dot_dimension_numbers<[1], [0], [0], [1], [0, 0, 1, 1], [], []>} : vector<8x32xbf16>, vector<32x64xbf16>, vector<8x64xf32> -> vector<8x64xf32>
      %127 = arith.addf %122, %126 : vector<8x64xf32>
      %c64_102 = arith.constant 64 : index
      %c0_103 = arith.constant 0 : index
      %128 = vector.load %arg2[%c64_102, %c0_103] : memref<288x64xbf16, #tpu.memory_space<vmem>>, vector<32x64xbf16>
      %cst_104 = arith.constant dense<0.000000e+00> : vector<8x64xf32>
      %129 = tpu.matmul %109, %128, %cst_104 {dimension_numbers = #tpu.dot_dimension_numbers<[1], [0], [0], [1], [0, 0, 1, 1], [], []>} : vector<8x32xbf16>, vector<32x64xbf16>, vector<8x64xf32> -> vector<8x64xf32>
      %130 = arith.addf %125, %129 : vector<8x64xf32>
      %cst_105 = arith.constant dense<0.000000e+00> : vector<8x64xf32>
      %131 = tpu.matmul %117, %128, %cst_105 {dimension_numbers = #tpu.dot_dimension_numbers<[1], [0], [0], [1], [0, 0, 1, 1], [], []>} : vector<8x32xbf16>, vector<32x64xbf16>, vector<8x64xf32> -> vector<8x64xf32>
      %132 = arith.addf %127, %131 : vector<8x64xf32>
      %c2_i32_106 = arith.constant 2 : i32
      %133 = arith.muli %c2_i32_106, %arg5 : i32
      %c1_i32_107 = arith.constant 1 : i32
      %134 = arith.addi %133, %c1_i32_107 : i32
      %c1_i32_108 = arith.constant 1 : i32
      %135 = arith.addi %134, %c1_i32_108 : i32
      %c0_109 = arith.constant 0 : index
      %136 = arith.index_cast %135 : i32 to index
      %c0_110 = arith.constant 0 : index
      %c0_111 = arith.constant 0 : index
      %137 = vector.load %arg1[%c0_109, %136, %c0_110, %c0_111] : memref<1x36x9x32xbf16, #tpu.memory_space<vmem>>, vector<1x1x8x32xbf16>
      %138 = vector.shape_cast %137 : vector<1x1x8x32xbf16> to vector<8x32xbf16>
      %c0_112 = arith.constant 0 : index
      %139 = arith.index_cast %135 : i32 to index
      %c1_113 = arith.constant 1 : index
      %c0_114 = arith.constant 0 : index
      %140 = vector.load %arg1[%c0_112, %139, %c1_113, %c0_114] : memref<1x36x9x32xbf16, #tpu.memory_space<vmem>>, vector<1x1x8x32xbf16>
      %141 = vector.shape_cast %140 : vector<1x1x8x32xbf16> to vector<8x32xbf16>
      %c18_i32_115 = arith.constant 18 : i32
      %142 = arith.addi %c18_i32_115, %135 : i32
      %c0_116 = arith.constant 0 : index
      %143 = arith.index_cast %142 : i32 to index
      %c0_117 = arith.constant 0 : index
      %c0_118 = arith.constant 0 : index
      %144 = vector.load %arg1[%c0_116, %143, %c0_117, %c0_118] : memref<1x36x9x32xbf16, #tpu.memory_space<vmem>>, vector<1x1x8x32xbf16>
      %145 = vector.shape_cast %144 : vector<1x1x8x32xbf16> to vector<8x32xbf16>
      %c18_i32_119 = arith.constant 18 : i32
      %146 = arith.addi %c18_i32_119, %135 : i32
      %c0_120 = arith.constant 0 : index
      %147 = arith.index_cast %146 : i32 to index
      %c1_121 = arith.constant 1 : index
      %c0_122 = arith.constant 0 : index
      %148 = vector.load %arg1[%c0_120, %147, %c1_121, %c0_122] : memref<1x36x9x32xbf16, #tpu.memory_space<vmem>>, vector<1x1x8x32xbf16>
      %149 = vector.shape_cast %148 : vector<1x1x8x32xbf16> to vector<8x32xbf16>
      %c96_123 = arith.constant 96 : index
      %c0_124 = arith.constant 0 : index
      %150 = vector.load %arg2[%c96_123, %c0_124] : memref<288x64xbf16, #tpu.memory_space<vmem>>, vector<32x64xbf16>
      %cst_125 = arith.constant dense<0.000000e+00> : vector<8x64xf32>
      %151 = tpu.matmul %138, %150, %cst_125 {dimension_numbers = #tpu.dot_dimension_numbers<[1], [0], [0], [1], [0, 0, 1, 1], [], []>} : vector<8x32xbf16>, vector<32x64xbf16>, vector<8x64xf32> -> vector<8x64xf32>
      %152 = arith.addf %130, %151 : vector<8x64xf32>
      %cst_126 = arith.constant dense<0.000000e+00> : vector<8x64xf32>
      %153 = tpu.matmul %145, %150, %cst_126 {dimension_numbers = #tpu.dot_dimension_numbers<[1], [0], [0], [1], [0, 0, 1, 1], [], []>} : vector<8x32xbf16>, vector<32x64xbf16>, vector<8x64xf32> -> vector<8x64xf32>
      %154 = arith.addf %132, %153 : vector<8x64xf32>
      %c128_127 = arith.constant 128 : index
      %c0_128 = arith.constant 0 : index
      %155 = vector.load %arg2[%c128_127, %c0_128] : memref<288x64xbf16, #tpu.memory_space<vmem>>, vector<32x64xbf16>
      %cst_129 = arith.constant dense<0.000000e+00> : vector<8x64xf32>
      %156 = tpu.matmul %145, %155, %cst_129 {dimension_numbers = #tpu.dot_dimension_numbers<[1], [0], [0], [1], [0, 0, 1, 1], [], []>} : vector<8x32xbf16>, vector<32x64xbf16>, vector<8x64xf32> -> vector<8x64xf32>
      %157 = arith.addf %152, %156 : vector<8x64xf32>
      %cst_130 = arith.constant dense<0.000000e+00> : vector<8x64xf32>
      %158 = tpu.matmul %141, %155, %cst_130 {dimension_numbers = #tpu.dot_dimension_numbers<[1], [0], [0], [1], [0, 0, 1, 1], [], []>} : vector<8x32xbf16>, vector<32x64xbf16>, vector<8x64xf32> -> vector<8x64xf32>
      %159 = arith.addf %154, %158 : vector<8x64xf32>
      %c160_131 = arith.constant 160 : index
      %c0_132 = arith.constant 0 : index
      %160 = vector.load %arg2[%c160_131, %c0_132] : memref<288x64xbf16, #tpu.memory_space<vmem>>, vector<32x64xbf16>
      %cst_133 = arith.constant dense<0.000000e+00> : vector<8x64xf32>
      %161 = tpu.matmul %141, %160, %cst_133 {dimension_numbers = #tpu.dot_dimension_numbers<[1], [0], [0], [1], [0, 0, 1, 1], [], []>} : vector<8x32xbf16>, vector<32x64xbf16>, vector<8x64xf32> -> vector<8x64xf32>
      %162 = arith.addf %157, %161 : vector<8x64xf32>
      %cst_134 = arith.constant dense<0.000000e+00> : vector<8x64xf32>
      %163 = tpu.matmul %149, %160, %cst_134 {dimension_numbers = #tpu.dot_dimension_numbers<[1], [0], [0], [1], [0, 0, 1, 1], [], []>} : vector<8x32xbf16>, vector<32x64xbf16>, vector<8x64xf32> -> vector<8x64xf32>
      %164 = arith.addf %159, %163 : vector<8x64xf32>
      %c2_i32_135 = arith.constant 2 : i32
      %165 = arith.muli %c2_i32_135, %arg5 : i32
      %c1_i32_136 = arith.constant 1 : i32
      %166 = arith.addi %165, %c1_i32_136 : i32
      %c2_i32_137 = arith.constant 2 : i32
      %167 = arith.addi %166, %c2_i32_137 : i32
      %c0_138 = arith.constant 0 : index
      %168 = arith.index_cast %167 : i32 to index
      %c0_139 = arith.constant 0 : index
      %c0_140 = arith.constant 0 : index
      %169 = vector.load %arg1[%c0_138, %168, %c0_139, %c0_140] : memref<1x36x9x32xbf16, #tpu.memory_space<vmem>>, vector<1x1x8x32xbf16>
      %170 = vector.shape_cast %169 : vector<1x1x8x32xbf16> to vector<8x32xbf16>
      %c0_141 = arith.constant 0 : index
      %171 = arith.index_cast %167 : i32 to index
      %c1_142 = arith.constant 1 : index
      %c0_143 = arith.constant 0 : index
      %172 = vector.load %arg1[%c0_141, %171, %c1_142, %c0_143] : memref<1x36x9x32xbf16, #tpu.memory_space<vmem>>, vector<1x1x8x32xbf16>
      %173 = vector.shape_cast %172 : vector<1x1x8x32xbf16> to vector<8x32xbf16>
      %c18_i32_144 = arith.constant 18 : i32
      %174 = arith.addi %c18_i32_144, %167 : i32
      %c0_145 = arith.constant 0 : index
      %175 = arith.index_cast %174 : i32 to index
      %c0_146 = arith.constant 0 : index
      %c0_147 = arith.constant 0 : index
      %176 = vector.load %arg1[%c0_145, %175, %c0_146, %c0_147] : memref<1x36x9x32xbf16, #tpu.memory_space<vmem>>, vector<1x1x8x32xbf16>
      %177 = vector.shape_cast %176 : vector<1x1x8x32xbf16> to vector<8x32xbf16>
      %c18_i32_148 = arith.constant 18 : i32
      %178 = arith.addi %c18_i32_148, %167 : i32
      %c0_149 = arith.constant 0 : index
      %179 = arith.index_cast %178 : i32 to index
      %c1_150 = arith.constant 1 : index
      %c0_151 = arith.constant 0 : index
      %180 = vector.load %arg1[%c0_149, %179, %c1_150, %c0_151] : memref<1x36x9x32xbf16, #tpu.memory_space<vmem>>, vector<1x1x8x32xbf16>
      %181 = vector.shape_cast %180 : vector<1x1x8x32xbf16> to vector<8x32xbf16>
      %c192_152 = arith.constant 192 : index
      %c0_153 = arith.constant 0 : index
      %182 = vector.load %arg2[%c192_152, %c0_153] : memref<288x64xbf16, #tpu.memory_space<vmem>>, vector<32x64xbf16>
      %cst_154 = arith.constant dense<0.000000e+00> : vector<8x64xf32>
      %183 = tpu.matmul %170, %182, %cst_154 {dimension_numbers = #tpu.dot_dimension_numbers<[1], [0], [0], [1], [0, 0, 1, 1], [], []>} : vector<8x32xbf16>, vector<32x64xbf16>, vector<8x64xf32> -> vector<8x64xf32>
      %184 = arith.addf %162, %183 : vector<8x64xf32>
      %cst_155 = arith.constant dense<0.000000e+00> : vector<8x64xf32>
      %185 = tpu.matmul %177, %182, %cst_155 {dimension_numbers = #tpu.dot_dimension_numbers<[1], [0], [0], [1], [0, 0, 1, 1], [], []>} : vector<8x32xbf16>, vector<32x64xbf16>, vector<8x64xf32> -> vector<8x64xf32>
      %186 = arith.addf %164, %185 : vector<8x64xf32>
      %c224_156 = arith.constant 224 : index
      %c0_157 = arith.constant 0 : index
      %187 = vector.load %arg2[%c224_156, %c0_157] : memref<288x64xbf16, #tpu.memory_space<vmem>>, vector<32x64xbf16>
      %cst_158 = arith.constant dense<0.000000e+00> : vector<8x64xf32>
      %188 = tpu.matmul %177, %187, %cst_158 {dimension_numbers = #tpu.dot_dimension_numbers<[1], [0], [0], [1], [0, 0, 1, 1], [], []>} : vector<8x32xbf16>, vector<32x64xbf16>, vector<8x64xf32> -> vector<8x64xf32>
      %189 = arith.addf %184, %188 : vector<8x64xf32>
      %cst_159 = arith.constant dense<0.000000e+00> : vector<8x64xf32>
      %190 = tpu.matmul %173, %187, %cst_159 {dimension_numbers = #tpu.dot_dimension_numbers<[1], [0], [0], [1], [0, 0, 1, 1], [], []>} : vector<8x32xbf16>, vector<32x64xbf16>, vector<8x64xf32> -> vector<8x64xf32>
      %191 = arith.addf %186, %190 : vector<8x64xf32>
      %c256_160 = arith.constant 256 : index
      %c0_161 = arith.constant 0 : index
      %192 = vector.load %arg2[%c256_160, %c0_161] : memref<288x64xbf16, #tpu.memory_space<vmem>>, vector<32x64xbf16>
      %cst_162 = arith.constant dense<0.000000e+00> : vector<8x64xf32>
      %193 = tpu.matmul %173, %192, %cst_162 {dimension_numbers = #tpu.dot_dimension_numbers<[1], [0], [0], [1], [0, 0, 1, 1], [], []>} : vector<8x32xbf16>, vector<32x64xbf16>, vector<8x64xf32> -> vector<8x64xf32>
      %194 = arith.addf %189, %193 : vector<8x64xf32>
      %cst_163 = arith.constant dense<0.000000e+00> : vector<8x64xf32>
      %195 = tpu.matmul %181, %192, %cst_163 {dimension_numbers = #tpu.dot_dimension_numbers<[1], [0], [0], [1], [0, 0, 1, 1], [], []>} : vector<8x32xbf16>, vector<32x64xbf16>, vector<8x64xf32> -> vector<8x64xf32>
      %196 = arith.addf %191, %195 : vector<8x64xf32>
      %197 = arith.maximumf %194, %196 : vector<8x64xf32>
      %198 = arith.maximumf %100, %197 : vector<8x64xf32>
      %cst_164 = arith.constant 0.000000e+00 : f32
      %199 = vector.broadcast %cst_164 : f32 to vector<8x64xf32>
      %200 = arith.maximumf %198, %199 : vector<8x64xf32>
      %201 = arith.truncf %200 : vector<8x64xf32> to vector<8x64xbf16>
      %c0_165 = arith.constant 0 : index
      %202 = arith.index_cast %arg5 : i32 to index
      %c0_166 = arith.constant 0 : index
      %c0_167 = arith.constant 0 : index
      %203 = vector.load %arg4[%c0_165, %202, %c0_166, %c0_167] : memref<1x8x8x64xbf16, #tpu.memory_space<vmem>>, vector<1x1x8x64xbf16>
      %204 = vector.shape_cast %203 : vector<1x1x8x64xbf16> to vector<8x64xbf16>
      %205 = vector.shape_cast %201 : vector<8x64xbf16> to vector<1x1x8x64xbf16>
      tpu.vector_store %arg4[%c0_165, %202, %c0_166, %c0_167], %205 {strides = array<i32>} : memref<1x8x8x64xbf16, #tpu.memory_space<vmem>>, vector<1x1x8x64xbf16>,
    }
    %c8_i32_1 = arith.constant 8 : i32
    return
  }
  func.func @transform_0(%arg0: i32) -> (i32, i32, i32, i32) {
    %c0_i32 = arith.constant 0 : i32
    %c0_i32_0 = arith.constant 0 : i32
    %c0_i32_1 = arith.constant 0 : i32
    %c0_i32_2 = arith.constant 0 : i32
    return %arg0, %c0_i32, %c0_i32_0, %c0_i32_1 : i32, i32, i32, i32
  }
  func.func @transform_1(%arg0: i32) -> (i32, i32) {
    %c0_i32 = arith.constant 0 : i32
    %c0_i32_0 = arith.constant 0 : i32
    %c0_i32_1 = arith.constant 0 : i32
    return %c0_i32, %c0_i32_0 : i32, i32
  }
  func.func @transform_2(%arg0: i32) -> (i32, i32) {
    %c0_i32 = arith.constant 0 : i32
    %c0_i32_0 = arith.constant 0 : i32
    %c0_i32_1 = arith.constant 0 : i32
    return %c0_i32, %c0_i32_0 : i32, i32
  }
  func.func @transform_3(%arg0: i32) -> (i32, i32, i32, i32) {
    %c0_i32 = arith.constant 0 : i32
    %c0_i32_0 = arith.constant 0 : i32
    %c0_i32_1 = arith.constant 0 : i32
    %c0_i32_2 = arith.constant 0 : i32
    return %arg0, %c0_i32, %c0_i32_0, %c0_i32_1 : i32, i32, i32, i32
  }
}

module attributes {stable_mosaic.version = 11 : i64} {
  func.func @_conv_bn_relu_pool_kernel(%arg0: i32, %arg1: memref<1x20x5x64xbf16, #tpu.memory_space<vmem>>, %arg2: memref<576x128xbf16, #tpu.memory_space<vmem>>, %arg3: memref<1x128xf32, #tpu.memory_space<vmem>>, %arg4: memref<1x4x4x128xbf16, #tpu.memory_space<vmem>>) attributes {dimension_semantics = [#tpu.dimension_semantics<parallel>], iteration_bounds = array<i64: 2>, scalar_prefetch = 0 : i64, scratch_operands = 0 : i64, tpu.core_type = #tpu.core_type<tc>, window_params = [{transform_indices = @transform_0, window_bounds = array<i64: 1, 20, 5, 64>}, {pipeline_mode = #tpu.pipeline_mode<synchronous>, transform_indices = @transform_1, window_bounds = array<i64: 576, 128>}, {pipeline_mode = #tpu.pipeline_mode<synchronous>, transform_indices = @transform_2, window_bounds = array<i64: 1, 128>}, {transform_indices = @transform_3, window_bounds = array<i64: 1, 4, 4, 128>}]} {
    %c0 = arith.constant 0 : index
    %c0_0 = arith.constant 0 : index
    %0 = vector.load %arg3[%c0, %c0_0] : memref<1x128xf32, #tpu.memory_space<vmem>>, vector<1x128xf32>
    %1 = vector.shape_cast %0 : vector<1x128xf32> to vector<1x128xf32>
    %2 = vector.broadcast %1 : vector<1x128xf32> to vector<4x128xf32>
    %c0_i32 = arith.constant 0 : i32
    %c4_i32 = arith.constant 4 : i32
    %3 = arith.addi %c0_i32, %c4_i32 : i32
    %c1_i32 = arith.constant 1 : i32
    scf.for %arg5 = %c0_i32 to %3 step %c1_i32  : i32 {
      %c2_i32 = arith.constant 2 : i32
      %4 = arith.muli %c2_i32, %arg5 : i32
      %c0_i32_2 = arith.constant 0 : i32
      %5 = arith.addi %4, %c0_i32_2 : i32
      %c0_i32_3 = arith.constant 0 : i32
      %6 = arith.addi %5, %c0_i32_3 : i32
      %c0_4 = arith.constant 0 : index
      %7 = arith.index_cast %6 : i32 to index
      %c0_5 = arith.constant 0 : index
      %c0_6 = arith.constant 0 : index
      %8 = vector.load %arg1[%c0_4, %7, %c0_5, %c0_6] : memref<1x20x5x64xbf16, #tpu.memory_space<vmem>>, vector<1x1x4x64xbf16>
      %9 = vector.shape_cast %8 : vector<1x1x4x64xbf16> to vector<4x64xbf16>
      %c0_7 = arith.constant 0 : index
      %10 = arith.index_cast %6 : i32 to index
      %c1 = arith.constant 1 : index
      %c0_8 = arith.constant 0 : index
      %11 = vector.load %arg1[%c0_7, %10, %c1, %c0_8] : memref<1x20x5x64xbf16, #tpu.memory_space<vmem>>, vector<1x1x4x64xbf16>
      %12 = vector.shape_cast %11 : vector<1x1x4x64xbf16> to vector<4x64xbf16>
      %c10_i32 = arith.constant 10 : i32
      %13 = arith.addi %c10_i32, %6 : i32
      %c0_9 = arith.constant 0 : index
      %14 = arith.index_cast %13 : i32 to index
      %c0_10 = arith.constant 0 : index
      %c0_11 = arith.constant 0 : index
      %15 = vector.load %arg1[%c0_9, %14, %c0_10, %c0_11] : memref<1x20x5x64xbf16, #tpu.memory_space<vmem>>, vector<1x1x4x64xbf16>
      %16 = vector.shape_cast %15 : vector<1x1x4x64xbf16> to vector<4x64xbf16>
      %c10_i32_12 = arith.constant 10 : i32
      %17 = arith.addi %c10_i32_12, %6 : i32
      %c0_13 = arith.constant 0 : index
      %18 = arith.index_cast %17 : i32 to index
      %c1_14 = arith.constant 1 : index
      %c0_15 = arith.constant 0 : index
      %19 = vector.load %arg1[%c0_13, %18, %c1_14, %c0_15] : memref<1x20x5x64xbf16, #tpu.memory_space<vmem>>, vector<1x1x4x64xbf16>
      %20 = vector.shape_cast %19 : vector<1x1x4x64xbf16> to vector<4x64xbf16>
      %c0_16 = arith.constant 0 : index
      %c0_17 = arith.constant 0 : index
      %21 = vector.load %arg2[%c0_16, %c0_17] : memref<576x128xbf16, #tpu.memory_space<vmem>>, vector<64x128xbf16>
      %cst = arith.constant dense<0.000000e+00> : vector<4x128xf32>
      %22 = tpu.matmul %9, %21, %cst {dimension_numbers = #tpu.dot_dimension_numbers<[1], [0], [0], [1], [0, 0, 1, 1], [], []>} : vector<4x64xbf16>, vector<64x128xbf16>, vector<4x128xf32> -> vector<4x128xf32>
      %23 = arith.addf %2, %22 : vector<4x128xf32>
      %cst_18 = arith.constant dense<0.000000e+00> : vector<4x128xf32>
      %24 = tpu.matmul %16, %21, %cst_18 {dimension_numbers = #tpu.dot_dimension_numbers<[1], [0], [0], [1], [0, 0, 1, 1], [], []>} : vector<4x64xbf16>, vector<64x128xbf16>, vector<4x128xf32> -> vector<4x128xf32>
      %25 = arith.addf %2, %24 : vector<4x128xf32>
      %c64 = arith.constant 64 : index
      %c0_19 = arith.constant 0 : index
      %26 = vector.load %arg2[%c64, %c0_19] : memref<576x128xbf16, #tpu.memory_space<vmem>>, vector<64x128xbf16>
      %cst_20 = arith.constant dense<0.000000e+00> : vector<4x128xf32>
      %27 = tpu.matmul %16, %26, %cst_20 {dimension_numbers = #tpu.dot_dimension_numbers<[1], [0], [0], [1], [0, 0, 1, 1], [], []>} : vector<4x64xbf16>, vector<64x128xbf16>, vector<4x128xf32> -> vector<4x128xf32>
      %28 = arith.addf %23, %27 : vector<4x128xf32>
      %cst_21 = arith.constant dense<0.000000e+00> : vector<4x128xf32>
      %29 = tpu.matmul %12, %26, %cst_21 {dimension_numbers = #tpu.dot_dimension_numbers<[1], [0], [0], [1], [0, 0, 1, 1], [], []>} : vector<4x64xbf16>, vector<64x128xbf16>, vector<4x128xf32> -> vector<4x128xf32>
      %30 = arith.addf %25, %29 : vector<4x128xf32>
      %c128 = arith.constant 128 : index
      %c0_22 = arith.constant 0 : index
      %31 = vector.load %arg2[%c128, %c0_22] : memref<576x128xbf16, #tpu.memory_space<vmem>>, vector<64x128xbf16>
      %cst_23 = arith.constant dense<0.000000e+00> : vector<4x128xf32>
      %32 = tpu.matmul %12, %31, %cst_23 {dimension_numbers = #tpu.dot_dimension_numbers<[1], [0], [0], [1], [0, 0, 1, 1], [], []>} : vector<4x64xbf16>, vector<64x128xbf16>, vector<4x128xf32> -> vector<4x128xf32>
      %33 = arith.addf %28, %32 : vector<4x128xf32>
      %cst_24 = arith.constant dense<0.000000e+00> : vector<4x128xf32>
      %34 = tpu.matmul %20, %31, %cst_24 {dimension_numbers = #tpu.dot_dimension_numbers<[1], [0], [0], [1], [0, 0, 1, 1], [], []>} : vector<4x64xbf16>, vector<64x128xbf16>, vector<4x128xf32> -> vector<4x128xf32>
      %35 = arith.addf %30, %34 : vector<4x128xf32>
      %c2_i32_25 = arith.constant 2 : i32
      %36 = arith.muli %c2_i32_25, %arg5 : i32
      %c0_i32_26 = arith.constant 0 : i32
      %37 = arith.addi %36, %c0_i32_26 : i32
      %c1_i32_27 = arith.constant 1 : i32
      %38 = arith.addi %37, %c1_i32_27 : i32
      %c0_28 = arith.constant 0 : index
      %39 = arith.index_cast %38 : i32 to index
      %c0_29 = arith.constant 0 : index
      %c0_30 = arith.constant 0 : index
      %40 = vector.load %arg1[%c0_28, %39, %c0_29, %c0_30] : memref<1x20x5x64xbf16, #tpu.memory_space<vmem>>, vector<1x1x4x64xbf16>
      %41 = vector.shape_cast %40 : vector<1x1x4x64xbf16> to vector<4x64xbf16>
      %c0_31 = arith.constant 0 : index
      %42 = arith.index_cast %38 : i32 to index
      %c1_32 = arith.constant 1 : index
      %c0_33 = arith.constant 0 : index
      %43 = vector.load %arg1[%c0_31, %42, %c1_32, %c0_33] : memref<1x20x5x64xbf16, #tpu.memory_space<vmem>>, vector<1x1x4x64xbf16>
      %44 = vector.shape_cast %43 : vector<1x1x4x64xbf16> to vector<4x64xbf16>
      %c10_i32_34 = arith.constant 10 : i32
      %45 = arith.addi %c10_i32_34, %38 : i32
      %c0_35 = arith.constant 0 : index
      %46 = arith.index_cast %45 : i32 to index
      %c0_36 = arith.constant 0 : index
      %c0_37 = arith.constant 0 : index
      %47 = vector.load %arg1[%c0_35, %46, %c0_36, %c0_37] : memref<1x20x5x64xbf16, #tpu.memory_space<vmem>>, vector<1x1x4x64xbf16>
      %48 = vector.shape_cast %47 : vector<1x1x4x64xbf16> to vector<4x64xbf16>
      %c10_i32_38 = arith.constant 10 : i32
      %49 = arith.addi %c10_i32_38, %38 : i32
      %c0_39 = arith.constant 0 : index
      %50 = arith.index_cast %49 : i32 to index
      %c1_40 = arith.constant 1 : index
      %c0_41 = arith.constant 0 : index
      %51 = vector.load %arg1[%c0_39, %50, %c1_40, %c0_41] : memref<1x20x5x64xbf16, #tpu.memory_space<vmem>>, vector<1x1x4x64xbf16>
      %52 = vector.shape_cast %51 : vector<1x1x4x64xbf16> to vector<4x64xbf16>
      %c192 = arith.constant 192 : index
      %c0_42 = arith.constant 0 : index
      %53 = vector.load %arg2[%c192, %c0_42] : memref<576x128xbf16, #tpu.memory_space<vmem>>, vector<64x128xbf16>
      %cst_43 = arith.constant dense<0.000000e+00> : vector<4x128xf32>
      %54 = tpu.matmul %41, %53, %cst_43 {dimension_numbers = #tpu.dot_dimension_numbers<[1], [0], [0], [1], [0, 0, 1, 1], [], []>} : vector<4x64xbf16>, vector<64x128xbf16>, vector<4x128xf32> -> vector<4x128xf32>
      %55 = arith.addf %33, %54 : vector<4x128xf32>
      %cst_44 = arith.constant dense<0.000000e+00> : vector<4x128xf32>
      %56 = tpu.matmul %48, %53, %cst_44 {dimension_numbers = #tpu.dot_dimension_numbers<[1], [0], [0], [1], [0, 0, 1, 1], [], []>} : vector<4x64xbf16>, vector<64x128xbf16>, vector<4x128xf32> -> vector<4x128xf32>
      %57 = arith.addf %35, %56 : vector<4x128xf32>
      %c256 = arith.constant 256 : index
      %c0_45 = arith.constant 0 : index
      %58 = vector.load %arg2[%c256, %c0_45] : memref<576x128xbf16, #tpu.memory_space<vmem>>, vector<64x128xbf16>
      %cst_46 = arith.constant dense<0.000000e+00> : vector<4x128xf32>
      %59 = tpu.matmul %48, %58, %cst_46 {dimension_numbers = #tpu.dot_dimension_numbers<[1], [0], [0], [1], [0, 0, 1, 1], [], []>} : vector<4x64xbf16>, vector<64x128xbf16>, vector<4x128xf32> -> vector<4x128xf32>
      %60 = arith.addf %55, %59 : vector<4x128xf32>
      %cst_47 = arith.constant dense<0.000000e+00> : vector<4x128xf32>
      %61 = tpu.matmul %44, %58, %cst_47 {dimension_numbers = #tpu.dot_dimension_numbers<[1], [0], [0], [1], [0, 0, 1, 1], [], []>} : vector<4x64xbf16>, vector<64x128xbf16>, vector<4x128xf32> -> vector<4x128xf32>
      %62 = arith.addf %57, %61 : vector<4x128xf32>
      %c320 = arith.constant 320 : index
      %c0_48 = arith.constant 0 : index
      %63 = vector.load %arg2[%c320, %c0_48] : memref<576x128xbf16, #tpu.memory_space<vmem>>, vector<64x128xbf16>
      %cst_49 = arith.constant dense<0.000000e+00> : vector<4x128xf32>
      %64 = tpu.matmul %44, %63, %cst_49 {dimension_numbers = #tpu.dot_dimension_numbers<[1], [0], [0], [1], [0, 0, 1, 1], [], []>} : vector<4x64xbf16>, vector<64x128xbf16>, vector<4x128xf32> -> vector<4x128xf32>
      %65 = arith.addf %60, %64 : vector<4x128xf32>
      %cst_50 = arith.constant dense<0.000000e+00> : vector<4x128xf32>
      %66 = tpu.matmul %52, %63, %cst_50 {dimension_numbers = #tpu.dot_dimension_numbers<[1], [0], [0], [1], [0, 0, 1, 1], [], []>} : vector<4x64xbf16>, vector<64x128xbf16>, vector<4x128xf32> -> vector<4x128xf32>
      %67 = arith.addf %62, %66 : vector<4x128xf32>
      %c2_i32_51 = arith.constant 2 : i32
      %68 = arith.muli %c2_i32_51, %arg5 : i32
      %c0_i32_52 = arith.constant 0 : i32
      %69 = arith.addi %68, %c0_i32_52 : i32
      %c2_i32_53 = arith.constant 2 : i32
      %70 = arith.addi %69, %c2_i32_53 : i32
      %c0_54 = arith.constant 0 : index
      %71 = arith.index_cast %70 : i32 to index
      %c0_55 = arith.constant 0 : index
      %c0_56 = arith.constant 0 : index
      %72 = vector.load %arg1[%c0_54, %71, %c0_55, %c0_56] : memref<1x20x5x64xbf16, #tpu.memory_space<vmem>>, vector<1x1x4x64xbf16>
      %73 = vector.shape_cast %72 : vector<1x1x4x64xbf16> to vector<4x64xbf16>
      %c0_57 = arith.constant 0 : index
      %74 = arith.index_cast %70 : i32 to index
      %c1_58 = arith.constant 1 : index
      %c0_59 = arith.constant 0 : index
      %75 = vector.load %arg1[%c0_57, %74, %c1_58, %c0_59] : memref<1x20x5x64xbf16, #tpu.memory_space<vmem>>, vector<1x1x4x64xbf16>
      %76 = vector.shape_cast %75 : vector<1x1x4x64xbf16> to vector<4x64xbf16>
      %c10_i32_60 = arith.constant 10 : i32
      %77 = arith.addi %c10_i32_60, %70 : i32
      %c0_61 = arith.constant 0 : index
      %78 = arith.index_cast %77 : i32 to index
      %c0_62 = arith.constant 0 : index
      %c0_63 = arith.constant 0 : index
      %79 = vector.load %arg1[%c0_61, %78, %c0_62, %c0_63] : memref<1x20x5x64xbf16, #tpu.memory_space<vmem>>, vector<1x1x4x64xbf16>
      %80 = vector.shape_cast %79 : vector<1x1x4x64xbf16> to vector<4x64xbf16>
      %c10_i32_64 = arith.constant 10 : i32
      %81 = arith.addi %c10_i32_64, %70 : i32
      %c0_65 = arith.constant 0 : index
      %82 = arith.index_cast %81 : i32 to index
      %c1_66 = arith.constant 1 : index
      %c0_67 = arith.constant 0 : index
      %83 = vector.load %arg1[%c0_65, %82, %c1_66, %c0_67] : memref<1x20x5x64xbf16, #tpu.memory_space<vmem>>, vector<1x1x4x64xbf16>
      %84 = vector.shape_cast %83 : vector<1x1x4x64xbf16> to vector<4x64xbf16>
      %c384 = arith.constant 384 : index
      %c0_68 = arith.constant 0 : index
      %85 = vector.load %arg2[%c384, %c0_68] : memref<576x128xbf16, #tpu.memory_space<vmem>>, vector<64x128xbf16>
      %cst_69 = arith.constant dense<0.000000e+00> : vector<4x128xf32>
      %86 = tpu.matmul %73, %85, %cst_69 {dimension_numbers = #tpu.dot_dimension_numbers<[1], [0], [0], [1], [0, 0, 1, 1], [], []>} : vector<4x64xbf16>, vector<64x128xbf16>, vector<4x128xf32> -> vector<4x128xf32>
      %87 = arith.addf %65, %86 : vector<4x128xf32>
      %cst_70 = arith.constant dense<0.000000e+00> : vector<4x128xf32>
      %88 = tpu.matmul %80, %85, %cst_70 {dimension_numbers = #tpu.dot_dimension_numbers<[1], [0], [0], [1], [0, 0, 1, 1], [], []>} : vector<4x64xbf16>, vector<64x128xbf16>, vector<4x128xf32> -> vector<4x128xf32>
      %89 = arith.addf %67, %88 : vector<4x128xf32>
      %c448 = arith.constant 448 : index
      %c0_71 = arith.constant 0 : index
      %90 = vector.load %arg2[%c448, %c0_71] : memref<576x128xbf16, #tpu.memory_space<vmem>>, vector<64x128xbf16>
      %cst_72 = arith.constant dense<0.000000e+00> : vector<4x128xf32>
      %91 = tpu.matmul %80, %90, %cst_72 {dimension_numbers = #tpu.dot_dimension_numbers<[1], [0], [0], [1], [0, 0, 1, 1], [], []>} : vector<4x64xbf16>, vector<64x128xbf16>, vector<4x128xf32> -> vector<4x128xf32>
      %92 = arith.addf %87, %91 : vector<4x128xf32>
      %cst_73 = arith.constant dense<0.000000e+00> : vector<4x128xf32>
      %93 = tpu.matmul %76, %90, %cst_73 {dimension_numbers = #tpu.dot_dimension_numbers<[1], [0], [0], [1], [0, 0, 1, 1], [], []>} : vector<4x64xbf16>, vector<64x128xbf16>, vector<4x128xf32> -> vector<4x128xf32>
      %94 = arith.addf %89, %93 : vector<4x128xf32>
      %c512 = arith.constant 512 : index
      %c0_74 = arith.constant 0 : index
      %95 = vector.load %arg2[%c512, %c0_74] : memref<576x128xbf16, #tpu.memory_space<vmem>>, vector<64x128xbf16>
      %cst_75 = arith.constant dense<0.000000e+00> : vector<4x128xf32>
      %96 = tpu.matmul %76, %95, %cst_75 {dimension_numbers = #tpu.dot_dimension_numbers<[1], [0], [0], [1], [0, 0, 1, 1], [], []>} : vector<4x64xbf16>, vector<64x128xbf16>, vector<4x128xf32> -> vector<4x128xf32>
      %97 = arith.addf %92, %96 : vector<4x128xf32>
      %cst_76 = arith.constant dense<0.000000e+00> : vector<4x128xf32>
      %98 = tpu.matmul %84, %95, %cst_76 {dimension_numbers = #tpu.dot_dimension_numbers<[1], [0], [0], [1], [0, 0, 1, 1], [], []>} : vector<4x64xbf16>, vector<64x128xbf16>, vector<4x128xf32> -> vector<4x128xf32>
      %99 = arith.addf %94, %98 : vector<4x128xf32>
      %100 = arith.maximumf %97, %99 : vector<4x128xf32>
      %c2_i32_77 = arith.constant 2 : i32
      %101 = arith.muli %c2_i32_77, %arg5 : i32
      %c1_i32_78 = arith.constant 1 : i32
      %102 = arith.addi %101, %c1_i32_78 : i32
      %c0_i32_79 = arith.constant 0 : i32
      %103 = arith.addi %102, %c0_i32_79 : i32
      %c0_80 = arith.constant 0 : index
      %104 = arith.index_cast %103 : i32 to index
      %c0_81 = arith.constant 0 : index
      %c0_82 = arith.constant 0 : index
      %105 = vector.load %arg1[%c0_80, %104, %c0_81, %c0_82] : memref<1x20x5x64xbf16, #tpu.memory_space<vmem>>, vector<1x1x4x64xbf16>
      %106 = vector.shape_cast %105 : vector<1x1x4x64xbf16> to vector<4x64xbf16>
      %c0_83 = arith.constant 0 : index
      %107 = arith.index_cast %103 : i32 to index
      %c1_84 = arith.constant 1 : index
      %c0_85 = arith.constant 0 : index
      %108 = vector.load %arg1[%c0_83, %107, %c1_84, %c0_85] : memref<1x20x5x64xbf16, #tpu.memory_space<vmem>>, vector<1x1x4x64xbf16>
      %109 = vector.shape_cast %108 : vector<1x1x4x64xbf16> to vector<4x64xbf16>
      %c10_i32_86 = arith.constant 10 : i32
      %110 = arith.addi %c10_i32_86, %103 : i32
      %c0_87 = arith.constant 0 : index
      %111 = arith.index_cast %110 : i32 to index
      %c0_88 = arith.constant 0 : index
      %c0_89 = arith.constant 0 : index
      %112 = vector.load %arg1[%c0_87, %111, %c0_88, %c0_89] : memref<1x20x5x64xbf16, #tpu.memory_space<vmem>>, vector<1x1x4x64xbf16>
      %113 = vector.shape_cast %112 : vector<1x1x4x64xbf16> to vector<4x64xbf16>
      %c10_i32_90 = arith.constant 10 : i32
      %114 = arith.addi %c10_i32_90, %103 : i32
      %c0_91 = arith.constant 0 : index
      %115 = arith.index_cast %114 : i32 to index
      %c1_92 = arith.constant 1 : index
      %c0_93 = arith.constant 0 : index
      %116 = vector.load %arg1[%c0_91, %115, %c1_92, %c0_93] : memref<1x20x5x64xbf16, #tpu.memory_space<vmem>>, vector<1x1x4x64xbf16>
      %117 = vector.shape_cast %116 : vector<1x1x4x64xbf16> to vector<4x64xbf16>
      %c0_94 = arith.constant 0 : index
      %c0_95 = arith.constant 0 : index
      %118 = vector.load %arg2[%c0_94, %c0_95] : memref<576x128xbf16, #tpu.memory_space<vmem>>, vector<64x128xbf16>
      %cst_96 = arith.constant dense<0.000000e+00> : vector<4x128xf32>
      %119 = tpu.matmul %106, %118, %cst_96 {dimension_numbers = #tpu.dot_dimension_numbers<[1], [0], [0], [1], [0, 0, 1, 1], [], []>} : vector<4x64xbf16>, vector<64x128xbf16>, vector<4x128xf32> -> vector<4x128xf32>
      %120 = arith.addf %2, %119 : vector<4x128xf32>
      %cst_97 = arith.constant dense<0.000000e+00> : vector<4x128xf32>
      %121 = tpu.matmul %113, %118, %cst_97 {dimension_numbers = #tpu.dot_dimension_numbers<[1], [0], [0], [1], [0, 0, 1, 1], [], []>} : vector<4x64xbf16>, vector<64x128xbf16>, vector<4x128xf32> -> vector<4x128xf32>
      %122 = arith.addf %2, %121 : vector<4x128xf32>
      %c64_98 = arith.constant 64 : index
      %c0_99 = arith.constant 0 : index
      %123 = vector.load %arg2[%c64_98, %c0_99] : memref<576x128xbf16, #tpu.memory_space<vmem>>, vector<64x128xbf16>
      %cst_100 = arith.constant dense<0.000000e+00> : vector<4x128xf32>
      %124 = tpu.matmul %113, %123, %cst_100 {dimension_numbers = #tpu.dot_dimension_numbers<[1], [0], [0], [1], [0, 0, 1, 1], [], []>} : vector<4x64xbf16>, vector<64x128xbf16>, vector<4x128xf32> -> vector<4x128xf32>
      %125 = arith.addf %120, %124 : vector<4x128xf32>
      %cst_101 = arith.constant dense<0.000000e+00> : vector<4x128xf32>
      %126 = tpu.matmul %109, %123, %cst_101 {dimension_numbers = #tpu.dot_dimension_numbers<[1], [0], [0], [1], [0, 0, 1, 1], [], []>} : vector<4x64xbf16>, vector<64x128xbf16>, vector<4x128xf32> -> vector<4x128xf32>
      %127 = arith.addf %122, %126 : vector<4x128xf32>
      %c128_102 = arith.constant 128 : index
      %c0_103 = arith.constant 0 : index
      %128 = vector.load %arg2[%c128_102, %c0_103] : memref<576x128xbf16, #tpu.memory_space<vmem>>, vector<64x128xbf16>
      %cst_104 = arith.constant dense<0.000000e+00> : vector<4x128xf32>
      %129 = tpu.matmul %109, %128, %cst_104 {dimension_numbers = #tpu.dot_dimension_numbers<[1], [0], [0], [1], [0, 0, 1, 1], [], []>} : vector<4x64xbf16>, vector<64x128xbf16>, vector<4x128xf32> -> vector<4x128xf32>
      %130 = arith.addf %125, %129 : vector<4x128xf32>
      %cst_105 = arith.constant dense<0.000000e+00> : vector<4x128xf32>
      %131 = tpu.matmul %117, %128, %cst_105 {dimension_numbers = #tpu.dot_dimension_numbers<[1], [0], [0], [1], [0, 0, 1, 1], [], []>} : vector<4x64xbf16>, vector<64x128xbf16>, vector<4x128xf32> -> vector<4x128xf32>
      %132 = arith.addf %127, %131 : vector<4x128xf32>
      %c2_i32_106 = arith.constant 2 : i32
      %133 = arith.muli %c2_i32_106, %arg5 : i32
      %c1_i32_107 = arith.constant 1 : i32
      %134 = arith.addi %133, %c1_i32_107 : i32
      %c1_i32_108 = arith.constant 1 : i32
      %135 = arith.addi %134, %c1_i32_108 : i32
      %c0_109 = arith.constant 0 : index
      %136 = arith.index_cast %135 : i32 to index
      %c0_110 = arith.constant 0 : index
      %c0_111 = arith.constant 0 : index
      %137 = vector.load %arg1[%c0_109, %136, %c0_110, %c0_111] : memref<1x20x5x64xbf16, #tpu.memory_space<vmem>>, vector<1x1x4x64xbf16>
      %138 = vector.shape_cast %137 : vector<1x1x4x64xbf16> to vector<4x64xbf16>
      %c0_112 = arith.constant 0 : index
      %139 = arith.index_cast %135 : i32 to index
      %c1_113 = arith.constant 1 : index
      %c0_114 = arith.constant 0 : index
      %140 = vector.load %arg1[%c0_112, %139, %c1_113, %c0_114] : memref<1x20x5x64xbf16, #tpu.memory_space<vmem>>, vector<1x1x4x64xbf16>
      %141 = vector.shape_cast %140 : vector<1x1x4x64xbf16> to vector<4x64xbf16>
      %c10_i32_115 = arith.constant 10 : i32
      %142 = arith.addi %c10_i32_115, %135 : i32
      %c0_116 = arith.constant 0 : index
      %143 = arith.index_cast %142 : i32 to index
      %c0_117 = arith.constant 0 : index
      %c0_118 = arith.constant 0 : index
      %144 = vector.load %arg1[%c0_116, %143, %c0_117, %c0_118] : memref<1x20x5x64xbf16, #tpu.memory_space<vmem>>, vector<1x1x4x64xbf16>
      %145 = vector.shape_cast %144 : vector<1x1x4x64xbf16> to vector<4x64xbf16>
      %c10_i32_119 = arith.constant 10 : i32
      %146 = arith.addi %c10_i32_119, %135 : i32
      %c0_120 = arith.constant 0 : index
      %147 = arith.index_cast %146 : i32 to index
      %c1_121 = arith.constant 1 : index
      %c0_122 = arith.constant 0 : index
      %148 = vector.load %arg1[%c0_120, %147, %c1_121, %c0_122] : memref<1x20x5x64xbf16, #tpu.memory_space<vmem>>, vector<1x1x4x64xbf16>
      %149 = vector.shape_cast %148 : vector<1x1x4x64xbf16> to vector<4x64xbf16>
      %c192_123 = arith.constant 192 : index
      %c0_124 = arith.constant 0 : index
      %150 = vector.load %arg2[%c192_123, %c0_124] : memref<576x128xbf16, #tpu.memory_space<vmem>>, vector<64x128xbf16>
      %cst_125 = arith.constant dense<0.000000e+00> : vector<4x128xf32>
      %151 = tpu.matmul %138, %150, %cst_125 {dimension_numbers = #tpu.dot_dimension_numbers<[1], [0], [0], [1], [0, 0, 1, 1], [], []>} : vector<4x64xbf16>, vector<64x128xbf16>, vector<4x128xf32> -> vector<4x128xf32>
      %152 = arith.addf %130, %151 : vector<4x128xf32>
      %cst_126 = arith.constant dense<0.000000e+00> : vector<4x128xf32>
      %153 = tpu.matmul %145, %150, %cst_126 {dimension_numbers = #tpu.dot_dimension_numbers<[1], [0], [0], [1], [0, 0, 1, 1], [], []>} : vector<4x64xbf16>, vector<64x128xbf16>, vector<4x128xf32> -> vector<4x128xf32>
      %154 = arith.addf %132, %153 : vector<4x128xf32>
      %c256_127 = arith.constant 256 : index
      %c0_128 = arith.constant 0 : index
      %155 = vector.load %arg2[%c256_127, %c0_128] : memref<576x128xbf16, #tpu.memory_space<vmem>>, vector<64x128xbf16>
      %cst_129 = arith.constant dense<0.000000e+00> : vector<4x128xf32>
      %156 = tpu.matmul %145, %155, %cst_129 {dimension_numbers = #tpu.dot_dimension_numbers<[1], [0], [0], [1], [0, 0, 1, 1], [], []>} : vector<4x64xbf16>, vector<64x128xbf16>, vector<4x128xf32> -> vector<4x128xf32>
      %157 = arith.addf %152, %156 : vector<4x128xf32>
      %cst_130 = arith.constant dense<0.000000e+00> : vector<4x128xf32>
      %158 = tpu.matmul %141, %155, %cst_130 {dimension_numbers = #tpu.dot_dimension_numbers<[1], [0], [0], [1], [0, 0, 1, 1], [], []>} : vector<4x64xbf16>, vector<64x128xbf16>, vector<4x128xf32> -> vector<4x128xf32>
      %159 = arith.addf %154, %158 : vector<4x128xf32>
      %c320_131 = arith.constant 320 : index
      %c0_132 = arith.constant 0 : index
      %160 = vector.load %arg2[%c320_131, %c0_132] : memref<576x128xbf16, #tpu.memory_space<vmem>>, vector<64x128xbf16>
      %cst_133 = arith.constant dense<0.000000e+00> : vector<4x128xf32>
      %161 = tpu.matmul %141, %160, %cst_133 {dimension_numbers = #tpu.dot_dimension_numbers<[1], [0], [0], [1], [0, 0, 1, 1], [], []>} : vector<4x64xbf16>, vector<64x128xbf16>, vector<4x128xf32> -> vector<4x128xf32>
      %162 = arith.addf %157, %161 : vector<4x128xf32>
      %cst_134 = arith.constant dense<0.000000e+00> : vector<4x128xf32>
      %163 = tpu.matmul %149, %160, %cst_134 {dimension_numbers = #tpu.dot_dimension_numbers<[1], [0], [0], [1], [0, 0, 1, 1], [], []>} : vector<4x64xbf16>, vector<64x128xbf16>, vector<4x128xf32> -> vector<4x128xf32>
      %164 = arith.addf %159, %163 : vector<4x128xf32>
      %c2_i32_135 = arith.constant 2 : i32
      %165 = arith.muli %c2_i32_135, %arg5 : i32
      %c1_i32_136 = arith.constant 1 : i32
      %166 = arith.addi %165, %c1_i32_136 : i32
      %c2_i32_137 = arith.constant 2 : i32
      %167 = arith.addi %166, %c2_i32_137 : i32
      %c0_138 = arith.constant 0 : index
      %168 = arith.index_cast %167 : i32 to index
      %c0_139 = arith.constant 0 : index
      %c0_140 = arith.constant 0 : index
      %169 = vector.load %arg1[%c0_138, %168, %c0_139, %c0_140] : memref<1x20x5x64xbf16, #tpu.memory_space<vmem>>, vector<1x1x4x64xbf16>
      %170 = vector.shape_cast %169 : vector<1x1x4x64xbf16> to vector<4x64xbf16>
      %c0_141 = arith.constant 0 : index
      %171 = arith.index_cast %167 : i32 to index
      %c1_142 = arith.constant 1 : index
      %c0_143 = arith.constant 0 : index
      %172 = vector.load %arg1[%c0_141, %171, %c1_142, %c0_143] : memref<1x20x5x64xbf16, #tpu.memory_space<vmem>>, vector<1x1x4x64xbf16>
      %173 = vector.shape_cast %172 : vector<1x1x4x64xbf16> to vector<4x64xbf16>
      %c10_i32_144 = arith.constant 10 : i32
      %174 = arith.addi %c10_i32_144, %167 : i32
      %c0_145 = arith.constant 0 : index
      %175 = arith.index_cast %174 : i32 to index
      %c0_146 = arith.constant 0 : index
      %c0_147 = arith.constant 0 : index
      %176 = vector.load %arg1[%c0_145, %175, %c0_146, %c0_147] : memref<1x20x5x64xbf16, #tpu.memory_space<vmem>>, vector<1x1x4x64xbf16>
      %177 = vector.shape_cast %176 : vector<1x1x4x64xbf16> to vector<4x64xbf16>
      %c10_i32_148 = arith.constant 10 : i32
      %178 = arith.addi %c10_i32_148, %167 : i32
      %c0_149 = arith.constant 0 : index
      %179 = arith.index_cast %178 : i32 to index
      %c1_150 = arith.constant 1 : index
      %c0_151 = arith.constant 0 : index
      %180 = vector.load %arg1[%c0_149, %179, %c1_150, %c0_151] : memref<1x20x5x64xbf16, #tpu.memory_space<vmem>>, vector<1x1x4x64xbf16>
      %181 = vector.shape_cast %180 : vector<1x1x4x64xbf16> to vector<4x64xbf16>
      %c384_152 = arith.constant 384 : index
      %c0_153 = arith.constant 0 : index
      %182 = vector.load %arg2[%c384_152, %c0_153] : memref<576x128xbf16, #tpu.memory_space<vmem>>, vector<64x128xbf16>
      %cst_154 = arith.constant dense<0.000000e+00> : vector<4x128xf32>
      %183 = tpu.matmul %170, %182, %cst_154 {dimension_numbers = #tpu.dot_dimension_numbers<[1], [0], [0], [1], [0, 0, 1, 1], [], []>} : vector<4x64xbf16>, vector<64x128xbf16>, vector<4x128xf32> -> vector<4x128xf32>
      %184 = arith.addf %162, %183 : vector<4x128xf32>
      %cst_155 = arith.constant dense<0.000000e+00> : vector<4x128xf32>
      %185 = tpu.matmul %177, %182, %cst_155 {dimension_numbers = #tpu.dot_dimension_numbers<[1], [0], [0], [1], [0, 0, 1, 1], [], []>} : vector<4x64xbf16>, vector<64x128xbf16>, vector<4x128xf32> -> vector<4x128xf32>
      %186 = arith.addf %164, %185 : vector<4x128xf32>
      %c448_156 = arith.constant 448 : index
      %c0_157 = arith.constant 0 : index
      %187 = vector.load %arg2[%c448_156, %c0_157] : memref<576x128xbf16, #tpu.memory_space<vmem>>, vector<64x128xbf16>
      %cst_158 = arith.constant dense<0.000000e+00> : vector<4x128xf32>
      %188 = tpu.matmul %177, %187, %cst_158 {dimension_numbers = #tpu.dot_dimension_numbers<[1], [0], [0], [1], [0, 0, 1, 1], [], []>} : vector<4x64xbf16>, vector<64x128xbf16>, vector<4x128xf32> -> vector<4x128xf32>
      %189 = arith.addf %184, %188 : vector<4x128xf32>
      %cst_159 = arith.constant dense<0.000000e+00> : vector<4x128xf32>
      %190 = tpu.matmul %173, %187, %cst_159 {dimension_numbers = #tpu.dot_dimension_numbers<[1], [0], [0], [1], [0, 0, 1, 1], [], []>} : vector<4x64xbf16>, vector<64x128xbf16>, vector<4x128xf32> -> vector<4x128xf32>
      %191 = arith.addf %186, %190 : vector<4x128xf32>
      %c512_160 = arith.constant 512 : index
      %c0_161 = arith.constant 0 : index
      %192 = vector.load %arg2[%c512_160, %c0_161] : memref<576x128xbf16, #tpu.memory_space<vmem>>, vector<64x128xbf16>
      %cst_162 = arith.constant dense<0.000000e+00> : vector<4x128xf32>
      %193 = tpu.matmul %173, %192, %cst_162 {dimension_numbers = #tpu.dot_dimension_numbers<[1], [0], [0], [1], [0, 0, 1, 1], [], []>} : vector<4x64xbf16>, vector<64x128xbf16>, vector<4x128xf32> -> vector<4x128xf32>
      %194 = arith.addf %189, %193 : vector<4x128xf32>
      %cst_163 = arith.constant dense<0.000000e+00> : vector<4x128xf32>
      %195 = tpu.matmul %181, %192, %cst_163 {dimension_numbers = #tpu.dot_dimension_numbers<[1], [0], [0], [1], [0, 0, 1, 1], [], []>} : vector<4x64xbf16>, vector<64x128xbf16>, vector<4x128xf32> -> vector<4x128xf32>
      %196 = arith.addf %191, %195 : vector<4x128xf32>
      %197 = arith.maximumf %194, %196 : vector<4x128xf32>
      %198 = arith.maximumf %100, %197 : vector<4x128xf32>
      %cst_164 = arith.constant 0.000000e+00 : f32
      %199 = vector.broadcast %cst_164 : f32 to vector<4x128xf32>
      %200 = arith.maximumf %198, %199 : vector<4x128xf32>
      %201 = arith.truncf %200 : vector<4x128xf32> to vector<4x128xbf16>
      %c0_165 = arith.constant 0 : index
      %202 = arith.index_cast %arg5 : i32 to index
      %c0_166 = arith.constant 0 : index
      %c0_167 = arith.constant 0 : index
      %203 = vector.load %arg4[%c0_165, %202, %c0_166, %c0_167] : memref<1x4x4x128xbf16, #tpu.memory_space<vmem>>, vector<1x1x4x128xbf16>
      %204 = vector.shape_cast %203 : vector<1x1x4x128xbf16> to vector<4x128xbf16>
      %205 = vector.shape_cast %201 : vector<4x128xbf16> to vector<1x1x4x128xbf16>
      tpu.vector_store %arg4[%c0_165, %202, %c0_166, %c0_167], %205 {strides = array<i32>} : memref<1x4x4x128xbf16, #tpu.memory_space<vmem>>, vector<1x1x4x128xbf16>,
    }
    %c4_i32_1 = arith.constant 4 : i32
    return
  }
  func.func @transform_0(%arg0: i32) -> (i32, i32, i32, i32) {
    %c0_i32 = arith.constant 0 : i32
    %c0_i32_0 = arith.constant 0 : i32
    %c0_i32_1 = arith.constant 0 : i32
    %c0_i32_2 = arith.constant 0 : i32
    return %arg0, %c0_i32, %c0_i32_0, %c0_i32_1 : i32, i32, i32, i32
  }
  func.func @transform_1(%arg0: i32) -> (i32, i32) {
    %c0_i32 = arith.constant 0 : i32
    %c0_i32_0 = arith.constant 0 : i32
    %c0_i32_1 = arith.constant 0 : i32
    return %c0_i32, %c0_i32_0 : i32, i32
  }
  func.func @transform_2(%arg0: i32) -> (i32, i32) {
    %c0_i32 = arith.constant 0 : i32
    %c0_i32_0 = arith.constant 0 : i32
    %c0_i32_1 = arith.constant 0 : i32
    return %c0_i32, %c0_i32_0 : i32, i32
  }
  func.func @transform_3(%arg0: i32) -> (i32, i32, i32, i32) {
    %c0_i32 = arith.constant 0 : i32
    %c0_i32_0 = arith.constant 0 : i32
    %c0_i32_1 = arith.constant 0 : i32
    %c0_i32_2 = arith.constant 0 : i32
    return %arg0, %c0_i32, %c0_i32_0, %c0_i32_1 : i32, i32, i32, i32
  }
}

module attributes {stable_mosaic.version = 11 : i64} {
  func.func @_conv_bn_relu_pool_kernel(%arg0: i32, %arg1: memref<1x12x3x128xbf16, #tpu.memory_space<vmem>>, %arg2: memref<1152x256xbf16, #tpu.memory_space<vmem>>, %arg3: memref<1x256xf32, #tpu.memory_space<vmem>>, %arg4: memref<1x2x2x256xbf16, #tpu.memory_space<vmem>>) attributes {dimension_semantics = [#tpu.dimension_semantics<parallel>], iteration_bounds = array<i64: 2>, scalar_prefetch = 0 : i64, scratch_operands = 0 : i64, tpu.core_type = #tpu.core_type<tc>, window_params = [{transform_indices = @transform_0, window_bounds = array<i64: 1, 12, 3, 128>}, {pipeline_mode = #tpu.pipeline_mode<synchronous>, transform_indices = @transform_1, window_bounds = array<i64: 1152, 256>}, {pipeline_mode = #tpu.pipeline_mode<synchronous>, transform_indices = @transform_2, window_bounds = array<i64: 1, 256>}, {transform_indices = @transform_3, window_bounds = array<i64: 1, 2, 2, 256>}]} {
    %c0 = arith.constant 0 : index
    %c0_0 = arith.constant 0 : index
    %0 = vector.load %arg3[%c0, %c0_0] : memref<1x256xf32, #tpu.memory_space<vmem>>, vector<1x256xf32>
    %1 = vector.shape_cast %0 : vector<1x256xf32> to vector<1x256xf32>
    %2 = vector.broadcast %1 : vector<1x256xf32> to vector<2x256xf32>
    %c0_i32 = arith.constant 0 : i32
    %c2_i32 = arith.constant 2 : i32
    %3 = arith.addi %c0_i32, %c2_i32 : i32
    %c1_i32 = arith.constant 1 : i32
    scf.for %arg5 = %c0_i32 to %3 step %c1_i32  : i32 {
      %c2_i32_2 = arith.constant 2 : i32
      %4 = arith.muli %c2_i32_2, %arg5 : i32
      %c0_i32_3 = arith.constant 0 : i32
      %5 = arith.addi %4, %c0_i32_3 : i32
      %c0_i32_4 = arith.constant 0 : i32
      %6 = arith.addi %5, %c0_i32_4 : i32
      %c0_5 = arith.constant 0 : index
      %7 = arith.index_cast %6 : i32 to index
      %c0_6 = arith.constant 0 : index
      %c0_7 = arith.constant 0 : index
      %8 = vector.load %arg1[%c0_5, %7, %c0_6, %c0_7] : memref<1x12x3x128xbf16, #tpu.memory_space<vmem>>, vector<1x1x2x128xbf16>
      %9 = vector.shape_cast %8 : vector<1x1x2x128xbf16> to vector<2x128xbf16>
      %c0_8 = arith.constant 0 : index
      %10 = arith.index_cast %6 : i32 to index
      %c1 = arith.constant 1 : index
      %c0_9 = arith.constant 0 : index
      %11 = vector.load %arg1[%c0_8, %10, %c1, %c0_9] : memref<1x12x3x128xbf16, #tpu.memory_space<vmem>>, vector<1x1x2x128xbf16>
      %12 = vector.shape_cast %11 : vector<1x1x2x128xbf16> to vector<2x128xbf16>
      %c6_i32 = arith.constant 6 : i32
      %13 = arith.addi %c6_i32, %6 : i32
      %c0_10 = arith.constant 0 : index
      %14 = arith.index_cast %13 : i32 to index
      %c0_11 = arith.constant 0 : index
      %c0_12 = arith.constant 0 : index
      %15 = vector.load %arg1[%c0_10, %14, %c0_11, %c0_12] : memref<1x12x3x128xbf16, #tpu.memory_space<vmem>>, vector<1x1x2x128xbf16>
      %16 = vector.shape_cast %15 : vector<1x1x2x128xbf16> to vector<2x128xbf16>
      %c6_i32_13 = arith.constant 6 : i32
      %17 = arith.addi %c6_i32_13, %6 : i32
      %c0_14 = arith.constant 0 : index
      %18 = arith.index_cast %17 : i32 to index
      %c1_15 = arith.constant 1 : index
      %c0_16 = arith.constant 0 : index
      %19 = vector.load %arg1[%c0_14, %18, %c1_15, %c0_16] : memref<1x12x3x128xbf16, #tpu.memory_space<vmem>>, vector<1x1x2x128xbf16>
      %20 = vector.shape_cast %19 : vector<1x1x2x128xbf16> to vector<2x128xbf16>
      %c0_17 = arith.constant 0 : index
      %c0_18 = arith.constant 0 : index
      %21 = vector.load %arg2[%c0_17, %c0_18] : memref<1152x256xbf16, #tpu.memory_space<vmem>>, vector<128x256xbf16>
      %cst = arith.constant dense<0.000000e+00> : vector<2x256xf32>
      %22 = tpu.matmul %9, %21, %cst {dimension_numbers = #tpu.dot_dimension_numbers<[1], [0], [0], [1], [0, 0, 1, 1], [], []>} : vector<2x128xbf16>, vector<128x256xbf16>, vector<2x256xf32> -> vector<2x256xf32>
      %23 = arith.addf %2, %22 : vector<2x256xf32>
      %cst_19 = arith.constant dense<0.000000e+00> : vector<2x256xf32>
      %24 = tpu.matmul %16, %21, %cst_19 {dimension_numbers = #tpu.dot_dimension_numbers<[1], [0], [0], [1], [0, 0, 1, 1], [], []>} : vector<2x128xbf16>, vector<128x256xbf16>, vector<2x256xf32> -> vector<2x256xf32>
      %25 = arith.addf %2, %24 : vector<2x256xf32>
      %c128 = arith.constant 128 : index
      %c0_20 = arith.constant 0 : index
      %26 = vector.load %arg2[%c128, %c0_20] : memref<1152x256xbf16, #tpu.memory_space<vmem>>, vector<128x256xbf16>
      %cst_21 = arith.constant dense<0.000000e+00> : vector<2x256xf32>
      %27 = tpu.matmul %16, %26, %cst_21 {dimension_numbers = #tpu.dot_dimension_numbers<[1], [0], [0], [1], [0, 0, 1, 1], [], []>} : vector<2x128xbf16>, vector<128x256xbf16>, vector<2x256xf32> -> vector<2x256xf32>
      %28 = arith.addf %23, %27 : vector<2x256xf32>
      %cst_22 = arith.constant dense<0.000000e+00> : vector<2x256xf32>
      %29 = tpu.matmul %12, %26, %cst_22 {dimension_numbers = #tpu.dot_dimension_numbers<[1], [0], [0], [1], [0, 0, 1, 1], [], []>} : vector<2x128xbf16>, vector<128x256xbf16>, vector<2x256xf32> -> vector<2x256xf32>
      %30 = arith.addf %25, %29 : vector<2x256xf32>
      %c256 = arith.constant 256 : index
      %c0_23 = arith.constant 0 : index
      %31 = vector.load %arg2[%c256, %c0_23] : memref<1152x256xbf16, #tpu.memory_space<vmem>>, vector<128x256xbf16>
      %cst_24 = arith.constant dense<0.000000e+00> : vector<2x256xf32>
      %32 = tpu.matmul %12, %31, %cst_24 {dimension_numbers = #tpu.dot_dimension_numbers<[1], [0], [0], [1], [0, 0, 1, 1], [], []>} : vector<2x128xbf16>, vector<128x256xbf16>, vector<2x256xf32> -> vector<2x256xf32>
      %33 = arith.addf %28, %32 : vector<2x256xf32>
      %cst_25 = arith.constant dense<0.000000e+00> : vector<2x256xf32>
      %34 = tpu.matmul %20, %31, %cst_25 {dimension_numbers = #tpu.dot_dimension_numbers<[1], [0], [0], [1], [0, 0, 1, 1], [], []>} : vector<2x128xbf16>, vector<128x256xbf16>, vector<2x256xf32> -> vector<2x256xf32>
      %35 = arith.addf %30, %34 : vector<2x256xf32>
      %c2_i32_26 = arith.constant 2 : i32
      %36 = arith.muli %c2_i32_26, %arg5 : i32
      %c0_i32_27 = arith.constant 0 : i32
      %37 = arith.addi %36, %c0_i32_27 : i32
      %c1_i32_28 = arith.constant 1 : i32
      %38 = arith.addi %37, %c1_i32_28 : i32
      %c0_29 = arith.constant 0 : index
      %39 = arith.index_cast %38 : i32 to index
      %c0_30 = arith.constant 0 : index
      %c0_31 = arith.constant 0 : index
      %40 = vector.load %arg1[%c0_29, %39, %c0_30, %c0_31] : memref<1x12x3x128xbf16, #tpu.memory_space<vmem>>, vector<1x1x2x128xbf16>
      %41 = vector.shape_cast %40 : vector<1x1x2x128xbf16> to vector<2x128xbf16>
      %c0_32 = arith.constant 0 : index
      %42 = arith.index_cast %38 : i32 to index
      %c1_33 = arith.constant 1 : index
      %c0_34 = arith.constant 0 : index
      %43 = vector.load %arg1[%c0_32, %42, %c1_33, %c0_34] : memref<1x12x3x128xbf16, #tpu.memory_space<vmem>>, vector<1x1x2x128xbf16>
      %44 = vector.shape_cast %43 : vector<1x1x2x128xbf16> to vector<2x128xbf16>
      %c6_i32_35 = arith.constant 6 : i32
      %45 = arith.addi %c6_i32_35, %38 : i32
      %c0_36 = arith.constant 0 : index
      %46 = arith.index_cast %45 : i32 to index
      %c0_37 = arith.constant 0 : index
      %c0_38 = arith.constant 0 : index
      %47 = vector.load %arg1[%c0_36, %46, %c0_37, %c0_38] : memref<1x12x3x128xbf16, #tpu.memory_space<vmem>>, vector<1x1x2x128xbf16>
      %48 = vector.shape_cast %47 : vector<1x1x2x128xbf16> to vector<2x128xbf16>
      %c6_i32_39 = arith.constant 6 : i32
      %49 = arith.addi %c6_i32_39, %38 : i32
      %c0_40 = arith.constant 0 : index
      %50 = arith.index_cast %49 : i32 to index
      %c1_41 = arith.constant 1 : index
      %c0_42 = arith.constant 0 : index
      %51 = vector.load %arg1[%c0_40, %50, %c1_41, %c0_42] : memref<1x12x3x128xbf16, #tpu.memory_space<vmem>>, vector<1x1x2x128xbf16>
      %52 = vector.shape_cast %51 : vector<1x1x2x128xbf16> to vector<2x128xbf16>
      %c384 = arith.constant 384 : index
      %c0_43 = arith.constant 0 : index
      %53 = vector.load %arg2[%c384, %c0_43] : memref<1152x256xbf16, #tpu.memory_space<vmem>>, vector<128x256xbf16>
      %cst_44 = arith.constant dense<0.000000e+00> : vector<2x256xf32>
      %54 = tpu.matmul %41, %53, %cst_44 {dimension_numbers = #tpu.dot_dimension_numbers<[1], [0], [0], [1], [0, 0, 1, 1], [], []>} : vector<2x128xbf16>, vector<128x256xbf16>, vector<2x256xf32> -> vector<2x256xf32>
      %55 = arith.addf %33, %54 : vector<2x256xf32>
      %cst_45 = arith.constant dense<0.000000e+00> : vector<2x256xf32>
      %56 = tpu.matmul %48, %53, %cst_45 {dimension_numbers = #tpu.dot_dimension_numbers<[1], [0], [0], [1], [0, 0, 1, 1], [], []>} : vector<2x128xbf16>, vector<128x256xbf16>, vector<2x256xf32> -> vector<2x256xf32>
      %57 = arith.addf %35, %56 : vector<2x256xf32>
      %c512 = arith.constant 512 : index
      %c0_46 = arith.constant 0 : index
      %58 = vector.load %arg2[%c512, %c0_46] : memref<1152x256xbf16, #tpu.memory_space<vmem>>, vector<128x256xbf16>
      %cst_47 = arith.constant dense<0.000000e+00> : vector<2x256xf32>
      %59 = tpu.matmul %48, %58, %cst_47 {dimension_numbers = #tpu.dot_dimension_numbers<[1], [0], [0], [1], [0, 0, 1, 1], [], []>} : vector<2x128xbf16>, vector<128x256xbf16>, vector<2x256xf32> -> vector<2x256xf32>
      %60 = arith.addf %55, %59 : vector<2x256xf32>
      %cst_48 = arith.constant dense<0.000000e+00> : vector<2x256xf32>
      %61 = tpu.matmul %44, %58, %cst_48 {dimension_numbers = #tpu.dot_dimension_numbers<[1], [0], [0], [1], [0, 0, 1, 1], [], []>} : vector<2x128xbf16>, vector<128x256xbf16>, vector<2x256xf32> -> vector<2x256xf32>
      %62 = arith.addf %57, %61 : vector<2x256xf32>
      %c640 = arith.constant 640 : index
      %c0_49 = arith.constant 0 : index
      %63 = vector.load %arg2[%c640, %c0_49] : memref<1152x256xbf16, #tpu.memory_space<vmem>>, vector<128x256xbf16>
      %cst_50 = arith.constant dense<0.000000e+00> : vector<2x256xf32>
      %64 = tpu.matmul %44, %63, %cst_50 {dimension_numbers = #tpu.dot_dimension_numbers<[1], [0], [0], [1], [0, 0, 1, 1], [], []>} : vector<2x128xbf16>, vector<128x256xbf16>, vector<2x256xf32> -> vector<2x256xf32>
      %65 = arith.addf %60, %64 : vector<2x256xf32>
      %cst_51 = arith.constant dense<0.000000e+00> : vector<2x256xf32>
      %66 = tpu.matmul %52, %63, %cst_51 {dimension_numbers = #tpu.dot_dimension_numbers<[1], [0], [0], [1], [0, 0, 1, 1], [], []>} : vector<2x128xbf16>, vector<128x256xbf16>, vector<2x256xf32> -> vector<2x256xf32>
      %67 = arith.addf %62, %66 : vector<2x256xf32>
      %c2_i32_52 = arith.constant 2 : i32
      %68 = arith.muli %c2_i32_52, %arg5 : i32
      %c0_i32_53 = arith.constant 0 : i32
      %69 = arith.addi %68, %c0_i32_53 : i32
      %c2_i32_54 = arith.constant 2 : i32
      %70 = arith.addi %69, %c2_i32_54 : i32
      %c0_55 = arith.constant 0 : index
      %71 = arith.index_cast %70 : i32 to index
      %c0_56 = arith.constant 0 : index
      %c0_57 = arith.constant 0 : index
      %72 = vector.load %arg1[%c0_55, %71, %c0_56, %c0_57] : memref<1x12x3x128xbf16, #tpu.memory_space<vmem>>, vector<1x1x2x128xbf16>
      %73 = vector.shape_cast %72 : vector<1x1x2x128xbf16> to vector<2x128xbf16>
      %c0_58 = arith.constant 0 : index
      %74 = arith.index_cast %70 : i32 to index
      %c1_59 = arith.constant 1 : index
      %c0_60 = arith.constant 0 : index
      %75 = vector.load %arg1[%c0_58, %74, %c1_59, %c0_60] : memref<1x12x3x128xbf16, #tpu.memory_space<vmem>>, vector<1x1x2x128xbf16>
      %76 = vector.shape_cast %75 : vector<1x1x2x128xbf16> to vector<2x128xbf16>
      %c6_i32_61 = arith.constant 6 : i32
      %77 = arith.addi %c6_i32_61, %70 : i32
      %c0_62 = arith.constant 0 : index
      %78 = arith.index_cast %77 : i32 to index
      %c0_63 = arith.constant 0 : index
      %c0_64 = arith.constant 0 : index
      %79 = vector.load %arg1[%c0_62, %78, %c0_63, %c0_64] : memref<1x12x3x128xbf16, #tpu.memory_space<vmem>>, vector<1x1x2x128xbf16>
      %80 = vector.shape_cast %79 : vector<1x1x2x128xbf16> to vector<2x128xbf16>
      %c6_i32_65 = arith.constant 6 : i32
      %81 = arith.addi %c6_i32_65, %70 : i32
      %c0_66 = arith.constant 0 : index
      %82 = arith.index_cast %81 : i32 to index
      %c1_67 = arith.constant 1 : index
      %c0_68 = arith.constant 0 : index
      %83 = vector.load %arg1[%c0_66, %82, %c1_67, %c0_68] : memref<1x12x3x128xbf16, #tpu.memory_space<vmem>>, vector<1x1x2x128xbf16>
      %84 = vector.shape_cast %83 : vector<1x1x2x128xbf16> to vector<2x128xbf16>
      %c768 = arith.constant 768 : index
      %c0_69 = arith.constant 0 : index
      %85 = vector.load %arg2[%c768, %c0_69] : memref<1152x256xbf16, #tpu.memory_space<vmem>>, vector<128x256xbf16>
      %cst_70 = arith.constant dense<0.000000e+00> : vector<2x256xf32>
      %86 = tpu.matmul %73, %85, %cst_70 {dimension_numbers = #tpu.dot_dimension_numbers<[1], [0], [0], [1], [0, 0, 1, 1], [], []>} : vector<2x128xbf16>, vector<128x256xbf16>, vector<2x256xf32> -> vector<2x256xf32>
      %87 = arith.addf %65, %86 : vector<2x256xf32>
      %cst_71 = arith.constant dense<0.000000e+00> : vector<2x256xf32>
      %88 = tpu.matmul %80, %85, %cst_71 {dimension_numbers = #tpu.dot_dimension_numbers<[1], [0], [0], [1], [0, 0, 1, 1], [], []>} : vector<2x128xbf16>, vector<128x256xbf16>, vector<2x256xf32> -> vector<2x256xf32>
      %89 = arith.addf %67, %88 : vector<2x256xf32>
      %c896 = arith.constant 896 : index
      %c0_72 = arith.constant 0 : index
      %90 = vector.load %arg2[%c896, %c0_72] : memref<1152x256xbf16, #tpu.memory_space<vmem>>, vector<128x256xbf16>
      %cst_73 = arith.constant dense<0.000000e+00> : vector<2x256xf32>
      %91 = tpu.matmul %80, %90, %cst_73 {dimension_numbers = #tpu.dot_dimension_numbers<[1], [0], [0], [1], [0, 0, 1, 1], [], []>} : vector<2x128xbf16>, vector<128x256xbf16>, vector<2x256xf32> -> vector<2x256xf32>
      %92 = arith.addf %87, %91 : vector<2x256xf32>
      %cst_74 = arith.constant dense<0.000000e+00> : vector<2x256xf32>
      %93 = tpu.matmul %76, %90, %cst_74 {dimension_numbers = #tpu.dot_dimension_numbers<[1], [0], [0], [1], [0, 0, 1, 1], [], []>} : vector<2x128xbf16>, vector<128x256xbf16>, vector<2x256xf32> -> vector<2x256xf32>
      %94 = arith.addf %89, %93 : vector<2x256xf32>
      %c1024 = arith.constant 1024 : index
      %c0_75 = arith.constant 0 : index
      %95 = vector.load %arg2[%c1024, %c0_75] : memref<1152x256xbf16, #tpu.memory_space<vmem>>, vector<128x256xbf16>
      %cst_76 = arith.constant dense<0.000000e+00> : vector<2x256xf32>
      %96 = tpu.matmul %76, %95, %cst_76 {dimension_numbers = #tpu.dot_dimension_numbers<[1], [0], [0], [1], [0, 0, 1, 1], [], []>} : vector<2x128xbf16>, vector<128x256xbf16>, vector<2x256xf32> -> vector<2x256xf32>
      %97 = arith.addf %92, %96 : vector<2x256xf32>
      %cst_77 = arith.constant dense<0.000000e+00> : vector<2x256xf32>
      %98 = tpu.matmul %84, %95, %cst_77 {dimension_numbers = #tpu.dot_dimension_numbers<[1], [0], [0], [1], [0, 0, 1, 1], [], []>} : vector<2x128xbf16>, vector<128x256xbf16>, vector<2x256xf32> -> vector<2x256xf32>
      %99 = arith.addf %94, %98 : vector<2x256xf32>
      %100 = arith.maximumf %97, %99 : vector<2x256xf32>
      %c2_i32_78 = arith.constant 2 : i32
      %101 = arith.muli %c2_i32_78, %arg5 : i32
      %c1_i32_79 = arith.constant 1 : i32
      %102 = arith.addi %101, %c1_i32_79 : i32
      %c0_i32_80 = arith.constant 0 : i32
      %103 = arith.addi %102, %c0_i32_80 : i32
      %c0_81 = arith.constant 0 : index
      %104 = arith.index_cast %103 : i32 to index
      %c0_82 = arith.constant 0 : index
      %c0_83 = arith.constant 0 : index
      %105 = vector.load %arg1[%c0_81, %104, %c0_82, %c0_83] : memref<1x12x3x128xbf16, #tpu.memory_space<vmem>>, vector<1x1x2x128xbf16>
      %106 = vector.shape_cast %105 : vector<1x1x2x128xbf16> to vector<2x128xbf16>
      %c0_84 = arith.constant 0 : index
      %107 = arith.index_cast %103 : i32 to index
      %c1_85 = arith.constant 1 : index
      %c0_86 = arith.constant 0 : index
      %108 = vector.load %arg1[%c0_84, %107, %c1_85, %c0_86] : memref<1x12x3x128xbf16, #tpu.memory_space<vmem>>, vector<1x1x2x128xbf16>
      %109 = vector.shape_cast %108 : vector<1x1x2x128xbf16> to vector<2x128xbf16>
      %c6_i32_87 = arith.constant 6 : i32
      %110 = arith.addi %c6_i32_87, %103 : i32
      %c0_88 = arith.constant 0 : index
      %111 = arith.index_cast %110 : i32 to index
      %c0_89 = arith.constant 0 : index
      %c0_90 = arith.constant 0 : index
      %112 = vector.load %arg1[%c0_88, %111, %c0_89, %c0_90] : memref<1x12x3x128xbf16, #tpu.memory_space<vmem>>, vector<1x1x2x128xbf16>
      %113 = vector.shape_cast %112 : vector<1x1x2x128xbf16> to vector<2x128xbf16>
      %c6_i32_91 = arith.constant 6 : i32
      %114 = arith.addi %c6_i32_91, %103 : i32
      %c0_92 = arith.constant 0 : index
      %115 = arith.index_cast %114 : i32 to index
      %c1_93 = arith.constant 1 : index
      %c0_94 = arith.constant 0 : index
      %116 = vector.load %arg1[%c0_92, %115, %c1_93, %c0_94] : memref<1x12x3x128xbf16, #tpu.memory_space<vmem>>, vector<1x1x2x128xbf16>
      %117 = vector.shape_cast %116 : vector<1x1x2x128xbf16> to vector<2x128xbf16>
      %c0_95 = arith.constant 0 : index
      %c0_96 = arith.constant 0 : index
      %118 = vector.load %arg2[%c0_95, %c0_96] : memref<1152x256xbf16, #tpu.memory_space<vmem>>, vector<128x256xbf16>
      %cst_97 = arith.constant dense<0.000000e+00> : vector<2x256xf32>
      %119 = tpu.matmul %106, %118, %cst_97 {dimension_numbers = #tpu.dot_dimension_numbers<[1], [0], [0], [1], [0, 0, 1, 1], [], []>} : vector<2x128xbf16>, vector<128x256xbf16>, vector<2x256xf32> -> vector<2x256xf32>
      %120 = arith.addf %2, %119 : vector<2x256xf32>
      %cst_98 = arith.constant dense<0.000000e+00> : vector<2x256xf32>
      %121 = tpu.matmul %113, %118, %cst_98 {dimension_numbers = #tpu.dot_dimension_numbers<[1], [0], [0], [1], [0, 0, 1, 1], [], []>} : vector<2x128xbf16>, vector<128x256xbf16>, vector<2x256xf32> -> vector<2x256xf32>
      %122 = arith.addf %2, %121 : vector<2x256xf32>
      %c128_99 = arith.constant 128 : index
      %c0_100 = arith.constant 0 : index
      %123 = vector.load %arg2[%c128_99, %c0_100] : memref<1152x256xbf16, #tpu.memory_space<vmem>>, vector<128x256xbf16>
      %cst_101 = arith.constant dense<0.000000e+00> : vector<2x256xf32>
      %124 = tpu.matmul %113, %123, %cst_101 {dimension_numbers = #tpu.dot_dimension_numbers<[1], [0], [0], [1], [0, 0, 1, 1], [], []>} : vector<2x128xbf16>, vector<128x256xbf16>, vector<2x256xf32> -> vector<2x256xf32>
      %125 = arith.addf %120, %124 : vector<2x256xf32>
      %cst_102 = arith.constant dense<0.000000e+00> : vector<2x256xf32>
      %126 = tpu.matmul %109, %123, %cst_102 {dimension_numbers = #tpu.dot_dimension_numbers<[1], [0], [0], [1], [0, 0, 1, 1], [], []>} : vector<2x128xbf16>, vector<128x256xbf16>, vector<2x256xf32> -> vector<2x256xf32>
      %127 = arith.addf %122, %126 : vector<2x256xf32>
      %c256_103 = arith.constant 256 : index
      %c0_104 = arith.constant 0 : index
      %128 = vector.load %arg2[%c256_103, %c0_104] : memref<1152x256xbf16, #tpu.memory_space<vmem>>, vector<128x256xbf16>
      %cst_105 = arith.constant dense<0.000000e+00> : vector<2x256xf32>
      %129 = tpu.matmul %109, %128, %cst_105 {dimension_numbers = #tpu.dot_dimension_numbers<[1], [0], [0], [1], [0, 0, 1, 1], [], []>} : vector<2x128xbf16>, vector<128x256xbf16>, vector<2x256xf32> -> vector<2x256xf32>
      %130 = arith.addf %125, %129 : vector<2x256xf32>
      %cst_106 = arith.constant dense<0.000000e+00> : vector<2x256xf32>
      %131 = tpu.matmul %117, %128, %cst_106 {dimension_numbers = #tpu.dot_dimension_numbers<[1], [0], [0], [1], [0, 0, 1, 1], [], []>} : vector<2x128xbf16>, vector<128x256xbf16>, vector<2x256xf32> -> vector<2x256xf32>
      %132 = arith.addf %127, %131 : vector<2x256xf32>
      %c2_i32_107 = arith.constant 2 : i32
      %133 = arith.muli %c2_i32_107, %arg5 : i32
      %c1_i32_108 = arith.constant 1 : i32
      %134 = arith.addi %133, %c1_i32_108 : i32
      %c1_i32_109 = arith.constant 1 : i32
      %135 = arith.addi %134, %c1_i32_109 : i32
      %c0_110 = arith.constant 0 : index
      %136 = arith.index_cast %135 : i32 to index
      %c0_111 = arith.constant 0 : index
      %c0_112 = arith.constant 0 : index
      %137 = vector.load %arg1[%c0_110, %136, %c0_111, %c0_112] : memref<1x12x3x128xbf16, #tpu.memory_space<vmem>>, vector<1x1x2x128xbf16>
      %138 = vector.shape_cast %137 : vector<1x1x2x128xbf16> to vector<2x128xbf16>
      %c0_113 = arith.constant 0 : index
      %139 = arith.index_cast %135 : i32 to index
      %c1_114 = arith.constant 1 : index
      %c0_115 = arith.constant 0 : index
      %140 = vector.load %arg1[%c0_113, %139, %c1_114, %c0_115] : memref<1x12x3x128xbf16, #tpu.memory_space<vmem>>, vector<1x1x2x128xbf16>
      %141 = vector.shape_cast %140 : vector<1x1x2x128xbf16> to vector<2x128xbf16>
      %c6_i32_116 = arith.constant 6 : i32
      %142 = arith.addi %c6_i32_116, %135 : i32
      %c0_117 = arith.constant 0 : index
      %143 = arith.index_cast %142 : i32 to index
      %c0_118 = arith.constant 0 : index
      %c0_119 = arith.constant 0 : index
      %144 = vector.load %arg1[%c0_117, %143, %c0_118, %c0_119] : memref<1x12x3x128xbf16, #tpu.memory_space<vmem>>, vector<1x1x2x128xbf16>
      %145 = vector.shape_cast %144 : vector<1x1x2x128xbf16> to vector<2x128xbf16>
      %c6_i32_120 = arith.constant 6 : i32
      %146 = arith.addi %c6_i32_120, %135 : i32
      %c0_121 = arith.constant 0 : index
      %147 = arith.index_cast %146 : i32 to index
      %c1_122 = arith.constant 1 : index
      %c0_123 = arith.constant 0 : index
      %148 = vector.load %arg1[%c0_121, %147, %c1_122, %c0_123] : memref<1x12x3x128xbf16, #tpu.memory_space<vmem>>, vector<1x1x2x128xbf16>
      %149 = vector.shape_cast %148 : vector<1x1x2x128xbf16> to vector<2x128xbf16>
      %c384_124 = arith.constant 384 : index
      %c0_125 = arith.constant 0 : index
      %150 = vector.load %arg2[%c384_124, %c0_125] : memref<1152x256xbf16, #tpu.memory_space<vmem>>, vector<128x256xbf16>
      %cst_126 = arith.constant dense<0.000000e+00> : vector<2x256xf32>
      %151 = tpu.matmul %138, %150, %cst_126 {dimension_numbers = #tpu.dot_dimension_numbers<[1], [0], [0], [1], [0, 0, 1, 1], [], []>} : vector<2x128xbf16>, vector<128x256xbf16>, vector<2x256xf32> -> vector<2x256xf32>
      %152 = arith.addf %130, %151 : vector<2x256xf32>
      %cst_127 = arith.constant dense<0.000000e+00> : vector<2x256xf32>
      %153 = tpu.matmul %145, %150, %cst_127 {dimension_numbers = #tpu.dot_dimension_numbers<[1], [0], [0], [1], [0, 0, 1, 1], [], []>} : vector<2x128xbf16>, vector<128x256xbf16>, vector<2x256xf32> -> vector<2x256xf32>
      %154 = arith.addf %132, %153 : vector<2x256xf32>
      %c512_128 = arith.constant 512 : index
      %c0_129 = arith.constant 0 : index
      %155 = vector.load %arg2[%c512_128, %c0_129] : memref<1152x256xbf16, #tpu.memory_space<vmem>>, vector<128x256xbf16>
      %cst_130 = arith.constant dense<0.000000e+00> : vector<2x256xf32>
      %156 = tpu.matmul %145, %155, %cst_130 {dimension_numbers = #tpu.dot_dimension_numbers<[1], [0], [0], [1], [0, 0, 1, 1], [], []>} : vector<2x128xbf16>, vector<128x256xbf16>, vector<2x256xf32> -> vector<2x256xf32>
      %157 = arith.addf %152, %156 : vector<2x256xf32>
      %cst_131 = arith.constant dense<0.000000e+00> : vector<2x256xf32>
      %158 = tpu.matmul %141, %155, %cst_131 {dimension_numbers = #tpu.dot_dimension_numbers<[1], [0], [0], [1], [0, 0, 1, 1], [], []>} : vector<2x128xbf16>, vector<128x256xbf16>, vector<2x256xf32> -> vector<2x256xf32>
      %159 = arith.addf %154, %158 : vector<2x256xf32>
      %c640_132 = arith.constant 640 : index
      %c0_133 = arith.constant 0 : index
      %160 = vector.load %arg2[%c640_132, %c0_133] : memref<1152x256xbf16, #tpu.memory_space<vmem>>, vector<128x256xbf16>
      %cst_134 = arith.constant dense<0.000000e+00> : vector<2x256xf32>
      %161 = tpu.matmul %141, %160, %cst_134 {dimension_numbers = #tpu.dot_dimension_numbers<[1], [0], [0], [1], [0, 0, 1, 1], [], []>} : vector<2x128xbf16>, vector<128x256xbf16>, vector<2x256xf32> -> vector<2x256xf32>
      %162 = arith.addf %157, %161 : vector<2x256xf32>
      %cst_135 = arith.constant dense<0.000000e+00> : vector<2x256xf32>
      %163 = tpu.matmul %149, %160, %cst_135 {dimension_numbers = #tpu.dot_dimension_numbers<[1], [0], [0], [1], [0, 0, 1, 1], [], []>} : vector<2x128xbf16>, vector<128x256xbf16>, vector<2x256xf32> -> vector<2x256xf32>
      %164 = arith.addf %159, %163 : vector<2x256xf32>
      %c2_i32_136 = arith.constant 2 : i32
      %165 = arith.muli %c2_i32_136, %arg5 : i32
      %c1_i32_137 = arith.constant 1 : i32
      %166 = arith.addi %165, %c1_i32_137 : i32
      %c2_i32_138 = arith.constant 2 : i32
      %167 = arith.addi %166, %c2_i32_138 : i32
      %c0_139 = arith.constant 0 : index
      %168 = arith.index_cast %167 : i32 to index
      %c0_140 = arith.constant 0 : index
      %c0_141 = arith.constant 0 : index
      %169 = vector.load %arg1[%c0_139, %168, %c0_140, %c0_141] : memref<1x12x3x128xbf16, #tpu.memory_space<vmem>>, vector<1x1x2x128xbf16>
      %170 = vector.shape_cast %169 : vector<1x1x2x128xbf16> to vector<2x128xbf16>
      %c0_142 = arith.constant 0 : index
      %171 = arith.index_cast %167 : i32 to index
      %c1_143 = arith.constant 1 : index
      %c0_144 = arith.constant 0 : index
      %172 = vector.load %arg1[%c0_142, %171, %c1_143, %c0_144] : memref<1x12x3x128xbf16, #tpu.memory_space<vmem>>, vector<1x1x2x128xbf16>
      %173 = vector.shape_cast %172 : vector<1x1x2x128xbf16> to vector<2x128xbf16>
      %c6_i32_145 = arith.constant 6 : i32
      %174 = arith.addi %c6_i32_145, %167 : i32
      %c0_146 = arith.constant 0 : index
      %175 = arith.index_cast %174 : i32 to index
      %c0_147 = arith.constant 0 : index
      %c0_148 = arith.constant 0 : index
      %176 = vector.load %arg1[%c0_146, %175, %c0_147, %c0_148] : memref<1x12x3x128xbf16, #tpu.memory_space<vmem>>, vector<1x1x2x128xbf16>
      %177 = vector.shape_cast %176 : vector<1x1x2x128xbf16> to vector<2x128xbf16>
      %c6_i32_149 = arith.constant 6 : i32
      %178 = arith.addi %c6_i32_149, %167 : i32
      %c0_150 = arith.constant 0 : index
      %179 = arith.index_cast %178 : i32 to index
      %c1_151 = arith.constant 1 : index
      %c0_152 = arith.constant 0 : index
      %180 = vector.load %arg1[%c0_150, %179, %c1_151, %c0_152] : memref<1x12x3x128xbf16, #tpu.memory_space<vmem>>, vector<1x1x2x128xbf16>
      %181 = vector.shape_cast %180 : vector<1x1x2x128xbf16> to vector<2x128xbf16>
      %c768_153 = arith.constant 768 : index
      %c0_154 = arith.constant 0 : index
      %182 = vector.load %arg2[%c768_153, %c0_154] : memref<1152x256xbf16, #tpu.memory_space<vmem>>, vector<128x256xbf16>
      %cst_155 = arith.constant dense<0.000000e+00> : vector<2x256xf32>
      %183 = tpu.matmul %170, %182, %cst_155 {dimension_numbers = #tpu.dot_dimension_numbers<[1], [0], [0], [1], [0, 0, 1, 1], [], []>} : vector<2x128xbf16>, vector<128x256xbf16>, vector<2x256xf32> -> vector<2x256xf32>
      %184 = arith.addf %162, %183 : vector<2x256xf32>
      %cst_156 = arith.constant dense<0.000000e+00> : vector<2x256xf32>
      %185 = tpu.matmul %177, %182, %cst_156 {dimension_numbers = #tpu.dot_dimension_numbers<[1], [0], [0], [1], [0, 0, 1, 1], [], []>} : vector<2x128xbf16>, vector<128x256xbf16>, vector<2x256xf32> -> vector<2x256xf32>
      %186 = arith.addf %164, %185 : vector<2x256xf32>
      %c896_157 = arith.constant 896 : index
      %c0_158 = arith.constant 0 : index
      %187 = vector.load %arg2[%c896_157, %c0_158] : memref<1152x256xbf16, #tpu.memory_space<vmem>>, vector<128x256xbf16>
      %cst_159 = arith.constant dense<0.000000e+00> : vector<2x256xf32>
      %188 = tpu.matmul %177, %187, %cst_159 {dimension_numbers = #tpu.dot_dimension_numbers<[1], [0], [0], [1], [0, 0, 1, 1], [], []>} : vector<2x128xbf16>, vector<128x256xbf16>, vector<2x256xf32> -> vector<2x256xf32>
      %189 = arith.addf %184, %188 : vector<2x256xf32>
      %cst_160 = arith.constant dense<0.000000e+00> : vector<2x256xf32>
      %190 = tpu.matmul %173, %187, %cst_160 {dimension_numbers = #tpu.dot_dimension_numbers<[1], [0], [0], [1], [0, 0, 1, 1], [], []>} : vector<2x128xbf16>, vector<128x256xbf16>, vector<2x256xf32> -> vector<2x256xf32>
      %191 = arith.addf %186, %190 : vector<2x256xf32>
      %c1024_161 = arith.constant 1024 : index
      %c0_162 = arith.constant 0 : index
      %192 = vector.load %arg2[%c1024_161, %c0_162] : memref<1152x256xbf16, #tpu.memory_space<vmem>>, vector<128x256xbf16>
      %cst_163 = arith.constant dense<0.000000e+00> : vector<2x256xf32>
      %193 = tpu.matmul %173, %192, %cst_163 {dimension_numbers = #tpu.dot_dimension_numbers<[1], [0], [0], [1], [0, 0, 1, 1], [], []>} : vector<2x128xbf16>, vector<128x256xbf16>, vector<2x256xf32> -> vector<2x256xf32>
      %194 = arith.addf %189, %193 : vector<2x256xf32>
      %cst_164 = arith.constant dense<0.000000e+00> : vector<2x256xf32>
      %195 = tpu.matmul %181, %192, %cst_164 {dimension_numbers = #tpu.dot_dimension_numbers<[1], [0], [0], [1], [0, 0, 1, 1], [], []>} : vector<2x128xbf16>, vector<128x256xbf16>, vector<2x256xf32> -> vector<2x256xf32>
      %196 = arith.addf %191, %195 : vector<2x256xf32>
      %197 = arith.maximumf %194, %196 : vector<2x256xf32>
      %198 = arith.maximumf %100, %197 : vector<2x256xf32>
      %cst_165 = arith.constant 0.000000e+00 : f32
      %199 = vector.broadcast %cst_165 : f32 to vector<2x256xf32>
      %200 = arith.maximumf %198, %199 : vector<2x256xf32>
      %201 = arith.truncf %200 : vector<2x256xf32> to vector<2x256xbf16>
      %c0_166 = arith.constant 0 : index
      %202 = arith.index_cast %arg5 : i32 to index
      %c0_167 = arith.constant 0 : index
      %c0_168 = arith.constant 0 : index
      %203 = vector.load %arg4[%c0_166, %202, %c0_167, %c0_168] : memref<1x2x2x256xbf16, #tpu.memory_space<vmem>>, vector<1x1x2x256xbf16>
      %204 = vector.shape_cast %203 : vector<1x1x2x256xbf16> to vector<2x256xbf16>
      %205 = vector.shape_cast %201 : vector<2x256xbf16> to vector<1x1x2x256xbf16>
      tpu.vector_store %arg4[%c0_166, %202, %c0_167, %c0_168], %205 {strides = array<i32>} : memref<1x2x2x256xbf16, #tpu.memory_space<vmem>>, vector<1x1x2x256xbf16>,
    }
    %c2_i32_1 = arith.constant 2 : i32
    return
  }
  func.func @transform_0(%arg0: i32) -> (i32, i32, i32, i32) {
    %c0_i32 = arith.constant 0 : i32
    %c0_i32_0 = arith.constant 0 : i32
    %c0_i32_1 = arith.constant 0 : i32
    %c0_i32_2 = arith.constant 0 : i32
    return %arg0, %c0_i32, %c0_i32_0, %c0_i32_1 : i32, i32, i32, i32
  }
  func.func @transform_1(%arg0: i32) -> (i32, i32) {
    %c0_i32 = arith.constant 0 : i32
    %c0_i32_0 = arith.constant 0 : i32
    %c0_i32_1 = arith.constant 0 : i32
    return %c0_i32, %c0_i32_0 : i32, i32
  }
  func.func @transform_2(%arg0: i32) -> (i32, i32) {
    %c0_i32 = arith.constant 0 : i32
    %c0_i32_0 = arith.constant 0 : i32
    %c0_i32_1 = arith.constant 0 : i32
    return %c0_i32, %c0_i32_0 : i32, i32
  }
  func.func @transform_3(%arg0: i32) -> (i32, i32, i32, i32) {
    %c0_i32 = arith.constant 0 : i32
    %c0_i32_0 = arith.constant 0 : i32
    %c0_i32_1 = arith.constant 0 : i32
    %c0_i32_2 = arith.constant 0 : i32
    return %arg0, %c0_i32, %c0_i32_0, %c0_i32_1 : i32, i32, i32, i32
  }
}

module attributes {stable_mosaic.version = 11 : i64} {
  func.func @_matmul_bias_kernel(%arg0: i32, %arg1: memref<4x512xbf16, #tpu.memory_space<vmem>>, %arg2: memref<512x1024xbf16, #tpu.memory_space<vmem>>, %arg3: memref<1x1024xf32, #tpu.memory_space<vmem>>, %arg4: memref<4x1024xf32, #tpu.memory_space<vmem>>) attributes {dimension_semantics = [#tpu.dimension_semantics<parallel>], iteration_bounds = array<i64: 1>, scalar_prefetch = 0 : i64, scratch_operands = 0 : i64, tpu.core_type = #tpu.core_type<tc>, window_params = [{transform_indices = @transform_0, window_bounds = array<i64: 4, 512>}, {pipeline_mode = #tpu.pipeline_mode<synchronous>, transform_indices = @transform_1, window_bounds = array<i64: 512, 1024>}, {pipeline_mode = #tpu.pipeline_mode<synchronous>, transform_indices = @transform_2, window_bounds = array<i64: 1, 1024>}, {transform_indices = @transform_3, window_bounds = array<i64: 4, 1024>}]} {
    %c0 = arith.constant 0 : index
    %c0_0 = arith.constant 0 : index
    %0 = vector.load %arg1[%c0, %c0_0] : memref<4x512xbf16, #tpu.memory_space<vmem>>, vector<4x512xbf16>
    %c0_1 = arith.constant 0 : index
    %c0_2 = arith.constant 0 : index
    %1 = vector.load %arg2[%c0_1, %c0_2] : memref<512x1024xbf16, #tpu.memory_space<vmem>>, vector<512x1024xbf16>
    %cst = arith.constant dense<0.000000e+00> : vector<4x1024xf32>
    %2 = tpu.matmul %0, %1, %cst {dimension_numbers = #tpu.dot_dimension_numbers<[1], [0], [0], [1], [0, 0, 1, 1], [], []>} : vector<4x512xbf16>, vector<512x1024xbf16>, vector<4x1024xf32> -> vector<4x1024xf32>
    %c0_3 = arith.constant 0 : index
    %c0_4 = arith.constant 0 : index
    %3 = vector.load %arg3[%c0_3, %c0_4] : memref<1x1024xf32, #tpu.memory_space<vmem>>, vector<1x1024xf32>
    %4 = vector.broadcast %3 : vector<1x1024xf32> to vector<4x1024xf32>
    %5 = arith.addf %2, %4 : vector<4x1024xf32>
    %c0_5 = arith.constant 0 : index
    %c0_6 = arith.constant 0 : index
    %6 = vector.load %arg4[%c0_5, %c0_6] : memref<4x1024xf32, #tpu.memory_space<vmem>>, vector<4x1024xf32>
    tpu.vector_store %arg4[%c0_5, %c0_6], %5 {strides = array<i32>} : memref<4x1024xf32, #tpu.memory_space<vmem>>, vector<4x1024xf32>,
    return
  }
  func.func @transform_0(%arg0: i32) -> (i32, i32) {
    %c0_i32 = arith.constant 0 : i32
    %c0_i32_0 = arith.constant 0 : i32
    return %arg0, %c0_i32 : i32, i32
  }
  func.func @transform_1(%arg0: i32) -> (i32, i32) {
    %c0_i32 = arith.constant 0 : i32
    %c0_i32_0 = arith.constant 0 : i32
    %c0_i32_1 = arith.constant 0 : i32
    return %c0_i32, %c0_i32_0 : i32, i32
  }
  func.func @transform_2(%arg0: i32) -> (i32, i32) {
    %c0_i32 = arith.constant 0 : i32
    %c0_i32_0 = arith.constant 0 : i32
    %c0_i32_1 = arith.constant 0 : i32
    return %c0_i32, %c0_i32_0 : i32, i32
  }
  func.func @transform_3(%arg0: i32) -> (i32, i32) {
    %c0_i32 = arith.constant 0 : i32
    %c0_i32_0 = arith.constant 0 : i32
    return %arg0, %c0_i32 : i32, i32
  }
}

module attributes {stable_mosaic.version = 11 : i64} {
  func.func @_bilstm_kernel(%arg0: i32, %arg1: memref<1x2x2x512xf32, #tpu.memory_space<vmem>>, %arg2: memref<1x128x512xf32, #tpu.memory_space<vmem>>, %arg3: memref<1x2x2x128xf32, #tpu.memory_space<vmem>>) attributes {dimension_semantics = [#tpu.dimension_semantics<parallel>], iteration_bounds = array<i64: 2>, scalar_prefetch = 0 : i64, scratch_operands = 0 : i64, tpu.core_type = #tpu.core_type<tc>, window_params = [{transform_indices = @transform_0, window_bounds = array<i64: 1, 2, 2, 512>}, {transform_indices = @transform_1, window_bounds = array<i64: 1, 128, 512>}, {transform_indices = @transform_2, window_bounds = array<i64: 1, 2, 2, 128>}]} {
    %cst = arith.constant 0.000000e+00 : f32
    %0 = vector.broadcast %cst : f32 to vector<2x128xf32>
    %cst_0 = arith.constant 0.000000e+00 : f32
    %1 = vector.broadcast %cst_0 : f32 to vector<2x128xf32>
    %c0_i32 = arith.constant 0 : i32
    %c2_i32 = arith.constant 2 : i32
    %2 = arith.addi %c0_i32, %c2_i32 : i32
    %c1_i32 = arith.constant 1 : i32
    %3:2 = scf.for %arg4 = %c0_i32 to %2 step %c1_i32 iter_args(%arg5 = %0, %arg6 = %1) -> (vector<2x128xf32>, vector<2x128xf32>)  : i32 {
      %c0_i32_2 = arith.constant 0 : i32
      %4 = arith.cmpi eq, %arg0, %c0_i32_2 : i32
      %c1_i32_3 = arith.constant 1 : i32
      %5 = arith.subi %c1_i32_3, %arg4 : i32
      %6 = arith.select %4, %arg4, %5 : i32
      %c0 = arith.constant 0 : index
      %7 = arith.index_cast %6 : i32 to index
      %c0_4 = arith.constant 0 : index
      %c0_5 = arith.constant 0 : index
      %8 = vector.load %arg1[%c0, %7, %c0_4, %c0_5] : memref<1x2x2x512xf32, #tpu.memory_space<vmem>>, vector<1x1x2x512xf32>
      %9 = vector.shape_cast %8 : vector<1x1x2x512xf32> to vector<2x512xf32>
      %c0_6 = arith.constant 0 : index
      %c0_7 = arith.constant 0 : index
      %c0_8 = arith.constant 0 : index
      %10 = vector.load %arg2[%c0_6, %c0_7, %c0_8] : memref<1x128x512xf32, #tpu.memory_space<vmem>>, vector<1x128x512xf32>
      %11 = vector.shape_cast %10 : vector<1x128x512xf32> to vector<128x512xf32>
      %cst_9 = arith.constant dense<0.000000e+00> : vector<2x512xf32>
      %12 = tpu.matmul %arg5, %11, %cst_9 {dimension_numbers = #tpu.dot_dimension_numbers<[1], [0], [0], [1], [0, 0, 1, 1], [], []>} : vector<2x128xf32>, vector<128x512xf32>, vector<2x512xf32> -> vector<2x512xf32>
      %13 = arith.addf %9, %12 : vector<2x512xf32>
      %14 = vector.extract_strided_slice %13 {offsets = [0, 0], sizes = [2, 128], strides = [1, 1]} : vector<2x512xf32> to vector<2x128xf32>
      %15 = arith.negf %14 : vector<2x128xf32>
      %16 = math.exp %15 : vector<2x128xf32>
      %cst_10 = arith.constant 1.000000e+00 : f32
      %17 = vector.broadcast %cst_10 : f32 to vector<2x128xf32>
      %18 = arith.addf %17, %16 : vector<2x128xf32>
      %19 = arith.divf %17, %18 : vector<2x128xf32>
      %20 = vector.extract_strided_slice %13 {offsets = [0, 128], sizes = [2, 128], strides = [1, 1]} : vector<2x512xf32> to vector<2x128xf32>
      %21 = arith.negf %20 : vector<2x128xf32>
      %22 = math.exp %21 : vector<2x128xf32>
      %cst_11 = arith.constant 1.000000e+00 : f32
      %23 = vector.broadcast %cst_11 : f32 to vector<2x128xf32>
      %24 = arith.addf %23, %22 : vector<2x128xf32>
      %25 = arith.divf %23, %24 : vector<2x128xf32>
      %26 = vector.extract_strided_slice %13 {offsets = [0, 256], sizes = [2, 128], strides = [1, 1]} : vector<2x512xf32> to vector<2x128xf32>
      %27 = math.tanh %26 : vector<2x128xf32>
      %28 = vector.extract_strided_slice %13 {offsets = [0, 384], sizes = [2, 128], strides = [1, 1]} : vector<2x512xf32> to vector<2x128xf32>
      %29 = arith.negf %28 : vector<2x128xf32>
      %30 = math.exp %29 : vector<2x128xf32>
      %cst_12 = arith.constant 1.000000e+00 : f32
      %31 = vector.broadcast %cst_12 : f32 to vector<2x128xf32>
      %32 = arith.addf %31, %30 : vector<2x128xf32>
      %33 = arith.divf %31, %32 : vector<2x128xf32>
      %34 = arith.mulf %25, %arg6 : vector<2x128xf32>
      %35 = arith.mulf %19, %27 : vector<2x128xf32>
      %36 = arith.addf %34, %35 : vector<2x128xf32>
      %37 = math.tanh %36 : vector<2x128xf32>
      %38 = arith.mulf %33, %37 : vector<2x128xf32>
      %c0_13 = arith.constant 0 : index
      %39 = arith.index_cast %6 : i32 to index
      %c0_14 = arith.constant 0 : index
      %c0_15 = arith.constant 0 : index
      %40 = vector.load %arg3[%c0_13, %39, %c0_14, %c0_15] : memref<1x2x2x128xf32, #tpu.memory_space<vmem>>, vector<1x1x2x128xf32>
      %41 = vector.shape_cast %40 : vector<1x1x2x128xf32> to vector<2x128xf32>
      %42 = vector.shape_cast %38 : vector<2x128xf32> to vector<1x1x2x128xf32>
      tpu.vector_store %arg3[%c0_13, %39, %c0_14, %c0_15], %42 {strides = array<i32>} : memref<1x2x2x128xf32, #tpu.memory_space<vmem>>, vector<1x1x2x128xf32>,
      scf.yield %38, %36 : vector<2x128xf32>, vector<2x128xf32>
    }
    %c2_i32_1 = arith.constant 2 : i32
    return
  }
  func.func @transform_0(%arg0: i32) -> (i32, i32, i32, i32) {
    %c0_i32 = arith.constant 0 : i32
    %c0_i32_0 = arith.constant 0 : i32
    %c0_i32_1 = arith.constant 0 : i32
    %c0_i32_2 = arith.constant 0 : i32
    return %arg0, %c0_i32, %c0_i32_0, %c0_i32_1 : i32, i32, i32, i32
  }
  func.func @transform_1(%arg0: i32) -> (i32, i32, i32) {
    %c0_i32 = arith.constant 0 : i32
    %c0_i32_0 = arith.constant 0 : i32
    %c0_i32_1 = arith.constant 0 : i32
    return %arg0, %c0_i32, %c0_i32_0 : i32, i32, i32
  }
  func.func @transform_2(%arg0: i32) -> (i32, i32, i32, i32) {
    %c0_i32 = arith.constant 0 : i32
    %c0_i32_0 = arith.constant 0 : i32
    %c0_i32_1 = arith.constant 0 : i32
    %c0_i32_2 = arith.constant 0 : i32
    return %arg0, %c0_i32, %c0_i32_0, %c0_i32_1 : i32, i32, i32, i32
  }
}

module attributes {stable_mosaic.version = 11 : i64} {
  func.func @_matmul_bias_kernel(%arg0: i32, %arg1: memref<2x256xf32, #tpu.memory_space<vmem>>, %arg2: memref<256x8xf32, #tpu.memory_space<vmem>>, %arg3: memref<1x8xf32, #tpu.memory_space<vmem>>, %arg4: memref<2x8xf32, #tpu.memory_space<vmem>>) attributes {dimension_semantics = [#tpu.dimension_semantics<parallel>], iteration_bounds = array<i64: 1>, scalar_prefetch = 0 : i64, scratch_operands = 0 : i64, tpu.core_type = #tpu.core_type<tc>, window_params = [{transform_indices = @transform_0, window_bounds = array<i64: 2, 256>}, {pipeline_mode = #tpu.pipeline_mode<synchronous>, transform_indices = @transform_1, window_bounds = array<i64: 256, 8>}, {pipeline_mode = #tpu.pipeline_mode<synchronous>, transform_indices = @transform_2, window_bounds = array<i64: 1, 8>}, {transform_indices = @transform_3, window_bounds = array<i64: 2, 8>}]} {
    %c0 = arith.constant 0 : index
    %c0_0 = arith.constant 0 : index
    %0 = vector.load %arg1[%c0, %c0_0] : memref<2x256xf32, #tpu.memory_space<vmem>>, vector<2x256xf32>
    %c0_1 = arith.constant 0 : index
    %c0_2 = arith.constant 0 : index
    %1 = vector.load %arg2[%c0_1, %c0_2] : memref<256x8xf32, #tpu.memory_space<vmem>>, vector<256x8xf32>
    %cst = arith.constant dense<0.000000e+00> : vector<2x8xf32>
    %2 = tpu.matmul %0, %1, %cst {dimension_numbers = #tpu.dot_dimension_numbers<[1], [0], [0], [1], [0, 0, 1, 1], [], []>} : vector<2x256xf32>, vector<256x8xf32>, vector<2x8xf32> -> vector<2x8xf32>
    %c0_3 = arith.constant 0 : index
    %c0_4 = arith.constant 0 : index
    %3 = vector.load %arg3[%c0_3, %c0_4] : memref<1x8xf32, #tpu.memory_space<vmem>>, vector<1x8xf32>
    %4 = vector.broadcast %3 : vector<1x8xf32> to vector<2x8xf32>
    %5 = arith.addf %2, %4 : vector<2x8xf32>
    %c0_5 = arith.constant 0 : index
    %c0_6 = arith.constant 0 : index
    %6 = vector.load %arg4[%c0_5, %c0_6] : memref<2x8xf32, #tpu.memory_space<vmem>>, vector<2x8xf32>
    tpu.vector_store %arg4[%c0_5, %c0_6], %5 {strides = array<i32>} : memref<2x8xf32, #tpu.memory_space<vmem>>, vector<2x8xf32>,
    return
  }
  func.func @transform_0(%arg0: i32) -> (i32, i32) {
    %c0_i32 = arith.constant 0 : i32
    %c0_i32_0 = arith.constant 0 : i32
    return %arg0, %c0_i32 : i32, i32
  }
  func.func @transform_1(%arg0: i32) -> (i32, i32) {
    %c0_i32 = arith.constant 0 : i32
    %c0_i32_0 = arith.constant 0 : i32
    %c0_i32_1 = arith.constant 0 : i32
    return %c0_i32, %c0_i32_0 : i32, i32
  }
  func.func @transform_2(%arg0: i32) -> (i32, i32) {
    %c0_i32 = arith.constant 0 : i32
    %c0_i32_0 = arith.constant 0 : i32
    %c0_i32_1 = arith.constant 0 : i32
    return %c0_i32, %c0_i32_0 : i32, i32
  }
  func.func @transform_3(%arg0: i32) -> (i32, i32) {
    %c0_i32 = arith.constant 0 : i32
    %c0_i32_0 = arith.constant 0 : i32
    return %arg0, %c0_i32 : i32, i32
  }
}

</mosaic_0001>

<bundles_post_ra>
// kernel: crnn_ser_forward.7
= control target key start
LH: loop header
LB: loop body
LE: loop exit
PB: predicated region body
PF: predicated region fallthrough
CT: control target
= control target key end

     0   :  { %s2747_s12 = smov 0   ;;  %s3097_s0 = inlined_call_operand.vmem [shape: bf16[2,68,17,8], index: 0, kind: input, shape index: {}]   ;;  %s3098_s1 = inlined_call_operand.vmem [shape: bf16[72,32], index: 1, kind: input, shape index: {}]   ;;  %s3099_s2 = inlined_call_operand.vmem [shape: f32[1,32], index: 2, kind: input, shape index: {}]   ;;  %s3100_s3 = inlined_call_operand.vmem [shape: bf16[2,16,16,32], index: 3, kind: output, shape index: {}]  }
   0x1 LB: > { %s2141_s13 = sadd.s32 4294967295, %s2719_s12   ;;  %p2145_p0 = scmp.ge.s32.totalorder %s2719_s12, 1  ;;  %s2719_s12 = sphi %s2747_s12, %s13_s12  }
   0x2   : > { %p137_p1 = scmp.lt.s32.totalorder %s2719_s12, 3 }
   0x4   : > { %p138_p2 = pnand %p2145_p0, %p137_p1 }
   0x5   : > { %p161_p3 = scmp.lt.s32.totalorder (!%p138_p2), %s2141_s13, 1  ;;  %v2758_v0 = vld [vmem:[%s3099_s2] ss:$0 sm:$0xff] (!%p138_p2)  ;;  %s2770_s24 = smov (!%p138_p2), 0  }
   0x6   : > { %141 = sbr.rel (%p138_p2) target bundleno = 447 (0x1bf), region = 32 }
   0xd   : > { %s3102_s13 = smov (!%p161_p3, %s2141_s13), 1 }
   0xe   : > { %s2674_s16 = smul.u32 816, %s3102_s13  ;;  %s2245_s17 = sshll.u32 %s3102_s13, 7 }
   0xf   : > { %s2763_s20 = scalar_lea.vmem %s3100_s3, %s2245_s17 }
  0x10   : > { %s2768_s23 = scalar_lea.vmem %s3097_s0, %s2674_s16 }
  0x11 LB: >> { %v199_v1 = vld [vmem:[%s3098_s1] sm:$0xf]  ;;  %vm209_vm0 = vcmask 1043456   ;;  %v2725_v2 = vmov 0.0   ;;  %s2246_s27 = smul.u32 24, %s2723_s24  ;;  %vm2726_vm1 = vmmov 0   ;;  %s2723_s24 = sphi %s2770_s24, %s184_s24  }
  0x12   : >> { %2322 = vmatprep.subr.bf16.mxu0 %v2725_v2  ;;  %2328 = vmatprep.subr.bf16.mxu1 %v2725_v2  ;;  %v2781_v3 = vsel %vm209_vm0, %v199_v1, 0  ;;  %v307_v4 = vld [vmem:[%s3098_s1 + $0x4] sm:$0xf]  ;;  %vm205_vm2 = vcmask 64512   ;;  %v415_v15 = vld [vmem:[%s3098_s1 + $0x8] sm:$0xf] }
  0x13   : >> { %2323 = vmatpush3.bf16.msra.mxu0 %v2781_v3  ;;  %2329 = vmatpush3.bf16.msra.mxu1 %v2781_v3  ;;  %s2796_s30 = scalar_lea.vmem %s2768_s23, %s2246_s27  ;;  %v2800_v6 = vsel %vm209_vm0, %v307_v4, 0  ;;  %vm357_vm3 = vsmask.f32 7424  ;;  %v2818_v16 = vsel %vm209_vm0, %v415_v15, 0  ;;  %v536_v25 = vld [vmem:[%s3098_s1 + $0xc] sm:$0xf] }
  0x14   : >> { %2324 = vmatprep.mubr.msk.bf16.mxu0 %vm2726_vm1, %v2725_v2  ;;  %2330 = vmatprep.mubr.msk.bf16.mxu1 %vm2726_vm1, %v2725_v2  ;;  %v2693_v5 = vld [vmem:[%s2796_s30] sm:$0xff]   ;;  %v2694_v7 = vld [vmem:[%s2796_s30 + $0x198] sm:$0xff]   ;;  %v2695_v9 = vld [vmem:[%s2796_s30 + $0x8] ss:$0 sps:$4 sm:$0x11]   ;;  %v2837_v27 = vsel %vm209_vm0, %v536_v25, 0 }
  0x15   : >> { %2334 = vmatprep.subr.bf16.mxu0 %v2725_v2  ;;  %2340 = vmatprep.subr.bf16.mxu1 %v2725_v2  ;;  %v360_v8 = vshll.u32 %v2693_v5, 16  ;;  %v358_v10 = vshrl.u32 %v2693_v5, 16  ;;  %v365_v12 = vshll.u32 %v2695_v9, 16  ;;  %v2696_v18 = vld [vmem:[%s2796_s30 + $0x1a0] ss:$0 sps:$4 sm:$0x11]  }
  0x16   : >> { %2325 = vmatmul.mubr.msk.bf16.vlgmr.msra.gmra.mrb[0].mxu0 %vm205_vm2, %v2693_v5  ;;  %2331 = vmatmul.mubr.msk.bf16.vlgmr.msra.gmra.mrb[0].mxu1 %vm205_vm2, %v2694_v7  ;;  %v467_v19 = vshll.u32 %v2694_v7, 16  ;;  %v465_v20 = vshrl.u32 %v2694_v7, 16  ;;  %v472_v22 = vshll.u32 %v2696_v18, 16  ;;  %v642_v28 = vld [vmem:[%s3098_s1 + $0x10] sm:$0xf]  ;;  %v2856_v30 = vld [vmem:[%s2796_s30 + $0x1a4] sm:$0xff]  }
  0x17   : >> { %2335 = vmatpush3.bf16.msra.mxu0 %v2800_v6  ;;  %2341 = vmatpush3.bf16.msra.mxu1 %v2800_v6  ;;  %v362_v11 = vrot.slane %v360_v8, 1  ;;  %v367_v14 = vrot.slane %v365_v12, 1  ;;  %v2853_v29 = vld [vmem:[%s2796_s30 + $0xc] sm:$0xff]   ;;  %v2859_v31 = vsel %vm209_vm0, %v642_v28, 0  ;;  %v749_v39 = vld [vmem:[%s3098_s1 + $0x14] sm:$0xf] }
  0x18   : >> { %2336 = vmatprep.mubr.msk.bf16.mxu0 %vm2726_vm1, %v2725_v2  ;;  %2342 = vmatprep.mubr.msk.bf16.mxu1 %vm2726_vm1, %v2725_v2  ;;  %v469_v21 = vrot.slane %v467_v19, 1  ;;  %v474_v24 = vrot.slane %v472_v22, 1  ;;  %v2699_v32 = vld [vmem:[%s2796_s30 + $0x14] ss:$0 sps:$4 sm:$0x11]   ;;  %v694_v33 = vshll.u32 %v2853_v29, 16 }
  0x19   : >> { %2346 = vmatprep.subr.bf16.mxu0 %v2725_v2  ;;  %2352 = vmatprep.subr.bf16.mxu1 %v2725_v2  ;;  %v363_v13 = vor.u32 %v362_v11, %v358_v10  ;;  %v692_v34 = vshrl.u32 %v2853_v29, 16  ;;  %v699_v36 = vshll.u32 %v2699_v32, 16  ;;  %v2883_v41 = vsel %vm209_vm0, %v749_v39, 0  ;;  %v2700_v42 = vld [vmem:[%s2796_s30 + $0x1ac] ss:$0 sps:$4 sm:$0x11]  }
  0x1a   : >> { %v470_v23 = vor.u32 %v469_v21, %v465_v20  ;;  %v696_v35 = vrot.slane %v694_v33, 1  ;;  %v801_v43 = vshll.u32 %v2856_v30, 16  ;;  %v799_v44 = vshrl.u32 %v2856_v30, 16  ;;  %v870_v49 = vld [vmem:[%s3098_s1 + $0x18] sm:$0xf]  ;;  %v2928_v54 = vld [vmem:[%s2796_s30 + $0x1b0] sm:$0xff]  }
  0x1b   : >> { %v368_v17 = vsel %vm357_vm3, %v363_v13, %v367_v14  ;;  %v701_v38 = vrot.slane %v699_v36, 1  ;;  %v806_v46 = vshll.u32 %v2700_v42, 16  ;;  %v2907_v51 = vsel %vm209_vm0, %v870_v49, 0  ;;  %v976_v52 = vld [vmem:[%s3098_s1 + $0x1c] sm:$0xf]  ;;  %s2249_s19 = sshll.u32 %s2723_s24, 3 }
  0x1c   : >> { %v475_v26 = vsel %vm357_vm3, %v470_v23, %v474_v24  ;;  %v697_v37 = vor.u32 %v696_v35, %v692_v34  ;;  %v803_v45 = vrot.slane %v801_v43, 1  ;;  %v2925_v53 = vld [vmem:[%s2796_s30 + $0x18] sm:$0xff]   ;;  %v2931_v55 = vsel %vm209_vm0, %v976_v52, 0  ;;  %v2703_v56 = vld [vmem:[%s2796_s30 + $0x20] ss:$0 sps:$4 sm:$0x11]   ;;  %s2045_s21 = scalar_lea.vmem %s2763_s20, %s2249_s19 }
  0x1d   : >> { %v808_v48 = vrot.slane %v806_v46, 1  ;;  %v1028_v57 = vshll.u32 %v2925_v53, 16  ;;  %v1026_v58 = vshrl.u32 %v2925_v53, 16  ;;  %v1033_v60 = vshll.u32 %v2703_v56, 16  ;;  %v1083_v63 = vld [vmem:[%s3098_s1 + $0x20] sm:$0xf] }
  0x1e   : >> { %v2880_v40 = vsel %vm357_vm3, %v697_v37, %v701_v38  ;;  %v804_v47 = vor.u32 %v803_v45, %v799_v44  ;;  %v2955_v4 = vsel %vm209_vm0, %v1083_v63, 0  ;;  %v2704_v5 = vld [vmem:[%s2796_s30 + $0x1b8] ss:$0 sps:$4 sm:$0x11]   ;;  %v1133_v8 = vshrl.u32 %v2928_v54, 16  ;;  %s184_s24 = sadd.s32 1, %s2723_s24  }
  0x1f   : >> { %v1030_v59 = vrot.slane %v1028_v57, 1  ;;  %v1035_v62 = vrot.slane %v1033_v60, 1  ;;  %v1140_v10 = vshll.u32 %v2704_v5, 16  ;;  %v2707_v14 = vld [vmem:[%s2796_s30 + $0x2c] ss:$0 sps:$4 sm:$0x11]  }
  0x20   : >> { %v2904_v50 = vsel %vm357_vm3, %v804_v47, %v808_v48  ;;  %v1877_v18 = vshll.u32 %v2707_v14, 16  ;;  %v2708_v22 = vld [vmem:[%s2796_s30 + $0x1c4] ss:$0 sps:$4 sm:$0x11]   ;;  %vm2046_vm4 = vcmask 257024   ;;  %p181_p4 = scmp.ge.s32.totalorder %s184_s24, 16  }
  0x21   : >> { %v1031_v61 = vor.u32 %v1030_v59, %v1026_v58  ;;  %v1142_v12 = vrot.slane %v1140_v10, 1 }
  0x22   : >> { %2337 = vmatmul.mubr.msk.bf16.vlgmr.msra.gmra.mrb[0].mxu0 %vm205_vm2, %v2694_v7  ;;  %2343 = vmatmul.mubr.msk.bf16.vlgmr.msra.gmra.mrb[0].mxu1 %vm205_vm2, %v368_v17  ;;  %v1135_v7 = vshll.u32 %v2928_v54, 16  ;;  %v1879_v20 = vrot.slane %v1877_v18, 1 }
  0x23   : >> { %2347 = vmatpush3.bf16.msra.mxu0 %v2818_v16  ;;  %2353 = vmatpush3.bf16.msra.mxu1 %v2818_v16  ;;  %v2952_v1 = vsel %vm357_vm3, %v1031_v61, %v1035_v62 }
  0x24   : >> { %2348 = vmatprep.mubr.msk.bf16.mxu0 %vm2726_vm1, %v2725_v2  ;;  %2354 = vmatprep.mubr.msk.bf16.mxu1 %vm2726_vm1, %v2725_v2  ;;  %v1137_v9 = vrot.slane %v1135_v7, 1 }
  0x25   : >> { %2358 = vmatprep.subr.bf16.mxu0 %v2725_v2  ;;  %2364 = vmatprep.subr.bf16.mxu1 %v2725_v2 }
  0x26   : >> { %v1138_v11 = vor.u32 %v1137_v9, %v1133_v8 }
  0x28   : >> { %v1143_v13 = vsel %vm357_vm3, %v1138_v11, %v1142_v12 }
  0x2e   : >> { %2349 = vmatmul.mubr.msk.bf16.vlgmr.msra.gmra.mrb[0].mxu0 %vm205_vm2, %v368_v17  ;;  %2355 = vmatmul.mubr.msk.bf16.vlgmr.msra.gmra.mrb[0].mxu1 %vm205_vm2, %v475_v26  ;;  %v1980_v26 = vshll.u32 %v2708_v22, 16 }
  0x2f   : >> { %2359 = vmatpush3.bf16.msra.mxu0 %v2837_v27  ;;  %2365 = vmatpush3.bf16.msra.mxu1 %v2837_v27 }
  0x30   : >> { %2360 = vmatprep.mubr.msk.bf16.mxu0 %vm2726_vm1, %v2725_v2  ;;  %2366 = vmatprep.mubr.msk.bf16.mxu1 %vm2726_vm1, %v2725_v2  ;;  %v1982_v28 = vrot.slane %v1980_v26, 1 }
  0x31   : >> { %2370 = vmatprep.subr.bf16.mxu0 %v2725_v2  ;;  %2376 = vmatprep.subr.bf16.mxu1 %v2725_v2 }
  0x3a   : >> { %2361 = vmatmul.mubr.msk.bf16.vlgmr.msra.gmra.mrb[0].mxu0 %vm205_vm2, %v2853_v29  ;;  %2367 = vmatmul.mubr.msk.bf16.vlgmr.msra.gmra.mrb[0].mxu1 %vm205_vm2, %v2856_v30 }
  0x3b   : >> { %2371 = vmatpush3.bf16.msra.mxu0 %v2859_v31  ;;  %2377 = vmatpush3.bf16.msra.mxu1 %v2859_v31 }
  0x3c   : >> { %2372 = vmatprep.mubr.msk.bf16.mxu0 %vm2726_vm1, %v2725_v2  ;;  %2378 = vmatprep.mubr.msk.bf16.mxu1 %vm2726_vm1, %v2725_v2 }
  0x3d   : >> { %2382 = vmatprep.subr.bf16.mxu0 %v2725_v2  ;;  %2388 = vmatprep.subr.bf16.mxu1 %v2725_v2 }
  0x46   : >> { %2373 = vmatmul.mubr.msk.bf16.vlgmr.msra.gmra.mrb[0].mxu0 %vm205_vm2, %v2856_v30  ;;  %2379 = vmatmul.mubr.msk.bf16.vlgmr.msra.gmra.mrb[0].mxu1 %vm205_vm2, %v2880_v40 }
  0x47   : >> { %2383 = vmatpush3.bf16.msra.mxu0 %v2883_v41  ;;  %2389 = vmatpush3.bf16.msra.mxu1 %v2883_v41 }
  0x48   : >> { %2384 = vmatprep.mubr.msk.bf16.mxu0 %vm2726_vm1, %v2725_v2  ;;  %2390 = vmatprep.mubr.msk.bf16.mxu1 %vm2726_vm1, %v2725_v2 }
  0x49   : >> { %2394 = vmatprep.subr.bf16.mxu0 %v2725_v2  ;;  %2400 = vmatprep.subr.bf16.mxu1 %v2725_v2 }
  0x52   : >> { %2385 = vmatmul.mubr.msk.bf16.vlgmr.msra.gmra.mrb[0].mxu0 %vm205_vm2, %v2880_v40  ;;  %2391 = vmatmul.mubr.msk.bf16.vlgmr.msra.gmra.mrb[0].mxu1 %vm205_vm2, %v2904_v50 }
  0x53   : >> { %2395 = vmatpush3.bf16.msra.mxu0 %v2907_v51  ;;  %2401 = vmatpush3.bf16.msra.mxu1 %v2907_v51 }
  0x54   : >> { %2396 = vmatprep.mubr.msk.bf16.mxu0 %vm2726_vm1, %v2725_v2  ;;  %2402 = vmatprep.mubr.msk.bf16.mxu1 %vm2726_vm1, %v2725_v2 }
  0x55   : >> { %2406 = vmatprep.subr.bf16.mxu0 %v2725_v2  ;;  %2412 = vmatprep.subr.bf16.mxu1 %v2725_v2 }
  0x5e   : >> { %2397 = vmatmul.mubr.msk.bf16.vlgmr.msra.gmra.mrb[0].mxu0 %vm205_vm2, %v2925_v53  ;;  %2403 = vmatmul.mubr.msk.bf16.vlgmr.msra.gmra.mrb[0].mxu1 %vm205_vm2, %v2928_v54 }
  0x5f   : >> { %2407 = vmatpush3.bf16.msra.mxu0 %v2931_v55  ;;  %2413 = vmatpush3.bf16.msra.mxu1 %v2931_v55 }
  0x60   : >> { %2408 = vmatprep.mubr.msk.bf16.mxu0 %vm2726_vm1, %v2725_v2  ;;  %2414 = vmatprep.mubr.msk.bf16.mxu1 %vm2726_vm1, %v2725_v2 }
  0x61   : >> { %2418 = vmatprep.subr.bf16.mxu0 %v2725_v2  ;;  %2424 = vmatprep.subr.bf16.mxu1 %v2725_v2 }
  0x6a   : >> { %2409 = vmatmul.mubr.msk.bf16.vlgmr.msra.gmra.mrb[0].mxu0 %vm205_vm2, %v2928_v54  ;;  %2415 = vmatmul.mubr.msk.bf16.vlgmr.msra.gmra.mrb[0].mxu1 %vm205_vm2, %v2952_v1 }
  0x6b   : >> { %2419 = vmatpush3.bf16.msra.mxu0 %v2955_v4  ;;  %2425 = vmatpush3.bf16.msra.mxu1 %v2955_v4 }
  0x6c   : >> { %2420 = vmatprep.mubr.msk.bf16.mxu0 %vm2726_vm1, %v2725_v2  ;;  %2426 = vmatprep.mubr.msk.bf16.mxu1 %vm2726_vm1, %v2725_v2 }
  0x6d   : >> { %2430 = vmatprep.subr.bf16.mxu0 %v2725_v2  ;;  %2436 = vmatprep.subr.bf16.mxu1 %v2725_v2 }
  0x76   : >> { %2421 = vmatmul.mubr.msk.bf16.vlgmr.msra.gmra.mrb[0].mxu0 %vm205_vm2, %v2952_v1  ;;  %2427 = vmatmul.mubr.msk.bf16.vlgmr.msra.gmra.mrb[0].mxu1 %vm205_vm2, %v1143_v13 }
  0x77   : >> { %2431 = vmatpush3.bf16.msra.mxu0 %v2781_v3  ;;  %2437 = vmatpush3.bf16.msra.mxu1 %v2781_v3  ;;  %v2705_v3 = vld [vmem:[%s2796_s30 + $0x24] sm:$0xff]  }
  0x78   : >> { %2432 = vmatprep.mubr.msk.bf16.mxu0 %vm2726_vm1, %v2725_v2  ;;  %2438 = vmatprep.mubr.msk.bf16.mxu1 %vm2726_vm1, %v2725_v2  ;;  %v1872_v15 = vshll.u32 %v2705_v3, 16 }
  0x79   : >> { %2442 = vmatprep.subr.bf16.mxu0 %v2725_v2  ;;  %2448 = vmatprep.subr.bf16.mxu1 %v2725_v2 }
  0x7a   : >> { %v1874_v17 = vrot.slane %v1872_v15, 1 }
  0x7e   : >> { %2433 = vmatmul.mubr.msk.bf16.vlgmr.msra.gmra.mrb[4].mxu0 %vm205_vm2, %v2853_v29  ;;  %2439 = vmatmul.mubr.msk.bf16.vlgmr.msra.gmra.mrb[4].mxu1 %vm205_vm2, %v2856_v30 }
  0x7f   : >> { %2443 = vmatpush3.bf16.msra.mxu0 %v2800_v6  ;;  %2449 = vmatpush3.bf16.msra.mxu1 %v2800_v6  ;;  %v2706_v6 = vld [vmem:[%s2796_s30 + $0x1bc] sm:$0xff]  }
  0x80   : >> { %2444 = vmatprep.mubr.msk.bf16.mxu0 %vm2726_vm1, %v2725_v2  ;;  %2450 = vmatprep.mubr.msk.bf16.mxu1 %vm2726_vm1, %v2725_v2  ;;  %v1975_v23 = vshll.u32 %v2706_v6, 16  ;;  %v1973_v24 = vshrl.u32 %v2706_v6, 16 }
  0x81   : >> { %2454 = vmatprep.subr.bf16.mxu0 %v2725_v2  ;;  %2460 = vmatprep.subr.bf16.mxu1 %v2725_v2 }
  0x82   : >> { %v1977_v25 = vrot.slane %v1975_v23, 1 }
  0x8a   : >> { %2445 = vmatmul.mubr.msk.bf16.vlgmr.msra.gmra.mrb[4].mxu0 %vm205_vm2, %v2856_v30  ;;  %2451 = vmatmul.mubr.msk.bf16.vlgmr.msra.gmra.mrb[4].mxu1 %vm205_vm2, %v2880_v40 }
  0x8b   : >> { %2455 = vmatpush3.bf16.msra.mxu0 %v2818_v16  ;;  %2461 = vmatpush3.bf16.msra.mxu1 %v2818_v16  ;;  %v1870_v16 = vshrl.u32 %v2705_v3, 16 }
  0x8c   : >> { %2456 = vmatprep.mubr.msk.bf16.mxu0 %vm2726_vm1, %v2725_v2  ;;  %2462 = vmatprep.mubr.msk.bf16.mxu1 %vm2726_vm1, %v2725_v2 }
  0x8d   : >> { %2466 = vmatprep.subr.bf16.mxu0 %v2725_v2  ;;  %2472 = vmatprep.subr.bf16.mxu1 %v2725_v2  ;;  %v1875_v19 = vor.u32 %v1874_v17, %v1870_v16 }
  0x8f   : >> { %v1880_v21 = vsel %vm357_vm3, %v1875_v19, %v1879_v20 }
  0x96   : >> { %2457 = vmatmul.mubr.msk.bf16.vlgmr.msra.gmra.mrb[4].mxu0 %vm205_vm2, %v2880_v40  ;;  %2463 = vmatmul.mubr.msk.bf16.vlgmr.msra.gmra.mrb[4].mxu1 %vm205_vm2, %v2904_v50 }
  0x97   : >> { %2467 = vmatpush3.bf16.msra.mxu0 %v2837_v27  ;;  %2473 = vmatpush3.bf16.msra.mxu1 %v2837_v27  ;;  %v1978_v27 = vor.u32 %v1977_v25, %v1973_v24 }
  0x98   : >> { %2468 = vmatprep.mubr.msk.bf16.mxu0 %vm2726_vm1, %v2725_v2  ;;  %2474 = vmatprep.mubr.msk.bf16.mxu1 %vm2726_vm1, %v2725_v2 }
  0x99   : >> { %2478 = vmatprep.subr.bf16.mxu0 %v2725_v2  ;;  %2484 = vmatprep.subr.bf16.mxu1 %v2725_v2  ;;  %v1983_v29 = vsel %vm357_vm3, %v1978_v27, %v1982_v28 }
  0xa2   : >> { %2469 = vmatmul.mubr.msk.bf16.vlgmr.msra.gmra.mrb[4].mxu0 %vm205_vm2, %v2925_v53  ;;  %2475 = vmatmul.mubr.msk.bf16.vlgmr.msra.gmra.mrb[4].mxu1 %vm205_vm2, %v2928_v54 }
  0xa3   : >> { %2479 = vmatpush3.bf16.msra.mxu0 %v2859_v31  ;;  %2485 = vmatpush3.bf16.msra.mxu1 %v2859_v31 }
  0xa4   : >> { %2480 = vmatprep.mubr.msk.bf16.mxu0 %vm2726_vm1, %v2725_v2  ;;  %2486 = vmatprep.mubr.msk.bf16.mxu1 %vm2726_vm1, %v2725_v2 }
  0xa5   : >> { %2490 = vmatprep.subr.bf16.mxu0 %v2725_v2  ;;  %2496 = vmatprep.subr.bf16.mxu1 %v2725_v2 }
  0xae   : >> { %2481 = vmatmul.mubr.msk.bf16.vlgmr.msra.gmra.mrb[4].mxu0 %vm205_vm2, %v2928_v54  ;;  %2487 = vmatmul.mubr.msk.bf16.vlgmr.msra.gmra.mrb[4].mxu1 %vm205_vm2, %v2952_v1 }
  0xaf   : >> { %2491 = vmatpush3.bf16.msra.mxu0 %v2883_v41  ;;  %2497 = vmatpush3.bf16.msra.mxu1 %v2883_v41 }
  0xb0   : >> { %2492 = vmatprep.mubr.msk.bf16.mxu0 %vm2726_vm1, %v2725_v2  ;;  %2498 = vmatprep.mubr.msk.bf16.mxu1 %vm2726_vm1, %v2725_v2 }
  0xb1   : >> { %2502 = vmatprep.subr.bf16.mxu0 %v2725_v2  ;;  %2508 = vmatprep.subr.bf16.mxu1 %v2725_v2 }
  0xba   : >> { %2493 = vmatmul.mubr.msk.bf16.vlgmr.msra.gmra.mrb[4].mxu0 %vm205_vm2, %v2952_v1  ;;  %2499 = vmatmul.mubr.msk.bf16.vlgmr.msra.gmra.mrb[4].mxu1 %vm205_vm2, %v1143_v13 }
  0xbb   : >> { %2503 = vmatpush3.bf16.msra.mxu0 %v2907_v51  ;;  %2509 = vmatpush3.bf16.msra.mxu1 %v2907_v51 }
  0xbc   : >> { %2504 = vmatprep.mubr.msk.bf16.mxu0 %vm2726_vm1, %v2725_v2  ;;  %2510 = vmatprep.mubr.msk.bf16.mxu1 %vm2726_vm1, %v2725_v2 }
  0xbd   : >> { %2514 = vmatprep.subr.bf16.mxu0 %v2725_v2  ;;  %2520 = vmatprep.subr.bf16.mxu1 %v2725_v2 }
  0xc6   : >> { %2505 = vmatmul.mubr.msk.bf16.vlgmr.msra.gmra.mrb[4].mxu0 %vm205_vm2, %v2705_v3  ;;  %2511 = vmatmul.mubr.msk.bf16.vlgmr.msra.gmra.mrb[4].mxu1 %vm205_vm2, %v2706_v6 }
  0xc7   : >> { %2515 = vmatpush3.bf16.msra.mxu0 %v2931_v55  ;;  %2521 = vmatpush3.bf16.msra.mxu1 %v2931_v55 }
  0xc8   : >> { %2516 = vmatprep.mubr.msk.bf16.mxu0 %vm2726_vm1, %v2725_v2  ;;  %2522 = vmatprep.mubr.msk.bf16.mxu1 %vm2726_vm1, %v2725_v2 }
  0xc9   : >> { %2526 = vmatprep.subr.bf16.mxu0 %v2725_v2  ;;  %2532 = vmatprep.subr.bf16.mxu1 %v2725_v2 }
  0xd2   : >> { %2517 = vmatmul.mubr.msk.bf16.vlgmr.msra.gmra.mrb[4].mxu0 %vm205_vm2, %v2706_v6  ;;  %2523 = vmatmul.mubr.msk.bf16.vlgmr.msra.gmra.mrb[4].mxu1 %vm205_vm2, %v1880_v21 }
  0xd3   : >> { %2527 = vmatpush3.bf16.msra.mxu0 %v2955_v4  ;;  %2533 = vmatpush3.bf16.msra.mxu1 %v2955_v4 }
  0xd4   : >> { %2528 = vmatprep.mubr.msk.bf16.mxu0 %vm2726_vm1, %v2725_v2  ;;  %2534 = vmatprep.mubr.msk.bf16.mxu1 %vm2726_vm1, %v2725_v2 }
  0xde   : >> { %2529 = vmatmul.mubr.msk.bf16.vlgmr.msra.gmra.mrb[4].mxu0 %vm205_vm2, %v1880_v21  ;;  %2535 = vmatmul.mubr.msk.bf16.vlgmr.msra.gmra.mrb[4].mxu1 %vm205_vm2, %v1983_v29 }
 0x149   : >> { %v1121_v30 = vpop.f32.mrb[0].mxu0  ;;  %v1181_v32 = vpop.f32.mrb[0].mxu1 }
 0x14a   : >> { %v2538_v31 = vadd.f32 %v2758_v0, %v1121_v30  ;;  %v2422_v33 = vpop.f32.mrb[1].mxu0  ;;  %v2540_v34 = vadd.f32 %v2758_v0, %v1181_v32  ;;  %v2428_v35 = vpop.f32.mrb[1].mxu1 }
 0x14b   : >> { %v1124_v36 = vpop.f32.mrb[2].mxu0  ;;  %v1184_v2 = vpop.f32.mrb[2].mxu1 }
 0x14c   : >> { %v2539_v37 = vadd.f32 %v2758_v0, %v1124_v36  ;;  %v2423_v38 = vpop.f32.mrb[3].mxu0  ;;  %v1190_v39 = vmax.f32 %v2538_v31, %v2540_v34  ;;  %v2541_v40 = vadd.f32 %v2758_v0, %v1184_v2  ;;  %v2429_v41 = vpop.f32.mrb[3].mxu1 }
 0x14e   : >> { %v1191_v42 = vmax.f32 %v2539_v37, %v2541_v40 }
 0x1b1   : >> { %v1961_v43 = vpop.f32.mrb[4].mxu0  ;;  %v2021_v45 = vpop.f32.mrb[4].mxu1 }
 0x1b2   : >> { %v2542_v44 = vadd.f32 %v2758_v0, %v1961_v43  ;;  %v2530_v46 = vpop.f32.mrb[5].mxu0  ;;  %v2544_v47 = vadd.f32 %v2758_v0, %v2021_v45  ;;  %v2536_v48 = vpop.f32.mrb[5].mxu1 }
 0x1b3   : >> { %v1964_v49 = vpop.f32.mrb[6].mxu0  ;;  %v2024_v51 = vpop.f32.mrb[6].mxu1 }
 0x1b4   : >> { %v2543_v50 = vadd.f32 %v2758_v0, %v1964_v49  ;;  %v2531_v52 = vpop.f32.mrb[7].mxu0  ;;  %v2030_v53 = vmax.f32 %v2542_v44, %v2544_v47  ;;  %v2545_v54 = vadd.f32 %v2758_v0, %v2024_v51  ;;  %v2537_v55 = vpop.f32.mrb[7].mxu1 }
 0x1b6   : >> { %v2032_v56 = vmax.f32 %v1190_v39, %v2030_v53  ;;  %v2031_v57 = vmax.f32 %v2543_v50, %v2545_v54 }
 0x1b8   : >> { %v2034_v58 = vmax.f32 %v2032_v56, 0.0  ;;  %v2033_v59 = vmax.f32 %v1191_v42, %v2031_v57  ;;  %183 = sbr.rel (!%p181_p4) target bundleno = 17 (0x11), region = 78 }
 0x1ba   : >> { %v2247_v60 = vpack.c.bf16 %v2034_v58, %v2034_v58  ;;  %v2035_v61 = vmax.f32 %v2033_v59, 0.0 }
 0x1bc   : >> { %2047 = vst.msk [vmem:[%s2045_s21] sm:$0xf] %vm2046_vm4, %v2247_v60  ;;  %v2248_v62 = vpack.c.bf16 %v2035_v61, %v2035_v61 }
 0x1be   : >> { %2048 = vst.msk [vmem:[%s2045_s21 + $0x4] sm:$0xf] %vm2046_vm4, %v2248_v62 }
 0x1bf PF: > { %s13_s12 = sadd.s32 1, %s2719_s12  }
 0x1c0   : > { %p10_p5 = scmp.ge.s32.totalorder %s13_s12, 4  }
 0x1c2   :  { %12 = sbr.rel (!%p10_p5) target bundleno = 1 (0x1), region = 89 }

// kernel: crnn_ser_forward.8
= control target key start
LH: loop header
LB: loop body
LE: loop exit
PB: predicated region body
PF: predicated region fallthrough
CT: control target
= control target key end

     0   :  { %s2825_s12 = smov 0   ;;  %s3271_s0 = inlined_call_operand.vmem [shape: bf16[2,36,9,32], index: 0, kind: input, shape index: {}]   ;;  %s3272_s1 = inlined_call_operand.vmem [shape: bf16[288,64], index: 1, kind: input, shape index: {}]   ;;  %s3273_s2 = inlined_call_operand.vmem [shape: f32[1,64], index: 2, kind: input, shape index: {}]   ;;  %s3274_s3 = inlined_call_operand.vmem [shape: bf16[2,8,8,64], index: 3, kind: output, shape index: {}]  }
   0x1 LB: > { %s2099_s13 = sadd.s32 4294967295, %s2797_s12   ;;  %p2103_p0 = scmp.ge.s32.totalorder %s2797_s12, 1  ;;  %s2797_s12 = sphi %s2825_s12, %s13_s12  }
   0x2   : > { %p137_p1 = scmp.lt.s32.totalorder %s2797_s12, 3 }
   0x4   : > { %p138_p2 = pnand %p2103_p0, %p137_p1 }
   0x5   : > { %p161_p3 = scmp.lt.s32.totalorder (!%p138_p2), %s2099_s13, 1  ;;  %v2836_v0 = vld [vmem:[%s3273_s2] ss:$0 sm:$0xff] (!%p138_p2)  ;;  %s2848_s24 = smov (!%p138_p2), 0  }
   0x6   : > { %141 = sbr.rel (%p138_p2) target bundleno = 449 (0x1c1), region = 32 }
   0xd   : > { %s3276_s13 = smov (!%p161_p3, %s2099_s13), 1 }
   0xe   : > { %s2742_s16 = smul.u32 288, %s3276_s13  ;;  %s2204_s17 = sshll.u32 %s3276_s13, 5 }
   0xf   : > { %s2841_s20 = scalar_lea.vmem %s3274_s3, %s2204_s17 }
  0x10   : > { %s2846_s23 = scalar_lea.vmem %s3271_s0, %s2742_s16 }
  0x11 LB: >> { %v2856_v1 = vld [vmem:[%s3272_s1] sm:$0xff]   ;;  %v2803_v2 = vmov 0.0   ;;  %v2865_v3 = vld [vmem:[%s3272_s1 + $0x8] sm:$0xff]   ;;  %s2206_s29 = sshll.u32 %s2801_s24, 4  ;;  %vm2804_vm0 = vmmov 0   ;;  %vm213_vm1 = vcmask 261120   ;;  %s2801_s24 = sphi %s2848_s24, %s184_s24  }
  0x12   : >> { %2322 = vmatprep.subr.bf16.mxu0 %v2803_v2  ;;  %2330 = vmatprep.subr.bf16.mxu1 %v2803_v2  ;;  %s2871_s30 = scalar_lea.vmem %s2846_s23, %s2206_s29  ;;  %v2882_v7 = vld [vmem:[%s3272_s1 + $0x10] sm:$0xff]   ;;  %v2896_v10 = vld [vmem:[%s3272_s1 + $0x18] sm:$0xff]   ;;  %v2912_v16 = vld [vmem:[%s3272_s1 + $0x20] sm:$0xff]   ;;  %vm2005_vm2 = vcmask 519168  }
  0x13   : >> { %2323 = vmatpush3.bf16.msra.mxu0 %v2856_v1  ;;  %2331 = vmatpush3.bf16.msra.mxu1 %v2856_v1  ;;  %v189_v4 = vld [vmem:[%s2871_s30] sm:$0xf]  ;;  %v190_v5 = vld [vmem:[%s2871_s30 + $0x4] sm:$0x1]  ;;  %v2113_v8 = vld [vmem:[%s2871_s30 + $0x90] sm:$0xf] }
  0x14   : >> { %2324 = vmatprep.subr.bf16.mxu0 %v2803_v2  ;;  %2332 = vmatprep.subr.bf16.mxu1 %v2803_v2  ;;  %v2122_v6 = vcombine.low %v189_v4, %v190_v5  ;;  %v2114_v13 = vld [vmem:[%s2871_s30 + $0x94] sm:$0x1]  ;;  %v2919_v18 = vld [vmem:[%s3272_s1 + $0x28] sm:$0xff]   ;;  %v2945_v23 = vld [vmem:[%s3272_s1 + $0x38] sm:$0xff]  }
  0x15   : >> { %2326 = vmatprep.mubr.msk.bf16.mxu0 %vm2804_vm0, %v2803_v2  ;;  %2334 = vmatprep.mubr.msk.bf16.mxu1 %vm2804_vm0, %v2803_v2  ;;  %v2127_v15 = vcombine.low %v2113_v8, %v2114_v13  ;;  %v2936_v22 = vld [vmem:[%s3272_s1 + $0x30] sm:$0xff]   ;;  %v2132_v24 = vld [vmem:[%s2871_s30 + $0xc] sm:$0x1]  ;;  %v2959_v25 = vld [vmem:[%s2871_s30 + $0x8] sm:$0xf] }
  0x16   : >> { %v367_v9 = vshll.u32 %v2122_v6, 16  ;;  %v365_v11 = vshrl.u32 %v2122_v6, 16  ;;  %v2144_v26 = vcombine.low %v2959_v25, %v2132_v24  ;;  %v2963_v27 = vld [vmem:[%s2871_s30 + $0x98] sm:$0xf]  ;;  %v2968_v28 = vld [vmem:[%s3272_s1 + $0x40] sm:$0xff]   ;;  %v2979_v30 = vld [vmem:[%s3272_s1 + $0x48] sm:$0xff]  }
  0x17   : >> { %2325 = vmatpush3.bf16.msra.mxu0 %v2865_v3  ;;  %2333 = vmatpush3.bf16.msra.mxu1 %v2865_v3  ;;  %v480_v17 = vshll.u32 %v2127_v15, 16  ;;  %v478_v19 = vshrl.u32 %v2127_v15, 16  ;;  %v2136_v33 = vld [vmem:[%s2871_s30 + $0x9c] sm:$0x1]  ;;  %v2998_v36 = vld [vmem:[%s3272_s1 + $0x50] sm:$0xff]   ;;  %v3026_v42 = vld [vmem:[%s3272_s1 + $0x60] sm:$0xff]  }
  0x18   : >> { %2338 = vmatprep.subr.bf16.mxu0 %v2803_v2  ;;  %2346 = vmatprep.subr.bf16.mxu1 %v2803_v2  ;;  %v369_v12 = vrot.slane %v367_v9, 1  ;;  %v709_v29 = vshll.u32 %v2144_v26, 16  ;;  %v707_v31 = vshrl.u32 %v2144_v26, 16  ;;  %v2149_v34 = vcombine.low %v2963_v27, %v2136_v33  ;;  %v3009_v38 = vld [vmem:[%s3272_s1 + $0x58] sm:$0xff]   ;;  %v3037_v43 = vld [vmem:[%s3272_s1 + $0x68] sm:$0xff]   ;;  %v3060_v48 = vld [vmem:[%s3272_s1 + $0x70] sm:$0xff]  }
  0x19   : >> { %v482_v20 = vrot.slane %v480_v17, 1  ;;  %v2154_v44 = vld [vmem:[%s2871_s30 + $0x14] sm:$0x1]  ;;  %v3051_v45 = vld [vmem:[%s2871_s30 + $0x10] sm:$0xf]  ;;  %v3071_v50 = vld [vmem:[%s3272_s1 + $0x78] sm:$0xff]  }
  0x1a   : >> { %2327 = vmatmul.mubr.msk.bf16.vlgmr.msra.gmra.mrb[0].mxu0 %vm213_vm1, %v189_v4  ;;  %2335 = vmatmul.mubr.msk.bf16.vlgmr.msra.gmra.mrb[0].mxu1 %vm213_vm1, %v2113_v8  ;;  %v370_v14 = vor.u32 %v369_v12, %v365_v11  ;;  %v711_v32 = vrot.slane %v709_v29, 1  ;;  %v822_v37 = vshll.u32 %v2149_v34, 16  ;;  %v820_v39 = vshrl.u32 %v2149_v34, 16  ;;  %v3055_v47 = vld [vmem:[%s2871_s30 + $0xa0] sm:$0xf]  ;;  %v3101_v58 = vld [vmem:[%s3272_s1 + $0x88] sm:$0xff]  }
  0x1b   : >> { %2339 = vmatpush3.bf16.msra.mxu0 %v2882_v7  ;;  %2347 = vmatpush3.bf16.msra.mxu1 %v2882_v7  ;;  %v483_v21 = vor.u32 %v482_v20, %v478_v19  ;;  %v2166_v46 = vcombine.low %v3051_v45, %v2154_v44  ;;  %v2158_v53 = vld [vmem:[%s2871_s30 + $0xa4] sm:$0x1]  ;;  %v2188_v62 = vld [vmem:[%s2871_s30 + $0x1c] sm:$0x1]  ;;  %v2187_v63 = vld [vmem:[%s2871_s30 + $0x18] sm:$0xf] }
  0x1c   : >> { %2340 = vmatprep.subr.bf16.mxu0 %v2803_v2  ;;  %2348 = vmatprep.subr.bf16.mxu1 %v2803_v2  ;;  %v2993_v35 = vor.u32 %v711_v32, %v707_v31  ;;  %v824_v40 = vrot.slane %v822_v37, 1  ;;  %v2171_v54 = vcombine.low %v3055_v47, %v2158_v53  ;;  %v3090_v56 = vld [vmem:[%s3272_s1 + $0x80] sm:$0xff]  }
  0x1d   : >> { %2342 = vmatprep.mubr.msk.bf16.mxu0 %vm2804_vm0, %v2803_v2  ;;  %2350 = vmatprep.mubr.msk.bf16.mxu1 %vm2804_vm0, %v2803_v2  ;;  %v1051_v49 = vshll.u32 %v2166_v46, 16  ;;  %v1049_v51 = vshrl.u32 %v2166_v46, 16 }
  0x1e   : >> { %v3021_v41 = vor.u32 %v824_v40, %v820_v39  ;;  %v1164_v57 = vshll.u32 %v2171_v54, 16  ;;  %v1162_v59 = vshrl.u32 %v2171_v54, 16 }
  0x1f   : >> { %2341 = vmatpush3.bf16.msra.mxu0 %v2896_v10  ;;  %2349 = vmatpush3.bf16.msra.mxu1 %v2896_v10  ;;  %v1053_v52 = vrot.slane %v1051_v49, 1 }
  0x20   : >> { %2354 = vmatprep.subr.bf16.mxu0 %v2803_v2  ;;  %2362 = vmatprep.subr.bf16.mxu1 %v2803_v2  ;;  %v1166_v60 = vrot.slane %v1164_v57, 1 }
  0x21   : >> { %v3085_v55 = vor.u32 %v1053_v52, %v1049_v51 }
  0x22   : >> { %v3113_v61 = vor.u32 %v1166_v60, %v1162_v59 }
  0x26   : >> { %2343 = vmatmul.mubr.msk.bf16.vlgmr.msra.gmra.mrb[0].mxu0 %vm213_vm1, %v2113_v8  ;;  %2351 = vmatmul.mubr.msk.bf16.vlgmr.msra.gmra.mrb[0].mxu1 %vm213_vm1, %v370_v14 }
  0x27   : >> { %2355 = vmatpush3.bf16.msra.mxu0 %v2912_v16  ;;  %2363 = vmatpush3.bf16.msra.mxu1 %v2912_v16 }
  0x28   : >> { %2356 = vmatprep.subr.bf16.mxu0 %v2803_v2  ;;  %2364 = vmatprep.subr.bf16.mxu1 %v2803_v2 }
  0x29   : >> { %2358 = vmatprep.mubr.msk.bf16.mxu0 %vm2804_vm0, %v2803_v2  ;;  %2366 = vmatprep.mubr.msk.bf16.mxu1 %vm2804_vm0, %v2803_v2 }
  0x2b   : >> { %2357 = vmatpush3.bf16.msra.mxu0 %v2919_v18  ;;  %2365 = vmatpush3.bf16.msra.mxu1 %v2919_v18 }
  0x2c   : >> { %2370 = vmatprep.subr.bf16.mxu0 %v2803_v2  ;;  %2378 = vmatprep.subr.bf16.mxu1 %v2803_v2 }
  0x32   : >> { %2359 = vmatmul.mubr.msk.bf16.vlgmr.msra.gmra.mrb[0].mxu0 %vm213_vm1, %v370_v14  ;;  %2367 = vmatmul.mubr.msk.bf16.vlgmr.msra.gmra.mrb[0].mxu1 %vm213_vm1, %v483_v21 }
  0x33   : >> { %2371 = vmatpush3.bf16.msra.mxu0 %v2936_v22  ;;  %2379 = vmatpush3.bf16.msra.mxu1 %v2936_v22 }
  0x34   : >> { %2372 = vmatprep.subr.bf16.mxu0 %v2803_v2  ;;  %2380 = vmatprep.subr.bf16.mxu1 %v2803_v2 }
  0x35   : >> { %2374 = vmatprep.mubr.msk.bf16.mxu0 %vm2804_vm0, %v2803_v2  ;;  %2382 = vmatprep.mubr.msk.bf16.mxu1 %vm2804_vm0, %v2803_v2 }
  0x37   : >> { %2373 = vmatpush3.bf16.msra.mxu0 %v2945_v23  ;;  %2381 = vmatpush3.bf16.msra.mxu1 %v2945_v23 }
  0x38   : >> { %2386 = vmatprep.subr.bf16.mxu0 %v2803_v2  ;;  %2394 = vmatprep.subr.bf16.mxu1 %v2803_v2 }
  0x3e   : >> { %2375 = vmatmul.mubr.msk.bf16.vlgmr.msra.gmra.mrb[0].mxu0 %vm213_vm1, %v2959_v25  ;;  %2383 = vmatmul.mubr.msk.bf16.vlgmr.msra.gmra.mrb[0].mxu1 %vm213_vm1, %v2963_v27 }
  0x3f   : >> { %2387 = vmatpush3.bf16.msra.mxu0 %v2968_v28  ;;  %2395 = vmatpush3.bf16.msra.mxu1 %v2968_v28 }
  0x40   : >> { %2388 = vmatprep.subr.bf16.mxu0 %v2803_v2  ;;  %2396 = vmatprep.subr.bf16.mxu1 %v2803_v2 }
  0x41   : >> { %2390 = vmatprep.mubr.msk.bf16.mxu0 %vm2804_vm0, %v2803_v2  ;;  %2398 = vmatprep.mubr.msk.bf16.mxu1 %vm2804_vm0, %v2803_v2 }
  0x43   : >> { %2389 = vmatpush3.bf16.msra.mxu0 %v2979_v30  ;;  %2397 = vmatpush3.bf16.msra.mxu1 %v2979_v30 }
  0x44   : >> { %2402 = vmatprep.subr.bf16.mxu0 %v2803_v2  ;;  %2410 = vmatprep.subr.bf16.mxu1 %v2803_v2 }
  0x4a   : >> { %2391 = vmatmul.mubr.msk.bf16.vlgmr.msra.gmra.mrb[0].mxu0 %vm213_vm1, %v2963_v27  ;;  %2399 = vmatmul.mubr.msk.bf16.vlgmr.msra.gmra.mrb[0].mxu1 %vm213_vm1, %v2993_v35 }
  0x4b   : >> { %2403 = vmatpush3.bf16.msra.mxu0 %v2998_v36  ;;  %2411 = vmatpush3.bf16.msra.mxu1 %v2998_v36 }
  0x4c   : >> { %2404 = vmatprep.subr.bf16.mxu0 %v2803_v2  ;;  %2412 = vmatprep.subr.bf16.mxu1 %v2803_v2 }
  0x4d   : >> { %2406 = vmatprep.mubr.msk.bf16.mxu0 %vm2804_vm0, %v2803_v2  ;;  %2414 = vmatprep.mubr.msk.bf16.mxu1 %vm2804_vm0, %v2803_v2 }
  0x4f   : >> { %2405 = vmatpush3.bf16.msra.mxu0 %v3009_v38  ;;  %2413 = vmatpush3.bf16.msra.mxu1 %v3009_v38 }
  0x50   : >> { %2418 = vmatprep.subr.bf16.mxu0 %v2803_v2  ;;  %2426 = vmatprep.subr.bf16.mxu1 %v2803_v2 }
  0x56   : >> { %2407 = vmatmul.mubr.msk.bf16.vlgmr.msra.gmra.mrb[0].mxu0 %vm213_vm1, %v2993_v35  ;;  %2415 = vmatmul.mubr.msk.bf16.vlgmr.msra.gmra.mrb[0].mxu1 %vm213_vm1, %v3021_v41 }
  0x57   : >> { %2419 = vmatpush3.bf16.msra.mxu0 %v3026_v42  ;;  %2427 = vmatpush3.bf16.msra.mxu1 %v3026_v42 }
  0x58   : >> { %2420 = vmatprep.subr.bf16.mxu0 %v2803_v2  ;;  %2428 = vmatprep.subr.bf16.mxu1 %v2803_v2 }
  0x59   : >> { %2422 = vmatprep.mubr.msk.bf16.mxu0 %vm2804_vm0, %v2803_v2  ;;  %2430 = vmatprep.mubr.msk.bf16.mxu1 %vm2804_vm0, %v2803_v2 }
  0x5b   : >> { %2421 = vmatpush3.bf16.msra.mxu0 %v3037_v43  ;;  %2429 = vmatpush3.bf16.msra.mxu1 %v3037_v43 }
  0x5c   : >> { %2434 = vmatprep.subr.bf16.mxu0 %v2803_v2  ;;  %2442 = vmatprep.subr.bf16.mxu1 %v2803_v2 }
  0x62   : >> { %2423 = vmatmul.mubr.msk.bf16.vlgmr.msra.gmra.mrb[0].mxu0 %vm213_vm1, %v3051_v45  ;;  %2431 = vmatmul.mubr.msk.bf16.vlgmr.msra.gmra.mrb[0].mxu1 %vm213_vm1, %v3055_v47 }
  0x63   : >> { %2435 = vmatpush3.bf16.msra.mxu0 %v3060_v48  ;;  %2443 = vmatpush3.bf16.msra.mxu1 %v3060_v48 }
  0x64   : >> { %2436 = vmatprep.subr.bf16.mxu0 %v2803_v2  ;;  %2444 = vmatprep.subr.bf16.mxu1 %v2803_v2 }
  0x65   : >> { %2438 = vmatprep.mubr.msk.bf16.mxu0 %vm2804_vm0, %v2803_v2  ;;  %2446 = vmatprep.mubr.msk.bf16.mxu1 %vm2804_vm0, %v2803_v2 }
  0x67   : >> { %2437 = vmatpush3.bf16.msra.mxu0 %v3071_v50  ;;  %2445 = vmatpush3.bf16.msra.mxu1 %v3071_v50 }
  0x68   : >> { %2450 = vmatprep.subr.bf16.mxu0 %v2803_v2  ;;  %2458 = vmatprep.subr.bf16.mxu1 %v2803_v2 }
  0x6e   : >> { %2439 = vmatmul.mubr.msk.bf16.vlgmr.msra.gmra.mrb[0].mxu0 %vm213_vm1, %v3055_v47  ;;  %2447 = vmatmul.mubr.msk.bf16.vlgmr.msra.gmra.mrb[0].mxu1 %vm213_vm1, %v3085_v55 }
  0x6f   : >> { %2451 = vmatpush3.bf16.msra.mxu0 %v3090_v56  ;;  %2459 = vmatpush3.bf16.msra.mxu1 %v3090_v56 }
  0x70   : >> { %2452 = vmatprep.subr.bf16.mxu0 %v2803_v2  ;;  %2460 = vmatprep.subr.bf16.mxu1 %v2803_v2 }
  0x71   : >> { %2454 = vmatprep.mubr.msk.bf16.mxu0 %vm2804_vm0, %v2803_v2  ;;  %2462 = vmatprep.mubr.msk.bf16.mxu1 %vm2804_vm0, %v2803_v2 }
  0x73   : >> { %2453 = vmatpush3.bf16.msra.mxu0 %v3101_v58  ;;  %2461 = vmatpush3.bf16.msra.mxu1 %v3101_v58 }
  0x74   : >> { %2466 = vmatprep.subr.bf16.mxu0 %v2803_v2  ;;  %2474 = vmatprep.subr.bf16.mxu1 %v2803_v2 }
  0x7a   : >> { %2455 = vmatmul.mubr.msk.bf16.vlgmr.msra.gmra.mrb[0].mxu0 %vm213_vm1, %v3085_v55  ;;  %2463 = vmatmul.mubr.msk.bf16.vlgmr.msra.gmra.mrb[0].mxu1 %vm213_vm1, %v3113_v61 }
  0x7b   : >> { %2467 = vmatpush3.bf16.msra.mxu0 %v2856_v1  ;;  %2475 = vmatpush3.bf16.msra.mxu1 %v2856_v1  ;;  %v2196_v1 = vcombine.low %v2187_v63, %v2188_v62 }
  0x7c   : >> { %2468 = vmatprep.subr.bf16.mxu0 %v2803_v2  ;;  %2476 = vmatprep.subr.bf16.mxu1 %v2803_v2 }
  0x7d   : >> { %2470 = vmatprep.mubr.msk.bf16.mxu0 %vm2804_vm0, %v2803_v2  ;;  %2478 = vmatprep.mubr.msk.bf16.mxu1 %vm2804_vm0, %v2803_v2  ;;  %v1854_v4 = vshll.u32 %v2196_v1, 16  ;;  %v1852_v5 = vshrl.u32 %v2196_v1, 16 }
  0x7f   : >> { %2469 = vmatpush3.bf16.msra.mxu0 %v2865_v3  ;;  %2477 = vmatpush3.bf16.msra.mxu1 %v2865_v3  ;;  %v2191_v3 = vld [vmem:[%s2871_s30 + $0xa8] sm:$0xf]  ;;  %v1856_v6 = vrot.slane %v1854_v4, 1 }
  0x80   : >> { %2482 = vmatprep.subr.bf16.mxu0 %v2803_v2  ;;  %2490 = vmatprep.subr.bf16.mxu1 %v2803_v2 }
  0x81   : >> { %v1857_v8 = vor.u32 %v1856_v6, %v1852_v5 }
  0x82   : >> { %2471 = vmatmul.mubr.msk.bf16.vlgmr.msra.gmra.mrb[4].mxu0 %vm213_vm1, %v2959_v25  ;;  %2479 = vmatmul.mubr.msk.bf16.vlgmr.msra.gmra.mrb[4].mxu1 %vm213_vm1, %v2963_v27 }
  0x83   : >> { %2483 = vmatpush3.bf16.msra.mxu0 %v2882_v7  ;;  %2491 = vmatpush3.bf16.msra.mxu1 %v2882_v7  ;;  %v2192_v7 = vld [vmem:[%s2871_s30 + $0xac] sm:$0x1]  ;;  %s2201_s30 = sshll.u32 %s2801_s24, 2  ;;  %s184_s24 = sadd.s32 1, %s2801_s24  }
  0x84   : >> { %2484 = vmatprep.subr.bf16.mxu0 %v2803_v2  ;;  %2492 = vmatprep.subr.bf16.mxu1 %v2803_v2  ;;  %v2199_v9 = vcombine.low %v2191_v3, %v2192_v7  ;;  %s2004_s15 = scalar_lea.vmem %s2841_s20, %s2201_s30  ;;  %p181_p4 = scmp.ge.s32.totalorder %s184_s24, 8  }
  0x85   : >> { %2486 = vmatprep.mubr.msk.bf16.mxu0 %vm2804_vm0, %v2803_v2  ;;  %2494 = vmatprep.mubr.msk.bf16.mxu1 %vm2804_vm0, %v2803_v2 }
  0x86   : >> { %v1949_v11 = vshrl.u32 %v2199_v9, 16 }
  0x87   : >> { %2485 = vmatpush3.bf16.msra.mxu0 %v2896_v10  ;;  %2493 = vmatpush3.bf16.msra.mxu1 %v2896_v10  ;;  %v1951_v10 = vshll.u32 %v2199_v9, 16 }
  0x88   : >> { %2498 = vmatprep.subr.bf16.mxu0 %v2803_v2  ;;  %2506 = vmatprep.subr.bf16.mxu1 %v2803_v2 }
  0x89   : >> { %v1953_v12 = vrot.slane %v1951_v10, 1 }
  0x8b   : >> { %v1954_v13 = vor.u32 %v1953_v12, %v1949_v11 }
  0x8e   : >> { %2487 = vmatmul.mubr.msk.bf16.vlgmr.msra.gmra.mrb[4].mxu0 %vm213_vm1, %v2963_v27  ;;  %2495 = vmatmul.mubr.msk.bf16.vlgmr.msra.gmra.mrb[4].mxu1 %vm213_vm1, %v2993_v35 }
  0x8f   : >> { %2499 = vmatpush3.bf16.msra.mxu0 %v2912_v16  ;;  %2507 = vmatpush3.bf16.msra.mxu1 %v2912_v16 }
  0x90   : >> { %2500 = vmatprep.subr.bf16.mxu0 %v2803_v2  ;;  %2508 = vmatprep.subr.bf16.mxu1 %v2803_v2 }
  0x91   : >> { %2502 = vmatprep.mubr.msk.bf16.mxu0 %vm2804_vm0, %v2803_v2  ;;  %2510 = vmatprep.mubr.msk.bf16.mxu1 %vm2804_vm0, %v2803_v2 }
  0x93   : >> { %2501 = vmatpush3.bf16.msra.mxu0 %v2919_v18  ;;  %2509 = vmatpush3.bf16.msra.mxu1 %v2919_v18 }
  0x94   : >> { %2514 = vmatprep.subr.bf16.mxu0 %v2803_v2  ;;  %2522 = vmatprep.subr.bf16.mxu1 %v2803_v2 }
  0x9a   : >> { %2503 = vmatmul.mubr.msk.bf16.vlgmr.msra.gmra.mrb[4].mxu0 %vm213_vm1, %v2993_v35  ;;  %2511 = vmatmul.mubr.msk.bf16.vlgmr.msra.gmra.mrb[4].mxu1 %vm213_vm1, %v3021_v41 }
  0x9b   : >> { %2515 = vmatpush3.bf16.msra.mxu0 %v2936_v22  ;;  %2523 = vmatpush3.bf16.msra.mxu1 %v2936_v22 }
  0x9c   : >> { %2516 = vmatprep.subr.bf16.mxu0 %v2803_v2  ;;  %2524 = vmatprep.subr.bf16.mxu1 %v2803_v2 }
  0x9d   : >> { %2518 = vmatprep.mubr.msk.bf16.mxu0 %vm2804_vm0, %v2803_v2  ;;  %2526 = vmatprep.mubr.msk.bf16.mxu1 %vm2804_vm0, %v2803_v2 }
  0x9f   : >> { %2517 = vmatpush3.bf16.msra.mxu0 %v2945_v23  ;;  %2525 = vmatpush3.bf16.msra.mxu1 %v2945_v23 }
  0xa0   : >> { %2530 = vmatprep.subr.bf16.mxu0 %v2803_v2  ;;  %2538 = vmatprep.subr.bf16.mxu1 %v2803_v2 }
  0xa6   : >> { %2519 = vmatmul.mubr.msk.bf16.vlgmr.msra.gmra.mrb[4].mxu0 %vm213_vm1, %v3051_v45  ;;  %2527 = vmatmul.mubr.msk.bf16.vlgmr.msra.gmra.mrb[4].mxu1 %vm213_vm1, %v3055_v47 }
  0xa7   : >> { %2531 = vmatpush3.bf16.msra.mxu0 %v2968_v28  ;;  %2539 = vmatpush3.bf16.msra.mxu1 %v2968_v28 }
  0xa8   : >> { %2532 = vmatprep.subr.bf16.mxu0 %v2803_v2  ;;  %2540 = vmatprep.subr.bf16.mxu1 %v2803_v2 }
  0xa9   : >> { %2534 = vmatprep.mubr.msk.bf16.mxu0 %vm2804_vm0, %v2803_v2  ;;  %2542 = vmatprep.mubr.msk.bf16.mxu1 %vm2804_vm0, %v2803_v2 }
  0xab   : >> { %2533 = vmatpush3.bf16.msra.mxu0 %v2979_v30  ;;  %2541 = vmatpush3.bf16.msra.mxu1 %v2979_v30 }
  0xac   : >> { %2546 = vmatprep.subr.bf16.mxu0 %v2803_v2  ;;  %2554 = vmatprep.subr.bf16.mxu1 %v2803_v2 }
  0xb2   : >> { %2535 = vmatmul.mubr.msk.bf16.vlgmr.msra.gmra.mrb[4].mxu0 %vm213_vm1, %v3055_v47  ;;  %2543 = vmatmul.mubr.msk.bf16.vlgmr.msra.gmra.mrb[4].mxu1 %vm213_vm1, %v3085_v55 }
  0xb3   : >> { %2547 = vmatpush3.bf16.msra.mxu0 %v2998_v36  ;;  %2555 = vmatpush3.bf16.msra.mxu1 %v2998_v36 }
  0xb4   : >> { %2548 = vmatprep.subr.bf16.mxu0 %v2803_v2  ;;  %2556 = vmatprep.subr.bf16.mxu1 %v2803_v2 }
  0xb5   : >> { %2550 = vmatprep.mubr.msk.bf16.mxu0 %vm2804_vm0, %v2803_v2  ;;  %2558 = vmatprep.mubr.msk.bf16.mxu1 %vm2804_vm0, %v2803_v2 }
  0xb7   : >> { %2549 = vmatpush3.bf16.msra.mxu0 %v3009_v38  ;;  %2557 = vmatpush3.bf16.msra.mxu1 %v3009_v38 }
  0xb8   : >> { %2562 = vmatprep.subr.bf16.mxu0 %v2803_v2  ;;  %2570 = vmatprep.subr.bf16.mxu1 %v2803_v2 }
  0xbe   : >> { %2551 = vmatmul.mubr.msk.bf16.vlgmr.msra.gmra.mrb[4].mxu0 %vm213_vm1, %v3085_v55  ;;  %2559 = vmatmul.mubr.msk.bf16.vlgmr.msra.gmra.mrb[4].mxu1 %vm213_vm1, %v3113_v61 }
  0xbf   : >> { %2563 = vmatpush3.bf16.msra.mxu0 %v3026_v42  ;;  %2571 = vmatpush3.bf16.msra.mxu1 %v3026_v42 }
  0xc0   : >> { %2564 = vmatprep.subr.bf16.mxu0 %v2803_v2  ;;  %2572 = vmatprep.subr.bf16.mxu1 %v2803_v2 }
  0xc1   : >> { %2566 = vmatprep.mubr.msk.bf16.mxu0 %vm2804_vm0, %v2803_v2  ;;  %2574 = vmatprep.mubr.msk.bf16.mxu1 %vm2804_vm0, %v2803_v2 }
  0xc3   : >> { %2565 = vmatpush3.bf16.msra.mxu0 %v3037_v43  ;;  %2573 = vmatpush3.bf16.msra.mxu1 %v3037_v43 }
  0xc4   : >> { %2578 = vmatprep.subr.bf16.mxu0 %v2803_v2  ;;  %2586 = vmatprep.subr.bf16.mxu1 %v2803_v2 }
  0xca   : >> { %2567 = vmatmul.mubr.msk.bf16.vlgmr.msra.gmra.mrb[4].mxu0 %vm213_vm1, %v2187_v63  ;;  %2575 = vmatmul.mubr.msk.bf16.vlgmr.msra.gmra.mrb[4].mxu1 %vm213_vm1, %v2191_v3 }
  0xcb   : >> { %2579 = vmatpush3.bf16.msra.mxu0 %v3060_v48  ;;  %2587 = vmatpush3.bf16.msra.mxu1 %v3060_v48 }
  0xcc   : >> { %2580 = vmatprep.subr.bf16.mxu0 %v2803_v2  ;;  %2588 = vmatprep.subr.bf16.mxu1 %v2803_v2 }
  0xcd   : >> { %2582 = vmatprep.mubr.msk.bf16.mxu0 %vm2804_vm0, %v2803_v2  ;;  %2590 = vmatprep.mubr.msk.bf16.mxu1 %vm2804_vm0, %v2803_v2 }
  0xcf   : >> { %2581 = vmatpush3.bf16.msra.mxu0 %v3071_v50  ;;  %2589 = vmatpush3.bf16.msra.mxu1 %v3071_v50 }
  0xd0   : >> { %2594 = vmatprep.subr.bf16.mxu0 %v2803_v2  ;;  %2602 = vmatprep.subr.bf16.mxu1 %v2803_v2 }
  0xd6   : >> { %2583 = vmatmul.mubr.msk.bf16.vlgmr.msra.gmra.mrb[4].mxu0 %vm213_vm1, %v2191_v3  ;;  %2591 = vmatmul.mubr.msk.bf16.vlgmr.msra.gmra.mrb[4].mxu1 %vm213_vm1, %v1857_v8 }
  0xd7   : >> { %2595 = vmatpush3.bf16.msra.mxu0 %v3090_v56  ;;  %2603 = vmatpush3.bf16.msra.mxu1 %v3090_v56 }
  0xd8   : >> { %2596 = vmatprep.subr.bf16.mxu0 %v2803_v2  ;;  %2604 = vmatprep.subr.bf16.mxu1 %v2803_v2 }
  0xd9   : >> { %2598 = vmatprep.mubr.msk.bf16.mxu0 %vm2804_vm0, %v2803_v2  ;;  %2606 = vmatprep.mubr.msk.bf16.mxu1 %vm2804_vm0, %v2803_v2 }
  0xdb   : >> { %2597 = vmatpush3.bf16.msra.mxu0 %v3101_v58  ;;  %2605 = vmatpush3.bf16.msra.mxu1 %v3101_v58 }
  0xe2   : >> { %2599 = vmatmul.mubr.msk.bf16.vlgmr.msra.gmra.mrb[4].mxu0 %vm213_vm1, %v1857_v8  ;;  %2607 = vmatmul.mubr.msk.bf16.vlgmr.msra.gmra.mrb[4].mxu1 %vm213_vm1, %v1954_v13 }
 0x14d   : >> { %v1149_v14 = vpop.f32.mrb[0].mxu0  ;;  %v1205_v15 = vpop.f32.mrb[0].mxu1 }
 0x14e   : >> { %v2610_v16 = vadd.f32 %v2836_v0, %v1149_v14  ;;  %v2611_v17 = vadd.f32 %v2836_v0, %v1205_v15  ;;  %v2456_v18 = vpop.f32.mrb[1].mxu0  ;;  %v2464_v19 = vpop.f32.mrb[1].mxu1 }
 0x14f   : >> { %v1152_v2 = vpop.f32.mrb[2].mxu0  ;;  %v1208_v20 = vpop.f32.mrb[2].mxu1 }
 0x150   : >> { %v1212_v21 = vmax.f32 %v2610_v16, %v2611_v17  ;;  %v2457_v22 = vpop.f32.mrb[3].mxu0  ;;  %v2465_v23 = vpop.f32.mrb[3].mxu1 }
 0x1b5   : >> { %v1936_v24 = vpop.f32.mrb[4].mxu0  ;;  %v1992_v25 = vpop.f32.mrb[4].mxu1 }
 0x1b6   : >> { %v2612_v26 = vadd.f32 %v2836_v0, %v1936_v24  ;;  %v2613_v27 = vadd.f32 %v2836_v0, %v1992_v25  ;;  %v2600_v28 = vpop.f32.mrb[5].mxu0  ;;  %v2608_v29 = vpop.f32.mrb[5].mxu1 }
 0x1b7   : >> { %v1939_v30 = vpop.f32.mrb[6].mxu0  ;;  %v1995_v31 = vpop.f32.mrb[6].mxu1 }
 0x1b8   : >> { %v1999_v32 = vmax.f32 %v2612_v26, %v2613_v27  ;;  %v2601_v33 = vpop.f32.mrb[7].mxu0  ;;  %v2609_v34 = vpop.f32.mrb[7].mxu1 }
 0x1ba   : >> { %v2000_v35 = vmax.f32 %v1212_v21, %v1999_v32  ;;  %183 = sbr.rel (!%p181_p4) target bundleno = 17 (0x11), region = 78 }
 0x1bc   : >> { %v2001_v36 = vmax.f32 %v2000_v35, 0.0 }
 0x1be   : >> { %v2002_v37 = vpack.c.bf16 %v2001_v36, %v2001_v36 }
 0x1c0   : >> { %2006 = vst.msk [vmem:[%s2004_s15] sm:$0xf] %vm2005_vm2, %v2002_v37 }
 0x1c1 PF: > { %s13_s12 = sadd.s32 1, %s2797_s12  }
 0x1c2   : > { %p10_p5 = scmp.ge.s32.totalorder %s13_s12, 4  }
 0x1c4   :  { %12 = sbr.rel (!%p10_p5) target bundleno = 1 (0x1), region = 89 }

// kernel: crnn_ser_forward.9
= control target key start
LH: loop header
LB: loop body
LE: loop exit
PB: predicated region body
PF: predicated region fallthrough
CT: control target
= control target key end

     0   :  { %s3194_s12 = smov 0   ;;  %s3870_s0 = inlined_call_operand.vmem [shape: bf16[2,20,5,64], index: 0, kind: input, shape index: {}]   ;;  %s3871_s1 = inlined_call_operand.vmem [shape: bf16[576,128], index: 1, kind: input, shape index: {}]   ;;  %s3872_s2 = inlined_call_operand.vmem [shape: f32[1,128], index: 2, kind: input, shape index: {}]   ;;  %s3873_s3 = inlined_call_operand.vmem [shape: bf16[2,4,4,128], index: 3, kind: output, shape index: {}]  }
   0x1 LB: > { %s2218_s13 = sadd.s32 4294967295, %s3166_s12   ;;  %p2222_p0 = scmp.ge.s32.totalorder %s3166_s12, 1  ;;  %s3166_s12 = sphi %s3194_s12, %s13_s12  }
   0x2   : > { %p137_p1 = scmp.lt.s32.totalorder %s3166_s12, 3 }
   0x4   : > { %p138_p2 = pnand %p2222_p0, %p137_p1 }
   0x5   : > { %p161_p3 = scmp.lt.s32.totalorder (!%p138_p2), %s2218_s13, 1  ;;  %v3205_v0 = vld [vmem:[%s3872_s2] ss:$0 sm:$0xff] (!%p138_p2)  ;;  %s3217_s24 = smov (!%p138_p2), 0  }
   0x6   : > { %141 = sbr.rel (%p138_p2) target bundleno = 529 (0x211), region = 32 }
   0xd   : > { %s3875_s13 = smov (!%p161_p3, %s2218_s13), 1 }
   0xe   : > { %s3093_s16 = smul.u32 80, %s3875_s13  ;;  %s2340_s17 = sshll.u32 %s3875_s13, 3 }
   0xf   : > { %s3210_s20 = scalar_lea.vmem %s3873_s3, %s2340_s17 }
  0x10   : > { %s3215_s23 = scalar_lea.vmem %s3870_s0, %s3093_s16 }
  0x11 LB: >> { %v3225_v1 = vld [vmem:[%s3871_s1] sm:$0xff]   ;;  %v3172_v2 = vmov 0.0   ;;  %v3234_v3 = vld [vmem:[%s3871_s1 + $0x8] sm:$0xff]   ;;  %vm3173_vm0 = vmmov 0   ;;  %s2341_s29 = sshll.u32 %s3170_s24, 3  ;;  %v3248_v4 = vld [vmem:[%s3871_s1 + $0x10] sm:$0xff]   ;;  %s3170_s24 = sphi %s3217_s24, %s184_s24  }
  0x12   : >> { %2529 = vmatprep.subr.bf16.mxu0 %v3172_v2  ;;  %2541 = vmatprep.subr.bf16.mxu1 %v3172_v2  ;;  %s3253_s5 = scalar_lea.vmem %s3215_s23, %s2341_s29  ;;  %v3258_v5 = vld [vmem:[%s3871_s1 + $0x18] sm:$0xff]   ;;  %vm227_vm1 = vcmask 523264   ;;  %v3271_v8 = vld [vmem:[%s3871_s1 + $0x20] sm:$0xff]   ;;  %v3283_v10 = vld [vmem:[%s3871_s1 + $0x28] sm:$0xff]  }
  0x13   : >> { %2530 = vmatpush3.bf16.msra.mxu0 %v3225_v1  ;;  %2542 = vmatpush3.bf16.msra.mxu1 %v3225_v1  ;;  %v188_v6 = vld [vmem:[%s3253_s5] sm:$0x3]  ;;  %v2231_v7 = vld [vmem:[%s3253_s5 + $0x28] sm:$0x3]  ;;  %v3296_v12 = vld [vmem:[%s3871_s1 + $0x30] sm:$0xff]  }
  0x14   : >> { %2531 = vmatprep.subr.bf16.mxu0 %v3172_v2  ;;  %2543 = vmatprep.subr.bf16.mxu1 %v3172_v2  ;;  %v3120_v9 = vld [vmem:[%s3253_s5] ss:$0 sps:$4 sm:$0x77]   ;;  %v3303_v13 = vld [vmem:[%s3871_s1 + $0x38] sm:$0xff]   ;;  %v3326_v19 = vld [vmem:[%s3871_s1 + $0x48] sm:$0xff]  }
  0x15   : >> { %2537 = vmatprep.mubr.msk.bf16.mxu0 %vm3173_vm0, %v3172_v2  ;;  %2549 = vmatprep.mubr.msk.bf16.mxu1 %vm3173_vm0, %v3172_v2  ;;  %v395_v11 = vshll.u32 %v3120_v9, 16  ;;  %v393_v14 = vshrl.u32 %v3120_v9, 16  ;;  %v3314_v17 = vld [vmem:[%s3871_s1 + $0x40] sm:$0xff]   ;;  %v3125_v18 = vld [vmem:[%s3253_s5 + $0x28] ss:$0 sps:$4 sm:$0x77]  }
  0x16   : >> { %v3337_v20 = vld [vmem:[%s3871_s1 + $0x50] sm:$0xff]   ;;  %v522_v21 = vshll.u32 %v3125_v18, 16  ;;  %v520_v22 = vshrl.u32 %v3125_v18, 16  ;;  %v3348_v24 = vld [vmem:[%s3871_s1 + $0x58] sm:$0xff]   ;;  %v3357_v26 = vld [vmem:[%s3871_s1 + $0x60] sm:$0xff]  }
  0x17   : >> { %2532 = vmatpush3.bf16.msra.mxu0 %v3234_v3  ;;  %2544 = vmatpush3.bf16.msra.mxu1 %v3234_v3  ;;  %v397_v15 = vrot.slane %v395_v11, 1  ;;  %v3368_v27 = vld [vmem:[%s3871_s1 + $0x68] sm:$0xff]   ;;  %v3381_v28 = vld [vmem:[%s3871_s1 + $0x70] sm:$0xff]   ;;  %v3390_v29 = vld [vmem:[%s3871_s1 + $0x78] sm:$0xff]  }
  0x18   : >> { %2533 = vmatprep.subr.bf16.mxu0 %v3172_v2  ;;  %2545 = vmatprep.subr.bf16.mxu1 %v3172_v2  ;;  %v524_v23 = vrot.slane %v522_v21, 1  ;;  %v3397_v30 = vld [vmem:[%s3253_s5 + $0x4] sm:$0x3]  ;;  %v3400_v31 = vld [vmem:[%s3253_s5 + $0x2c] sm:$0x3]  ;;  %v3432_v36 = vld [vmem:[%s3871_s1 + $0x90] sm:$0xff]  }
  0x19   : >> { %v398_v16 = vor.u32 %v397_v15, %v393_v14  ;;  %v3405_v32 = vld [vmem:[%s3871_s1 + $0x80] sm:$0xff]   ;;  %v3419_v34 = vld [vmem:[%s3871_s1 + $0x88] sm:$0xff]   ;;  %v3441_v39 = vld [vmem:[%s3871_s1 + $0x98] sm:$0xff]  }
  0x1a   : >> { %v525_v25 = vor.u32 %v524_v23, %v520_v22  ;;  %v3134_v33 = vld [vmem:[%s3253_s5 + $0x4] ss:$0 sps:$4 sm:$0x77]   ;;  %v3139_v42 = vld [vmem:[%s3253_s5 + $0x2c] ss:$0 sps:$4 sm:$0x77]  }
  0x1b   : >> { %2534 = vmatpush3.bf16.msra.mxu0 %v3248_v4  ;;  %2546 = vmatpush3.bf16.msra.mxu1 %v3248_v4  ;;  %v779_v35 = vshll.u32 %v3134_v33, 16  ;;  %v777_v37 = vshrl.u32 %v3134_v33, 16  ;;  %v3452_v41 = vld [vmem:[%s3871_s1 + $0xa0] sm:$0xff]   ;;  %v3466_v43 = vld [vmem:[%s3871_s1 + $0xa8] sm:$0xff]   ;;  %v906_v44 = vshll.u32 %v3139_v42, 16  ;;  %v3479_v45 = vld [vmem:[%s3871_s1 + $0xb0] sm:$0xff]  }
  0x1c   : >> { %2535 = vmatprep.subr.bf16.mxu0 %v3172_v2  ;;  %2547 = vmatprep.subr.bf16.mxu1 %v3172_v2  ;;  %v904_v46 = vshrl.u32 %v3139_v42, 16  ;;  %v3488_v48 = vld [vmem:[%s3871_s1 + $0xb8] sm:$0xff]   ;;  %v3499_v50 = vld [vmem:[%s3871_s1 + $0xc0] sm:$0xff]   ;;  %v3512_v51 = vld [vmem:[%s3871_s1 + $0xc8] sm:$0xff]  }
  0x1d   : >> { %v781_v38 = vrot.slane %v779_v35, 1  ;;  %v908_v47 = vrot.slane %v906_v44, 1  ;;  %v3525_v52 = vld [vmem:[%s3871_s1 + $0xd0] sm:$0xff]   ;;  %v3534_v53 = vld [vmem:[%s3871_s1 + $0xd8] sm:$0xff]   ;;  %v3541_v54 = vld [vmem:[%s3253_s5 + $0x8] sm:$0x3] }
  0x1e   : >> { %v3544_v55 = vld [vmem:[%s3253_s5 + $0x30] sm:$0x3]  ;;  %v3549_v56 = vld [vmem:[%s3871_s1 + $0xe0] sm:$0xff]   ;;  %v3148_v57 = vld [vmem:[%s3253_s5 + $0x8] ss:$0 sps:$4 sm:$0x77]  }
  0x1f   : >> { %2536 = vmatpush3.bf16.msra.mxu0 %v3258_v5  ;;  %2548 = vmatpush3.bf16.msra.mxu1 %v3258_v5  ;;  %v3445_v40 = vor.u32 %v781_v38, %v777_v37  ;;  %v3492_v49 = vor.u32 %v908_v47, %v904_v46  ;;  %v3563_v58 = vld [vmem:[%s3871_s1 + $0xe8] sm:$0xff]   ;;  %v1163_v59 = vshll.u32 %v3148_v57, 16  ;;  %v3576_v60 = vld [vmem:[%s3871_s1 + $0xf0] sm:$0xff]   ;;  %v1161_v61 = vshrl.u32 %v3148_v57, 16  ;;  %v3585_v63 = vld [vmem:[%s3871_s1 + $0xf8] sm:$0xff]  }
  0x20   : >> { %2553 = vmatprep.subr.bf16.mxu0 %v3172_v2  ;;  %2565 = vmatprep.subr.bf16.mxu1 %v3172_v2  ;;  %v3153_v9 = vld [vmem:[%s3253_s5 + $0x30] ss:$0 sps:$4 sm:$0x77]   ;;  %v3610_v11 = vld [vmem:[%s3871_s1 + $0x108] sm:$0xff]   ;;  %v3632_v21 = vld [vmem:[%s3871_s1 + $0x118] sm:$0xff]  }
  0x21   : >> { %v1165_v62 = vrot.slane %v1163_v59, 1  ;;  %v1290_v14 = vshll.u32 %v3153_v9, 16  ;;  %v3623_v15 = vld [vmem:[%s3871_s1 + $0x110] sm:$0xff]  }
  0x22   : >> { %2538 = vmatmul.mubr.msk.bf16.vlgmr.msra.gmra.mrb[0].mxu0 %vm227_vm1, %v188_v6  ;;  %2550 = vmatmul.mubr.msk.bf16.vlgmr.msra.gmra.mrb[0].mxu1 %vm227_vm1, %v2231_v7 }
  0x23   : >> { %2554 = vmatpush3.bf16.msra.mxu0 %v3271_v8  ;;  %2566 = vmatpush3.bf16.msra.mxu1 %v3271_v8  ;;  %v3589_v6 = vor.u32 %v1165_v62, %v1161_v61  ;;  %v1292_v18 = vrot.slane %v1290_v14, 1 }
  0x24   : >> { %2555 = vmatprep.subr.bf16.mxu0 %v3172_v2  ;;  %2567 = vmatprep.subr.bf16.mxu1 %v3172_v2 }
  0x25   : >> { %2561 = vmatprep.mubr.msk.bf16.mxu0 %vm3173_vm0, %v3172_v2  ;;  %2573 = vmatprep.mubr.msk.bf16.mxu1 %vm3173_vm0, %v3172_v2 }
  0x27   : >> { %2556 = vmatpush3.bf16.msra.mxu0 %v3283_v10  ;;  %2568 = vmatpush3.bf16.msra.mxu1 %v3283_v10 }
  0x28   : >> { %2557 = vmatprep.subr.bf16.mxu0 %v3172_v2  ;;  %2569 = vmatprep.subr.bf16.mxu1 %v3172_v2 }
  0x2b   : >> { %2558 = vmatpush3.bf16.msra.mxu0 %v3296_v12  ;;  %2570 = vmatpush3.bf16.msra.mxu1 %v3296_v12 }
  0x2c   : >> { %2559 = vmatprep.subr.bf16.mxu0 %v3172_v2  ;;  %2571 = vmatprep.subr.bf16.mxu1 %v3172_v2 }
  0x2f   : >> { %2560 = vmatpush3.bf16.msra.mxu0 %v3303_v13  ;;  %2572 = vmatpush3.bf16.msra.mxu1 %v3303_v13 }
  0x30   : >> { %2577 = vmatprep.subr.bf16.mxu0 %v3172_v2  ;;  %2589 = vmatprep.subr.bf16.mxu1 %v3172_v2 }
  0x32   : >> { %2562 = vmatmul.mubr.msk.bf16.vlgmr.msra.gmra.mrb[0].mxu0 %vm227_vm1, %v2231_v7  ;;  %2574 = vmatmul.mubr.msk.bf16.vlgmr.msra.gmra.mrb[0].mxu1 %vm227_vm1, %v398_v16  ;;  %v3596_v7 = vld [vmem:[%s3871_s1 + $0x100] sm:$0xff]  }
  0x33   : >> { %2578 = vmatpush3.bf16.msra.mxu0 %v3314_v17  ;;  %2590 = vmatpush3.bf16.msra.mxu1 %v3314_v17 }
  0x34   : >> { %2579 = vmatprep.subr.bf16.mxu0 %v3172_v2  ;;  %2591 = vmatprep.subr.bf16.mxu1 %v3172_v2 }
  0x35   : >> { %2585 = vmatprep.mubr.msk.bf16.mxu0 %vm3173_vm0, %v3172_v2  ;;  %2597 = vmatprep.mubr.msk.bf16.mxu1 %vm3173_vm0, %v3172_v2 }
  0x37   : >> { %2580 = vmatpush3.bf16.msra.mxu0 %v3326_v19  ;;  %2592 = vmatpush3.bf16.msra.mxu1 %v3326_v19 }
  0x38   : >> { %2581 = vmatprep.subr.bf16.mxu0 %v3172_v2  ;;  %2593 = vmatprep.subr.bf16.mxu1 %v3172_v2 }
  0x3b   : >> { %2582 = vmatpush3.bf16.msra.mxu0 %v3337_v20  ;;  %2594 = vmatpush3.bf16.msra.mxu1 %v3337_v20 }
  0x3c   : >> { %2583 = vmatprep.subr.bf16.mxu0 %v3172_v2  ;;  %2595 = vmatprep.subr.bf16.mxu1 %v3172_v2 }
  0x3f   : >> { %2584 = vmatpush3.bf16.msra.mxu0 %v3348_v24  ;;  %2596 = vmatpush3.bf16.msra.mxu1 %v3348_v24 }
  0x40   : >> { %2601 = vmatprep.subr.bf16.mxu0 %v3172_v2  ;;  %2613 = vmatprep.subr.bf16.mxu1 %v3172_v2 }
  0x42   : >> { %2586 = vmatmul.mubr.msk.bf16.vlgmr.msra.gmra.mrb[0].mxu0 %vm227_vm1, %v398_v16  ;;  %2598 = vmatmul.mubr.msk.bf16.vlgmr.msra.gmra.mrb[0].mxu1 %vm227_vm1, %v525_v25  ;;  %v1288_v16 = vshrl.u32 %v3153_v9, 16 }
  0x43   : >> { %2602 = vmatpush3.bf16.msra.mxu0 %v3357_v26  ;;  %2614 = vmatpush3.bf16.msra.mxu1 %v3357_v26 }
  0x44   : >> { %2603 = vmatprep.subr.bf16.mxu0 %v3172_v2  ;;  %2615 = vmatprep.subr.bf16.mxu1 %v3172_v2  ;;  %v3636_v22 = vor.u32 %v1292_v18, %v1288_v16 }
  0x45   : >> { %2609 = vmatprep.mubr.msk.bf16.mxu0 %vm3173_vm0, %v3172_v2  ;;  %2621 = vmatprep.mubr.msk.bf16.mxu1 %vm3173_vm0, %v3172_v2 }
  0x47   : >> { %2604 = vmatpush3.bf16.msra.mxu0 %v3368_v27  ;;  %2616 = vmatpush3.bf16.msra.mxu1 %v3368_v27 }
  0x48   : >> { %2605 = vmatprep.subr.bf16.mxu0 %v3172_v2  ;;  %2617 = vmatprep.subr.bf16.mxu1 %v3172_v2 }
  0x4b   : >> { %2606 = vmatpush3.bf16.msra.mxu0 %v3381_v28  ;;  %2618 = vmatpush3.bf16.msra.mxu1 %v3381_v28 }
  0x4c   : >> { %2607 = vmatprep.subr.bf16.mxu0 %v3172_v2  ;;  %2619 = vmatprep.subr.bf16.mxu1 %v3172_v2 }
  0x4f   : >> { %2608 = vmatpush3.bf16.msra.mxu0 %v3390_v29  ;;  %2620 = vmatpush3.bf16.msra.mxu1 %v3390_v29 }
  0x50   : >> { %2625 = vmatprep.subr.bf16.mxu0 %v3172_v2  ;;  %2637 = vmatprep.subr.bf16.mxu1 %v3172_v2 }
  0x52   : >> { %2610 = vmatmul.mubr.msk.bf16.vlgmr.msra.gmra.mrb[0].mxu0 %vm227_vm1, %v3397_v30  ;;  %2622 = vmatmul.mubr.msk.bf16.vlgmr.msra.gmra.mrb[0].mxu1 %vm227_vm1, %v3400_v31 }
  0x53   : >> { %2626 = vmatpush3.bf16.msra.mxu0 %v3405_v32  ;;  %2638 = vmatpush3.bf16.msra.mxu1 %v3405_v32 }
  0x54   : >> { %2627 = vmatprep.subr.bf16.mxu0 %v3172_v2  ;;  %2639 = vmatprep.subr.bf16.mxu1 %v3172_v2 }
  0x55   : >> { %2633 = vmatprep.mubr.msk.bf16.mxu0 %vm3173_vm0, %v3172_v2  ;;  %2645 = vmatprep.mubr.msk.bf16.mxu1 %vm3173_vm0, %v3172_v2 }
  0x57   : >> { %2628 = vmatpush3.bf16.msra.mxu0 %v3419_v34  ;;  %2640 = vmatpush3.bf16.msra.mxu1 %v3419_v34 }
  0x58   : >> { %2629 = vmatprep.subr.bf16.mxu0 %v3172_v2  ;;  %2641 = vmatprep.subr.bf16.mxu1 %v3172_v2 }
  0x5b   : >> { %2630 = vmatpush3.bf16.msra.mxu0 %v3432_v36  ;;  %2642 = vmatpush3.bf16.msra.mxu1 %v3432_v36 }
  0x5c   : >> { %2631 = vmatprep.subr.bf16.mxu0 %v3172_v2  ;;  %2643 = vmatprep.subr.bf16.mxu1 %v3172_v2 }
  0x5f   : >> { %2632 = vmatpush3.bf16.msra.mxu0 %v3441_v39  ;;  %2644 = vmatpush3.bf16.msra.mxu1 %v3441_v39 }
  0x60   : >> { %2649 = vmatprep.subr.bf16.mxu0 %v3172_v2  ;;  %2661 = vmatprep.subr.bf16.mxu1 %v3172_v2 }
  0x62   : >> { %2634 = vmatmul.mubr.msk.bf16.vlgmr.msra.gmra.mrb[0].mxu0 %vm227_vm1, %v3400_v31  ;;  %2646 = vmatmul.mubr.msk.bf16.vlgmr.msra.gmra.mrb[0].mxu1 %vm227_vm1, %v3445_v40 }
  0x63   : >> { %2650 = vmatpush3.bf16.msra.mxu0 %v3452_v41  ;;  %2662 = vmatpush3.bf16.msra.mxu1 %v3452_v41 }
  0x64   : >> { %2651 = vmatprep.subr.bf16.mxu0 %v3172_v2  ;;  %2663 = vmatprep.subr.bf16.mxu1 %v3172_v2 }
  0x65   : >> { %2657 = vmatprep.mubr.msk.bf16.mxu0 %vm3173_vm0, %v3172_v2  ;;  %2669 = vmatprep.mubr.msk.bf16.mxu1 %vm3173_vm0, %v3172_v2 }
  0x67   : >> { %2652 = vmatpush3.bf16.msra.mxu0 %v3466_v43  ;;  %2664 = vmatpush3.bf16.msra.mxu1 %v3466_v43 }
  0x68   : >> { %2653 = vmatprep.subr.bf16.mxu0 %v3172_v2  ;;  %2665 = vmatprep.subr.bf16.mxu1 %v3172_v2 }
  0x6b   : >> { %2654 = vmatpush3.bf16.msra.mxu0 %v3479_v45  ;;  %2666 = vmatpush3.bf16.msra.mxu1 %v3479_v45 }
  0x6c   : >> { %2655 = vmatprep.subr.bf16.mxu0 %v3172_v2  ;;  %2667 = vmatprep.subr.bf16.mxu1 %v3172_v2 }
  0x6f   : >> { %2656 = vmatpush3.bf16.msra.mxu0 %v3488_v48  ;;  %2668 = vmatpush3.bf16.msra.mxu1 %v3488_v48 }
  0x70   : >> { %2673 = vmatprep.subr.bf16.mxu0 %v3172_v2  ;;  %2685 = vmatprep.subr.bf16.mxu1 %v3172_v2 }
  0x72   : >> { %2658 = vmatmul.mubr.msk.bf16.vlgmr.msra.gmra.mrb[0].mxu0 %vm227_vm1, %v3445_v40  ;;  %2670 = vmatmul.mubr.msk.bf16.vlgmr.msra.gmra.mrb[0].mxu1 %vm227_vm1, %v3492_v49 }
  0x73   : >> { %2674 = vmatpush3.bf16.msra.mxu0 %v3499_v50  ;;  %2686 = vmatpush3.bf16.msra.mxu1 %v3499_v50 }
  0x74   : >> { %2675 = vmatprep.subr.bf16.mxu0 %v3172_v2  ;;  %2687 = vmatprep.subr.bf16.mxu1 %v3172_v2 }
  0x75   : >> { %2681 = vmatprep.mubr.msk.bf16.mxu0 %vm3173_vm0, %v3172_v2  ;;  %2693 = vmatprep.mubr.msk.bf16.mxu1 %vm3173_vm0, %v3172_v2 }
  0x77   : >> { %2676 = vmatpush3.bf16.msra.mxu0 %v3512_v51  ;;  %2688 = vmatpush3.bf16.msra.mxu1 %v3512_v51 }
  0x78   : >> { %2677 = vmatprep.subr.bf16.mxu0 %v3172_v2  ;;  %2689 = vmatprep.subr.bf16.mxu1 %v3172_v2 }
  0x7b   : >> { %2678 = vmatpush3.bf16.msra.mxu0 %v3525_v52  ;;  %2690 = vmatpush3.bf16.msra.mxu1 %v3525_v52 }
  0x7c   : >> { %2679 = vmatprep.subr.bf16.mxu0 %v3172_v2  ;;  %2691 = vmatprep.subr.bf16.mxu1 %v3172_v2 }
  0x7f   : >> { %2680 = vmatpush3.bf16.msra.mxu0 %v3534_v53  ;;  %2692 = vmatpush3.bf16.msra.mxu1 %v3534_v53 }
  0x80   : >> { %2697 = vmatprep.subr.bf16.mxu0 %v3172_v2  ;;  %2709 = vmatprep.subr.bf16.mxu1 %v3172_v2 }
  0x82   : >> { %2682 = vmatmul.mubr.msk.bf16.vlgmr.msra.gmra.mrb[0].mxu0 %vm227_vm1, %v3541_v54  ;;  %2694 = vmatmul.mubr.msk.bf16.vlgmr.msra.gmra.mrb[0].mxu1 %vm227_vm1, %v3544_v55 }
  0x83   : >> { %2698 = vmatpush3.bf16.msra.mxu0 %v3549_v56  ;;  %2710 = vmatpush3.bf16.msra.mxu1 %v3549_v56 }
  0x84   : >> { %2699 = vmatprep.subr.bf16.mxu0 %v3172_v2  ;;  %2711 = vmatprep.subr.bf16.mxu1 %v3172_v2 }
  0x85   : >> { %2705 = vmatprep.mubr.msk.bf16.mxu0 %vm3173_vm0, %v3172_v2  ;;  %2717 = vmatprep.mubr.msk.bf16.mxu1 %vm3173_vm0, %v3172_v2 }
  0x87   : >> { %2700 = vmatpush3.bf16.msra.mxu0 %v3563_v58  ;;  %2712 = vmatpush3.bf16.msra.mxu1 %v3563_v58 }
  0x88   : >> { %2701 = vmatprep.subr.bf16.mxu0 %v3172_v2  ;;  %2713 = vmatprep.subr.bf16.mxu1 %v3172_v2 }
  0x8b   : >> { %2702 = vmatpush3.bf16.msra.mxu0 %v3576_v60  ;;  %2714 = vmatpush3.bf16.msra.mxu1 %v3576_v60 }
  0x8c   : >> { %2703 = vmatprep.subr.bf16.mxu0 %v3172_v2  ;;  %2715 = vmatprep.subr.bf16.mxu1 %v3172_v2 }
  0x8f   : >> { %2704 = vmatpush3.bf16.msra.mxu0 %v3585_v63  ;;  %2716 = vmatpush3.bf16.msra.mxu1 %v3585_v63 }
  0x90   : >> { %2721 = vmatprep.subr.bf16.mxu0 %v3172_v2  ;;  %2733 = vmatprep.subr.bf16.mxu1 %v3172_v2 }
  0x92   : >> { %2706 = vmatmul.mubr.msk.bf16.vlgmr.msra.gmra.mrb[0].mxu0 %vm227_vm1, %v3544_v55  ;;  %2718 = vmatmul.mubr.msk.bf16.vlgmr.msra.gmra.mrb[0].mxu1 %vm227_vm1, %v3589_v6 }
  0x93   : >> { %2722 = vmatpush3.bf16.msra.mxu0 %v3596_v7  ;;  %2734 = vmatpush3.bf16.msra.mxu1 %v3596_v7 }
  0x94   : >> { %2723 = vmatprep.subr.bf16.mxu0 %v3172_v2  ;;  %2735 = vmatprep.subr.bf16.mxu1 %v3172_v2 }
  0x95   : >> { %2729 = vmatprep.mubr.msk.bf16.mxu0 %vm3173_vm0, %v3172_v2  ;;  %2741 = vmatprep.mubr.msk.bf16.mxu1 %vm3173_vm0, %v3172_v2 }
  0x97   : >> { %2724 = vmatpush3.bf16.msra.mxu0 %v3610_v11  ;;  %2736 = vmatpush3.bf16.msra.mxu1 %v3610_v11 }
  0x98   : >> { %2725 = vmatprep.subr.bf16.mxu0 %v3172_v2  ;;  %2737 = vmatprep.subr.bf16.mxu1 %v3172_v2 }
  0x9b   : >> { %2726 = vmatpush3.bf16.msra.mxu0 %v3623_v15  ;;  %2738 = vmatpush3.bf16.msra.mxu1 %v3623_v15 }
  0x9c   : >> { %2727 = vmatprep.subr.bf16.mxu0 %v3172_v2  ;;  %2739 = vmatprep.subr.bf16.mxu1 %v3172_v2 }
  0x9f   : >> { %2728 = vmatpush3.bf16.msra.mxu0 %v3632_v21  ;;  %2740 = vmatpush3.bf16.msra.mxu1 %v3632_v21 }
  0xa0   : >> { %2745 = vmatprep.subr.bf16.mxu0 %v3172_v2  ;;  %2757 = vmatprep.subr.bf16.mxu1 %v3172_v2 }
  0xa2   : >> { %2730 = vmatmul.mubr.msk.bf16.vlgmr.msra.gmra.mrb[0].mxu0 %vm227_vm1, %v3589_v6  ;;  %2742 = vmatmul.mubr.msk.bf16.vlgmr.msra.gmra.mrb[0].mxu1 %vm227_vm1, %v3636_v22 }
  0xa3   : >> { %2746 = vmatpush3.bf16.msra.mxu0 %v3225_v1  ;;  %2758 = vmatpush3.bf16.msra.mxu1 %v3225_v1  ;;  %v2323_v1 = vld [vmem:[%s3253_s5 + $0xc] sm:$0x3] }
  0xa4   : >> { %2747 = vmatprep.subr.bf16.mxu0 %v3172_v2  ;;  %2759 = vmatprep.subr.bf16.mxu1 %v3172_v2 }
  0xa5   : >> { %2753 = vmatprep.mubr.msk.bf16.mxu0 %vm3173_vm0, %v3172_v2  ;;  %2765 = vmatprep.mubr.msk.bf16.mxu1 %vm3173_vm0, %v3172_v2 }
  0xa7   : >> { %2748 = vmatpush3.bf16.msra.mxu0 %v3234_v3  ;;  %2760 = vmatpush3.bf16.msra.mxu1 %v3234_v3  ;;  %v2327_v3 = vld [vmem:[%s3253_s5 + $0x34] sm:$0x3] }
  0xa8   : >> { %2749 = vmatprep.subr.bf16.mxu0 %v3172_v2  ;;  %2761 = vmatprep.subr.bf16.mxu1 %v3172_v2 }
  0xab   : >> { %2750 = vmatpush3.bf16.msra.mxu0 %v3248_v4  ;;  %2762 = vmatpush3.bf16.msra.mxu1 %v3248_v4  ;;  %v3154_v4 = vld [vmem:[%s3253_s5 + $0xc] ss:$0 sps:$4 sm:$0x77]  }
  0xac   : >> { %2751 = vmatprep.subr.bf16.mxu0 %v3172_v2  ;;  %2763 = vmatprep.subr.bf16.mxu1 %v3172_v2 }
  0xaf   : >> { %2752 = vmatpush3.bf16.msra.mxu0 %v3258_v5  ;;  %2764 = vmatpush3.bf16.msra.mxu1 %v3258_v5  ;;  %v1976_v5 = vshll.u32 %v3154_v4, 16 }
  0xb0   : >> { %2769 = vmatprep.subr.bf16.mxu0 %v3172_v2  ;;  %2781 = vmatprep.subr.bf16.mxu1 %v3172_v2 }
  0xb2   : >> { %2754 = vmatmul.mubr.msk.bf16.vlgmr.msra.gmra.mrb[4].mxu0 %vm227_vm1, %v3397_v30  ;;  %2766 = vmatmul.mubr.msk.bf16.vlgmr.msra.gmra.mrb[4].mxu1 %vm227_vm1, %v3400_v31 }
  0xb3   : >> { %2770 = vmatpush3.bf16.msra.mxu0 %v3271_v8  ;;  %2782 = vmatpush3.bf16.msra.mxu1 %v3271_v8  ;;  %v1974_v8 = vshrl.u32 %v3154_v4, 16 }
  0xb4   : >> { %2771 = vmatprep.subr.bf16.mxu0 %v3172_v2  ;;  %2783 = vmatprep.subr.bf16.mxu1 %v3172_v2 }
  0xb5   : >> { %2777 = vmatprep.mubr.msk.bf16.mxu0 %vm3173_vm0, %v3172_v2  ;;  %2789 = vmatprep.mubr.msk.bf16.mxu1 %vm3173_vm0, %v3172_v2 }
  0xb7   : >> { %2772 = vmatpush3.bf16.msra.mxu0 %v3283_v10  ;;  %2784 = vmatpush3.bf16.msra.mxu1 %v3283_v10  ;;  %v1978_v10 = vrot.slane %v1976_v5, 1 }
  0xb8   : >> { %2773 = vmatprep.subr.bf16.mxu0 %v3172_v2  ;;  %2785 = vmatprep.subr.bf16.mxu1 %v3172_v2 }
  0xbb   : >> { %2774 = vmatpush3.bf16.msra.mxu0 %v3296_v12  ;;  %2786 = vmatpush3.bf16.msra.mxu1 %v3296_v12  ;;  %v1979_v12 = vor.u32 %v1978_v10, %v1974_v8 }
  0xbc   : >> { %2775 = vmatprep.subr.bf16.mxu0 %v3172_v2  ;;  %2787 = vmatprep.subr.bf16.mxu1 %v3172_v2 }
  0xbf   : >> { %2776 = vmatpush3.bf16.msra.mxu0 %v3303_v13  ;;  %2788 = vmatpush3.bf16.msra.mxu1 %v3303_v13  ;;  %v3155_v13 = vld [vmem:[%s3253_s5 + $0x34] ss:$0 sps:$4 sm:$0x77]   ;;  %s2337_s5 = sshll.u32 %s3170_s24, 1  ;;  %s184_s24 = sadd.s32 1, %s3170_s24  }
  0xc0   : >> { %2793 = vmatprep.subr.bf16.mxu0 %v3172_v2  ;;  %2805 = vmatprep.subr.bf16.mxu1 %v3172_v2  ;;  %s2124_s6 = scalar_lea.vmem %s3210_s20, %s2337_s5  ;;  %p181_p4 = scmp.ge.s32.totalorder %s184_s24, 4  }
  0xc2   : >> { %2778 = vmatmul.mubr.msk.bf16.vlgmr.msra.gmra.mrb[4].mxu0 %vm227_vm1, %v3400_v31  ;;  %2790 = vmatmul.mubr.msk.bf16.vlgmr.msra.gmra.mrb[4].mxu1 %vm227_vm1, %v3445_v40 }
  0xc3   : >> { %2794 = vmatpush3.bf16.msra.mxu0 %v3314_v17  ;;  %2806 = vmatpush3.bf16.msra.mxu1 %v3314_v17  ;;  %v2071_v17 = vshll.u32 %v3155_v13, 16 }
  0xc4   : >> { %2795 = vmatprep.subr.bf16.mxu0 %v3172_v2  ;;  %2807 = vmatprep.subr.bf16.mxu1 %v3172_v2 }
  0xc5   : >> { %2801 = vmatprep.mubr.msk.bf16.mxu0 %vm3173_vm0, %v3172_v2  ;;  %2813 = vmatprep.mubr.msk.bf16.mxu1 %vm3173_vm0, %v3172_v2 }
  0xc7   : >> { %2796 = vmatpush3.bf16.msra.mxu0 %v3326_v19  ;;  %2808 = vmatpush3.bf16.msra.mxu1 %v3326_v19  ;;  %v2069_v19 = vshrl.u32 %v3155_v13, 16 }
  0xc8   : >> { %2797 = vmatprep.subr.bf16.mxu0 %v3172_v2  ;;  %2809 = vmatprep.subr.bf16.mxu1 %v3172_v2 }
  0xcb   : >> { %2798 = vmatpush3.bf16.msra.mxu0 %v3337_v20  ;;  %2810 = vmatpush3.bf16.msra.mxu1 %v3337_v20  ;;  %v2073_v20 = vrot.slane %v2071_v17, 1 }
  0xcc   : >> { %2799 = vmatprep.subr.bf16.mxu0 %v3172_v2  ;;  %2811 = vmatprep.subr.bf16.mxu1 %v3172_v2 }
  0xcd   : >> { %v2074_v23 = vor.u32 %v2073_v20, %v2069_v19 }
  0xcf   : >> { %2800 = vmatpush3.bf16.msra.mxu0 %v3348_v24  ;;  %2812 = vmatpush3.bf16.msra.mxu1 %v3348_v24 }
  0xd0   : >> { %2817 = vmatprep.subr.bf16.mxu0 %v3172_v2  ;;  %2829 = vmatprep.subr.bf16.mxu1 %v3172_v2 }
  0xd2   : >> { %2802 = vmatmul.mubr.msk.bf16.vlgmr.msra.gmra.mrb[4].mxu0 %vm227_vm1, %v3445_v40  ;;  %2814 = vmatmul.mubr.msk.bf16.vlgmr.msra.gmra.mrb[4].mxu1 %vm227_vm1, %v3492_v49 }
  0xd3   : >> { %2818 = vmatpush3.bf16.msra.mxu0 %v3357_v26  ;;  %2830 = vmatpush3.bf16.msra.mxu1 %v3357_v26 }
  0xd4   : >> { %2819 = vmatprep.subr.bf16.mxu0 %v3172_v2  ;;  %2831 = vmatprep.subr.bf16.mxu1 %v3172_v2 }
  0xd5   : >> { %2825 = vmatprep.mubr.msk.bf16.mxu0 %vm3173_vm0, %v3172_v2  ;;  %2837 = vmatprep.mubr.msk.bf16.mxu1 %vm3173_vm0, %v3172_v2 }
  0xd7   : >> { %2820 = vmatpush3.bf16.msra.mxu0 %v3368_v27  ;;  %2832 = vmatpush3.bf16.msra.mxu1 %v3368_v27 }
  0xd8   : >> { %2821 = vmatprep.subr.bf16.mxu0 %v3172_v2  ;;  %2833 = vmatprep.subr.bf16.mxu1 %v3172_v2 }
  0xdb   : >> { %2822 = vmatpush3.bf16.msra.mxu0 %v3381_v28  ;;  %2834 = vmatpush3.bf16.msra.mxu1 %v3381_v28 }
  0xdc   : >> { %2823 = vmatprep.subr.bf16.mxu0 %v3172_v2  ;;  %2835 = vmatprep.subr.bf16.mxu1 %v3172_v2 }
  0xdf   : >> { %2824 = vmatpush3.bf16.msra.mxu0 %v3390_v29  ;;  %2836 = vmatpush3.bf16.msra.mxu1 %v3390_v29 }
  0xe0   : >> { %2841 = vmatprep.subr.bf16.mxu0 %v3172_v2  ;;  %2853 = vmatprep.subr.bf16.mxu1 %v3172_v2 }
  0xe2   : >> { %2826 = vmatmul.mubr.msk.bf16.vlgmr.msra.gmra.mrb[4].mxu0 %vm227_vm1, %v3541_v54  ;;  %2838 = vmatmul.mubr.msk.bf16.vlgmr.msra.gmra.mrb[4].mxu1 %vm227_vm1, %v3544_v55 }
  0xe3   : >> { %2842 = vmatpush3.bf16.msra.mxu0 %v3405_v32  ;;  %2854 = vmatpush3.bf16.msra.mxu1 %v3405_v32 }
  0xe4   : >> { %2843 = vmatprep.subr.bf16.mxu0 %v3172_v2  ;;  %2855 = vmatprep.subr.bf16.mxu1 %v3172_v2 }
  0xe5   : >> { %2849 = vmatprep.mubr.msk.bf16.mxu0 %vm3173_vm0, %v3172_v2  ;;  %2861 = vmatprep.mubr.msk.bf16.mxu1 %vm3173_vm0, %v3172_v2 }
  0xe7   : >> { %2844 = vmatpush3.bf16.msra.mxu0 %v3419_v34  ;;  %2856 = vmatpush3.bf16.msra.mxu1 %v3419_v34 }
  0xe8   : >> { %2845 = vmatprep.subr.bf16.mxu0 %v3172_v2  ;;  %2857 = vmatprep.subr.bf16.mxu1 %v3172_v2 }
  0xeb   : >> { %2846 = vmatpush3.bf16.msra.mxu0 %v3432_v36  ;;  %2858 = vmatpush3.bf16.msra.mxu1 %v3432_v36 }
  0xec   : >> { %2847 = vmatprep.subr.bf16.mxu0 %v3172_v2  ;;  %2859 = vmatprep.subr.bf16.mxu1 %v3172_v2 }
  0xef   : >> { %2848 = vmatpush3.bf16.msra.mxu0 %v3441_v39  ;;  %2860 = vmatpush3.bf16.msra.mxu1 %v3441_v39 }
  0xf0   : >> { %2865 = vmatprep.subr.bf16.mxu0 %v3172_v2  ;;  %2877 = vmatprep.subr.bf16.mxu1 %v3172_v2 }
  0xf2   : >> { %2850 = vmatmul.mubr.msk.bf16.vlgmr.msra.gmra.mrb[4].mxu0 %vm227_vm1, %v3544_v55  ;;  %2862 = vmatmul.mubr.msk.bf16.vlgmr.msra.gmra.mrb[4].mxu1 %vm227_vm1, %v3589_v6 }
  0xf3   : >> { %2866 = vmatpush3.bf16.msra.mxu0 %v3452_v41  ;;  %2878 = vmatpush3.bf16.msra.mxu1 %v3452_v41 }
  0xf4   : >> { %2867 = vmatprep.subr.bf16.mxu0 %v3172_v2  ;;  %2879 = vmatprep.subr.bf16.mxu1 %v3172_v2 }
  0xf5   : >> { %2873 = vmatprep.mubr.msk.bf16.mxu0 %vm3173_vm0, %v3172_v2  ;;  %2885 = vmatprep.mubr.msk.bf16.mxu1 %vm3173_vm0, %v3172_v2 }
  0xf7   : >> { %2868 = vmatpush3.bf16.msra.mxu0 %v3466_v43  ;;  %2880 = vmatpush3.bf16.msra.mxu1 %v3466_v43 }
  0xf8   : >> { %2869 = vmatprep.subr.bf16.mxu0 %v3172_v2  ;;  %2881 = vmatprep.subr.bf16.mxu1 %v3172_v2 }
  0xfb   : >> { %2870 = vmatpush3.bf16.msra.mxu0 %v3479_v45  ;;  %2882 = vmatpush3.bf16.msra.mxu1 %v3479_v45 }
  0xfc   : >> { %2871 = vmatprep.subr.bf16.mxu0 %v3172_v2  ;;  %2883 = vmatprep.subr.bf16.mxu1 %v3172_v2 }
  0xff   : >> { %2872 = vmatpush3.bf16.msra.mxu0 %v3488_v48  ;;  %2884 = vmatpush3.bf16.msra.mxu1 %v3488_v48 }
 0x100   : >> { %2889 = vmatprep.subr.bf16.mxu0 %v3172_v2  ;;  %2901 = vmatprep.subr.bf16.mxu1 %v3172_v2 }
 0x102   : >> { %2874 = vmatmul.mubr.msk.bf16.vlgmr.msra.gmra.mrb[4].mxu0 %vm227_vm1, %v3589_v6  ;;  %2886 = vmatmul.mubr.msk.bf16.vlgmr.msra.gmra.mrb[4].mxu1 %vm227_vm1, %v3636_v22 }
 0x103   : >> { %2890 = vmatpush3.bf16.msra.mxu0 %v3499_v50  ;;  %2902 = vmatpush3.bf16.msra.mxu1 %v3499_v50 }
 0x104   : >> { %2891 = vmatprep.subr.bf16.mxu0 %v3172_v2  ;;  %2903 = vmatprep.subr.bf16.mxu1 %v3172_v2 }
 0x105   : >> { %2897 = vmatprep.mubr.msk.bf16.mxu0 %vm3173_vm0, %v3172_v2  ;;  %2909 = vmatprep.mubr.msk.bf16.mxu1 %vm3173_vm0, %v3172_v2 }
 0x107   : >> { %2892 = vmatpush3.bf16.msra.mxu0 %v3512_v51  ;;  %2904 = vmatpush3.bf16.msra.mxu1 %v3512_v51 }
 0x108   : >> { %2893 = vmatprep.subr.bf16.mxu0 %v3172_v2  ;;  %2905 = vmatprep.subr.bf16.mxu1 %v3172_v2 }
 0x10b   : >> { %2894 = vmatpush3.bf16.msra.mxu0 %v3525_v52  ;;  %2906 = vmatpush3.bf16.msra.mxu1 %v3525_v52 }
 0x10c   : >> { %2895 = vmatprep.subr.bf16.mxu0 %v3172_v2  ;;  %2907 = vmatprep.subr.bf16.mxu1 %v3172_v2 }
 0x10f   : >> { %2896 = vmatpush3.bf16.msra.mxu0 %v3534_v53  ;;  %2908 = vmatpush3.bf16.msra.mxu1 %v3534_v53 }
 0x110   : >> { %2913 = vmatprep.subr.bf16.mxu0 %v3172_v2  ;;  %2925 = vmatprep.subr.bf16.mxu1 %v3172_v2 }
 0x112   : >> { %2898 = vmatmul.mubr.msk.bf16.vlgmr.msra.gmra.mrb[4].mxu0 %vm227_vm1, %v2323_v1  ;;  %2910 = vmatmul.mubr.msk.bf16.vlgmr.msra.gmra.mrb[4].mxu1 %vm227_vm1, %v2327_v3 }
 0x113   : >> { %2914 = vmatpush3.bf16.msra.mxu0 %v3549_v56  ;;  %2926 = vmatpush3.bf16.msra.mxu1 %v3549_v56 }
 0x114   : >> { %2915 = vmatprep.subr.bf16.mxu0 %v3172_v2  ;;  %2927 = vmatprep.subr.bf16.mxu1 %v3172_v2 }
 0x115   : >> { %2921 = vmatprep.mubr.msk.bf16.mxu0 %vm3173_vm0, %v3172_v2  ;;  %2933 = vmatprep.mubr.msk.bf16.mxu1 %vm3173_vm0, %v3172_v2 }
 0x117   : >> { %2916 = vmatpush3.bf16.msra.mxu0 %v3563_v58  ;;  %2928 = vmatpush3.bf16.msra.mxu1 %v3563_v58 }
 0x118   : >> { %2917 = vmatprep.subr.bf16.mxu0 %v3172_v2  ;;  %2929 = vmatprep.subr.bf16.mxu1 %v3172_v2 }
 0x11b   : >> { %2918 = vmatpush3.bf16.msra.mxu0 %v3576_v60  ;;  %2930 = vmatpush3.bf16.msra.mxu1 %v3576_v60 }
 0x11c   : >> { %2919 = vmatprep.subr.bf16.mxu0 %v3172_v2  ;;  %2931 = vmatprep.subr.bf16.mxu1 %v3172_v2 }
 0x11f   : >> { %2920 = vmatpush3.bf16.msra.mxu0 %v3585_v63  ;;  %2932 = vmatpush3.bf16.msra.mxu1 %v3585_v63 }
 0x120   : >> { %2937 = vmatprep.subr.bf16.mxu0 %v3172_v2  ;;  %2949 = vmatprep.subr.bf16.mxu1 %v3172_v2 }
 0x122   : >> { %2922 = vmatmul.mubr.msk.bf16.vlgmr.msra.gmra.mrb[4].mxu0 %vm227_vm1, %v2327_v3  ;;  %2934 = vmatmul.mubr.msk.bf16.vlgmr.msra.gmra.mrb[4].mxu1 %vm227_vm1, %v1979_v12 }
 0x123   : >> { %2938 = vmatpush3.bf16.msra.mxu0 %v3596_v7  ;;  %2950 = vmatpush3.bf16.msra.mxu1 %v3596_v7 }
 0x124   : >> { %2939 = vmatprep.subr.bf16.mxu0 %v3172_v2  ;;  %2951 = vmatprep.subr.bf16.mxu1 %v3172_v2 }
 0x125   : >> { %2945 = vmatprep.mubr.msk.bf16.mxu0 %vm3173_vm0, %v3172_v2  ;;  %2957 = vmatprep.mubr.msk.bf16.mxu1 %vm3173_vm0, %v3172_v2 }
 0x127   : >> { %2940 = vmatpush3.bf16.msra.mxu0 %v3610_v11  ;;  %2952 = vmatpush3.bf16.msra.mxu1 %v3610_v11 }
 0x128   : >> { %2941 = vmatprep.subr.bf16.mxu0 %v3172_v2  ;;  %2953 = vmatprep.subr.bf16.mxu1 %v3172_v2 }
 0x12b   : >> { %2942 = vmatpush3.bf16.msra.mxu0 %v3623_v15  ;;  %2954 = vmatpush3.bf16.msra.mxu1 %v3623_v15 }
 0x12c   : >> { %2943 = vmatprep.subr.bf16.mxu0 %v3172_v2  ;;  %2955 = vmatprep.subr.bf16.mxu1 %v3172_v2 }
 0x12f   : >> { %2944 = vmatpush3.bf16.msra.mxu0 %v3632_v21  ;;  %2956 = vmatpush3.bf16.msra.mxu1 %v3632_v21 }
 0x132   : >> { %2946 = vmatmul.mubr.msk.bf16.vlgmr.msra.gmra.mrb[4].mxu0 %vm227_vm1, %v1979_v12  ;;  %2958 = vmatmul.mubr.msk.bf16.vlgmr.msra.gmra.mrb[4].mxu1 %vm227_vm1, %v2074_v23 }
 0x175   : >> { %v1277_v24 = vpop.f32.mrb[0].mxu0  ;;  %v1331_v25 = vpop.f32.mrb[0].mxu1 }
 0x176   : >> { %v2961_v26 = vadd.f32 %v3205_v0, %v1277_v24  ;;  %v2962_v27 = vadd.f32 %v3205_v0, %v1331_v25  ;;  %v2731_v28 = vpop.f32.mrb[1].mxu0  ;;  %v2743_v29 = vpop.f32.mrb[1].mxu1 }
 0x177   : >> { %v1280_v30 = vpop.f32.mrb[2].mxu0  ;;  %v1334_v31 = vpop.f32.mrb[2].mxu1 }
 0x178   : >> { %v1338_v2 = vmax.f32 %v2961_v26, %v2962_v27  ;;  %v2732_v32 = vpop.f32.mrb[3].mxu0  ;;  %v2744_v33 = vpop.f32.mrb[3].mxu1 }
 0x205   : >> { %v2058_v34 = vpop.f32.mrb[4].mxu0  ;;  %v2112_v35 = vpop.f32.mrb[4].mxu1 }
 0x206   : >> { %v2963_v36 = vadd.f32 %v3205_v0, %v2058_v34  ;;  %v2964_v37 = vadd.f32 %v3205_v0, %v2112_v35  ;;  %v2947_v38 = vpop.f32.mrb[5].mxu0  ;;  %v2959_v39 = vpop.f32.mrb[5].mxu1 }
 0x207   : >> { %v2061_v40 = vpop.f32.mrb[6].mxu0  ;;  %v2115_v41 = vpop.f32.mrb[6].mxu1 }
 0x208   : >> { %v2119_v42 = vmax.f32 %v2963_v36, %v2964_v37  ;;  %v2948_v43 = vpop.f32.mrb[7].mxu0  ;;  %v2960_v44 = vpop.f32.mrb[7].mxu1 }
 0x20a   : >> { %v2120_v45 = vmax.f32 %v1338_v2, %v2119_v42  ;;  %183 = sbr.rel (!%p181_p4) target bundleno = 17 (0x11), region = 78 }
 0x20c   : >> { %v2121_v46 = vmax.f32 %v2120_v45, 0.0 }
 0x20e   : >> { %v2122_v47 = vpack.c.bf16 %v2121_v46, %v2121_v46 }
 0x210   : >> { %2125 = vst [vmem:[%s2124_s6] sm:$0x3] %v2122_v47 }
 0x211 PF: > { %s13_s12 = sadd.s32 1, %s3166_s12  }
 0x212   : > { %p10_p5 = scmp.ge.s32.totalorder %s13_s12, 4  }
 0x214   :  { %12 = sbr.rel (!%p10_p5) target bundleno = 1 (0x1), region = 89 }

// kernel: crnn_ser_forward.10
= control target key start
LH: loop header
LB: loop body
LE: loop exit
PB: predicated region body
PF: predicated region fallthrough
CT: control target
= control target key end

     0   :  { %s3535_s12 = smov 0   ;;  %s4894_s0 = inlined_call_operand.vmem [shape: bf16[2,12,3,128], index: 0, kind: input, shape index: {}]   ;;  %s4895_s1 = inlined_call_operand.vmem [shape: bf16[1152,256], index: 1, kind: input, shape index: {}]   ;;  %s4896_s2 = inlined_call_operand.vmem [shape: f32[1,256], index: 2, kind: input, shape index: {}]   ;;  %s4897_s3 = inlined_call_operand.vmem [shape: bf16[2,2,2,256], index: 3, kind: output, shape index: {}]  }
   0x1 LB: > { %s2888_s13 = sadd.s32 4294967295, %s3507_s12   ;;  %p2892_p0 = scmp.ge.s32.totalorder %s3507_s12, 1  ;;  %s3507_s12 = sphi %s3535_s12, %s13_s12  }
   0x2   : > { %p137_p1 = scmp.lt.s32.totalorder %s3507_s12, 3 }
   0x4   : > { %p138_p2 = pnand %p2892_p0, %p137_p1 }
   0x5   : > { %p160_p3 = scmp.lt.s32.totalorder (!%p138_p2), %s2888_s13, 1  ;;  %v172_v0 = vlaneseq (!%p138_p2)  ;;  %v170_v2 = vld [vmem:[%s4896_s2] sm:$0x3] (!%p138_p2)  ;;  %s3564_s24 = smov (!%p138_p2), 0  }
   0x6   : > { %141 = sbr.rel (%p138_p2) target bundleno = 821 (0x335), region = 32 }
   0x7   : > { %v3543_v1 = vshrl.u32 (!%p138_p2), %v172_v0, 7 }
   0x9   : > { %5017 = vst [vmem:[#allocation2_spill] sm:$0xff] (!%p138_p2), %v3543_v1  ;;  %v174_v3 = vsub.s32 (!%p138_p2), 0, %v3543_v1  ;;  %v178_v4 = vsub.s32 (!%p138_p2), 1, %v3543_v1 }
   0xb   : > { %v3560_v5 = vrot.slane (!%p138_p2), %v170_v2, %v174_v3  ;;  %v3562_v6 = vrot.slane (!%p138_p2), %v170_v2, %v178_v4 }
   0xd   : > { %s5139_s13 = smov (!%p160_p3, %s2888_s13), 1  ;;  %5018 = vst [vmem:[#allocation3_spill] sm:$0xff] %v3560_v5  ;;  %5019 = vst [vmem:[#allocation4_spill] sm:$0xff] %v3562_v6 }
   0xe   : > { %s3225_s16 = smul.u32 24, %s5139_s13  ;;  %s2894_s17 = sshll.u32 %s5139_s13, 2 }
   0xf   : > { %s3553_s20 = scalar_lea.vmem %s4897_s3, %s2894_s17 }
  0x10   : > { %s3558_s23 = scalar_lea.vmem %s4894_s0, %s3225_s16 }
  0x11 LB: >> { %v3244_v7 = vld [vmem:[%s4895_s1 + $0x4] ss:$8 sps:$4 sm:$0xff]   ;;  %v3246_v8 = vld [vmem:[%s4895_s1] ss:$8 sps:$4 sm:$0xff]   ;;  %v4898_v9 = vmov 0   ;;  %s3081_s5 = sshll.u32 %s3511_s24, 2  ;;  %s3511_s24 = sphi %s3564_s24, %s187_s24  }
  0x12   : >> { %326 = vmatprep.mubr.bf16.mxu0 %v4898_v9  ;;  %369 = vmatprep.mubr.bf16.mxu1 %v4898_v9  ;;  %v3247_v10 = vld [vmem:[%s4895_s1 + $0x14] ss:$8 sps:$4 sm:$0xff]   ;;  %v3249_v11 = vld [vmem:[%s4895_s1 + $0x10] ss:$8 sps:$4 sm:$0xff]   ;;  %v3250_v12 = vld [vmem:[%s4895_s1 + $0x24] ss:$8 sps:$4 sm:$0xff]   ;;  %s3621_s8 = scalar_lea.vmem %s3558_s23, %s3081_s5 }
  0x13   : >> { %294 = vmatprep.subr.bf16.mxu0 %v3244_v7  ;;  %337 = vmatprep.subr.bf16.mxu1 %v3244_v7  ;;  %v3252_v13 = vld [vmem:[%s4895_s1 + $0x20] ss:$8 sps:$4 sm:$0xff]   ;;  %v3253_v14 = vld [vmem:[%s4895_s1 + $0x34] ss:$8 sps:$4 sm:$0xff]   ;;  %v3255_v15 = vld [vmem:[%s4895_s1 + $0x30] ss:$8 sps:$4 sm:$0xff]  }
  0x14   : >> { %295 = vmatpush1.bf16.msra.mxu0 %v3246_v8  ;;  %338 = vmatpush1.bf16.msra.mxu1 %v3246_v8  ;;  %v3256_v16 = vld [vmem:[%s4895_s1 + $0x44] ss:$8 sps:$4 sm:$0xff]   ;;  %v3258_v17 = vld [vmem:[%s4895_s1 + $0x40] ss:$8 sps:$4 sm:$0xff]   ;;  %v3259_v18 = vld [vmem:[%s4895_s1 + $0x54] ss:$8 sps:$4 sm:$0xff]  }
  0x15   : >> { %296 = vmatprep.subr.bf16.mxu0 %v3247_v10  ;;  %339 = vmatprep.subr.bf16.mxu1 %v3247_v10  ;;  %v3261_v19 = vld [vmem:[%s4895_s1 + $0x50] ss:$8 sps:$4 sm:$0xff]   ;;  %v3262_v20 = vld [vmem:[%s4895_s1 + $0x64] ss:$8 sps:$4 sm:$0xff]   ;;  %v3264_v21 = vld [vmem:[%s4895_s1 + $0x60] ss:$8 sps:$4 sm:$0xff]  }
  0x16   : >> { %v3265_v22 = vld [vmem:[%s4895_s1 + $0x74] ss:$8 sps:$4 sm:$0xff]   ;;  %v3267_v23 = vld [vmem:[%s4895_s1 + $0x70] ss:$8 sps:$4 sm:$0xff]   ;;  %v3268_v24 = vld [vmem:[%s4895_s1 + $0x84] ss:$8 sps:$4 sm:$0xff]  }
  0x17   : >> { %v191_v25 = vld [vmem:[%s3621_s8] sm:$0x1]  ;;  %v2899_v26 = vld [vmem:[%s3621_s8 + $0xc] sm:$0x1]  ;;  %v3271_v28 = vld [vmem:[%s4895_s1 + $0x94] ss:$8 sps:$4 sm:$0xff]  }
  0x18   : >> { %297 = vmatpush1.bf16.msra.mxu0 %v3249_v11  ;;  %340 = vmatpush1.bf16.msra.mxu1 %v3249_v11  ;;  %v3270_v27 = vld [vmem:[%s4895_s1 + $0x80] ss:$8 sps:$4 sm:$0xff]   ;;  %v3273_v29 = vld [vmem:[%s4895_s1 + $0x90] ss:$8 sps:$4 sm:$0xff]   ;;  %v3274_v30 = vld [vmem:[%s4895_s1 + $0xa4] ss:$8 sps:$4 sm:$0xff]  }
  0x19   : >> { %298 = vmatprep.subr.bf16.mxu0 %v3250_v12  ;;  %341 = vmatprep.subr.bf16.mxu1 %v3250_v12  ;;  %v3276_v31 = vld [vmem:[%s4895_s1 + $0xa0] ss:$8 sps:$4 sm:$0xff]   ;;  %v3277_v32 = vld [vmem:[%s4895_s1 + $0xb4] ss:$8 sps:$4 sm:$0xff]   ;;  %v3279_v33 = vld [vmem:[%s4895_s1 + $0xb0] ss:$8 sps:$4 sm:$0xff]  }
  0x1a   : >> { %v3280_v34 = vld [vmem:[%s4895_s1 + $0xc4] ss:$8 sps:$4 sm:$0xff]   ;;  %v3282_v35 = vld [vmem:[%s4895_s1 + $0xc0] ss:$8 sps:$4 sm:$0xff]   ;;  %v3283_v36 = vld [vmem:[%s4895_s1 + $0xd4] ss:$8 sps:$4 sm:$0xff]  }
  0x1b   : >> { %v3285_v37 = vld [vmem:[%s4895_s1 + $0xd0] ss:$8 sps:$4 sm:$0xff]   ;;  %v2933_v38 = vld.sshfl [vmem:[%s3621_s8] sm:$0x3 pattern:$0x76325410] }
  0x1c   : >> { %299 = vmatpush1.bf16.msra.mxu0 %v3252_v13  ;;  %342 = vmatpush1.bf16.msra.mxu1 %v3252_v13  ;;  %v3286_v39 = vld [vmem:[%s4895_s1 + $0xe4] ss:$8 sps:$4 sm:$0xff]   ;;  %v530_v40 = vshll.u32 %v2933_v38, 16  ;;  %v3288_v41 = vld [vmem:[%s4895_s1 + $0xe0] ss:$8 sps:$4 sm:$0xff]   ;;  %v528_v43 = vshrl.u32 %v2933_v38, 16 }
  0x1d   : >> { %300 = vmatprep.subr.bf16.mxu0 %v3253_v14  ;;  %343 = vmatprep.subr.bf16.mxu1 %v3253_v14  ;;  %v3289_v42 = vld [vmem:[%s4895_s1 + $0xf4] ss:$8 sps:$4 sm:$0xff]   ;;  %v3291_v45 = vld [vmem:[%s4895_s1 + $0xf0] ss:$8 sps:$4 sm:$0xff]   ;;  %v3292_v46 = vld [vmem:[%s4895_s1 + $0x104] ss:$8 sps:$4 sm:$0xff]  }
  0x1e   : >> { %v532_v44 = vrot.slane %v530_v40, 1  ;;  %v3294_v48 = vld [vmem:[%s4895_s1 + $0x100] ss:$8 sps:$4 sm:$0xff]   ;;  %v3295_v49 = vld [vmem:[%s4895_s1 + $0x114] ss:$8 sps:$4 sm:$0xff]  }
  0x1f   : >> { %v3297_v50 = vld [vmem:[%s4895_s1 + $0x110] ss:$8 sps:$4 sm:$0xff]   ;;  %v3694_v51 = vld [vmem:[%s4895_s1 + $0x124] ss:$8 sps:$4 sm:$0xff]   ;;  %v3701_v52 = vld [vmem:[%s4895_s1 + $0x120] ss:$8 sps:$4 sm:$0xff]  }
  0x20   : >> { %301 = vmatpush1.bf16.msra.mxu0 %v3255_v15  ;;  %344 = vmatpush1.bf16.msra.mxu1 %v3255_v15  ;;  %v3679_v47 = vor.u32 %v532_v44, %v528_v43  ;;  %v3708_v53 = vld [vmem:[%s4895_s1 + $0x134] ss:$8 sps:$4 sm:$0xff]   ;;  %v3715_v54 = vld [vmem:[%s4895_s1 + $0x130] ss:$8 sps:$4 sm:$0xff]   ;;  %v3722_v55 = vld [vmem:[%s4895_s1 + $0x144] ss:$8 sps:$4 sm:$0xff]  }
  0x21   : >> { %302 = vmatprep.subr.bf16.mxu0 %v3256_v16  ;;  %345 = vmatprep.subr.bf16.mxu1 %v3256_v16  ;;  %v3729_v56 = vld [vmem:[%s4895_s1 + $0x140] ss:$8 sps:$4 sm:$0xff]   ;;  %v3736_v57 = vld [vmem:[%s4895_s1 + $0x154] ss:$8 sps:$4 sm:$0xff]   ;;  %v3741_v58 = vld [vmem:[%s4895_s1 + $0x150] ss:$8 sps:$4 sm:$0xff]  }
  0x22   : >> { %v2950_v59 = vld.sshfl [vmem:[%s3621_s8 + $0xc] sm:$0x3 pattern:$0x76325410]  ;;  %v3758_v62 = vld [vmem:[%s4895_s1 + $0x160] ss:$8 sps:$4 sm:$0xff]  }
  0x23   : >> { %v3751_v60 = vld [vmem:[%s4895_s1 + $0x164] ss:$8 sps:$4 sm:$0xff]   ;;  %v728_v61 = vshll.u32 %v2950_v59, 16  ;;  %v3765_v63 = vld [vmem:[%s4895_s1 + $0x174] ss:$8 sps:$4 sm:$0xff]   ;;  %v726_v0 = vshrl.u32 %v2950_v59, 16 }
  0x24   : >> { %303 = vmatpush1.bf16.msra.mxu0 %v3258_v17  ;;  %346 = vmatpush1.bf16.msra.mxu1 %v3258_v17  ;;  %v3772_v3 = vld [vmem:[%s4895_s1 + $0x170] ss:$8 sps:$4 sm:$0xff]   ;;  %v3779_v4 = vld [vmem:[%s4895_s1 + $0x184] ss:$8 sps:$4 sm:$0xff]   ;;  %v3786_v8 = vld [vmem:[%s4895_s1 + $0x180] ss:$8 sps:$4 sm:$0xff]  }
  0x25   : >> { %304 = vmatprep.subr.bf16.mxu0 %v3259_v18  ;;  %347 = vmatprep.subr.bf16.mxu1 %v3259_v18  ;;  %v730_v2 = vrot.slane %v728_v61, 1  ;;  %v3793_v10 = vld [vmem:[%s4895_s1 + $0x194] ss:$8 sps:$4 sm:$0xff]   ;;  %v3801_v11 = vld [vmem:[%s4895_s1 + $0x190] ss:$8 sps:$4 sm:$0xff]  }
  0x26   : >> { %v3808_v12 = vld [vmem:[%s4895_s1 + $0x1a4] ss:$8 sps:$4 sm:$0xff]   ;;  %v3817_v13 = vld [vmem:[%s4895_s1 + $0x1a0] ss:$8 sps:$4 sm:$0xff]   ;;  %v3824_v14 = vld [vmem:[%s4895_s1 + $0x1b4] ss:$8 sps:$4 sm:$0xff]  }
  0x27   : >> { %v731_v7 = vor.u32 %v730_v2, %v726_v0  ;;  %v3831_v15 = vld [vmem:[%s4895_s1 + $0x1b0] ss:$8 sps:$4 sm:$0xff]   ;;  %v3838_v16 = vld [vmem:[%s4895_s1 + $0x1c4] ss:$8 sps:$4 sm:$0xff]   ;;  %v3845_v17 = vld [vmem:[%s4895_s1 + $0x1c0] ss:$8 sps:$4 sm:$0xff]  }
  0x28   : >> { %305 = vmatpush1.bf16.msra.mxu0 %v3261_v19  ;;  %348 = vmatpush1.bf16.msra.mxu1 %v3261_v19  ;;  %v3852_v18 = vld [vmem:[%s4895_s1 + $0x1d4] ss:$8 sps:$4 sm:$0xff]   ;;  %v3859_v19 = vld [vmem:[%s4895_s1 + $0x1d0] ss:$8 sps:$4 sm:$0xff]   ;;  %v4049_v59 = vld [vmem:[%s4895_s1 + $0x2a4] ss:$8 sps:$4 sm:$0xff]  }
  0x29   : >> { %306 = vmatprep.subr.bf16.mxu0 %v3262_v20  ;;  %349 = vmatprep.subr.bf16.mxu1 %v3262_v20  ;;  %v3866_v20 = vld [vmem:[%s4895_s1 + $0x1e4] ss:$8 sps:$4 sm:$0xff]   ;;  %v2991_v38 = vld.sshfl [vmem:[%s3621_s8 + $0x2] sm:$0x3 pattern:$0x76325410] }
  0x2a   : >> { %v1118_v40 = vshll.u32 %v2991_v38, 16  ;;  %v1116_v43 = vshrl.u32 %v2991_v38, 16  ;;  %5020 = vst [vmem:[#allocation5_spill] sm:$0xff] %v4049_v59  ;;  %v4058_v61 = vld [vmem:[%s4895_s1 + $0x2a0] ss:$8 sps:$4 sm:$0xff]  }
  0x2b   : >> { %5021 = vst [vmem:[#allocation6_spill] sm:$0xff] %v4058_v61  ;;  %v4065_v0 = vld [vmem:[%s4895_s1 + $0x2b4] ss:$8 sps:$4 sm:$0xff]   ;;  %v4072_v2 = vld [vmem:[%s4895_s1 + $0x2b0] ss:$8 sps:$4 sm:$0xff]  }
  0x2c   : >> { %307 = vmatpush1.bf16.msra.mxu0 %v3264_v21  ;;  %350 = vmatpush1.bf16.msra.mxu1 %v3264_v21  ;;  %v3873_v21 = vld [vmem:[%s4895_s1 + $0x1e0] ss:$8 sps:$4 sm:$0xff]   ;;  %v1120_v44 = vrot.slane %v1118_v40, 1  ;;  %5022 = vst [vmem:[#allocation7_spill] sm:$0xff] %v4065_v0  ;;  %5023 = vst [vmem:[#allocation8_spill] sm:$0xff] %v4072_v2 }
  0x2d   : >> { %308 = vmatprep.subr.bf16.mxu0 %v3265_v22  ;;  %351 = vmatprep.subr.bf16.mxu1 %v3265_v22  ;;  %v3880_v22 = vld [vmem:[%s4895_s1 + $0x1f4] ss:$8 sps:$4 sm:$0xff]   ;;  %v4086_v38 = vld [vmem:[%s4895_s1 + $0x2c0] ss:$8 sps:$4 sm:$0xff]  }
  0x2e   : >> { %5025 = vst [vmem:[#allocation10_spill] sm:$0xff] %v4086_v38  ;;  %v4093_v40 = vld [vmem:[%s4895_s1 + $0x2d4] ss:$8 sps:$4 sm:$0xff]   ;;  %v4115_v6 = vld [vmem:[%s4895_s1 + $0x2e0] ss:$8 sps:$4 sm:$0xff]  }
  0x2f   : >> { %5026 = vst [vmem:[#allocation11_spill] sm:$0xff] %v4093_v40  ;;  %5029 = vst [vmem:[#allocation14_spill] sm:$0xff] %v4115_v6  ;;  %v4122_v5 = vld [vmem:[%s4895_s1 + $0x2f4] ss:$8 sps:$4 sm:$0xff]  }
  0x30   : >> { %309 = vmatpush1.bf16.msra.mxu0 %v3267_v23  ;;  %352 = vmatpush1.bf16.msra.mxu1 %v3267_v23  ;;  %v3887_v23 = vld [vmem:[%s4895_s1 + $0x1f0] ss:$8 sps:$4 sm:$0xff]   ;;  %5030 = vst [vmem:[#allocation15_spill] sm:$0xff] %v4122_v5 }
  0x31   : >> { %476 = vmatprep.subr.bf16.mxu0 %v3268_v24  ;;  %535 = vmatprep.subr.bf16.mxu1 %v3268_v24  ;;  %v3894_v24 = vld [vmem:[%s4895_s1 + $0x204] ss:$8 sps:$4 sm:$0xff]  }
  0x33   : >> { %327 = vmatmul.mubr.bf16.vlgmr.msra.gmra.mrb[0].mxu0 %v191_v25  ;;  %370 = vmatmul.mubr.bf16.vlgmr.msra.gmra.mrb[0].mxu1 %v2899_v26  ;;  %v3899_v25 = vld [vmem:[%s3621_s8 + $0x2] sm:$0x1] }
  0x34   : >> { %477 = vmatpush1.bf16.msra.mxu0 %v3270_v27  ;;  %536 = vmatpush1.bf16.msra.mxu1 %v3270_v27  ;;  %v3907_v27 = vld [vmem:[%s4895_s1 + $0x200] ss:$8 sps:$4 sm:$0xff]  }
  0x35   : >> { %478 = vmatprep.subr.bf16.mxu0 %v3271_v28  ;;  %537 = vmatprep.subr.bf16.mxu1 %v3271_v28  ;;  %v3914_v28 = vld [vmem:[%s4895_s1 + $0x214] ss:$8 sps:$4 sm:$0xff]  }
  0x36   : >> { %508 = vmatprep.mubr.bf16.mxu0 %v4898_v9  ;;  %567 = vmatprep.mubr.bf16.mxu1 %v4898_v9 }
  0x38   : >> { %479 = vmatpush1.bf16.msra.mxu0 %v3273_v29  ;;  %538 = vmatpush1.bf16.msra.mxu1 %v3273_v29  ;;  %v3923_v29 = vld [vmem:[%s4895_s1 + $0x210] ss:$8 sps:$4 sm:$0xff]  }
  0x39   : >> { %480 = vmatprep.subr.bf16.mxu0 %v3274_v30  ;;  %539 = vmatprep.subr.bf16.mxu1 %v3274_v30  ;;  %v3930_v30 = vld [vmem:[%s4895_s1 + $0x224] ss:$8 sps:$4 sm:$0xff]  }
  0x3c   : >> { %481 = vmatpush1.bf16.msra.mxu0 %v3276_v31  ;;  %540 = vmatpush1.bf16.msra.mxu1 %v3276_v31  ;;  %v3939_v31 = vld [vmem:[%s4895_s1 + $0x220] ss:$8 sps:$4 sm:$0xff]  }
  0x3d   : >> { %482 = vmatprep.subr.bf16.mxu0 %v3277_v32  ;;  %541 = vmatprep.subr.bf16.mxu1 %v3277_v32  ;;  %v3946_v32 = vld [vmem:[%s4895_s1 + $0x234] ss:$8 sps:$4 sm:$0xff]  }
  0x40   : >> { %483 = vmatpush1.bf16.msra.mxu0 %v3279_v33  ;;  %542 = vmatpush1.bf16.msra.mxu1 %v3279_v33  ;;  %v3953_v33 = vld [vmem:[%s4895_s1 + $0x230] ss:$8 sps:$4 sm:$0xff]  }
  0x41   : >> { %484 = vmatprep.subr.bf16.mxu0 %v3280_v34  ;;  %543 = vmatprep.subr.bf16.mxu1 %v3280_v34  ;;  %v3960_v34 = vld [vmem:[%s4895_s1 + $0x244] ss:$8 sps:$4 sm:$0xff]  }
  0x44   : >> { %485 = vmatpush1.bf16.msra.mxu0 %v3282_v35  ;;  %544 = vmatpush1.bf16.msra.mxu1 %v3282_v35  ;;  %v3967_v35 = vld [vmem:[%s4895_s1 + $0x240] ss:$8 sps:$4 sm:$0xff]  }
  0x45   : >> { %486 = vmatprep.subr.bf16.mxu0 %v3283_v36  ;;  %545 = vmatprep.subr.bf16.mxu1 %v3283_v36  ;;  %v3974_v36 = vld [vmem:[%s4895_s1 + $0x254] ss:$8 sps:$4 sm:$0xff]  }
  0x48   : >> { %487 = vmatpush1.bf16.msra.mxu0 %v3285_v37  ;;  %546 = vmatpush1.bf16.msra.mxu1 %v3285_v37  ;;  %v3981_v37 = vld [vmem:[%s4895_s1 + $0x250] ss:$8 sps:$4 sm:$0xff]  }
  0x49   : >> { %488 = vmatprep.subr.bf16.mxu0 %v3286_v39  ;;  %547 = vmatprep.subr.bf16.mxu1 %v3286_v39  ;;  %v3989_v39 = vld [vmem:[%s4895_s1 + $0x264] ss:$8 sps:$4 sm:$0xff]  }
  0x4c   : >> { %489 = vmatpush1.bf16.msra.mxu0 %v3288_v41  ;;  %548 = vmatpush1.bf16.msra.mxu1 %v3288_v41  ;;  %v3996_v41 = vld [vmem:[%s4895_s1 + $0x260] ss:$8 sps:$4 sm:$0xff]  }
  0x4d   : >> { %490 = vmatprep.subr.bf16.mxu0 %v3289_v42  ;;  %549 = vmatprep.subr.bf16.mxu1 %v3289_v42  ;;  %v4003_v42 = vld [vmem:[%s4895_s1 + $0x274] ss:$8 sps:$4 sm:$0xff]  }
  0x50   : >> { %491 = vmatpush1.bf16.msra.mxu0 %v3291_v45  ;;  %550 = vmatpush1.bf16.msra.mxu1 %v3291_v45  ;;  %v4010_v45 = vld [vmem:[%s4895_s1 + $0x270] ss:$8 sps:$4 sm:$0xff]  }
  0x51   : >> { %674 = vmatprep.subr.bf16.mxu0 %v3292_v46  ;;  %733 = vmatprep.subr.bf16.mxu1 %v3292_v46  ;;  %v4017_v46 = vld [vmem:[%s4895_s1 + $0x284] ss:$8 sps:$4 sm:$0xff]  }
  0x53   : >> { %509 = vmatmul.mubr.bf16.vlgmr.msra.gmra.mrb[0].mxu0 %v2899_v26  ;;  %568 = vmatmul.mubr.bf16.vlgmr.msra.gmra.mrb[0].mxu1 %v3679_v47  ;;  %v3902_v26 = vld [vmem:[%s3621_s8 + $0xe] sm:$0x1] }
  0x54   : >> { %675 = vmatpush1.bf16.msra.mxu0 %v3294_v48  ;;  %734 = vmatpush1.bf16.msra.mxu1 %v3294_v48  ;;  %v4026_v48 = vld [vmem:[%s4895_s1 + $0x280] ss:$8 sps:$4 sm:$0xff]  }
  0x55   : >> { %676 = vmatprep.subr.bf16.mxu0 %v3295_v49  ;;  %735 = vmatprep.subr.bf16.mxu1 %v3295_v49  ;;  %v4033_v49 = vld [vmem:[%s4895_s1 + $0x294] ss:$8 sps:$4 sm:$0xff]  }
  0x56   : >> { %706 = vmatprep.mubr.bf16.mxu0 %v4898_v9  ;;  %765 = vmatprep.mubr.bf16.mxu1 %v4898_v9 }
  0x58   : >> { %677 = vmatpush1.bf16.msra.mxu0 %v3297_v50  ;;  %736 = vmatpush1.bf16.msra.mxu1 %v3297_v50  ;;  %v4042_v50 = vld [vmem:[%s4895_s1 + $0x290] ss:$8 sps:$4 sm:$0xff]  }
  0x59   : >> { %678 = vmatprep.subr.bf16.mxu0 %v3694_v51  ;;  %737 = vmatprep.subr.bf16.mxu1 %v3694_v51 }
  0x5c   : >> { %679 = vmatpush1.bf16.msra.mxu0 %v3701_v52  ;;  %738 = vmatpush1.bf16.msra.mxu1 %v3701_v52 }
  0x5d   : >> { %680 = vmatprep.subr.bf16.mxu0 %v3708_v53  ;;  %739 = vmatprep.subr.bf16.mxu1 %v3708_v53 }
  0x60   : >> { %681 = vmatpush1.bf16.msra.mxu0 %v3715_v54  ;;  %740 = vmatpush1.bf16.msra.mxu1 %v3715_v54 }
  0x61   : >> { %682 = vmatprep.subr.bf16.mxu0 %v3722_v55  ;;  %741 = vmatprep.subr.bf16.mxu1 %v3722_v55 }
  0x64   : >> { %683 = vmatpush1.bf16.msra.mxu0 %v3729_v56  ;;  %742 = vmatpush1.bf16.msra.mxu1 %v3729_v56 }
  0x65   : >> { %684 = vmatprep.subr.bf16.mxu0 %v3736_v57  ;;  %743 = vmatprep.subr.bf16.mxu1 %v3736_v57 }
  0x68   : >> { %685 = vmatpush1.bf16.msra.mxu0 %v3741_v58  ;;  %744 = vmatpush1.bf16.msra.mxu1 %v3741_v58 }
  0x69   : >> { %686 = vmatprep.subr.bf16.mxu0 %v3751_v60  ;;  %745 = vmatprep.subr.bf16.mxu1 %v3751_v60 }
  0x6c   : >> { %687 = vmatpush1.bf16.msra.mxu0 %v3758_v62  ;;  %746 = vmatpush1.bf16.msra.mxu1 %v3758_v62 }
  0x6d   : >> { %688 = vmatprep.subr.bf16.mxu0 %v3765_v63  ;;  %747 = vmatprep.subr.bf16.mxu1 %v3765_v63 }
  0x70   : >> { %689 = vmatpush1.bf16.msra.mxu0 %v3772_v3  ;;  %748 = vmatpush1.bf16.msra.mxu1 %v3772_v3 }
  0x71   : >> { %882 = vmatprep.subr.bf16.mxu0 %v3779_v4  ;;  %925 = vmatprep.subr.bf16.mxu1 %v3779_v4 }
  0x73   : >> { %707 = vmatmul.mubr.bf16.vlgmr.msra.gmra.mrb[0].mxu0 %v3679_v47  ;;  %766 = vmatmul.mubr.bf16.vlgmr.msra.gmra.mrb[0].mxu1 %v731_v7  ;;  %v4019_v47 = vor.u32 %v1120_v44, %v1116_v43  ;;  %v4079_v7 = vld [vmem:[%s4895_s1 + $0x2c4] ss:$8 sps:$4 sm:$0xff]   ;;  %v4100_v43 = vld [vmem:[%s4895_s1 + $0x2d0] ss:$8 sps:$4 sm:$0xff]  }
  0x74   : >> { %883 = vmatpush1.bf16.msra.mxu0 %v3786_v8  ;;  %926 = vmatpush1.bf16.msra.mxu1 %v3786_v8  ;;  %5024 = vst [vmem:[#allocation9_spill] sm:$0xff] %v4079_v7  ;;  %5027 = vst [vmem:[#allocation12_spill] sm:$0xff] %v4100_v43  ;;  %v3008_v44 = vld.sshfl [vmem:[%s3621_s8 + $0xe] sm:$0x3 pattern:$0x76325410] }
  0x75   : >> { %884 = vmatprep.subr.bf16.mxu0 %v3793_v10  ;;  %927 = vmatprep.subr.bf16.mxu1 %v3793_v10  ;;  %v1316_v1 = vshll.u32 %v3008_v44, 16 }
  0x76   : >> { %914 = vmatprep.mubr.bf16.mxu0 %v4898_v9  ;;  %957 = vmatprep.mubr.bf16.mxu1 %v4898_v9 }
  0x78   : >> { %885 = vmatpush1.bf16.msra.mxu0 %v3801_v11  ;;  %928 = vmatpush1.bf16.msra.mxu1 %v3801_v11 }
  0x79   : >> { %886 = vmatprep.subr.bf16.mxu0 %v3808_v12  ;;  %929 = vmatprep.subr.bf16.mxu1 %v3808_v12 }
  0x7c   : >> { %887 = vmatpush1.bf16.msra.mxu0 %v3817_v13  ;;  %930 = vmatpush1.bf16.msra.mxu1 %v3817_v13 }
  0x7d   : >> { %888 = vmatprep.subr.bf16.mxu0 %v3824_v14  ;;  %931 = vmatprep.subr.bf16.mxu1 %v3824_v14 }
  0x80   : >> { %889 = vmatpush1.bf16.msra.mxu0 %v3831_v15  ;;  %932 = vmatpush1.bf16.msra.mxu1 %v3831_v15 }
  0x81   : >> { %890 = vmatprep.subr.bf16.mxu0 %v3838_v16  ;;  %933 = vmatprep.subr.bf16.mxu1 %v3838_v16 }
  0x84   : >> { %891 = vmatpush1.bf16.msra.mxu0 %v3845_v17  ;;  %934 = vmatpush1.bf16.msra.mxu1 %v3845_v17 }
  0x85   : >> { %892 = vmatprep.subr.bf16.mxu0 %v3852_v18  ;;  %935 = vmatprep.subr.bf16.mxu1 %v3852_v18 }
  0x88   : >> { %893 = vmatpush1.bf16.msra.mxu0 %v3859_v19  ;;  %936 = vmatpush1.bf16.msra.mxu1 %v3859_v19 }
  0x89   : >> { %894 = vmatprep.subr.bf16.mxu0 %v3866_v20  ;;  %937 = vmatprep.subr.bf16.mxu1 %v3866_v20 }
  0x8c   : >> { %895 = vmatpush1.bf16.msra.mxu0 %v3873_v21  ;;  %938 = vmatpush1.bf16.msra.mxu1 %v3873_v21 }
  0x8d   : >> { %896 = vmatprep.subr.bf16.mxu0 %v3880_v22  ;;  %939 = vmatprep.subr.bf16.mxu1 %v3880_v22 }
  0x90   : >> { %897 = vmatpush1.bf16.msra.mxu0 %v3887_v23  ;;  %940 = vmatpush1.bf16.msra.mxu1 %v3887_v23 }
  0x91   : >> { %1064 = vmatprep.subr.bf16.mxu0 %v3894_v24  ;;  %1123 = vmatprep.subr.bf16.mxu1 %v3894_v24 }
  0x93   : >> { %915 = vmatmul.mubr.bf16.vlgmr.msra.gmra.mrb[0].mxu0 %v3899_v25  ;;  %958 = vmatmul.mubr.bf16.vlgmr.msra.gmra.mrb[0].mxu1 %v3902_v26 }
  0x94   : >> { %1065 = vmatpush1.bf16.msra.mxu0 %v3907_v27  ;;  %1124 = vmatpush1.bf16.msra.mxu1 %v3907_v27 }
  0x95   : >> { %1066 = vmatprep.subr.bf16.mxu0 %v3914_v28  ;;  %1125 = vmatprep.subr.bf16.mxu1 %v3914_v28 }
  0x96   : >> { %1096 = vmatprep.mubr.bf16.mxu0 %v4898_v9  ;;  %1155 = vmatprep.mubr.bf16.mxu1 %v4898_v9 }
  0x98   : >> { %1067 = vmatpush1.bf16.msra.mxu0 %v3923_v29  ;;  %1126 = vmatpush1.bf16.msra.mxu1 %v3923_v29 }
  0x99   : >> { %1068 = vmatprep.subr.bf16.mxu0 %v3930_v30  ;;  %1127 = vmatprep.subr.bf16.mxu1 %v3930_v30 }
  0x9c   : >> { %1069 = vmatpush1.bf16.msra.mxu0 %v3939_v31  ;;  %1128 = vmatpush1.bf16.msra.mxu1 %v3939_v31 }
  0x9d   : >> { %1070 = vmatprep.subr.bf16.mxu0 %v3946_v32  ;;  %1129 = vmatprep.subr.bf16.mxu1 %v3946_v32 }
  0xa0   : >> { %1071 = vmatpush1.bf16.msra.mxu0 %v3953_v33  ;;  %1130 = vmatpush1.bf16.msra.mxu1 %v3953_v33 }
  0xa1   : >> { %1072 = vmatprep.subr.bf16.mxu0 %v3960_v34  ;;  %1131 = vmatprep.subr.bf16.mxu1 %v3960_v34 }
  0xa4   : >> { %1073 = vmatpush1.bf16.msra.mxu0 %v3967_v35  ;;  %1132 = vmatpush1.bf16.msra.mxu1 %v3967_v35 }
  0xa5   : >> { %1074 = vmatprep.subr.bf16.mxu0 %v3974_v36  ;;  %1133 = vmatprep.subr.bf16.mxu1 %v3974_v36 }
  0xa8   : >> { %1075 = vmatpush1.bf16.msra.mxu0 %v3981_v37  ;;  %1134 = vmatpush1.bf16.msra.mxu1 %v3981_v37 }
  0xa9   : >> { %1076 = vmatprep.subr.bf16.mxu0 %v3989_v39  ;;  %1135 = vmatprep.subr.bf16.mxu1 %v3989_v39 }
  0xac   : >> { %1077 = vmatpush1.bf16.msra.mxu0 %v3996_v41  ;;  %1136 = vmatpush1.bf16.msra.mxu1 %v3996_v41 }
  0xad   : >> { %1078 = vmatprep.subr.bf16.mxu0 %v4003_v42  ;;  %1137 = vmatprep.subr.bf16.mxu1 %v4003_v42 }
  0xb0   : >> { %1079 = vmatpush1.bf16.msra.mxu0 %v4010_v45  ;;  %1138 = vmatpush1.bf16.msra.mxu1 %v4010_v45 }
  0xb1   : >> { %1262 = vmatprep.subr.bf16.mxu0 %v4017_v46  ;;  %1321 = vmatprep.subr.bf16.mxu1 %v4017_v46 }
  0xb3   : >> { %1097 = vmatmul.mubr.bf16.vlgmr.msra.gmra.mrb[0].mxu0 %v3902_v26  ;;  %1156 = vmatmul.mubr.bf16.vlgmr.msra.gmra.mrb[0].mxu1 %v4019_v47 }
  0xb4   : >> { %1263 = vmatpush1.bf16.msra.mxu0 %v4026_v48  ;;  %1322 = vmatpush1.bf16.msra.mxu1 %v4026_v48 }
  0xb5   : >> { %1264 = vmatprep.subr.bf16.mxu0 %v4033_v49  ;;  %1323 = vmatprep.subr.bf16.mxu1 %v4033_v49 }
  0xb6   : >> { %1294 = vmatprep.mubr.bf16.mxu0 %v4898_v9  ;;  %1353 = vmatprep.mubr.bf16.mxu1 %v4898_v9  ;;  %v4108_v9 = vld [vmem:[%s4895_s1 + $0x2e4] ss:$8 sps:$4 sm:$0xff]  }
  0xb7   : >> { %5028 = vst [vmem:[#allocation13_spill] sm:$0xff] %v4108_v9 }
  0xb8   : >> { %1265 = vmatpush1.bf16.msra.mxu0 %v4042_v50  ;;  %1324 = vmatpush1.bf16.msra.mxu1 %v4042_v50 }
  0xb9   : >> { %1266 = vmatprep.subr.bf16.mxu0 %v4049_v59  ;;  %1325 = vmatprep.subr.bf16.mxu1 %v4049_v59 }
  0xbc   : >> { %1267 = vmatpush1.bf16.msra.mxu0 %v4058_v61  ;;  %1326 = vmatpush1.bf16.msra.mxu1 %v4058_v61 }
  0xbd   : >> { %1268 = vmatprep.subr.bf16.mxu0 %v4065_v0  ;;  %1327 = vmatprep.subr.bf16.mxu1 %v4065_v0 }
  0xc0   : >> { %1269 = vmatpush1.bf16.msra.mxu0 %v4072_v2  ;;  %1328 = vmatpush1.bf16.msra.mxu1 %v4072_v2 }
  0xc1   : >> { %1270 = vmatprep.subr.bf16.mxu0 %v4079_v7  ;;  %1329 = vmatprep.subr.bf16.mxu1 %v4079_v7  ;;  %v3049_v7 = vld.sshfl [vmem:[%s3621_s8 + $0x4] sm:$0x3 pattern:$0x76325410] }
  0xc2   : >> { %v1706_v2 = vshll.u32 %v3049_v7, 16  ;;  %v1704_v0 = vshrl.u32 %v3049_v7, 16 }
  0xc4   : >> { %1271 = vmatpush1.bf16.msra.mxu0 %v4086_v38  ;;  %1330 = vmatpush1.bf16.msra.mxu1 %v4086_v38  ;;  %v1318_v38 = vrot.slane %v1316_v1, 1  ;;  %v4145_v1 = vld [vmem:[%s4895_s1 + $0x300] ss:$8 sps:$4 sm:$0xff]   ;;  %v1708_v61 = vrot.slane %v1706_v2, 1 }
  0xc5   : >> { %1272 = vmatprep.subr.bf16.mxu0 %v4093_v40  ;;  %1331 = vmatprep.subr.bf16.mxu1 %v4093_v40  ;;  %v1314_v40 = vshrl.u32 %v3008_v44, 16  ;;  %5033 = vst [vmem:[#allocation18_spill] sm:$0xff] %v4145_v1  ;;  %v4386_v2 = vld [vmem:[%s4895_s1 + $0x400] ss:$8 sps:$4 sm:$0xff]  }
  0xc6   : >> { %v4379_v7 = vor.u32 %v1708_v61, %v1704_v0  ;;  %5066 = vst [vmem:[#allocation50_spill] sm:$0xff] %v4386_v2  ;;  %v4402_v61 = vld [vmem:[%s4895_s1 + $0x410] ss:$8 sps:$4 sm:$0xff]   ;;  %v4409_v0 = vld [vmem:[%s4895_s1 + $0x424] ss:$8 sps:$4 sm:$0xff]  }
  0xc7   : >> { %v4138_v44 = vor.u32 %v1318_v38, %v1314_v40  ;;  %v4161_v38 = vld [vmem:[%s4895_s1 + $0x310] ss:$8 sps:$4 sm:$0xff]   ;;  %v4168_v40 = vld [vmem:[%s4895_s1 + $0x324] ss:$8 sps:$4 sm:$0xff]   ;;  %5068 = vst [vmem:[#allocation52_spill] sm:$0xff] %v4402_v61  ;;  %5069 = vst [vmem:[#allocation53_spill] sm:$0xff] %v4409_v0 }
  0xc8   : >> { %1273 = vmatpush1.bf16.msra.mxu0 %v4100_v43  ;;  %1332 = vmatpush1.bf16.msra.mxu1 %v4100_v43  ;;  %v4129_v43 = vld [vmem:[%s4895_s1 + $0x2f0] ss:$8 sps:$4 sm:$0xff]   ;;  %5035 = vst [vmem:[#allocation20_spill] sm:$0xff] %v4161_v38  ;;  %5036 = vst [vmem:[#allocation21_spill] sm:$0xff] %v4168_v40 }
  0xc9   : >> { %1274 = vmatprep.subr.bf16.mxu0 %v4108_v9  ;;  %1333 = vmatprep.subr.bf16.mxu1 %v4108_v9  ;;  %5031 = vst [vmem:[#allocation16_spill] sm:$0xff] %v4129_v43  ;;  %v4136_v9 = vld [vmem:[%s4895_s1 + $0x304] ss:$8 sps:$4 sm:$0xff]  }
  0xca   : >> { %5032 = vst [vmem:[#allocation17_spill] sm:$0xff] %v4136_v9 }
  0xcc   : >> { %1275 = vmatpush1.bf16.msra.mxu0 %v4115_v6  ;;  %1334 = vmatpush1.bf16.msra.mxu1 %v4115_v6  ;;  %v4267_v6 = vld [vmem:[%s4895_s1 + $0x380] ss:$8 sps:$4 sm:$0xff]  }
  0xcd   : >> { %1276 = vmatprep.subr.bf16.mxu0 %v4122_v5  ;;  %1335 = vmatprep.subr.bf16.mxu1 %v4122_v5  ;;  %v4152_v5 = vld [vmem:[%s4895_s1 + $0x314] ss:$8 sps:$4 sm:$0xff]   ;;  %5050 = vst [vmem:[#allocation34_spill] sm:$0xff] %v4267_v6 }
  0xce   : >> { %5034 = vst [vmem:[#allocation19_spill] sm:$0xff] %v4152_v5 }
  0xd0   : >> { %1277 = vmatpush1.bf16.msra.mxu0 %v4129_v43  ;;  %1336 = vmatpush1.bf16.msra.mxu1 %v4129_v43  ;;  %v4259_v43 = vld [vmem:[%s3621_s8 + $0x4] sm:$0x1] }
  0xd1   : >> { %1470 = vmatprep.subr.bf16.mxu0 %v4136_v9  ;;  %1513 = vmatprep.subr.bf16.mxu1 %v4136_v9  ;;  %v5037_v9 = vmov 0  }
  0xd3   : >> { %1295 = vmatmul.mubr.bf16.vlgmr.msra.gmra.mrb[0].mxu0 %v4019_v47  ;;  %1354 = vmatmul.mubr.bf16.vlgmr.msra.gmra.mrb[0].mxu1 %v4138_v44 }
  0xd4   : >> { %1471 = vmatpush1.bf16.msra.mxu0 %v4145_v1  ;;  %1514 = vmatpush1.bf16.msra.mxu1 %v4145_v1  ;;  %v4177_v1 = vld [vmem:[%s4895_s1 + $0x320] ss:$8 sps:$4 sm:$0xff]  }
  0xd5   : >> { %1472 = vmatprep.subr.bf16.mxu0 %v4152_v5  ;;  %1515 = vmatprep.subr.bf16.mxu1 %v4152_v5  ;;  %5038 = vst [vmem:[#allocation22_spill] sm:$0xff] %v4177_v1  ;;  %v4184_v5 = vld [vmem:[%s4895_s1 + $0x334] ss:$8 sps:$4 sm:$0xff]  }
  0xd6   : >> { %1502 = vmatprep.mubr.bf16.mxu0 %v5037_v9  ;;  %1545 = vmatprep.mubr.bf16.mxu1 %v5037_v9  ;;  %5039 = vst [vmem:[#allocation23_spill] sm:$0xff] %v4184_v5 }
  0xd8   : >> { %1473 = vmatpush1.bf16.msra.mxu0 %v4161_v38  ;;  %1516 = vmatpush1.bf16.msra.mxu1 %v4161_v38  ;;  %v4191_v38 = vld [vmem:[%s4895_s1 + $0x330] ss:$8 sps:$4 sm:$0xff]  }
  0xd9   : >> { %1474 = vmatprep.subr.bf16.mxu0 %v4168_v40  ;;  %1517 = vmatprep.subr.bf16.mxu1 %v4168_v40  ;;  %5040 = vst [vmem:[#allocation24_spill] sm:$0xff] %v4191_v38  ;;  %v4198_v40 = vld [vmem:[%s4895_s1 + $0x344] ss:$8 sps:$4 sm:$0xff]  }
  0xda   : >> { %5041 = vst [vmem:[#allocation25_spill] sm:$0xff] %v4198_v40 }
  0xdc   : >> { %1475 = vmatpush1.bf16.msra.mxu0 %v4177_v1  ;;  %1518 = vmatpush1.bf16.msra.mxu1 %v4177_v1  ;;  %v4205_v1 = vld [vmem:[%s4895_s1 + $0x340] ss:$8 sps:$4 sm:$0xff]  }
  0xdd   : >> { %1476 = vmatprep.subr.bf16.mxu0 %v4184_v5  ;;  %1519 = vmatprep.subr.bf16.mxu1 %v4184_v5  ;;  %5042 = vst [vmem:[#allocation26_spill] sm:$0xff] %v4205_v1  ;;  %v4212_v5 = vld [vmem:[%s4895_s1 + $0x354] ss:$8 sps:$4 sm:$0xff]  }
  0xde   : >> { %5043 = vst [vmem:[#allocation27_spill] sm:$0xff] %v4212_v5 }
  0xe0   : >> { %1477 = vmatpush1.bf16.msra.mxu0 %v4191_v38  ;;  %1520 = vmatpush1.bf16.msra.mxu1 %v4191_v38  ;;  %v4219_v38 = vld [vmem:[%s4895_s1 + $0x350] ss:$8 sps:$4 sm:$0xff]  }
  0xe1   : >> { %1478 = vmatprep.subr.bf16.mxu0 %v4198_v40  ;;  %1521 = vmatprep.subr.bf16.mxu1 %v4198_v40  ;;  %5044 = vst [vmem:[#allocation28_spill] sm:$0xff] %v4219_v38  ;;  %v4226_v40 = vld [vmem:[%s4895_s1 + $0x364] ss:$8 sps:$4 sm:$0xff]  }
  0xe2   : >> { %5045 = vst [vmem:[#allocation29_spill] sm:$0xff] %v4226_v40 }
  0xe4   : >> { %1479 = vmatpush1.bf16.msra.mxu0 %v4205_v1  ;;  %1522 = vmatpush1.bf16.msra.mxu1 %v4205_v1  ;;  %v4233_v1 = vld [vmem:[%s4895_s1 + $0x360] ss:$8 sps:$4 sm:$0xff]  }
  0xe5   : >> { %1480 = vmatprep.subr.bf16.mxu0 %v4212_v5  ;;  %1523 = vmatprep.subr.bf16.mxu1 %v4212_v5  ;;  %5046 = vst [vmem:[#allocation30_spill] sm:$0xff] %v4233_v1  ;;  %v4240_v5 = vld [vmem:[%s4895_s1 + $0x374] ss:$8 sps:$4 sm:$0xff]  }
  0xe6   : >> { %5047 = vst [vmem:[#allocation31_spill] sm:$0xff] %v4240_v5 }
  0xe8   : >> { %1481 = vmatpush1.bf16.msra.mxu0 %v4219_v38  ;;  %1524 = vmatpush1.bf16.msra.mxu1 %v4219_v38  ;;  %v4247_v38 = vld [vmem:[%s4895_s1 + $0x370] ss:$8 sps:$4 sm:$0xff]  }
  0xe9   : >> { %1482 = vmatprep.subr.bf16.mxu0 %v4226_v40  ;;  %1525 = vmatprep.subr.bf16.mxu1 %v4226_v40  ;;  %5048 = vst [vmem:[#allocation32_spill] sm:$0xff] %v4247_v38  ;;  %v4254_v40 = vld [vmem:[%s4895_s1 + $0x384] ss:$8 sps:$4 sm:$0xff]  }
  0xea   : >> { %5049 = vst [vmem:[#allocation33_spill] sm:$0xff] %v4254_v40 }
  0xec   : >> { %1483 = vmatpush1.bf16.msra.mxu0 %v4233_v1  ;;  %1526 = vmatpush1.bf16.msra.mxu1 %v4233_v1  ;;  %v4262_v1 = vld [vmem:[%s3621_s8 + $0x10] sm:$0x1] }
  0xed   : >> { %1484 = vmatprep.subr.bf16.mxu0 %v4240_v5  ;;  %1527 = vmatprep.subr.bf16.mxu1 %v4240_v5  ;;  %v4274_v5 = vld [vmem:[%s4895_s1 + $0x394] ss:$8 sps:$4 sm:$0xff]  }
  0xee   : >> { %5051 = vst [vmem:[#allocation35_spill] sm:$0xff] %v4274_v5 }
  0xf0   : >> { %1485 = vmatpush1.bf16.msra.mxu0 %v4247_v38  ;;  %1528 = vmatpush1.bf16.msra.mxu1 %v4247_v38  ;;  %v4283_v38 = vld [vmem:[%s4895_s1 + $0x390] ss:$8 sps:$4 sm:$0xff]  }
  0xf1   : >> { %1652 = vmatprep.subr.bf16.mxu0 %v4254_v40  ;;  %1711 = vmatprep.subr.bf16.mxu1 %v4254_v40  ;;  %5052 = vst [vmem:[#allocation36_spill] sm:$0xff] %v4283_v38  ;;  %v4290_v40 = vld [vmem:[%s4895_s1 + $0x3a4] ss:$8 sps:$4 sm:$0xff]  }
  0xf2   : >> { %5053 = vst [vmem:[#allocation37_spill] sm:$0xff] %v4290_v40 }
  0xf3   : >> { %1503 = vmatmul.mubr.bf16.vlgmr.msra.gmra.mrb[0].mxu0 %v4259_v43  ;;  %1546 = vmatmul.mubr.bf16.vlgmr.msra.gmra.mrb[0].mxu1 %v4262_v1 }
  0xf4   : >> { %1653 = vmatpush1.bf16.msra.mxu0 %v4267_v6  ;;  %1712 = vmatpush1.bf16.msra.mxu1 %v4267_v6  ;;  %v4299_v6 = vld [vmem:[%s4895_s1 + $0x3a0] ss:$8 sps:$4 sm:$0xff]  }
  0xf5   : >> { %1654 = vmatprep.subr.bf16.mxu0 %v4274_v5  ;;  %1713 = vmatprep.subr.bf16.mxu1 %v4274_v5  ;;  %5054 = vst [vmem:[#allocation38_spill] sm:$0xff] %v4299_v6  ;;  %v4306_v5 = vld [vmem:[%s4895_s1 + $0x3b4] ss:$8 sps:$4 sm:$0xff]  }
  0xf6   : >> { %1684 = vmatprep.mubr.bf16.mxu0 %v5037_v9  ;;  %1743 = vmatprep.mubr.bf16.mxu1 %v5037_v9  ;;  %5055 = vst [vmem:[#allocation39_spill] sm:$0xff] %v4306_v5 }
  0xf8   : >> { %1655 = vmatpush1.bf16.msra.mxu0 %v4283_v38  ;;  %1714 = vmatpush1.bf16.msra.mxu1 %v4283_v38  ;;  %v4313_v38 = vld [vmem:[%s4895_s1 + $0x3b0] ss:$8 sps:$4 sm:$0xff]  }
  0xf9   : >> { %1656 = vmatprep.subr.bf16.mxu0 %v4290_v40  ;;  %1715 = vmatprep.subr.bf16.mxu1 %v4290_v40  ;;  %5056 = vst [vmem:[#allocation40_spill] sm:$0xff] %v4313_v38  ;;  %v4320_v40 = vld [vmem:[%s4895_s1 + $0x3c4] ss:$8 sps:$4 sm:$0xff]  }
  0xfa   : >> { %5057 = vst [vmem:[#allocation41_spill] sm:$0xff] %v4320_v40 }
  0xfc   : >> { %1657 = vmatpush1.bf16.msra.mxu0 %v4299_v6  ;;  %1716 = vmatpush1.bf16.msra.mxu1 %v4299_v6  ;;  %v4327_v6 = vld [vmem:[%s4895_s1 + $0x3c0] ss:$8 sps:$4 sm:$0xff]  }
  0xfd   : >> { %1658 = vmatprep.subr.bf16.mxu0 %v4306_v5  ;;  %1717 = vmatprep.subr.bf16.mxu1 %v4306_v5  ;;  %5058 = vst [vmem:[#allocation42_spill] sm:$0xff] %v4327_v6  ;;  %v4334_v5 = vld [vmem:[%s4895_s1 + $0x3d4] ss:$8 sps:$4 sm:$0xff]  }
  0xfe   : >> { %5059 = vst [vmem:[#allocation43_spill] sm:$0xff] %v4334_v5 }
 0x100   : >> { %1659 = vmatpush1.bf16.msra.mxu0 %v4313_v38  ;;  %1718 = vmatpush1.bf16.msra.mxu1 %v4313_v38  ;;  %v4341_v38 = vld [vmem:[%s4895_s1 + $0x3d0] ss:$8 sps:$4 sm:$0xff]  }
 0x101   : >> { %1660 = vmatprep.subr.bf16.mxu0 %v4320_v40  ;;  %1719 = vmatprep.subr.bf16.mxu1 %v4320_v40  ;;  %5060 = vst [vmem:[#allocation44_spill] sm:$0xff] %v4341_v38  ;;  %v4349_v40 = vld [vmem:[%s4895_s1 + $0x3e4] ss:$8 sps:$4 sm:$0xff]  }
 0x102   : >> { %5061 = vst [vmem:[#allocation45_spill] sm:$0xff] %v4349_v40 }
 0x104   : >> { %1661 = vmatpush1.bf16.msra.mxu0 %v4327_v6  ;;  %1720 = vmatpush1.bf16.msra.mxu1 %v4327_v6  ;;  %v4356_v6 = vld [vmem:[%s4895_s1 + $0x3e0] ss:$8 sps:$4 sm:$0xff]  }
 0x105   : >> { %1662 = vmatprep.subr.bf16.mxu0 %v4334_v5  ;;  %1721 = vmatprep.subr.bf16.mxu1 %v4334_v5  ;;  %5062 = vst [vmem:[#allocation46_spill] sm:$0xff] %v4356_v6  ;;  %v4363_v5 = vld [vmem:[%s4895_s1 + $0x3f4] ss:$8 sps:$4 sm:$0xff]  }
 0x106   : >> { %5063 = vst [vmem:[#allocation47_spill] sm:$0xff] %v4363_v5 }
 0x108   : >> { %1663 = vmatpush1.bf16.msra.mxu0 %v4341_v38  ;;  %1722 = vmatpush1.bf16.msra.mxu1 %v4341_v38  ;;  %v4370_v38 = vld [vmem:[%s4895_s1 + $0x3f0] ss:$8 sps:$4 sm:$0xff]  }
 0x109   : >> { %1664 = vmatprep.subr.bf16.mxu0 %v4349_v40  ;;  %1723 = vmatprep.subr.bf16.mxu1 %v4349_v40  ;;  %5064 = vst [vmem:[#allocation48_spill] sm:$0xff] %v4370_v38  ;;  %v4377_v40 = vld [vmem:[%s4895_s1 + $0x404] ss:$8 sps:$4 sm:$0xff]  }
 0x10a   : >> { %5065 = vst [vmem:[#allocation49_spill] sm:$0xff] %v4377_v40 }
 0x10c   : >> { %1665 = vmatpush1.bf16.msra.mxu0 %v4356_v6  ;;  %1724 = vmatpush1.bf16.msra.mxu1 %v4356_v6 }
 0x10d   : >> { %1666 = vmatprep.subr.bf16.mxu0 %v4363_v5  ;;  %1725 = vmatprep.subr.bf16.mxu1 %v4363_v5  ;;  %v4393_v5 = vld [vmem:[%s4895_s1 + $0x414] ss:$8 sps:$4 sm:$0xff]  }
 0x10e   : >> { %5067 = vst [vmem:[#allocation51_spill] sm:$0xff] %v4393_v5 }
 0x110   : >> { %1667 = vmatpush1.bf16.msra.mxu0 %v4370_v38  ;;  %1726 = vmatpush1.bf16.msra.mxu1 %v4370_v38 }
 0x111   : >> { %1850 = vmatprep.subr.bf16.mxu0 %v4377_v40  ;;  %1909 = vmatprep.subr.bf16.mxu1 %v4377_v40  ;;  %v3066_v40 = vld.sshfl [vmem:[%s3621_s8 + $0x10] sm:$0x3 pattern:$0x76325410] }
 0x112   : >> { %v1904_v38 = vshll.u32 %v3066_v40, 16  ;;  %v1902_v6 = vshrl.u32 %v3066_v40, 16  ;;  %v3461_v40 = vld [vmem:[%s4895_s1] ss:$8 sps:$4 sm:$0xff]  }
 0x113   : >> { %1685 = vmatmul.mubr.bf16.vlgmr.msra.gmra.mrb[0].mxu0 %v4262_v1  ;;  %1744 = vmatmul.mubr.bf16.vlgmr.msra.gmra.mrb[0].mxu1 %v4379_v7 }
 0x114   : >> { %1851 = vmatpush1.bf16.msra.mxu0 %v4386_v2  ;;  %1910 = vmatpush1.bf16.msra.mxu1 %v4386_v2  ;;  %v4418_v2 = vld [vmem:[%s4895_s1 + $0x420] ss:$8 sps:$4 sm:$0xff]   ;;  %v1906_v59 = vrot.slane %v1904_v38, 1  ;;  %v3460_v38 = vld [vmem:[%s4895_s1 + $0x4] ss:$8 sps:$4 sm:$0xff]  }
 0x115   : >> { %1852 = vmatprep.subr.bf16.mxu0 %v4393_v5  ;;  %1911 = vmatprep.subr.bf16.mxu1 %v4393_v5  ;;  %5070 = vst [vmem:[#allocation54_spill] sm:$0xff] %v4418_v2  ;;  %v4425_v5 = vld [vmem:[%s4895_s1 + $0x434] ss:$8 sps:$4 sm:$0xff]  }
 0x116   : >> { %1882 = vmatprep.mubr.bf16.mxu0 %v5037_v9  ;;  %1941 = vmatprep.mubr.bf16.mxu1 %v5037_v9  ;;  %5071 = vst [vmem:[#allocation55_spill] sm:$0xff] %v4425_v5 }
 0x118   : >> { %1853 = vmatpush1.bf16.msra.mxu0 %v4402_v61  ;;  %1912 = vmatpush1.bf16.msra.mxu1 %v4402_v61  ;;  %v4432_v61 = vld [vmem:[%s4895_s1 + $0x430] ss:$8 sps:$4 sm:$0xff]  }
 0x119   : >> { %1854 = vmatprep.subr.bf16.mxu0 %v4409_v0  ;;  %1913 = vmatprep.subr.bf16.mxu1 %v4409_v0  ;;  %5072 = vst [vmem:[#allocation56_spill] sm:$0xff] %v4432_v61  ;;  %v4439_v0 = vld [vmem:[%s4895_s1 + $0x444] ss:$8 sps:$4 sm:$0xff]  }
 0x11a   : >> { %5073 = vst [vmem:[#allocation57_spill] sm:$0xff] %v4439_v0 }
 0x11c   : >> { %1855 = vmatpush1.bf16.msra.mxu0 %v4418_v2  ;;  %1914 = vmatpush1.bf16.msra.mxu1 %v4418_v2  ;;  %v4446_v2 = vld [vmem:[%s4895_s1 + $0x440] ss:$8 sps:$4 sm:$0xff]  }
 0x11d   : >> { %1856 = vmatprep.subr.bf16.mxu0 %v4425_v5  ;;  %1915 = vmatprep.subr.bf16.mxu1 %v4425_v5  ;;  %5074 = vst [vmem:[#allocation58_spill] sm:$0xff] %v4446_v2  ;;  %v4453_v5 = vld [vmem:[%s4895_s1 + $0x454] ss:$8 sps:$4 sm:$0xff]  }
 0x11e   : >> { %5075 = vst [vmem:[#allocation59_spill] sm:$0xff] %v4453_v5 }
 0x120   : >> { %1857 = vmatpush1.bf16.msra.mxu0 %v4432_v61  ;;  %1916 = vmatpush1.bf16.msra.mxu1 %v4432_v61  ;;  %v4460_v61 = vld [vmem:[%s4895_s1 + $0x450] ss:$8 sps:$4 sm:$0xff]  }
 0x121   : >> { %1858 = vmatprep.subr.bf16.mxu0 %v4439_v0  ;;  %1917 = vmatprep.subr.bf16.mxu1 %v4439_v0  ;;  %5076 = vst [vmem:[#allocation60_spill] sm:$0xff] %v4460_v61  ;;  %v4468_v0 = vld [vmem:[%s4895_s1 + $0x464] ss:$8 sps:$4 sm:$0xff]  }
 0x122   : >> { %5077 = vst [vmem:[#allocation61_spill] sm:$0xff] %v4468_v0 }
 0x124   : >> { %1859 = vmatpush1.bf16.msra.mxu0 %v4446_v2  ;;  %1918 = vmatpush1.bf16.msra.mxu1 %v4446_v2  ;;  %v4475_v2 = vld [vmem:[%s4895_s1 + $0x460] ss:$8 sps:$4 sm:$0xff]  }
 0x125   : >> { %1860 = vmatprep.subr.bf16.mxu0 %v4453_v5  ;;  %1919 = vmatprep.subr.bf16.mxu1 %v4453_v5  ;;  %v4482_v5 = vld [vmem:[%s4895_s1 + $0x474] ss:$8 sps:$4 sm:$0xff]  }
 0x128   : >> { %1861 = vmatpush1.bf16.msra.mxu0 %v4460_v61  ;;  %1920 = vmatpush1.bf16.msra.mxu1 %v4460_v61  ;;  %v4489_v61 = vld [vmem:[%s4895_s1 + $0x470] ss:$8 sps:$4 sm:$0xff]  }
 0x129   : >> { %1862 = vmatprep.subr.bf16.mxu0 %v4468_v0  ;;  %1921 = vmatprep.subr.bf16.mxu1 %v4468_v0  ;;  %v4493_v0 = vor.u32 %v1906_v59, %v1902_v6  ;;  %v3462_v6 = vld [vmem:[%s4895_s1 + $0x14] ss:$8 sps:$4 sm:$0xff]   ;;  %v3463_v59 = vld [vmem:[%s4895_s1 + $0x10] ss:$8 sps:$4 sm:$0xff]  }
 0x12c   : >> { %1863 = vmatpush1.bf16.msra.mxu0 %v4475_v2  ;;  %1922 = vmatpush1.bf16.msra.mxu1 %v4475_v2 }
 0x12d   : >> { %1864 = vmatprep.subr.bf16.mxu0 %v4482_v5  ;;  %1923 = vmatprep.subr.bf16.mxu1 %v4482_v5 }
 0x130   : >> { %1865 = vmatpush1.bf16.msra.mxu0 %v4489_v61  ;;  %1924 = vmatpush1.bf16.msra.mxu1 %v4489_v61 }
 0x131   : >> { %1954 = vmatprep.subr.bf16.mxu0 %v3460_v38  ;;  %1997 = vmatprep.subr.bf16.mxu1 %v3460_v38  ;;  %v3464_v38 = vld [vmem:[%s4895_s1 + $0x24] ss:$8 sps:$4 sm:$0xff]  }
 0x133   : >> { %1883 = vmatmul.mubr.bf16.vlgmr.msra.gmra.mrb[0].mxu0 %v4379_v7  ;;  %1942 = vmatmul.mubr.bf16.vlgmr.msra.gmra.mrb[0].mxu1 %v4493_v0 }
 0x134   : >> { %1955 = vmatpush1.bf16.msra.mxu0 %v3461_v40  ;;  %1998 = vmatpush1.bf16.msra.mxu1 %v3461_v40  ;;  %v3465_v40 = vld [vmem:[%s4895_s1 + $0x20] ss:$8 sps:$4 sm:$0xff]  }
 0x135   : >> { %1956 = vmatprep.subr.bf16.mxu0 %v3462_v6  ;;  %1999 = vmatprep.subr.bf16.mxu1 %v3462_v6  ;;  %v3466_v6 = vld [vmem:[%s4895_s1 + $0x34] ss:$8 sps:$4 sm:$0xff]  }
 0x136   : >> { %1986 = vmatprep.mubr.bf16.mxu0 %v5037_v9  ;;  %2029 = vmatprep.mubr.bf16.mxu1 %v5037_v9 }
 0x138   : >> { %1957 = vmatpush1.bf16.msra.mxu0 %v3463_v59  ;;  %2000 = vmatpush1.bf16.msra.mxu1 %v3463_v59  ;;  %v3467_v59 = vld [vmem:[%s4895_s1 + $0x30] ss:$8 sps:$4 sm:$0xff]  }
 0x139   : >> { %1958 = vmatprep.subr.bf16.mxu0 %v3464_v38  ;;  %2001 = vmatprep.subr.bf16.mxu1 %v3464_v38  ;;  %v3468_v38 = vld [vmem:[%s4895_s1 + $0x44] ss:$8 sps:$4 sm:$0xff]  }
 0x13c   : >> { %1959 = vmatpush1.bf16.msra.mxu0 %v3465_v40  ;;  %2002 = vmatpush1.bf16.msra.mxu1 %v3465_v40  ;;  %v3469_v40 = vld [vmem:[%s4895_s1 + $0x40] ss:$8 sps:$4 sm:$0xff]  }
 0x13d   : >> { %1960 = vmatprep.subr.bf16.mxu0 %v3466_v6  ;;  %2003 = vmatprep.subr.bf16.mxu1 %v3466_v6  ;;  %v3470_v6 = vld [vmem:[%s4895_s1 + $0x54] ss:$8 sps:$4 sm:$0xff]  }
 0x140   : >> { %1961 = vmatpush1.bf16.msra.mxu0 %v3467_v59  ;;  %2004 = vmatpush1.bf16.msra.mxu1 %v3467_v59  ;;  %v3471_v59 = vld [vmem:[%s4895_s1 + $0x50] ss:$8 sps:$4 sm:$0xff]  }
 0x141   : >> { %1962 = vmatprep.subr.bf16.mxu0 %v3468_v38  ;;  %2005 = vmatprep.subr.bf16.mxu1 %v3468_v38  ;;  %v3472_v38 = vld [vmem:[%s4895_s1 + $0x64] ss:$8 sps:$4 sm:$0xff]  }
 0x144   : >> { %1963 = vmatpush1.bf16.msra.mxu0 %v3469_v40  ;;  %2006 = vmatpush1.bf16.msra.mxu1 %v3469_v40  ;;  %v3473_v40 = vld [vmem:[%s4895_s1 + $0x60] ss:$8 sps:$4 sm:$0xff]  }
 0x145   : >> { %1964 = vmatprep.subr.bf16.mxu0 %v3470_v6  ;;  %2007 = vmatprep.subr.bf16.mxu1 %v3470_v6  ;;  %v3474_v6 = vld [vmem:[%s4895_s1 + $0x74] ss:$8 sps:$4 sm:$0xff]  }
 0x148   : >> { %1965 = vmatpush1.bf16.msra.mxu0 %v3471_v59  ;;  %2008 = vmatpush1.bf16.msra.mxu1 %v3471_v59  ;;  %v3475_v59 = vld [vmem:[%s4895_s1 + $0x70] ss:$8 sps:$4 sm:$0xff]  }
 0x149   : >> { %1966 = vmatprep.subr.bf16.mxu0 %v3472_v38  ;;  %2009 = vmatprep.subr.bf16.mxu1 %v3472_v38  ;;  %v3476_v38 = vld [vmem:[%s4895_s1 + $0x84] ss:$8 sps:$4 sm:$0xff]  }
 0x14c   : >> { %1967 = vmatpush1.bf16.msra.mxu0 %v3473_v40  ;;  %2010 = vmatpush1.bf16.msra.mxu1 %v3473_v40  ;;  %v3477_v40 = vld [vmem:[%s4895_s1 + $0x80] ss:$8 sps:$4 sm:$0xff]  }
 0x14d   : >> { %1968 = vmatprep.subr.bf16.mxu0 %v3474_v6  ;;  %2011 = vmatprep.subr.bf16.mxu1 %v3474_v6  ;;  %v3478_v6 = vld [vmem:[%s4895_s1 + $0x94] ss:$8 sps:$4 sm:$0xff]  }
 0x150   : >> { %1969 = vmatpush1.bf16.msra.mxu0 %v3475_v59  ;;  %2012 = vmatpush1.bf16.msra.mxu1 %v3475_v59  ;;  %v3480_v59 = vld [vmem:[%s4895_s1 + $0xa4] ss:$8 sps:$4 sm:$0xff]  }
 0x151   : >> { %2040 = vmatprep.subr.bf16.mxu0 %v3476_v38  ;;  %2083 = vmatprep.subr.bf16.mxu1 %v3476_v38  ;;  %v3481_v38 = vld [vmem:[%s4895_s1 + $0xa0] ss:$8 sps:$4 sm:$0xff]  }
 0x153   : >> { %1987 = vmatmul.mubr.bf16.vlgmr.msra.gmra.mrb[4].mxu0 %v3899_v25  ;;  %2030 = vmatmul.mubr.bf16.vlgmr.msra.gmra.mrb[4].mxu1 %v3902_v26  ;;  %v3479_v25 = vld [vmem:[%s4895_s1 + $0x90] ss:$8 sps:$4 sm:$0xff]  }
 0x154   : >> { %2041 = vmatpush1.bf16.msra.mxu0 %v3477_v40  ;;  %2084 = vmatpush1.bf16.msra.mxu1 %v3477_v40  ;;  %v3482_v40 = vld [vmem:[%s4895_s1 + $0xb4] ss:$8 sps:$4 sm:$0xff]  }
 0x155   : >> { %2042 = vmatprep.subr.bf16.mxu0 %v3478_v6  ;;  %2085 = vmatprep.subr.bf16.mxu1 %v3478_v6  ;;  %v3483_v6 = vld [vmem:[%s4895_s1 + $0xb0] ss:$8 sps:$4 sm:$0xff]  }
 0x156   : >> { %2072 = vmatprep.mubr.bf16.mxu0 %v5037_v9  ;;  %2115 = vmatprep.mubr.bf16.mxu1 %v5037_v9 }
 0x158   : >> { %2043 = vmatpush1.bf16.msra.mxu0 %v3479_v25  ;;  %2086 = vmatpush1.bf16.msra.mxu1 %v3479_v25  ;;  %v3484_v25 = vld [vmem:[%s4895_s1 + $0xc4] ss:$8 sps:$4 sm:$0xff]  }
 0x159   : >> { %2044 = vmatprep.subr.bf16.mxu0 %v3480_v59  ;;  %2087 = vmatprep.subr.bf16.mxu1 %v3480_v59  ;;  %v3485_v59 = vld [vmem:[%s4895_s1 + $0xc0] ss:$8 sps:$4 sm:$0xff]  }
 0x15c   : >> { %2045 = vmatpush1.bf16.msra.mxu0 %v3481_v38  ;;  %2088 = vmatpush1.bf16.msra.mxu1 %v3481_v38  ;;  %v3486_v38 = vld [vmem:[%s4895_s1 + $0xd4] ss:$8 sps:$4 sm:$0xff]  }
 0x15d   : >> { %2046 = vmatprep.subr.bf16.mxu0 %v3482_v40  ;;  %2089 = vmatprep.subr.bf16.mxu1 %v3482_v40  ;;  %v3487_v40 = vld [vmem:[%s4895_s1 + $0xd0] ss:$8 sps:$4 sm:$0xff]  }
 0x160   : >> { %2047 = vmatpush1.bf16.msra.mxu0 %v3483_v6  ;;  %2090 = vmatpush1.bf16.msra.mxu1 %v3483_v6  ;;  %v3488_v6 = vld [vmem:[%s4895_s1 + $0xe4] ss:$8 sps:$4 sm:$0xff]  }
 0x161   : >> { %2048 = vmatprep.subr.bf16.mxu0 %v3484_v25  ;;  %2091 = vmatprep.subr.bf16.mxu1 %v3484_v25  ;;  %v3489_v25 = vld [vmem:[%s4895_s1 + $0xe0] ss:$8 sps:$4 sm:$0xff]  }
 0x164   : >> { %2049 = vmatpush1.bf16.msra.mxu0 %v3485_v59  ;;  %2092 = vmatpush1.bf16.msra.mxu1 %v3485_v59  ;;  %v3490_v59 = vld [vmem:[%s4895_s1 + $0xf4] ss:$8 sps:$4 sm:$0xff]  }
 0x165   : >> { %2050 = vmatprep.subr.bf16.mxu0 %v3486_v38  ;;  %2093 = vmatprep.subr.bf16.mxu1 %v3486_v38  ;;  %v3491_v38 = vld [vmem:[%s4895_s1 + $0xf0] ss:$8 sps:$4 sm:$0xff]  }
 0x168   : >> { %2051 = vmatpush1.bf16.msra.mxu0 %v3487_v40  ;;  %2094 = vmatpush1.bf16.msra.mxu1 %v3487_v40  ;;  %v3492_v40 = vld [vmem:[%s4895_s1 + $0x104] ss:$8 sps:$4 sm:$0xff]  }
 0x169   : >> { %2052 = vmatprep.subr.bf16.mxu0 %v3488_v6  ;;  %2095 = vmatprep.subr.bf16.mxu1 %v3488_v6  ;;  %v3493_v6 = vld [vmem:[%s4895_s1 + $0x100] ss:$8 sps:$4 sm:$0xff]  }
 0x16c   : >> { %2053 = vmatpush1.bf16.msra.mxu0 %v3489_v25  ;;  %2096 = vmatpush1.bf16.msra.mxu1 %v3489_v25  ;;  %v3494_v25 = vld [vmem:[%s4895_s1 + $0x114] ss:$8 sps:$4 sm:$0xff]  }
 0x16d   : >> { %2054 = vmatprep.subr.bf16.mxu0 %v3490_v59  ;;  %2097 = vmatprep.subr.bf16.mxu1 %v3490_v59  ;;  %v3496_v59 = vld [vmem:[%s4895_s1 + $0x124] ss:$8 sps:$4 sm:$0xff]  }
 0x170   : >> { %2055 = vmatpush1.bf16.msra.mxu0 %v3491_v38  ;;  %2098 = vmatpush1.bf16.msra.mxu1 %v3491_v38  ;;  %v5116_v38 = vld [vmem:[#allocation41_spill] sm:$0xff] }
 0x171   : >> { %2126 = vmatprep.subr.bf16.mxu0 %v3492_v40  ;;  %2169 = vmatprep.subr.bf16.mxu1 %v3492_v40  ;;  %v5117_v40 = vld [vmem:[#allocation42_spill] sm:$0xff] }
 0x173   : >> { %2073 = vmatmul.mubr.bf16.vlgmr.msra.gmra.mrb[4].mxu0 %v3902_v26  ;;  %2116 = vmatmul.mubr.bf16.vlgmr.msra.gmra.mrb[4].mxu1 %v4019_v47  ;;  %v3495_v26 = vld [vmem:[%s4895_s1 + $0x110] ss:$8 sps:$4 sm:$0xff]  }
 0x174   : >> { %2127 = vmatpush1.bf16.msra.mxu0 %v3493_v6  ;;  %2170 = vmatpush1.bf16.msra.mxu1 %v3493_v6  ;;  %v3075_v6 = vld.sshfl [vmem:[%s3621_s8 + $0x6] sm:$0x3 pattern:$0x76325410] }
 0x175   : >> { %2128 = vmatprep.subr.bf16.mxu0 %v3494_v25  ;;  %2171 = vmatprep.subr.bf16.mxu1 %v3494_v25  ;;  %v5118_v25 = vld [vmem:[#allocation43_spill] sm:$0xff] }
 0x176   : >> { %2158 = vmatprep.mubr.bf16.mxu0 %v5037_v9  ;;  %2201 = vmatprep.mubr.bf16.mxu1 %v5037_v9 }
 0x178   : >> { %2129 = vmatpush1.bf16.msra.mxu0 %v3495_v26  ;;  %2172 = vmatpush1.bf16.msra.mxu1 %v3495_v26  ;;  %v2620_v26 = vshll.u32 %v3075_v6, 16 }
 0x179   : >> { %2130 = vmatprep.subr.bf16.mxu0 %v3694_v51  ;;  %2173 = vmatprep.subr.bf16.mxu1 %v3496_v59  ;;  %v5078_v51 = vld [vmem:[#allocation5_spill] sm:$0xff]  ;;  %v5119_v59 = vld [vmem:[#allocation44_spill] sm:$0xff] }
 0x17c   : >> { %2131 = vmatpush1.bf16.msra.mxu0 %v3701_v52  ;;  %2174 = vmatpush1.bf16.msra.mxu1 %v3701_v52  ;;  %v5079_v52 = vld [vmem:[#allocation6_spill] sm:$0xff] }
 0x17d   : >> { %2132 = vmatprep.subr.bf16.mxu0 %v3708_v53  ;;  %2175 = vmatprep.subr.bf16.mxu1 %v3708_v53  ;;  %v5080_v53 = vld [vmem:[#allocation7_spill] sm:$0xff] }
 0x180   : >> { %2133 = vmatpush1.bf16.msra.mxu0 %v3715_v54  ;;  %2176 = vmatpush1.bf16.msra.mxu1 %v3715_v54  ;;  %v5081_v54 = vld [vmem:[#allocation8_spill] sm:$0xff] }
 0x181   : >> { %2134 = vmatprep.subr.bf16.mxu0 %v3722_v55  ;;  %2177 = vmatprep.subr.bf16.mxu1 %v3722_v55  ;;  %v5082_v55 = vld [vmem:[#allocation9_spill] sm:$0xff] }
 0x184   : >> { %2135 = vmatpush1.bf16.msra.mxu0 %v3729_v56  ;;  %2178 = vmatpush1.bf16.msra.mxu1 %v3729_v56  ;;  %v5083_v56 = vld [vmem:[#allocation10_spill] sm:$0xff] }
 0x185   : >> { %2136 = vmatprep.subr.bf16.mxu0 %v3736_v57  ;;  %2179 = vmatprep.subr.bf16.mxu1 %v3736_v57  ;;  %v5084_v57 = vld [vmem:[#allocation11_spill] sm:$0xff] }
 0x188   : >> { %2137 = vmatpush1.bf16.msra.mxu0 %v3741_v58  ;;  %2180 = vmatpush1.bf16.msra.mxu1 %v3741_v58  ;;  %v5085_v58 = vld [vmem:[#allocation12_spill] sm:$0xff] }
 0x189   : >> { %2138 = vmatprep.subr.bf16.mxu0 %v3751_v60  ;;  %2181 = vmatprep.subr.bf16.mxu1 %v3751_v60  ;;  %v5086_v60 = vld [vmem:[#allocation13_spill] sm:$0xff] }
 0x18c   : >> { %2139 = vmatpush1.bf16.msra.mxu0 %v3758_v62  ;;  %2182 = vmatpush1.bf16.msra.mxu1 %v3758_v62  ;;  %v5087_v62 = vld [vmem:[#allocation14_spill] sm:$0xff] }
 0x18d   : >> { %2140 = vmatprep.subr.bf16.mxu0 %v3765_v63  ;;  %2183 = vmatprep.subr.bf16.mxu1 %v3765_v63  ;;  %v5088_v63 = vld [vmem:[#allocation15_spill] sm:$0xff] }
 0x190   : >> { %2141 = vmatpush1.bf16.msra.mxu0 %v3772_v3  ;;  %2184 = vmatpush1.bf16.msra.mxu1 %v3772_v3  ;;  %v5089_v3 = vld [vmem:[#allocation16_spill] sm:$0xff] }
 0x191   : >> { %2212 = vmatprep.subr.bf16.mxu0 %v3779_v4  ;;  %2255 = vmatprep.subr.bf16.mxu1 %v3779_v4  ;;  %v5090_v4 = vld [vmem:[#allocation17_spill] sm:$0xff] }
 0x193   : >> { %2159 = vmatmul.mubr.bf16.vlgmr.msra.gmra.mrb[4].mxu0 %v4019_v47  ;;  %2202 = vmatmul.mubr.bf16.vlgmr.msra.gmra.mrb[4].mxu1 %v4138_v44  ;;  %v3073_v47 = vld [vmem:[%s3621_s8 + $0x12] sm:$0x1]  ;;  %v5112_v44 = vld [vmem:[#allocation37_spill] sm:$0xff] }
 0x194   : >> { %2213 = vmatpush1.bf16.msra.mxu0 %v3786_v8  ;;  %2256 = vmatpush1.bf16.msra.mxu1 %v3786_v8  ;;  %v5091_v8 = vld [vmem:[#allocation18_spill] sm:$0xff] }
 0x195   : >> { %2214 = vmatprep.subr.bf16.mxu0 %v3793_v10  ;;  %2257 = vmatprep.subr.bf16.mxu1 %v3793_v10  ;;  %v5092_v10 = vld [vmem:[#allocation19_spill] sm:$0xff] }
 0x196   : >> { %2244 = vmatprep.mubr.bf16.mxu0 %v5037_v9  ;;  %2287 = vmatprep.mubr.bf16.mxu1 %v5037_v9 }
 0x198   : >> { %2215 = vmatpush1.bf16.msra.mxu0 %v3801_v11  ;;  %2258 = vmatpush1.bf16.msra.mxu1 %v3801_v11  ;;  %v5093_v11 = vld [vmem:[#allocation20_spill] sm:$0xff] }
 0x199   : >> { %2216 = vmatprep.subr.bf16.mxu0 %v3808_v12  ;;  %2259 = vmatprep.subr.bf16.mxu1 %v3808_v12  ;;  %v5094_v12 = vld [vmem:[#allocation21_spill] sm:$0xff] }
 0x19c   : >> { %2217 = vmatpush1.bf16.msra.mxu0 %v3817_v13  ;;  %2260 = vmatpush1.bf16.msra.mxu1 %v3817_v13  ;;  %v5095_v13 = vld [vmem:[#allocation22_spill] sm:$0xff] }
 0x19d   : >> { %2218 = vmatprep.subr.bf16.mxu0 %v3824_v14  ;;  %2261 = vmatprep.subr.bf16.mxu1 %v3824_v14  ;;  %v5096_v14 = vld [vmem:[#allocation23_spill] sm:$0xff] }
 0x1a0   : >> { %2219 = vmatpush1.bf16.msra.mxu0 %v3831_v15  ;;  %2262 = vmatpush1.bf16.msra.mxu1 %v3831_v15  ;;  %v5097_v15 = vld [vmem:[#allocation24_spill] sm:$0xff] }
 0x1a1   : >> { %2220 = vmatprep.subr.bf16.mxu0 %v3838_v16  ;;  %2263 = vmatprep.subr.bf16.mxu1 %v3838_v16  ;;  %v5098_v16 = vld [vmem:[#allocation25_spill] sm:$0xff] }
 0x1a4   : >> { %2221 = vmatpush1.bf16.msra.mxu0 %v3845_v17  ;;  %2264 = vmatpush1.bf16.msra.mxu1 %v3845_v17  ;;  %v5099_v17 = vld [vmem:[#allocation26_spill] sm:$0xff] }
 0x1a5   : >> { %2222 = vmatprep.subr.bf16.mxu0 %v3852_v18  ;;  %2265 = vmatprep.subr.bf16.mxu1 %v3852_v18  ;;  %v5100_v18 = vld [vmem:[#allocation27_spill] sm:$0xff] }
 0x1a8   : >> { %2223 = vmatpush1.bf16.msra.mxu0 %v3859_v19  ;;  %2266 = vmatpush1.bf16.msra.mxu1 %v3859_v19 }
 0x1a9   : >> { %2224 = vmatprep.subr.bf16.mxu0 %v3866_v20  ;;  %2267 = vmatprep.subr.bf16.mxu1 %v3866_v20 }
 0x1ac   : >> { %2225 = vmatpush1.bf16.msra.mxu0 %v3873_v21  ;;  %2268 = vmatpush1.bf16.msra.mxu1 %v3873_v21  ;;  %v5101_v21 = vld [vmem:[#allocation3_spill] sm:$0xff] }
 0x1ad   : >> { %2226 = vmatprep.subr.bf16.mxu0 %v3880_v22  ;;  %2269 = vmatprep.subr.bf16.mxu1 %v3880_v22 }
 0x1b0   : >> { %2227 = vmatpush1.bf16.msra.mxu0 %v3887_v23  ;;  %2270 = vmatpush1.bf16.msra.mxu1 %v3887_v23 }
 0x1b1   : >> { %2298 = vmatprep.subr.bf16.mxu0 %v3894_v24  ;;  %2341 = vmatprep.subr.bf16.mxu1 %v3894_v24 }
 0x1b3   : >> { %2245 = vmatmul.mubr.bf16.vlgmr.msra.gmra.mrb[4].mxu0 %v4259_v43  ;;  %2288 = vmatmul.mubr.bf16.vlgmr.msra.gmra.mrb[4].mxu1 %v4262_v1  ;;  %v5111_v43 = vld [vmem:[#allocation36_spill] sm:$0xff] }
 0x1b4   : >> { %2299 = vmatpush1.bf16.msra.mxu0 %v3907_v27  ;;  %2342 = vmatpush1.bf16.msra.mxu1 %v3907_v27 }
 0x1b5   : >> { %2300 = vmatprep.subr.bf16.mxu0 %v3914_v28  ;;  %2343 = vmatprep.subr.bf16.mxu1 %v3914_v28  ;;  %v5102_v28 = vld [vmem:[#allocation4_spill] sm:$0xff] }
 0x1b6   : >> { %2330 = vmatprep.mubr.bf16.mxu0 %v5037_v9  ;;  %2373 = vmatprep.mubr.bf16.mxu1 %v5037_v9 }
 0x1b8   : >> { %2301 = vmatpush1.bf16.msra.mxu0 %v3923_v29  ;;  %2344 = vmatpush1.bf16.msra.mxu1 %v3923_v29 }
 0x1b9   : >> { %2302 = vmatprep.subr.bf16.mxu0 %v3930_v30  ;;  %2345 = vmatprep.subr.bf16.mxu1 %v3930_v30 }
 0x1bc   : >> { %2303 = vmatpush1.bf16.msra.mxu0 %v3939_v31  ;;  %2346 = vmatpush1.bf16.msra.mxu1 %v3939_v31 }
 0x1bd   : >> { %2304 = vmatprep.subr.bf16.mxu0 %v3946_v32  ;;  %2347 = vmatprep.subr.bf16.mxu1 %v3946_v32 }
 0x1c0   : >> { %2305 = vmatpush1.bf16.msra.mxu0 %v3953_v33  ;;  %2348 = vmatpush1.bf16.msra.mxu1 %v3953_v33  ;;  %v5103_v33 = vld [vmem:[#allocation28_spill] sm:$0xff] }
 0x1c1   : >> { %2306 = vmatprep.subr.bf16.mxu0 %v3960_v34  ;;  %2349 = vmatprep.subr.bf16.mxu1 %v3960_v34 }
 0x1c4   : >> { %2307 = vmatpush1.bf16.msra.mxu0 %v3967_v35  ;;  %2350 = vmatpush1.bf16.msra.mxu1 %v3967_v35 }
 0x1c5   : >> { %2308 = vmatprep.subr.bf16.mxu0 %v3974_v36  ;;  %2351 = vmatprep.subr.bf16.mxu1 %v3974_v36 }
 0x1c8   : >> { %2309 = vmatpush1.bf16.msra.mxu0 %v3981_v37  ;;  %2352 = vmatpush1.bf16.msra.mxu1 %v3981_v37  ;;  %v5104_v37 = vld [vmem:[#allocation29_spill] sm:$0xff] }
 0x1c9   : >> { %2310 = vmatprep.subr.bf16.mxu0 %v3989_v39  ;;  %2353 = vmatprep.subr.bf16.mxu1 %v3989_v39 }
 0x1cc   : >> { %2311 = vmatpush1.bf16.msra.mxu0 %v3996_v41  ;;  %2354 = vmatpush1.bf16.msra.mxu1 %v3996_v41  ;;  %v5105_v41 = vld [vmem:[#allocation30_spill] sm:$0xff] }
 0x1cd   : >> { %2312 = vmatprep.subr.bf16.mxu0 %v4003_v42  ;;  %2355 = vmatprep.subr.bf16.mxu1 %v4003_v42  ;;  %v5106_v42 = vld [vmem:[#allocation31_spill] sm:$0xff] }
 0x1d0   : >> { %2313 = vmatpush1.bf16.msra.mxu0 %v4010_v45  ;;  %2356 = vmatpush1.bf16.msra.mxu1 %v4010_v45  ;;  %v5107_v45 = vld [vmem:[#allocation32_spill] sm:$0xff] }
 0x1d1   : >> { %2384 = vmatprep.subr.bf16.mxu0 %v4017_v46  ;;  %2427 = vmatprep.subr.bf16.mxu1 %v4017_v46  ;;  %v3069_v46 = vld [vmem:[%s3621_s8 + $0x6] sm:$0x1] }
 0x1d3   : >> { %2331 = vmatmul.mubr.bf16.vlgmr.msra.gmra.mrb[4].mxu0 %v4262_v1  ;;  %2374 = vmatmul.mubr.bf16.vlgmr.msra.gmra.mrb[4].mxu1 %v4379_v7  ;;  %v5113_v1 = vld [vmem:[#allocation38_spill] sm:$0xff] }
 0x1d4   : >> { %2385 = vmatpush1.bf16.msra.mxu0 %v4026_v48  ;;  %2428 = vmatpush1.bf16.msra.mxu1 %v4026_v48  ;;  %v5108_v48 = vld [vmem:[#allocation33_spill] sm:$0xff] }
 0x1d5   : >> { %2386 = vmatprep.subr.bf16.mxu0 %v4033_v49  ;;  %2429 = vmatprep.subr.bf16.mxu1 %v4033_v49  ;;  %v5109_v49 = vld [vmem:[#allocation34_spill] sm:$0xff] }
 0x1d6   : >> { %2416 = vmatprep.mubr.bf16.mxu0 %v5037_v9  ;;  %2459 = vmatprep.mubr.bf16.mxu1 %v5037_v9 }
 0x1d8   : >> { %2387 = vmatpush1.bf16.msra.mxu0 %v4042_v50  ;;  %2430 = vmatpush1.bf16.msra.mxu1 %v4042_v50  ;;  %v5110_v50 = vld [vmem:[#allocation35_spill] sm:$0xff] }
 0x1d9   : >> { %2388 = vmatprep.subr.bf16.mxu0 %v5078_v51  ;;  %2431 = vmatprep.subr.bf16.mxu1 %v5078_v51  ;;  %v5120_v51 = vld [vmem:[#allocation45_spill] sm:$0xff] }
 0x1dc   : >> { %2389 = vmatpush1.bf16.msra.mxu0 %v5079_v52  ;;  %2432 = vmatpush1.bf16.msra.mxu1 %v5079_v52  ;;  %v2618_v52 = vshrl.u32 %v3075_v6, 16 }
 0x1dd   : >> { %2390 = vmatprep.subr.bf16.mxu0 %v5080_v53  ;;  %2433 = vmatprep.subr.bf16.mxu1 %v5080_v53  ;;  %v2622_v53 = vrot.slane %v2620_v26, 1 }
 0x1e0   : >> { %2391 = vmatpush1.bf16.msra.mxu0 %v5081_v54  ;;  %2434 = vmatpush1.bf16.msra.mxu1 %v5081_v54  ;;  %v5121_v54 = vld [vmem:[#allocation46_spill] sm:$0xff] }
 0x1e1   : >> { %2392 = vmatprep.subr.bf16.mxu0 %v5082_v55  ;;  %2435 = vmatprep.subr.bf16.mxu1 %v5082_v55  ;;  %v5122_v55 = vld [vmem:[#allocation47_spill] sm:$0xff] }
 0x1e4   : >> { %2393 = vmatpush1.bf16.msra.mxu0 %v5083_v56  ;;  %2436 = vmatpush1.bf16.msra.mxu1 %v5083_v56  ;;  %v2623_v56 = vor.u32 %v2622_v53, %v2618_v52 }
 0x1e5   : >> { %2394 = vmatprep.subr.bf16.mxu0 %v5084_v57  ;;  %2437 = vmatprep.subr.bf16.mxu1 %v5084_v57  ;;  %v5123_v57 = vld [vmem:[#allocation48_spill] sm:$0xff] }
 0x1e8   : >> { %2395 = vmatpush1.bf16.msra.mxu0 %v5085_v58  ;;  %2438 = vmatpush1.bf16.msra.mxu1 %v5085_v58  ;;  %v5124_v58 = vld [vmem:[#allocation49_spill] sm:$0xff] }
 0x1e9   : >> { %2396 = vmatprep.subr.bf16.mxu0 %v5086_v60  ;;  %2439 = vmatprep.subr.bf16.mxu1 %v5086_v60  ;;  %v5125_v60 = vld [vmem:[#allocation50_spill] sm:$0xff] }
 0x1ec   : >> { %2397 = vmatpush1.bf16.msra.mxu0 %v5087_v62  ;;  %2440 = vmatpush1.bf16.msra.mxu1 %v5087_v62  ;;  %v5126_v62 = vld [vmem:[#allocation51_spill] sm:$0xff] }
 0x1ed   : >> { %2398 = vmatprep.subr.bf16.mxu0 %v5088_v63  ;;  %2441 = vmatprep.subr.bf16.mxu1 %v5088_v63  ;;  %v5127_v63 = vld [vmem:[#allocation52_spill] sm:$0xff] }
 0x1f0   : >> { %2399 = vmatpush1.bf16.msra.mxu0 %v5089_v3  ;;  %2442 = vmatpush1.bf16.msra.mxu1 %v5089_v3  ;;  %v5128_v3 = vld [vmem:[#allocation53_spill] sm:$0xff] }
 0x1f1   : >> { %2480 = vmatprep.subr.bf16.mxu0 %v5090_v4  ;;  %2523 = vmatprep.subr.bf16.mxu1 %v5090_v4  ;;  %v5129_v4 = vld [vmem:[#allocation54_spill] sm:$0xff] }
 0x1f3   : >> { %2417 = vmatmul.mubr.bf16.vlgmr.msra.gmra.mrb[4].mxu0 %v4379_v7  ;;  %2460 = vmatmul.mubr.bf16.vlgmr.msra.gmra.mrb[4].mxu1 %v4493_v0  ;;  %v5114_v7 = vld [vmem:[#allocation39_spill] sm:$0xff]  ;;  %v5115_v0 = vld [vmem:[#allocation40_spill] sm:$0xff] }
 0x1f4   : >> { %2481 = vmatpush1.bf16.msra.mxu0 %v5091_v8  ;;  %2524 = vmatpush1.bf16.msra.mxu1 %v5091_v8  ;;  %v5130_v8 = vld [vmem:[#allocation55_spill] sm:$0xff] }
 0x1f5   : >> { %2482 = vmatprep.subr.bf16.mxu0 %v5092_v10  ;;  %2525 = vmatprep.subr.bf16.mxu1 %v5092_v10  ;;  %v5131_v10 = vld [vmem:[#allocation56_spill] sm:$0xff] }
 0x1f6   : >> { %2512 = vmatprep.mubr.bf16.mxu0 %v5037_v9  ;;  %2555 = vmatprep.mubr.bf16.mxu1 %v5037_v9 }
 0x1f8   : >> { %2483 = vmatpush1.bf16.msra.mxu0 %v5093_v11  ;;  %2526 = vmatpush1.bf16.msra.mxu1 %v5093_v11  ;;  %v5133_v11 = vld [vmem:[#allocation58_spill] sm:$0xff] }
 0x1f9   : >> { %2484 = vmatprep.subr.bf16.mxu0 %v5094_v12  ;;  %2527 = vmatprep.subr.bf16.mxu1 %v5094_v12  ;;  %v3076_v12 = vld.sshfl [vmem:[%s3621_s8 + $0x12] sm:$0x3 pattern:$0x76325410]  ;;  %s2895_s8 = sshll.u32 %s3511_s24, 1  ;;  %s187_s24 = sadd.s32 1, %s3511_s24  }
 0x1fa   : >> { %s2796_s9 = scalar_lea.vmem %s3553_s20, %s2895_s8  ;;  %p184_p4 = scmp.ge.s32.totalorder %s187_s24, 2  }
 0x1fc   : >> { %2485 = vmatpush1.bf16.msra.mxu0 %v5095_v13  ;;  %2528 = vmatpush1.bf16.msra.mxu1 %v5095_v13  ;;  %v5134_v13 = vld [vmem:[#allocation59_spill] sm:$0xff] }
 0x1fd   : >> { %2486 = vmatprep.subr.bf16.mxu0 %v5096_v14  ;;  %2529 = vmatprep.subr.bf16.mxu1 %v5096_v14  ;;  %v2722_v14 = vshll.u32 %v3076_v12, 16 }
 0x200   : >> { %2487 = vmatpush1.bf16.msra.mxu0 %v5097_v15  ;;  %2530 = vmatpush1.bf16.msra.mxu1 %v5097_v15  ;;  %v5135_v15 = vld [vmem:[#allocation60_spill] sm:$0xff] }
 0x201   : >> { %2488 = vmatprep.subr.bf16.mxu0 %v5098_v16  ;;  %2531 = vmatprep.subr.bf16.mxu1 %v5098_v16  ;;  %v5136_v16 = vld [vmem:[#allocation61_spill] sm:$0xff] }
 0x204   : >> { %2489 = vmatpush1.bf16.msra.mxu0 %v5099_v17  ;;  %2532 = vmatpush1.bf16.msra.mxu1 %v5099_v17  ;;  %v2720_v17 = vshrl.u32 %v3076_v12, 16 }
 0x205   : >> { %2490 = vmatprep.subr.bf16.mxu0 %v5100_v18  ;;  %2533 = vmatprep.subr.bf16.mxu1 %v5100_v18  ;;  %v2724_v18 = vrot.slane %v2722_v14, 1 }
 0x206   : >> { %v1884_v19 = vpop.f32.mrb[0].mxu0  ;;  %v1943_v20 = vpop.f32.mrb[0].mxu1 }
 0x207   : >> { %v4778_v22 = vadd.f32 %v1884_v19, %v5101_v21  ;;  %v4781_v23 = vadd.f32 %v1943_v20, %v5101_v21  ;;  %v1886_v24 = vpop.f32.mrb[1].mxu0  ;;  %v1945_v27 = vpop.f32.mrb[1].mxu1  ;;  %v2725_v19 = vor.u32 %v2724_v18, %v2720_v17 }
 0x208   : >> { %v4784_v29 = vadd.f32 %v1886_v24, %v5102_v28  ;;  %v4787_v30 = vadd.f32 %v1945_v27, %v5102_v28  ;;  %v1888_v31 = vpop.f32.mrb[2].mxu0  ;;  %v1947_v32 = vpop.f32.mrb[2].mxu1  ;;  %2491 = vmatpush1.bf16.msra.mxu0 %v5103_v33  ;;  %2534 = vmatpush1.bf16.msra.mxu1 %v5103_v33  ;;  %v3514_v27 = vmov 1966171168  }
 0x209   : >> { %v1952_v34 = vmax.f32 %v4778_v22, %v4781_v23  ;;  %v1889_v35 = vpop.f32.mrb[3].mxu0  ;;  %v1948_v36 = vpop.f32.mrb[3].mxu1  ;;  %2492 = vmatprep.subr.bf16.mxu0 %v5104_v37  ;;  %2535 = vmatprep.subr.bf16.mxu1 %v5104_v37  ;;  %v2782_v31 = vunpack.c.l.s4 %v3514_v27 }
 0x20a   : >> { %v1953_v39 = vmax.f32 %v4784_v29, %v4787_v30 }
 0x20c   : >> { %2493 = vmatpush1.bf16.msra.mxu0 %v5105_v41  ;;  %2536 = vmatpush1.bf16.msra.mxu1 %v5105_v41 }
 0x20d   : >> { %2494 = vmatprep.subr.bf16.mxu0 %v5106_v42  ;;  %2537 = vmatprep.subr.bf16.mxu1 %v5106_v42 }
 0x210   : >> { %2495 = vmatpush1.bf16.msra.mxu0 %v5107_v45  ;;  %2538 = vmatpush1.bf16.msra.mxu1 %v5107_v45 }
 0x211   : >> { %2566 = vmatprep.subr.bf16.mxu0 %v5108_v48  ;;  %2625 = vmatprep.subr.bf16.mxu1 %v5108_v48 }
 0x213   : >> { %2513 = vmatmul.mubr.bf16.vlgmr.msra.gmra.mrb[4].mxu0 %v3069_v46  ;;  %2556 = vmatmul.mubr.bf16.vlgmr.msra.gmra.mrb[4].mxu1 %v3073_v47 }
 0x214   : >> { %2567 = vmatpush1.bf16.msra.mxu0 %v5109_v49  ;;  %2626 = vmatpush1.bf16.msra.mxu1 %v5109_v49 }
 0x215   : >> { %2568 = vmatprep.subr.bf16.mxu0 %v5110_v50  ;;  %2627 = vmatprep.subr.bf16.mxu1 %v5110_v50 }
 0x216   : >> { %2598 = vmatprep.mubr.bf16.mxu0 %v5037_v9  ;;  %2657 = vmatprep.mubr.bf16.mxu1 %v5037_v9 }
 0x218   : >> { %2569 = vmatpush1.bf16.msra.mxu0 %v5111_v43  ;;  %2628 = vmatpush1.bf16.msra.mxu1 %v5111_v43 }
 0x219   : >> { %2570 = vmatprep.subr.bf16.mxu0 %v5112_v44  ;;  %2629 = vmatprep.subr.bf16.mxu1 %v5112_v44  ;;  %v5137_v44 = vld [vmem:[#allocation2_spill] sm:$0xff] }
 0x21c   : >> { %2571 = vmatpush1.bf16.msra.mxu0 %v5113_v1  ;;  %2630 = vmatpush1.bf16.msra.mxu1 %v5113_v1 }
 0x21d   : >> { %2572 = vmatprep.subr.bf16.mxu0 %v5114_v7  ;;  %2631 = vmatprep.subr.bf16.mxu1 %v5114_v7 }
 0x220   : >> { %2573 = vmatpush1.bf16.msra.mxu0 %v5115_v0  ;;  %2632 = vmatpush1.bf16.msra.mxu1 %v5115_v0 }
 0x221   : >> { %2574 = vmatprep.subr.bf16.mxu0 %v5116_v38  ;;  %2633 = vmatprep.subr.bf16.mxu1 %v5116_v38 }
 0x224   : >> { %2575 = vmatpush1.bf16.msra.mxu0 %v5117_v40  ;;  %2634 = vmatpush1.bf16.msra.mxu1 %v5117_v40 }
 0x225   : >> { %2576 = vmatprep.subr.bf16.mxu0 %v5118_v25  ;;  %2635 = vmatprep.subr.bf16.mxu1 %v5118_v25 }
 0x228   : >> { %2577 = vmatpush1.bf16.msra.mxu0 %v5119_v59  ;;  %2636 = vmatpush1.bf16.msra.mxu1 %v5119_v59 }
 0x229   : >> { %2578 = vmatprep.subr.bf16.mxu0 %v5120_v51  ;;  %2637 = vmatprep.subr.bf16.mxu1 %v5120_v51 }
 0x22c   : >> { %2579 = vmatpush1.bf16.msra.mxu0 %v5121_v54  ;;  %2638 = vmatpush1.bf16.msra.mxu1 %v5121_v54 }
 0x22d   : >> { %2580 = vmatprep.subr.bf16.mxu0 %v5122_v55  ;;  %2639 = vmatprep.subr.bf16.mxu1 %v5122_v55 }
 0x230   : >> { %2581 = vmatpush1.bf16.msra.mxu0 %v5123_v57  ;;  %2640 = vmatpush1.bf16.msra.mxu1 %v5123_v57 }
 0x231   : >> { %2668 = vmatprep.subr.bf16.mxu0 %v5124_v58  ;;  %2727 = vmatprep.subr.bf16.mxu1 %v5124_v58 }
 0x233   : >> { %2599 = vmatmul.mubr.bf16.vlgmr.msra.gmra.mrb[4].mxu0 %v3073_v47  ;;  %2658 = vmatmul.mubr.bf16.vlgmr.msra.gmra.mrb[4].mxu1 %v2623_v56  ;;  %v2783_v47 = vunpack.c.0.s8 %v2782_v31 }
 0x234   : >> { %2669 = vmatpush1.bf16.msra.mxu0 %v5125_v60  ;;  %2728 = vmatpush1.bf16.msra.mxu1 %v5125_v60 }
 0x235   : >> { %2670 = vmatprep.subr.bf16.mxu0 %v5126_v62  ;;  %2729 = vmatprep.subr.bf16.mxu1 %v5126_v62  ;;  %v2786_v1 = vsub.s32 %v2783_v47, %v5137_v44 }
 0x236   : >> { %2700 = vmatprep.mubr.bf16.mxu0 %v5037_v9  ;;  %2759 = vmatprep.mubr.bf16.mxu1 %v5037_v9  ;;  %v5132_v9 = vld [vmem:[#allocation57_spill] sm:$0xff] }
 0x238   : >> { %2671 = vmatpush1.bf16.msra.mxu0 %v5127_v63  ;;  %2730 = vmatpush1.bf16.msra.mxu1 %v5127_v63 }
 0x239   : >> { %2672 = vmatprep.subr.bf16.mxu0 %v5128_v3  ;;  %2731 = vmatprep.subr.bf16.mxu1 %v5128_v3 }
 0x23c   : >> { %2673 = vmatpush1.bf16.msra.mxu0 %v5129_v4  ;;  %2732 = vmatpush1.bf16.msra.mxu1 %v5129_v4 }
 0x23d   : >> { %2674 = vmatprep.subr.bf16.mxu0 %v5130_v8  ;;  %2733 = vmatprep.subr.bf16.mxu1 %v5130_v8 }
 0x240   : >> { %2675 = vmatpush1.bf16.msra.mxu0 %v5131_v10  ;;  %2734 = vmatpush1.bf16.msra.mxu1 %v5131_v10 }
 0x241   : >> { %2676 = vmatprep.subr.bf16.mxu0 %v5132_v9  ;;  %2735 = vmatprep.subr.bf16.mxu1 %v5132_v9 }
 0x244   : >> { %2677 = vmatpush1.bf16.msra.mxu0 %v5133_v11  ;;  %2736 = vmatpush1.bf16.msra.mxu1 %v5133_v11 }
 0x245   : >> { %2678 = vmatprep.subr.bf16.mxu0 %v5134_v13  ;;  %2737 = vmatprep.subr.bf16.mxu1 %v5134_v13 }
 0x248   : >> { %2679 = vmatpush1.bf16.msra.mxu0 %v5135_v15  ;;  %2738 = vmatpush1.bf16.msra.mxu1 %v5135_v15 }
 0x249   : >> { %2680 = vmatprep.subr.bf16.mxu0 %v5136_v16  ;;  %2739 = vmatprep.subr.bf16.mxu1 %v5136_v16 }
 0x24c   : >> { %2681 = vmatpush1.bf16.msra.mxu0 %v4475_v2  ;;  %2740 = vmatpush1.bf16.msra.mxu1 %v4475_v2 }
 0x24d   : >> { %2682 = vmatprep.subr.bf16.mxu0 %v4482_v5  ;;  %2741 = vmatprep.subr.bf16.mxu1 %v4482_v5 }
 0x250   : >> { %2683 = vmatpush1.bf16.msra.mxu0 %v4489_v61  ;;  %2742 = vmatpush1.bf16.msra.mxu1 %v4489_v61 }
 0x253   : >> { %2701 = vmatmul.mubr.bf16.vlgmr.msra.gmra.mrb[4].mxu0 %v2623_v56  ;;  %2760 = vmatmul.mubr.bf16.vlgmr.msra.gmra.mrb[4].mxu1 %v2725_v19 }
 0x326   : >> { %v2702_v20 = vpop.f32.mrb[4].mxu0  ;;  %v2761_v24 = vpop.f32.mrb[4].mxu1 }
 0x327   : >> { %v3093_v32 = vadd.f32 %v2702_v20, %v5101_v21  ;;  %v3095_v2 = vadd.f32 %v2761_v24, %v5101_v21  ;;  %v2704_v33 = vpop.f32.mrb[5].mxu0  ;;  %v2763_v35 = vpop.f32.mrb[5].mxu1 }
 0x328   : >> { %v3094_v5 = vadd.f32 %v2704_v33, %v5102_v28  ;;  %v3096_v36 = vadd.f32 %v2763_v35, %v5102_v28  ;;  %v2706_v37 = vpop.f32.mrb[6].mxu0  ;;  %v2765_v61 = vpop.f32.mrb[6].mxu1 }
 0x329   : >> { %v2770_v41 = vmax.f32 %v3093_v32, %v3095_v2  ;;  %v2707_v42 = vpop.f32.mrb[7].mxu0  ;;  %v2766_v45 = vpop.f32.mrb[7].mxu1 }
 0x32a   : >> { %v2771_v46 = vmax.f32 %v3094_v5, %v3096_v36 }
 0x32b   : >> { %v2772_v48 = vmax.f32 %v1952_v34, %v2770_v41 }
 0x32c   : >> { %v2773_v49 = vmax.f32 %v1953_v39, %v2771_v46 }
 0x32d   : >> { %v2774_v50 = vmax.f32 %v2772_v48, 0.0 }
 0x32e   : >> { %v2775_v43 = vmax.f32 %v2773_v49, 0.0  ;;  %186 = sbr.rel (!%p184_p4) target bundleno = 17 (0x11), region = 78 }
 0x330   : >> { %v3077_v7 = vpack.c.bf16 %v2775_v43, %v2774_v50 }
 0x332   : >> { %v2787_v0 = vrot.slane %v3077_v7, %v2786_v1 }
 0x334   : >> { %3078 = vst.sshfl [vmem:[%s2796_s9] sm:$0x5 pattern:$0x73625140] %v2787_v0 }
 0x335 PF: > { %s13_s12 = sadd.s32 1, %s3507_s12  }
 0x336   : > { %p10_p5 = scmp.ge.s32.totalorder %s13_s12, 4  }
 0x338   :  { %12 = sbr.rel (!%p10_p5) target bundleno = 1 (0x1), region = 89 }

// kernel: crnn_ser_forward.11
= control target key start
LH: loop header
LB: loop body
LE: loop exit
PB: predicated region body
PF: predicated region fallthrough
CT: control target
= control target key end

     0   :  { %v273_v32 = vlaneseq  ;;  %v2249_v33 = vmov 1983009808   ;;  %s3104_s1 = inlined_call_operand.vmem [shape: bf16[512,1024], index: 1, kind: input, shape index: {}]   ;;  %s3105_s0 = inlined_call_operand.vmem [shape: bf16[4,512], index: 0, kind: input, shape index: {}]   ;;  %s3106_s2 = inlined_call_operand.vmem [shape: f32[1,1024], index: 2, kind: input, shape index: {}]   ;;  %s3107_s3 = inlined_call_operand.vmem [shape: f32[4,1024], index: 3, kind: output, shape index: {}]  }
   0x1   :  { %v15_v0 = vld [vmem:[%s3104_s1] sm:$0xff]  ;;  %v16_v2 = vld [vmem:[%s3104_s1 + $0x8] sm:$0xff]  ;;  %v316_v34 = vunpack.c.l.s4 %v2249_v33 }
   0x2   :  { %v19_v1 = vld [vmem:[%s3104_s1 + $0x20] sm:$0xff]  ;;  %v20_v4 = vld [vmem:[%s3104_s1 + $0x28] sm:$0xff]  ;;  %v2336_v43 = vshrl.u32 %v273_v32, 7 }
   0x3   :  { %v1968_v3 = vcombine.high %v15_v0, %v19_v1  ;;  %v1967_v5 = vcombine.low %v15_v0, %v19_v1  ;;  %v23_v6 = vld [vmem:[%s3104_s1 + $0x40] sm:$0xff]  ;;  %v1970_v8 = vcombine.high %v16_v2, %v20_v4  ;;  %v1969_v9 = vcombine.low %v16_v2, %v20_v4  ;;  %v24_v11 = vld [vmem:[%s3104_s1 + $0x48] sm:$0xff] }
   0x4   :  { %v27_v7 = vld [vmem:[%s3104_s1 + $0x60] sm:$0xff]  ;;  %v28_v12 = vld [vmem:[%s3104_s1 + $0x68] sm:$0xff]  ;;  %v317_v44 = vunpack.c.0.s8 %v316_v34 }
   0x5   :  { %v1976_v10 = vcombine.high %v23_v6, %v27_v7  ;;  %v31_v13 = vld [vmem:[%s3104_s1 + $0x80] sm:$0xff]  ;;  %1615 = vmatprep.subr.bf16.mxu0 %v1968_v3  ;;  %v1978_v14 = vcombine.high %v24_v11, %v28_v12  ;;  %v32_v16 = vld [vmem:[%s3104_s1 + $0x88] sm:$0xff]  ;;  %1697 = vmatprep.subr.bf16.mxu1 %v1970_v8  ;;  %v1975_v18 = vcombine.low %v23_v6, %v27_v7 }
   0x6   :  { %v35_v15 = vld [vmem:[%s3104_s1 + $0xa0] sm:$0xff]  ;;  %v36_v17 = vld [vmem:[%s3104_s1 + $0xa8] sm:$0xff]  ;;  %1616 = vmatpush1.bf16.msra.mxu0 %v1967_v5  ;;  %1698 = vmatpush1.bf16.msra.mxu1 %v1969_v9  ;;  %v1977_v19 = vcombine.low %v24_v11, %v28_v12  ;;  %v2351_v53 = vsub.s32 %v317_v44, %v2336_v43 }
   0x7   :  { %1617 = vmatprep.subr.bf16.mxu0 %v1976_v10  ;;  %v1984_v20 = vcombine.high %v31_v13, %v35_v15  ;;  %1699 = vmatprep.subr.bf16.mxu1 %v1978_v14  ;;  %v1986_v21 = vcombine.high %v32_v16, %v36_v17  ;;  %v39_v22 = vld [vmem:[%s3104_s1 + $0xc0] sm:$0xff]  ;;  %v40_v24 = vld [vmem:[%s3104_s1 + $0xc8] sm:$0xff]  ;;  %v1983_v26 = vcombine.low %v31_v13, %v35_v15 }
   0x8   :  { %v43_v23 = vld [vmem:[%s3104_s1 + $0xe0] sm:$0xff]  ;;  %v44_v25 = vld [vmem:[%s3104_s1 + $0xe8] sm:$0xff]  ;;  %v1985_v27 = vcombine.low %v32_v16, %v36_v17 }
   0x9   :  { %v1992_v28 = vcombine.high %v39_v22, %v43_v23  ;;  %v1994_v29 = vcombine.high %v40_v24, %v44_v25  ;;  %v47_v30 = vld [vmem:[%s3104_s1 + $0x100] sm:$0xff]  ;;  %v48_v35 = vld [vmem:[%s3104_s1 + $0x108] sm:$0xff]  ;;  %v1991_v37 = vcombine.low %v39_v22, %v43_v23  ;;  %v1993_v38 = vcombine.low %v40_v24, %v44_v25 }
   0xa   :  { %1618 = vmatpush1.bf16.msra.mxu0 %v1975_v18  ;;  %1700 = vmatpush1.bf16.msra.mxu1 %v1977_v19  ;;  %v51_v31 = vld [vmem:[%s3104_s1 + $0x120] sm:$0xff]  ;;  %v52_v36 = vld [vmem:[%s3104_s1 + $0x128] sm:$0xff] }
   0xb   :  { %1619 = vmatprep.subr.bf16.mxu0 %v1984_v20  ;;  %1701 = vmatprep.subr.bf16.mxu1 %v1986_v21  ;;  %v2000_v39 = vcombine.high %v47_v30, %v51_v31  ;;  %v2002_v40 = vcombine.high %v48_v35, %v52_v36  ;;  %v55_v41 = vld [vmem:[%s3104_s1 + $0x140] sm:$0xff]  ;;  %v56_v45 = vld [vmem:[%s3104_s1 + $0x148] sm:$0xff]  ;;  %v1999_v47 = vcombine.low %v47_v30, %v51_v31 }
   0xc   :  { %v59_v42 = vld [vmem:[%s3104_s1 + $0x160] sm:$0xff]  ;;  %v60_v46 = vld [vmem:[%s3104_s1 + $0x168] sm:$0xff]  ;;  %v2001_v48 = vcombine.low %v48_v35, %v52_v36 }
   0xd   :  { %v2008_v49 = vcombine.high %v55_v41, %v59_v42  ;;  %v2010_v50 = vcombine.high %v56_v45, %v60_v46  ;;  %v63_v51 = vld [vmem:[%s3104_s1 + $0x180] sm:$0xff]  ;;  %v64_v54 = vld [vmem:[%s3104_s1 + $0x188] sm:$0xff]  ;;  %v2007_v56 = vcombine.low %v55_v41, %v59_v42  ;;  %v2009_v57 = vcombine.low %v56_v45, %v60_v46 }
   0xe   :  { %1620 = vmatpush1.bf16.msra.mxu0 %v1983_v26  ;;  %1702 = vmatpush1.bf16.msra.mxu1 %v1985_v27  ;;  %v67_v52 = vld [vmem:[%s3104_s1 + $0x1a0] sm:$0xff]  ;;  %v68_v55 = vld [vmem:[%s3104_s1 + $0x1a8] sm:$0xff] }
   0xf   :  { %1621 = vmatprep.subr.bf16.mxu0 %v1992_v28  ;;  %1703 = vmatprep.subr.bf16.mxu1 %v1994_v29  ;;  %v2016_v58 = vcombine.high %v63_v51, %v67_v52  ;;  %v2362_v59 = vld [vmem:[%s3105_s0] sm:$0xff]  ;;  %v2018_v60 = vcombine.high %v64_v54, %v68_v55  ;;  %v72_v0 = vld [vmem:[%s3104_s1 + $0x1c8] sm:$0xff]  ;;  %v2015_v2 = vcombine.low %v63_v51, %v67_v52 }
  0x10   :  { %v71_v61 = vld [vmem:[%s3104_s1 + $0x1c0] sm:$0xff]  ;;  %v2372_v63 = vrot.slane %v2362_v59, %v2351_v53  ;;  %v76_v1 = vld [vmem:[%s3104_s1 + $0x1e8] sm:$0xff]  ;;  %v2017_v4 = vcombine.low %v64_v54, %v68_v55 }
  0x11   :  { %v75_v62 = vld [vmem:[%s3104_s1 + $0x1e0] sm:$0xff]  ;;  %v2026_v6 = vcombine.high %v72_v0, %v76_v1  ;;  %v80_v9 = vld [vmem:[%s3104_s1 + $0x208] sm:$0xff]  ;;  %v2025_v12 = vcombine.low %v72_v0, %v76_v1 }
  0x12   :  { %1622 = vmatpush1.bf16.msra.mxu0 %v1991_v37  ;;  %1704 = vmatpush1.bf16.msra.mxu1 %v1993_v38  ;;  %v2382_v3 = vcombine.high %v2372_v63, %v2372_v63  ;;  %v2024_v5 = vcombine.high %v71_v61, %v75_v62  ;;  %v79_v7 = vld [vmem:[%s3104_s1 + $0x200] sm:$0xff]  ;;  %v84_v10 = vld [vmem:[%s3104_s1 + $0x228] sm:$0xff]  ;;  %v2023_v11 = vcombine.low %v71_v61, %v75_v62 }
  0x13   :  { %1623 = vmatprep.subr.bf16.mxu0 %v2000_v39  ;;  %1705 = vmatprep.subr.bf16.mxu1 %v2002_v40  ;;  %v83_v8 = vld [vmem:[%s3104_s1 + $0x220] sm:$0xff]  ;;  %v2034_v14 = vcombine.high %v80_v9, %v84_v10  ;;  %v88_v17 = vld [vmem:[%s3104_s1 + $0x248] sm:$0xff]  ;;  %v2033_v20 = vcombine.low %v80_v9, %v84_v10 }
  0x14   :  { %1647 = vmatprep.mubr.bf16.mxu0 %v2382_v3  ;;  %1729 = vmatprep.mubr.bf16.mxu1 %v2382_v3  ;;  %v2032_v13 = vcombine.high %v79_v7, %v83_v8  ;;  %v87_v15 = vld [vmem:[%s3104_s1 + $0x240] sm:$0xff]  ;;  %v92_v18 = vld [vmem:[%s3104_s1 + $0x268] sm:$0xff]  ;;  %v2031_v19 = vcombine.low %v79_v7, %v83_v8 }
  0x15   :  { %v91_v16 = vld [vmem:[%s3104_s1 + $0x260] sm:$0xff]  ;;  %v2042_v22 = vcombine.high %v88_v17, %v92_v18  ;;  %v96_v25 = vld [vmem:[%s3104_s1 + $0x288] sm:$0xff]  ;;  %v2041_v28 = vcombine.low %v88_v17, %v92_v18 }
  0x16   :  { %1624 = vmatpush1.bf16.msra.mxu0 %v1999_v47  ;;  %1706 = vmatpush1.bf16.msra.mxu1 %v2001_v48  ;;  %v2040_v21 = vcombine.high %v87_v15, %v91_v16  ;;  %v95_v23 = vld [vmem:[%s3104_s1 + $0x280] sm:$0xff]  ;;  %v100_v26 = vld [vmem:[%s3104_s1 + $0x2a8] sm:$0xff]  ;;  %v2039_v27 = vcombine.low %v87_v15, %v91_v16 }
  0x17   :  { %1625 = vmatprep.subr.bf16.mxu0 %v2008_v49  ;;  %1707 = vmatprep.subr.bf16.mxu1 %v2010_v50  ;;  %v99_v24 = vld [vmem:[%s3104_s1 + $0x2a0] sm:$0xff]  ;;  %v2050_v30 = vcombine.high %v96_v25, %v100_v26  ;;  %v104_v33 = vld [vmem:[%s3104_s1 + $0x2c8] sm:$0xff]  ;;  %v2049_v36 = vcombine.low %v96_v25, %v100_v26 }
  0x18   :  { %v2048_v29 = vcombine.high %v95_v23, %v99_v24  ;;  %v103_v31 = vld [vmem:[%s3104_s1 + $0x2c0] sm:$0xff]  ;;  %v108_v34 = vld [vmem:[%s3104_s1 + $0x2e8] sm:$0xff]  ;;  %v2047_v35 = vcombine.low %v95_v23, %v99_v24 }
  0x19   :  { %v107_v32 = vld [vmem:[%s3104_s1 + $0x2e0] sm:$0xff]  ;;  %v2058_v38 = vcombine.high %v104_v33, %v108_v34  ;;  %v112_v41 = vld [vmem:[%s3104_s1 + $0x308] sm:$0xff]  ;;  %v2057_v45 = vcombine.low %v104_v33, %v108_v34 }
  0x1a   :  { %1626 = vmatpush1.bf16.msra.mxu0 %v2007_v56  ;;  %1708 = vmatpush1.bf16.msra.mxu1 %v2009_v57  ;;  %v2056_v37 = vcombine.high %v103_v31, %v107_v32  ;;  %v111_v39 = vld [vmem:[%s3104_s1 + $0x300] sm:$0xff]  ;;  %v116_v42 = vld [vmem:[%s3104_s1 + $0x328] sm:$0xff]  ;;  %v2055_v44 = vcombine.low %v103_v31, %v107_v32 }
  0x1b   :  { %1627 = vmatprep.subr.bf16.mxu0 %v2016_v58  ;;  %1709 = vmatprep.subr.bf16.mxu1 %v2018_v60  ;;  %v115_v40 = vld [vmem:[%s3104_s1 + $0x320] sm:$0xff]  ;;  %v2066_v47 = vcombine.high %v112_v41, %v116_v42  ;;  %v120_v50 = vld [vmem:[%s3104_s1 + $0x348] sm:$0xff]  ;;  %v2065_v54 = vcombine.low %v112_v41, %v116_v42 }
  0x1c   :  { %v2064_v46 = vcombine.high %v111_v39, %v115_v40  ;;  %v119_v48 = vld [vmem:[%s3104_s1 + $0x340] sm:$0xff]  ;;  %v124_v51 = vld [vmem:[%s3104_s1 + $0x368] sm:$0xff]  ;;  %v2063_v52 = vcombine.low %v111_v39, %v115_v40 }
  0x1d   :  { %v123_v49 = vld [vmem:[%s3104_s1 + $0x360] sm:$0xff]  ;;  %v2074_v56 = vcombine.high %v120_v50, %v124_v51  ;;  %v128_v60 = vld [vmem:[%s3104_s1 + $0x388] sm:$0xff]  ;;  %v2073_v0 = vcombine.low %v120_v50, %v124_v51 }
  0x1e   :  { %1628 = vmatpush1.bf16.msra.mxu0 %v2015_v2  ;;  %1710 = vmatpush1.bf16.msra.mxu1 %v2017_v4  ;;  %v2072_v55 = vcombine.high %v119_v48, %v123_v49  ;;  %v127_v57 = vld [vmem:[%s3104_s1 + $0x380] sm:$0xff]  ;;  %v132_v61 = vld [vmem:[%s3104_s1 + $0x3a8] sm:$0xff]  ;;  %v2071_v62 = vcombine.low %v119_v48, %v123_v49 }
  0x1f   :  { %1629 = vmatprep.subr.bf16.mxu0 %v2024_v5  ;;  %1711 = vmatprep.subr.bf16.mxu1 %v2026_v6  ;;  %v131_v58 = vld [vmem:[%s3104_s1 + $0x3a0] sm:$0xff]  ;;  %v2082_v2 = vcombine.high %v128_v60, %v132_v61  ;;  %v136_v6 = vld [vmem:[%s3104_s1 + $0x3c8] sm:$0xff]  ;;  %v2081_v9 = vcombine.low %v128_v60, %v132_v61 }
  0x20   :  { %v2080_v1 = vcombine.high %v127_v57, %v131_v58  ;;  %v135_v4 = vld [vmem:[%s3104_s1 + $0x3c0] sm:$0xff]  ;;  %v140_v7 = vld [vmem:[%s3104_s1 + $0x3e8] sm:$0xff]  ;;  %v2079_v8 = vcombine.low %v127_v57, %v131_v58 }
  0x21   :  { %v139_v5 = vld [vmem:[%s3104_s1 + $0x3e0] sm:$0xff]  ;;  %v144_v15 = vld [vmem:[%s3104_s1 + $0x408] sm:$0xff]  ;;  %v2089_v18 = vcombine.low %v136_v6, %v140_v7 }
  0x22   :  { %1630 = vmatpush1.bf16.msra.mxu0 %v2023_v11  ;;  %1712 = vmatpush1.bf16.msra.mxu1 %v2025_v12  ;;  %v2088_v10 = vcombine.high %v135_v4, %v139_v5  ;;  %v2090_v11 = vcombine.high %v136_v6, %v140_v7  ;;  %v143_v12 = vld [vmem:[%s3104_s1 + $0x400] sm:$0xff]  ;;  %v148_v16 = vld [vmem:[%s3104_s1 + $0x428] sm:$0xff]  ;;  %v2087_v17 = vcombine.low %v135_v4, %v139_v5 }
  0x23   :  { %1631 = vmatprep.subr.bf16.mxu0 %v2032_v13  ;;  %1713 = vmatprep.subr.bf16.mxu1 %v2034_v14  ;;  %v147_v13 = vld [vmem:[%s3104_s1 + $0x420] sm:$0xff]  ;;  %v314_v14 = vcombine.high %v2362_v59, %v2362_v59  ;;  %v152_v23 = vld [vmem:[%s3104_s1 + $0x448] sm:$0xff]  ;;  %v2097_v26 = vcombine.low %v144_v15, %v148_v16 }
  0x24   :  { %v151_v59 = vld [vmem:[%s3104_s1 + $0x440] sm:$0xff]  ;;  %v156_v24 = vld [vmem:[%s3104_s1 + $0x468] sm:$0xff]  ;;  %v2095_v25 = vcombine.low %v143_v12, %v147_v13 }
  0x25   :  { %v160_v31 = vld [vmem:[%s3104_s1 + $0x488] sm:$0xff]  ;;  %v2105_v34 = vcombine.low %v152_v23, %v156_v24 }
  0x26   :  { %1632 = vmatpush1.bf16.msra.mxu0 %v2031_v19  ;;  %1714 = vmatpush1.bf16.msra.mxu1 %v2033_v20  ;;  %v2096_v19 = vcombine.high %v143_v12, %v147_v13  ;;  %v2098_v20 = vcombine.high %v144_v15, %v148_v16  ;;  %v164_v32 = vld [vmem:[%s3104_s1 + $0x4a8] sm:$0xff] }
  0x27   :  { %1633 = vmatprep.subr.bf16.mxu0 %v2040_v21  ;;  %1715 = vmatprep.subr.bf16.mxu1 %v2042_v22  ;;  %v155_v21 = vld [vmem:[%s3104_s1 + $0x460] sm:$0xff]  ;;  %v2503_v22 = vrot.slane %v314_v14, %v2351_v53  ;;  %v168_v39 = vld [vmem:[%s3104_s1 + $0x4c8] sm:$0xff]  ;;  %v2113_v42 = vcombine.low %v160_v31, %v164_v32 }
  0x28   :  { %v159_v53 = vld [vmem:[%s3104_s1 + $0x480] sm:$0xff]  ;;  %v2103_v33 = vcombine.low %v151_v59, %v155_v21  ;;  %v172_v40 = vld [vmem:[%s3104_s1 + $0x4e8] sm:$0xff] }
  0x29   :  { %v176_v48 = vld [vmem:[%s3104_s1 + $0x508] sm:$0xff]  ;;  %v2121_v51 = vcombine.low %v168_v39, %v172_v40 }
  0x2a   :  { %1634 = vmatpush1.bf16.msra.mxu0 %v2039_v27  ;;  %1716 = vmatpush1.bf16.msra.mxu1 %v2041_v28  ;;  %v2104_v27 = vcombine.high %v151_v59, %v155_v21  ;;  %v2106_v28 = vcombine.high %v152_v23, %v156_v24  ;;  %v180_v49 = vld [vmem:[%s3104_s1 + $0x528] sm:$0xff] }
  0x2b   :  { %1635 = vmatprep.subr.bf16.mxu0 %v2048_v29  ;;  %1717 = vmatprep.subr.bf16.mxu1 %v2050_v30  ;;  %v163_v29 = vld [vmem:[%s3104_s1 + $0x4a0] sm:$0xff]  ;;  %v2519_v30 = vcombine.high %v2503_v22, %v2503_v22  ;;  %v184_v57 = vld [vmem:[%s3104_s1 + $0x548] sm:$0xff]  ;;  %v2129_v61 = vcombine.low %v176_v48, %v180_v49 }
  0x2c   :  { %v2111_v41 = vcombine.low %v159_v53, %v163_v29  ;;  %v188_v58 = vld [vmem:[%s3104_s1 + $0x568] sm:$0xff] }
  0x2d   :  { %v192_v4 = vld [vmem:[%s3104_s1 + $0x588] sm:$0xff]  ;;  %v2137_v7 = vcombine.low %v184_v57, %v188_v58 }
  0x2e   :  { %1636 = vmatpush1.bf16.msra.mxu0 %v2047_v35  ;;  %1718 = vmatpush1.bf16.msra.mxu1 %v2049_v36  ;;  %v2112_v35 = vcombine.high %v159_v53, %v163_v29  ;;  %v2114_v36 = vcombine.high %v160_v31, %v164_v32  ;;  %v196_v5 = vld [vmem:[%s3104_s1 + $0x5a8] sm:$0xff] }
  0x2f   :  { %1637 = vmatprep.subr.bf16.mxu0 %v2056_v37  ;;  %1719 = vmatprep.subr.bf16.mxu1 %v2058_v38  ;;  %v167_v37 = vld [vmem:[%s3104_s1 + $0x4c0] sm:$0xff]  ;;  %v200_v12 = vld [vmem:[%s3104_s1 + $0x5c8] sm:$0xff]  ;;  %v2145_v15 = vcombine.low %v192_v4, %v196_v5 }
  0x30   :  { %v171_v38 = vld [vmem:[%s3104_s1 + $0x4e0] sm:$0xff]  ;;  %v204_v13 = vld [vmem:[%s3104_s1 + $0x5e8] sm:$0xff] }
  0x31   :  { %v2119_v50 = vcombine.low %v167_v37, %v171_v38  ;;  %v212_v59 = vld [vmem:[%s3104_s1 + $0x628] sm:$0xff]  ;;  %v2153_v23 = vcombine.low %v200_v12, %v204_v13 }
  0x32   :  { %1638 = vmatpush1.bf16.msra.mxu0 %v2055_v44  ;;  %1720 = vmatpush1.bf16.msra.mxu1 %v2057_v45  ;;  %v2120_v44 = vcombine.high %v167_v37, %v171_v38  ;;  %v2122_v45 = vcombine.high %v168_v39, %v172_v40  ;;  %v220_v53 = vld [vmem:[%s3104_s1 + $0x668] sm:$0xff] }
  0x33   :  { %1639 = vmatprep.subr.bf16.mxu0 %v2064_v46  ;;  %1721 = vmatprep.subr.bf16.mxu1 %v2066_v47  ;;  %v175_v46 = vld [vmem:[%s3104_s1 + $0x500] sm:$0xff]  ;;  %v228_v37 = vld [vmem:[%s3104_s1 + $0x6a8] sm:$0xff] }
  0x34   :  { %v179_v47 = vld [vmem:[%s3104_s1 + $0x520] sm:$0xff] }
  0x35   :  { %v2127_v60 = vcombine.low %v175_v46, %v179_v47 }
  0x36   :  { %1640 = vmatpush1.bf16.msra.mxu0 %v2063_v52  ;;  %1722 = vmatpush1.bf16.msra.mxu1 %v2065_v54  ;;  %v2128_v52 = vcombine.high %v175_v46, %v179_v47  ;;  %v2130_v54 = vcombine.high %v176_v48, %v180_v49  ;;  %v236_v46 = vld [vmem:[%s3104_s1 + $0x6e8] sm:$0xff] }
  0x37   :  { %1641 = vmatprep.subr.bf16.mxu0 %v2072_v55  ;;  %1723 = vmatprep.subr.bf16.mxu1 %v2074_v56  ;;  %v183_v55 = vld [vmem:[%s3104_s1 + $0x540] sm:$0xff] }
  0x38   :  { %v187_v56 = vld [vmem:[%s3104_s1 + $0x560] sm:$0xff] }
  0x39   :  { %v2135_v6 = vcombine.low %v183_v55, %v187_v56 }
  0x3a   :  { %1642 = vmatpush1.bf16.msra.mxu0 %v2071_v62  ;;  %1724 = vmatpush1.bf16.msra.mxu1 %v2073_v0  ;;  %v2136_v62 = vcombine.high %v183_v55, %v187_v56  ;;  %v2138_v0 = vcombine.high %v184_v57, %v188_v58  ;;  %v244_v55 = vld [vmem:[%s3104_s1 + $0x728] sm:$0xff] }
  0x3b   :  { %1643 = vmatprep.subr.bf16.mxu0 %v2080_v1  ;;  %1725 = vmatprep.subr.bf16.mxu1 %v2082_v2  ;;  %v191_v1 = vld [vmem:[%s3104_s1 + $0x580] sm:$0xff] }
  0x3c   :  { %v195_v2 = vld [vmem:[%s3104_s1 + $0x5a0] sm:$0xff] }
  0x3d   :  { %v2143_v14 = vcombine.low %v191_v1, %v195_v2 }
  0x3e   :  { %1644 = vmatpush1.bf16.msra.mxu0 %v2079_v8  ;;  %1726 = vmatpush1.bf16.msra.mxu1 %v2081_v9  ;;  %v2144_v8 = vcombine.high %v191_v1, %v195_v2  ;;  %v2146_v9 = vcombine.high %v192_v4, %v196_v5  ;;  %v252_v1 = vld [vmem:[%s3104_s1 + $0x768] sm:$0xff] }
  0x3f   :  { %1645 = vmatprep.subr.bf16.mxu0 %v2088_v10  ;;  %1727 = vmatprep.subr.bf16.mxu1 %v2090_v11  ;;  %v199_v10 = vld [vmem:[%s3104_s1 + $0x5c0] sm:$0xff] }
  0x40   :  { %v203_v11 = vld [vmem:[%s3104_s1 + $0x5e0] sm:$0xff] }
  0x41   :  { %v2152_v16 = vcombine.high %v199_v10, %v203_v11  ;;  %v2151_v21 = vcombine.low %v199_v10, %v203_v11  ;;  %v260_v10 = vld [vmem:[%s3104_s1 + $0x7a8] sm:$0xff] }
  0x42   :  { %1646 = vmatpush1.bf16.msra.mxu0 %v2087_v17  ;;  %1728 = vmatpush1.bf16.msra.mxu1 %v2089_v18  ;;  %v2154_v17 = vcombine.high %v200_v12, %v204_v13  ;;  %v207_v18 = vld [vmem:[%s3104_s1 + $0x600] sm:$0xff] }
  0x43   :  { %1656 = vmatprep.subr.bf16.mxu0 %v2096_v19  ;;  %1738 = vmatprep.subr.bf16.mxu1 %v2098_v20  ;;  %v211_v19 = vld [vmem:[%s3104_s1 + $0x620] sm:$0xff]  ;;  %v208_v20 = vld [vmem:[%s3104_s1 + $0x608] sm:$0xff] }
  0x44   :  { %v2160_v24 = vcombine.high %v207_v18, %v211_v19  ;;  %v2159_v29 = vcombine.low %v207_v18, %v211_v19  ;;  %v2161_v31 = vcombine.low %v208_v20, %v212_v59  ;;  %v268_v18 = vld [vmem:[%s3104_s1 + $0x7e8] sm:$0xff] }
  0x45   :  { %1648 = vmatmul.mubr.bf16.vlgmr.msra.gmra.mrb[0].mxu0 %v2372_v63  ;;  %1730 = vmatmul.mubr.bf16.vlgmr.msra.gmra.mrb[0].mxu1 %v2372_v63 }
  0x46   :  { %1657 = vmatpush1.bf16.msra.mxu0 %v2095_v25  ;;  %1739 = vmatpush1.bf16.msra.mxu1 %v2097_v26  ;;  %v2162_v25 = vcombine.high %v208_v20, %v212_v59  ;;  %v215_v26 = vld [vmem:[%s3104_s1 + $0x640] sm:$0xff] }
  0x47   :  { %1658 = vmatprep.subr.bf16.mxu0 %v2104_v27  ;;  %1740 = vmatprep.subr.bf16.mxu1 %v2106_v28  ;;  %v219_v27 = vld [vmem:[%s3104_s1 + $0x660] sm:$0xff]  ;;  %v216_v28 = vld [vmem:[%s3104_s1 + $0x648] sm:$0xff] }
  0x48   :  { %1688 = vmatprep.mubr.bf16.mxu0 %v2519_v30  ;;  %1770 = vmatprep.mubr.bf16.mxu1 %v2519_v30  ;;  %v2168_v32 = vcombine.high %v215_v26, %v219_v27  ;;  %v2167_v38 = vcombine.low %v215_v26, %v219_v27  ;;  %v2169_v39 = vcombine.low %v216_v28, %v220_v53  ;;  %v22_v26 = vld [vmem:[%s3104_s1 + $0x38] sm:$0xff] }
  0x4a   :  { %1659 = vmatpush1.bf16.msra.mxu0 %v2103_v33  ;;  %1741 = vmatpush1.bf16.msra.mxu1 %v2105_v34  ;;  %v2170_v33 = vcombine.high %v216_v28, %v220_v53  ;;  %v223_v34 = vld [vmem:[%s3104_s1 + $0x680] sm:$0xff] }
  0x4b   :  { %1660 = vmatprep.subr.bf16.mxu0 %v2112_v35  ;;  %1742 = vmatprep.subr.bf16.mxu1 %v2114_v36  ;;  %v227_v35 = vld [vmem:[%s3104_s1 + $0x6a0] sm:$0xff]  ;;  %v224_v36 = vld [vmem:[%s3104_s1 + $0x688] sm:$0xff] }
  0x4c   :  { %v2176_v40 = vcombine.high %v223_v34, %v227_v35  ;;  %v2175_v47 = vcombine.low %v223_v34, %v227_v35  ;;  %v2177_v48 = vcombine.low %v224_v36, %v228_v37  ;;  %v30_v34 = vld [vmem:[%s3104_s1 + $0x78] sm:$0xff] }
  0x4e   :  { %1661 = vmatpush1.bf16.msra.mxu0 %v2111_v41  ;;  %1743 = vmatpush1.bf16.msra.mxu1 %v2113_v42  ;;  %v2178_v41 = vcombine.high %v224_v36, %v228_v37  ;;  %v231_v42 = vld [vmem:[%s3104_s1 + $0x6c0] sm:$0xff] }
  0x4f   :  { %1662 = vmatprep.subr.bf16.mxu0 %v2120_v44  ;;  %1744 = vmatprep.subr.bf16.mxu1 %v2122_v45  ;;  %v235_v44 = vld [vmem:[%s3104_s1 + $0x6e0] sm:$0xff]  ;;  %v232_v45 = vld [vmem:[%s3104_s1 + $0x6c8] sm:$0xff] }
  0x50   :  { %v2184_v49 = vcombine.high %v231_v42, %v235_v44  ;;  %v2183_v56 = vcombine.low %v231_v42, %v235_v44  ;;  %v2185_v57 = vcombine.low %v232_v45, %v236_v46  ;;  %v38_v42 = vld [vmem:[%s3104_s1 + $0xb8] sm:$0xff] }
  0x52   :  { %1663 = vmatpush1.bf16.msra.mxu0 %v2119_v50  ;;  %1745 = vmatpush1.bf16.msra.mxu1 %v2121_v51  ;;  %v2186_v50 = vcombine.high %v232_v45, %v236_v46  ;;  %v239_v51 = vld [vmem:[%s3104_s1 + $0x700] sm:$0xff] }
  0x53   :  { %1664 = vmatprep.subr.bf16.mxu0 %v2128_v52  ;;  %1746 = vmatprep.subr.bf16.mxu1 %v2130_v54  ;;  %v243_v52 = vld [vmem:[%s3104_s1 + $0x720] sm:$0xff]  ;;  %v240_v54 = vld [vmem:[%s3104_s1 + $0x708] sm:$0xff] }
  0x54   :  { %v2192_v58 = vcombine.high %v239_v51, %v243_v52  ;;  %v2191_v2 = vcombine.low %v239_v51, %v243_v52  ;;  %v2193_v4 = vcombine.low %v240_v54, %v244_v55  ;;  %v46_v51 = vld [vmem:[%s3104_s1 + $0xf8] sm:$0xff] }
  0x56   :  { %1665 = vmatpush1.bf16.msra.mxu0 %v2127_v60  ;;  %1747 = vmatpush1.bf16.msra.mxu1 %v2129_v61  ;;  %v2194_v60 = vcombine.high %v240_v54, %v244_v55  ;;  %v247_v61 = vld [vmem:[%s3104_s1 + $0x740] sm:$0xff] }
  0x57   :  { %1666 = vmatprep.subr.bf16.mxu0 %v2136_v62  ;;  %1748 = vmatprep.subr.bf16.mxu1 %v2138_v0  ;;  %v251_v62 = vld [vmem:[%s3104_s1 + $0x760] sm:$0xff]  ;;  %v248_v0 = vld [vmem:[%s3104_s1 + $0x748] sm:$0xff] }
  0x58   :  { %v2200_v5 = vcombine.high %v247_v61, %v251_v62  ;;  %v2199_v11 = vcombine.low %v247_v61, %v251_v62  ;;  %v2201_v12 = vcombine.low %v248_v0, %v252_v1 }
  0x5a   :  { %1667 = vmatpush1.bf16.msra.mxu0 %v2135_v6  ;;  %1749 = vmatpush1.bf16.msra.mxu1 %v2137_v7  ;;  %v2202_v6 = vcombine.high %v248_v0, %v252_v1  ;;  %v255_v7 = vld [vmem:[%s3104_s1 + $0x780] sm:$0xff] }
  0x5b   :  { %1668 = vmatprep.subr.bf16.mxu0 %v2144_v8  ;;  %1750 = vmatprep.subr.bf16.mxu1 %v2146_v9  ;;  %v259_v8 = vld [vmem:[%s3104_s1 + $0x7a0] sm:$0xff]  ;;  %v256_v9 = vld [vmem:[%s3104_s1 + $0x788] sm:$0xff] }
  0x5c   :  { %v2208_v13 = vcombine.high %v255_v7, %v259_v8  ;;  %v2207_v19 = vcombine.low %v255_v7, %v259_v8  ;;  %v2209_v20 = vcombine.low %v256_v9, %v260_v10 }
  0x5e   :  { %1669 = vmatpush1.bf16.msra.mxu0 %v2143_v14  ;;  %1751 = vmatpush1.bf16.msra.mxu1 %v2145_v15  ;;  %v2210_v14 = vcombine.high %v256_v9, %v260_v10  ;;  %v263_v15 = vld [vmem:[%s3104_s1 + $0x7c0] sm:$0xff] }
  0x5f   :  { %1670 = vmatprep.subr.bf16.mxu0 %v2152_v16  ;;  %1752 = vmatprep.subr.bf16.mxu1 %v2154_v17  ;;  %v267_v16 = vld [vmem:[%s3104_s1 + $0x7e0] sm:$0xff]  ;;  %v264_v17 = vld [vmem:[%s3104_s1 + $0x7c8] sm:$0xff] }
  0x60   :  { %v2216_v59 = vcombine.high %v263_v15, %v267_v16  ;;  %v2215_v27 = vcombine.low %v263_v15, %v267_v16  ;;  %v2217_v28 = vcombine.low %v264_v17, %v268_v18 }
  0x62   :  { %1671 = vmatpush1.bf16.msra.mxu0 %v2151_v21  ;;  %1753 = vmatpush1.bf16.msra.mxu1 %v2153_v23  ;;  %v2218_v21 = vcombine.high %v264_v17, %v268_v18  ;;  %v17_v23 = vld [vmem:[%s3104_s1 + $0x10] sm:$0xff] }
  0x63   :  { %1672 = vmatprep.subr.bf16.mxu0 %v2160_v24  ;;  %1754 = vmatprep.subr.bf16.mxu1 %v2162_v25  ;;  %v21_v24 = vld [vmem:[%s3104_s1 + $0x30] sm:$0xff]  ;;  %v18_v25 = vld [vmem:[%s3104_s1 + $0x18] sm:$0xff] }
  0x64   :  { %v1972_v53 = vcombine.high %v17_v23, %v21_v24  ;;  %v1971_v35 = vcombine.low %v17_v23, %v21_v24  ;;  %v1973_v36 = vcombine.low %v18_v25, %v22_v26 }
  0x66   :  { %1673 = vmatpush1.bf16.msra.mxu0 %v2159_v29  ;;  %1755 = vmatpush1.bf16.msra.mxu1 %v2161_v31  ;;  %v1974_v29 = vcombine.high %v18_v25, %v22_v26  ;;  %v25_v31 = vld [vmem:[%s3104_s1 + $0x50] sm:$0xff] }
  0x67   :  { %1674 = vmatprep.subr.bf16.mxu0 %v2168_v32  ;;  %1756 = vmatprep.subr.bf16.mxu1 %v2170_v33  ;;  %v29_v32 = vld [vmem:[%s3104_s1 + $0x70] sm:$0xff]  ;;  %v26_v33 = vld [vmem:[%s3104_s1 + $0x58] sm:$0xff] }
  0x68   :  { %v1980_v37 = vcombine.high %v25_v31, %v29_v32  ;;  %v1979_v44 = vcombine.low %v25_v31, %v29_v32  ;;  %v1981_v45 = vcombine.low %v26_v33, %v30_v34 }
  0x6a   :  { %1675 = vmatpush1.bf16.msra.mxu0 %v2167_v38  ;;  %1757 = vmatpush1.bf16.msra.mxu1 %v2169_v39  ;;  %v1982_v38 = vcombine.high %v26_v33, %v30_v34  ;;  %v33_v39 = vld [vmem:[%s3104_s1 + $0x90] sm:$0xff] }
  0x6b   :  { %1676 = vmatprep.subr.bf16.mxu0 %v2176_v40  ;;  %1758 = vmatprep.subr.bf16.mxu1 %v2178_v41  ;;  %v37_v40 = vld [vmem:[%s3104_s1 + $0xb0] sm:$0xff]  ;;  %v34_v41 = vld [vmem:[%s3104_s1 + $0x98] sm:$0xff] }
  0x6c   :  { %v1988_v46 = vcombine.high %v33_v39, %v37_v40  ;;  %v1987_v52 = vcombine.low %v33_v39, %v37_v40  ;;  %v1989_v54 = vcombine.low %v34_v41, %v38_v42 }
  0x6e   :  { %1677 = vmatpush1.bf16.msra.mxu0 %v2175_v47  ;;  %1759 = vmatpush1.bf16.msra.mxu1 %v2177_v48  ;;  %v1990_v47 = vcombine.high %v34_v41, %v38_v42  ;;  %v41_v48 = vld [vmem:[%s3104_s1 + $0xd0] sm:$0xff] }
  0x6f   :  { %1678 = vmatprep.subr.bf16.mxu0 %v2184_v49  ;;  %1760 = vmatprep.subr.bf16.mxu1 %v2186_v50  ;;  %v45_v49 = vld [vmem:[%s3104_s1 + $0xf0] sm:$0xff]  ;;  %v42_v50 = vld [vmem:[%s3104_s1 + $0xd8] sm:$0xff] }
  0x70   :  { %v1996_v55 = vcombine.high %v41_v48, %v45_v49  ;;  %v1995_v61 = vcombine.low %v41_v48, %v45_v49  ;;  %v1997_v62 = vcombine.low %v42_v50, %v46_v51 }
  0x72   :  { %1679 = vmatpush1.bf16.msra.mxu0 %v2183_v56  ;;  %1761 = vmatpush1.bf16.msra.mxu1 %v2185_v57  ;;  %v1998_v56 = vcombine.high %v42_v50, %v46_v51  ;;  %v49_v57 = vld [vmem:[%s3104_s1 + $0x110] sm:$0xff] }
  0x73   :  { %1680 = vmatprep.subr.bf16.mxu0 %v2192_v58  ;;  %1762 = vmatprep.subr.bf16.mxu1 %v2194_v60  ;;  %v53_v58 = vld [vmem:[%s3104_s1 + $0x130] sm:$0xff]  ;;  %v54_v60 = vld [vmem:[%s3104_s1 + $0x138] sm:$0xff] }
  0x74   :  { %v2004_v0 = vcombine.high %v49_v57, %v53_v58  ;;  %v2003_v7 = vcombine.low %v49_v57, %v53_v58 }
  0x76   :  { %1681 = vmatpush1.bf16.msra.mxu0 %v2191_v2  ;;  %1763 = vmatpush1.bf16.msra.mxu1 %v2193_v4  ;;  %v57_v2 = vld [vmem:[%s3104_s1 + $0x150] sm:$0xff] }
  0x77   :  { %1682 = vmatprep.subr.bf16.mxu0 %v2200_v5  ;;  %1764 = vmatprep.subr.bf16.mxu1 %v2202_v6  ;;  %v61_v4 = vld [vmem:[%s3104_s1 + $0x170] sm:$0xff]  ;;  %v58_v5 = vld [vmem:[%s3104_s1 + $0x158] sm:$0xff] }
  0x78   :  { %v62_v6 = vld [vmem:[%s3104_s1 + $0x178] sm:$0xff]  ;;  %v2012_v9 = vcombine.high %v57_v2, %v61_v4  ;;  %v2011_v15 = vcombine.low %v57_v2, %v61_v4 }
  0x79   :  { %v2014_v10 = vcombine.high %v58_v5, %v62_v6  ;;  %v2013_v16 = vcombine.low %v58_v5, %v62_v6 }
  0x7a   :  { %1683 = vmatpush1.bf16.msra.mxu0 %v2199_v11  ;;  %1765 = vmatpush1.bf16.msra.mxu1 %v2201_v12  ;;  %v65_v11 = vld [vmem:[%s3104_s1 + $0x190] sm:$0xff] }
  0x7b   :  { %1684 = vmatprep.subr.bf16.mxu0 %v2208_v13  ;;  %1766 = vmatprep.subr.bf16.mxu1 %v2210_v14  ;;  %v69_v12 = vld [vmem:[%s3104_s1 + $0x1b0] sm:$0xff]  ;;  %v66_v13 = vld [vmem:[%s3104_s1 + $0x198] sm:$0xff] }
  0x7c   :  { %v70_v14 = vld [vmem:[%s3104_s1 + $0x1b8] sm:$0xff]  ;;  %v2020_v17 = vcombine.high %v65_v11, %v69_v12  ;;  %v2019_v23 = vcombine.low %v65_v11, %v69_v12 }
  0x7d   :  { %v2022_v18 = vcombine.high %v66_v13, %v70_v14  ;;  %v2021_v24 = vcombine.low %v66_v13, %v70_v14 }
  0x7e   :  { %1685 = vmatpush1.bf16.msra.mxu0 %v2207_v19  ;;  %1767 = vmatpush1.bf16.msra.mxu1 %v2209_v20  ;;  %v73_v19 = vld [vmem:[%s3104_s1 + $0x1d0] sm:$0xff] }
  0x7f   :  { %1686 = vmatprep.subr.bf16.mxu0 %v2216_v59  ;;  %1768 = vmatprep.subr.bf16.mxu1 %v2218_v21  ;;  %v77_v20 = vld [vmem:[%s3104_s1 + $0x1f0] sm:$0xff]  ;;  %v74_v59 = vld [vmem:[%s3104_s1 + $0x1d8] sm:$0xff] }
  0x80   :  { %v78_v21 = vld [vmem:[%s3104_s1 + $0x1f8] sm:$0xff]  ;;  %v2028_v25 = vcombine.high %v73_v19, %v77_v20  ;;  %v2027_v31 = vcombine.low %v73_v19, %v77_v20 }
  0x81   :  { %v2030_v26 = vcombine.high %v74_v59, %v78_v21  ;;  %v2029_v32 = vcombine.low %v74_v59, %v78_v21 }
  0x82   :  { %1687 = vmatpush1.bf16.msra.mxu0 %v2215_v27  ;;  %1769 = vmatpush1.bf16.msra.mxu1 %v2217_v28  ;;  %v81_v27 = vld [vmem:[%s3104_s1 + $0x210] sm:$0xff] }
  0x83   :  { %1779 = vmatprep.subr.bf16.mxu0 %v1972_v53  ;;  %1861 = vmatprep.subr.bf16.mxu1 %v1974_v29  ;;  %v85_v28 = vld [vmem:[%s3104_s1 + $0x230] sm:$0xff]  ;;  %v82_v53 = vld [vmem:[%s3104_s1 + $0x218] sm:$0xff] }
  0x84   :  { %v86_v29 = vld [vmem:[%s3104_s1 + $0x238] sm:$0xff]  ;;  %v2036_v33 = vcombine.high %v81_v27, %v85_v28  ;;  %v2035_v39 = vcombine.low %v81_v27, %v85_v28 }
  0x85   :  { %1689 = vmatmul.mubr.bf16.vlgmr.msra.gmra.mrb[0].mxu0 %v2503_v22  ;;  %1771 = vmatmul.mubr.bf16.vlgmr.msra.gmra.mrb[0].mxu1 %v2503_v22  ;;  %v2038_v34 = vcombine.high %v82_v53, %v86_v29  ;;  %v2037_v40 = vcombine.low %v82_v53, %v86_v29 }
  0x86   :  { %1780 = vmatpush1.bf16.msra.mxu0 %v1971_v35  ;;  %1862 = vmatpush1.bf16.msra.mxu1 %v1973_v36  ;;  %v89_v35 = vld [vmem:[%s3104_s1 + $0x250] sm:$0xff] }
  0x87   :  { %1781 = vmatprep.subr.bf16.mxu0 %v1980_v37  ;;  %1863 = vmatprep.subr.bf16.mxu1 %v1982_v38  ;;  %v93_v36 = vld [vmem:[%s3104_s1 + $0x270] sm:$0xff]  ;;  %v90_v37 = vld [vmem:[%s3104_s1 + $0x258] sm:$0xff] }
  0x88   :  { %1811 = vmatprep.mubr.bf16.mxu0 %v2382_v3  ;;  %1893 = vmatprep.mubr.bf16.mxu1 %v2382_v3  ;;  %v50_v3 = vld [vmem:[%s3104_s1 + $0x118] sm:$0xff]  ;;  %v2044_v41 = vcombine.high %v89_v35, %v93_v36  ;;  %v2043_v48 = vcombine.low %v89_v35, %v93_v36 }
  0x89   :  { %v2006_v1 = vcombine.high %v50_v3, %v54_v60  ;;  %v2005_v8 = vcombine.low %v50_v3, %v54_v60  ;;  %v94_v38 = vld [vmem:[%s3104_s1 + $0x278] sm:$0xff] }
  0x8a   :  { %1782 = vmatpush1.bf16.msra.mxu0 %v1979_v44  ;;  %1864 = vmatpush1.bf16.msra.mxu1 %v1981_v45  ;;  %v2046_v42 = vcombine.high %v90_v37, %v94_v38  ;;  %v97_v44 = vld [vmem:[%s3104_s1 + $0x290] sm:$0xff]  ;;  %v2045_v49 = vcombine.low %v90_v37, %v94_v38 }
  0x8b   :  { %1783 = vmatprep.subr.bf16.mxu0 %v1988_v46  ;;  %1865 = vmatprep.subr.bf16.mxu1 %v1990_v47  ;;  %v101_v45 = vld [vmem:[%s3104_s1 + $0x2b0] sm:$0xff]  ;;  %v98_v46 = vld [vmem:[%s3104_s1 + $0x298] sm:$0xff] }
  0x8c   :  { %v102_v47 = vld [vmem:[%s3104_s1 + $0x2b8] sm:$0xff]  ;;  %v2052_v50 = vcombine.high %v97_v44, %v101_v45  ;;  %v2051_v57 = vcombine.low %v97_v44, %v101_v45 }
  0x8d   :  { %v2054_v51 = vcombine.high %v98_v46, %v102_v47  ;;  %v2053_v58 = vcombine.low %v98_v46, %v102_v47 }
  0x8e   :  { %1784 = vmatpush1.bf16.msra.mxu0 %v1987_v52  ;;  %1866 = vmatpush1.bf16.msra.mxu1 %v1989_v54  ;;  %v105_v52 = vld [vmem:[%s3104_s1 + $0x2d0] sm:$0xff] }
  0x8f   :  { %1785 = vmatprep.subr.bf16.mxu0 %v1996_v55  ;;  %1867 = vmatprep.subr.bf16.mxu1 %v1998_v56  ;;  %v109_v54 = vld [vmem:[%s3104_s1 + $0x2f0] sm:$0xff]  ;;  %v106_v55 = vld [vmem:[%s3104_s1 + $0x2d8] sm:$0xff] }
  0x90   :  { %v110_v56 = vld [vmem:[%s3104_s1 + $0x2f8] sm:$0xff]  ;;  %v2060_v3 = vcombine.high %v105_v52, %v109_v54  ;;  %v2059_v2 = vcombine.low %v105_v52, %v109_v54 }
  0x91   :  { %v2062_v60 = vcombine.high %v106_v55, %v110_v56  ;;  %v2061_v4 = vcombine.low %v106_v55, %v110_v56 }
  0x92   :  { %1786 = vmatpush1.bf16.msra.mxu0 %v1995_v61  ;;  %1868 = vmatpush1.bf16.msra.mxu1 %v1997_v62  ;;  %v113_v61 = vld [vmem:[%s3104_s1 + $0x310] sm:$0xff] }
  0x93   :  { %1787 = vmatprep.subr.bf16.mxu0 %v2004_v0  ;;  %1869 = vmatprep.subr.bf16.mxu1 %v2006_v1  ;;  %v117_v62 = vld [vmem:[%s3104_s1 + $0x330] sm:$0xff]  ;;  %v114_v0 = vld [vmem:[%s3104_s1 + $0x318] sm:$0xff] }
  0x94   :  { %v118_v1 = vld [vmem:[%s3104_s1 + $0x338] sm:$0xff]  ;;  %v2068_v5 = vcombine.high %v113_v61, %v117_v62  ;;  %v2067_v11 = vcombine.low %v113_v61, %v117_v62 }
  0x95   :  { %v2070_v6 = vcombine.high %v114_v0, %v118_v1  ;;  %v2069_v12 = vcombine.low %v114_v0, %v118_v1  ;;  %v177_v1 = vld [vmem:[%s3104_s1 + $0x510] sm:$0xff] }
  0x96   :  { %1788 = vmatpush1.bf16.msra.mxu0 %v2003_v7  ;;  %1870 = vmatpush1.bf16.msra.mxu1 %v2005_v8  ;;  %v121_v7 = vld [vmem:[%s3104_s1 + $0x350] sm:$0xff] }
  0x97   :  { %1789 = vmatprep.subr.bf16.mxu0 %v2012_v9  ;;  %1871 = vmatprep.subr.bf16.mxu1 %v2014_v10  ;;  %v125_v8 = vld [vmem:[%s3104_s1 + $0x370] sm:$0xff]  ;;  %v122_v9 = vld [vmem:[%s3104_s1 + $0x358] sm:$0xff] }
  0x98   :  { %v126_v10 = vld [vmem:[%s3104_s1 + $0x378] sm:$0xff]  ;;  %v2076_v13 = vcombine.high %v121_v7, %v125_v8  ;;  %v2075_v19 = vcombine.low %v121_v7, %v125_v8 }
  0x99   :  { %v2078_v14 = vcombine.high %v122_v9, %v126_v10  ;;  %v2077_v20 = vcombine.low %v122_v9, %v126_v10  ;;  %v185_v9 = vld [vmem:[%s3104_s1 + $0x550] sm:$0xff] }
  0x9a   :  { %1790 = vmatpush1.bf16.msra.mxu0 %v2011_v15  ;;  %1872 = vmatpush1.bf16.msra.mxu1 %v2013_v16  ;;  %v129_v15 = vld [vmem:[%s3104_s1 + $0x390] sm:$0xff] }
  0x9b   :  { %1791 = vmatprep.subr.bf16.mxu0 %v2020_v17  ;;  %1873 = vmatprep.subr.bf16.mxu1 %v2022_v18  ;;  %v133_v16 = vld [vmem:[%s3104_s1 + $0x3b0] sm:$0xff]  ;;  %v130_v17 = vld [vmem:[%s3104_s1 + $0x398] sm:$0xff] }
  0x9c   :  { %v134_v18 = vld [vmem:[%s3104_s1 + $0x3b8] sm:$0xff]  ;;  %v2084_v59 = vcombine.high %v129_v15, %v133_v16  ;;  %v2083_v27 = vcombine.low %v129_v15, %v133_v16  ;;  %v189_v10 = vld [vmem:[%s3104_s1 + $0x570] sm:$0xff] }
  0x9d   :  { %v2086_v21 = vcombine.high %v130_v17, %v134_v18  ;;  %v2085_v28 = vcombine.low %v130_v17, %v134_v18  ;;  %v2140_v15 = vcombine.high %v185_v9, %v189_v10  ;;  %v193_v17 = vld [vmem:[%s3104_s1 + $0x590] sm:$0xff] }
  0x9e   :  { %1792 = vmatpush1.bf16.msra.mxu0 %v2019_v23  ;;  %1874 = vmatpush1.bf16.msra.mxu1 %v2021_v24  ;;  %v137_v23 = vld [vmem:[%s3104_s1 + $0x3d0] sm:$0xff] }
  0x9f   :  { %1793 = vmatprep.subr.bf16.mxu0 %v2028_v25  ;;  %1875 = vmatprep.subr.bf16.mxu1 %v2030_v26  ;;  %v141_v24 = vld [vmem:[%s3104_s1 + $0x3f0] sm:$0xff]  ;;  %v138_v25 = vld [vmem:[%s3104_s1 + $0x3d8] sm:$0xff] }
  0xa0   :  { %v142_v26 = vld [vmem:[%s3104_s1 + $0x3f8] sm:$0xff]  ;;  %v2092_v53 = vcombine.high %v137_v23, %v141_v24  ;;  %v2091_v35 = vcombine.low %v137_v23, %v141_v24  ;;  %v197_v18 = vld [vmem:[%s3104_s1 + $0x5b0] sm:$0xff] }
  0xa1   :  { %v2094_v29 = vcombine.high %v138_v25, %v142_v26  ;;  %v2093_v36 = vcombine.low %v138_v25, %v142_v26  ;;  %v2148_v23 = vcombine.high %v193_v17, %v197_v18  ;;  %v201_v25 = vld [vmem:[%s3104_s1 + $0x5d0] sm:$0xff] }
  0xa2   :  { %1794 = vmatpush1.bf16.msra.mxu0 %v2027_v31  ;;  %1876 = vmatpush1.bf16.msra.mxu1 %v2029_v32  ;;  %v145_v31 = vld [vmem:[%s3104_s1 + $0x410] sm:$0xff] }
  0xa3   :  { %1795 = vmatprep.subr.bf16.mxu0 %v2036_v33  ;;  %1877 = vmatprep.subr.bf16.mxu1 %v2038_v34  ;;  %v149_v32 = vld [vmem:[%s3104_s1 + $0x430] sm:$0xff]  ;;  %v146_v33 = vld [vmem:[%s3104_s1 + $0x418] sm:$0xff] }
  0xa4   :  { %v150_v34 = vld [vmem:[%s3104_s1 + $0x438] sm:$0xff]  ;;  %v2100_v37 = vcombine.high %v145_v31, %v149_v32  ;;  %v2099_v44 = vcombine.low %v145_v31, %v149_v32  ;;  %v205_v26 = vld [vmem:[%s3104_s1 + $0x5f0] sm:$0xff] }
  0xa5   :  { %v2102_v38 = vcombine.high %v146_v33, %v150_v34  ;;  %v2101_v45 = vcombine.low %v146_v33, %v150_v34  ;;  %v2156_v31 = vcombine.high %v201_v25, %v205_v26  ;;  %v209_v33 = vld [vmem:[%s3104_s1 + $0x610] sm:$0xff] }
  0xa6   :  { %1796 = vmatpush1.bf16.msra.mxu0 %v2035_v39  ;;  %1878 = vmatpush1.bf16.msra.mxu1 %v2037_v40  ;;  %v153_v39 = vld [vmem:[%s3104_s1 + $0x450] sm:$0xff] }
  0xa7   :  { %1797 = vmatprep.subr.bf16.mxu0 %v2044_v41  ;;  %1879 = vmatprep.subr.bf16.mxu1 %v2046_v42  ;;  %v157_v40 = vld [vmem:[%s3104_s1 + $0x470] sm:$0xff]  ;;  %v154_v41 = vld [vmem:[%s3104_s1 + $0x458] sm:$0xff] }
  0xa8   :  { %v158_v42 = vld [vmem:[%s3104_s1 + $0x478] sm:$0xff]  ;;  %v2108_v46 = vcombine.high %v153_v39, %v157_v40  ;;  %v2107_v52 = vcombine.low %v153_v39, %v157_v40  ;;  %v213_v34 = vld [vmem:[%s3104_s1 + $0x630] sm:$0xff] }
  0xa9   :  { %v2110_v47 = vcombine.high %v154_v41, %v158_v42  ;;  %v2109_v54 = vcombine.low %v154_v41, %v158_v42  ;;  %v2164_v39 = vcombine.high %v209_v33, %v213_v34  ;;  %v217_v41 = vld [vmem:[%s3104_s1 + $0x650] sm:$0xff] }
  0xaa   :  { %1798 = vmatpush1.bf16.msra.mxu0 %v2043_v48  ;;  %1880 = vmatpush1.bf16.msra.mxu1 %v2045_v49  ;;  %v161_v48 = vld [vmem:[%s3104_s1 + $0x490] sm:$0xff] }
  0xab   :  { %1799 = vmatprep.subr.bf16.mxu0 %v2052_v50  ;;  %1881 = vmatprep.subr.bf16.mxu1 %v2054_v51  ;;  %v165_v49 = vld [vmem:[%s3104_s1 + $0x4b0] sm:$0xff]  ;;  %v162_v50 = vld [vmem:[%s3104_s1 + $0x498] sm:$0xff] }
  0xac   :  { %v166_v51 = vld [vmem:[%s3104_s1 + $0x4b8] sm:$0xff]  ;;  %v2116_v55 = vcombine.high %v161_v48, %v165_v49  ;;  %v221_v42 = vld [vmem:[%s3104_s1 + $0x670] sm:$0xff] }
  0xad   :  { %v2118_v56 = vcombine.high %v162_v50, %v166_v51  ;;  %v2117_v61 = vcombine.low %v162_v50, %v166_v51  ;;  %v225_v50 = vld [vmem:[%s3104_s1 + $0x690] sm:$0xff] }
  0xae   :  { %1800 = vmatpush1.bf16.msra.mxu0 %v2051_v57  ;;  %1882 = vmatpush1.bf16.msra.mxu1 %v2053_v58  ;;  %v169_v57 = vld [vmem:[%s3104_s1 + $0x4d0] sm:$0xff] }
  0xaf   :  { %1801 = vmatprep.subr.bf16.mxu0 %v2060_v3  ;;  %1883 = vmatprep.subr.bf16.mxu1 %v2062_v60  ;;  %v173_v58 = vld [vmem:[%s3104_s1 + $0x4f0] sm:$0xff]  ;;  %v174_v3 = vld [vmem:[%s3104_s1 + $0x4f8] sm:$0xff]  ;;  %v2115_v60 = vcombine.low %v161_v48, %v165_v49  ;;  %v2172_v48 = vcombine.high %v217_v41, %v221_v42 }
  0xb0   :  { %v2124_v62 = vcombine.high %v169_v57, %v173_v58  ;;  %v229_v51 = vld [vmem:[%s3104_s1 + $0x6b0] sm:$0xff] }
  0xb2   :  { %1802 = vmatpush1.bf16.msra.mxu0 %v2059_v2  ;;  %1884 = vmatpush1.bf16.msra.mxu1 %v2061_v4  ;;  %v181_v2 = vld [vmem:[%s3104_s1 + $0x530] sm:$0xff]  ;;  %v182_v4 = vld [vmem:[%s3104_s1 + $0x538] sm:$0xff] }
  0xb3   :  { %1803 = vmatprep.subr.bf16.mxu0 %v2068_v5  ;;  %1885 = vmatprep.subr.bf16.mxu1 %v2070_v6  ;;  %v2123_v5 = vcombine.low %v169_v57, %v173_v58  ;;  %v2132_v7 = vcombine.high %v177_v1, %v181_v2  ;;  %v2180_v57 = vcombine.high %v225_v50, %v229_v51 }
  0xb6   :  { %1804 = vmatpush1.bf16.msra.mxu0 %v2067_v11  ;;  %1886 = vmatpush1.bf16.msra.mxu1 %v2069_v12  ;;  %v186_v11 = vld [vmem:[%s3104_s1 + $0x558] sm:$0xff] }
  0xb7   :  { %1805 = vmatprep.subr.bf16.mxu0 %v2076_v13  ;;  %1887 = vmatprep.subr.bf16.mxu1 %v2078_v14  ;;  %v190_v12 = vld [vmem:[%s3104_s1 + $0x578] sm:$0xff]  ;;  %v2131_v13 = vcombine.low %v177_v1, %v181_v2 }
  0xb8   :  { %v2142_v16 = vcombine.high %v186_v11, %v190_v12 }
  0xba   :  { %1806 = vmatpush1.bf16.msra.mxu0 %v2075_v19  ;;  %1888 = vmatpush1.bf16.msra.mxu1 %v2077_v20  ;;  %v194_v19 = vld [vmem:[%s3104_s1 + $0x598] sm:$0xff] }
  0xbb   :  { %1807 = vmatprep.subr.bf16.mxu0 %v2084_v59  ;;  %1889 = vmatprep.subr.bf16.mxu1 %v2086_v21  ;;  %v198_v20 = vld [vmem:[%s3104_s1 + $0x5b8] sm:$0xff]  ;;  %v2139_v59 = vcombine.low %v185_v9, %v189_v10  ;;  %v2141_v21 = vcombine.low %v186_v11, %v190_v12  ;;  %v249_v11 = vld [vmem:[%s3104_s1 + $0x750] sm:$0xff] }
  0xbc   :  { %v2150_v24 = vcombine.high %v194_v19, %v198_v20  ;;  %v253_v12 = vld [vmem:[%s3104_s1 + $0x770] sm:$0xff] }
  0xbe   :  { %1808 = vmatpush1.bf16.msra.mxu0 %v2083_v27  ;;  %1890 = vmatpush1.bf16.msra.mxu1 %v2085_v28  ;;  %v202_v27 = vld [vmem:[%s3104_s1 + $0x5d8] sm:$0xff] }
  0xbf   :  { %1809 = vmatprep.subr.bf16.mxu0 %v2092_v53  ;;  %1891 = vmatprep.subr.bf16.mxu1 %v2094_v29  ;;  %v206_v28 = vld [vmem:[%s3104_s1 + $0x5f8] sm:$0xff]  ;;  %v2147_v53 = vcombine.low %v193_v17, %v197_v18  ;;  %v2149_v29 = vcombine.low %v194_v19, %v198_v20  ;;  %v2204_v17 = vcombine.high %v249_v11, %v253_v12  ;;  %v257_v19 = vld [vmem:[%s3104_s1 + $0x790] sm:$0xff] }
  0xc0   :  { %v2158_v32 = vcombine.high %v202_v27, %v206_v28  ;;  %v261_v20 = vld [vmem:[%s3104_s1 + $0x7b0] sm:$0xff] }
  0xc2   :  { %1810 = vmatpush1.bf16.msra.mxu0 %v2091_v35  ;;  %1892 = vmatpush1.bf16.msra.mxu1 %v2093_v36  ;;  %v210_v35 = vld [vmem:[%s3104_s1 + $0x618] sm:$0xff] }
  0xc3   :  { %1820 = vmatprep.subr.bf16.mxu0 %v2100_v37  ;;  %1902 = vmatprep.subr.bf16.mxu1 %v2102_v38  ;;  %v214_v36 = vld [vmem:[%s3104_s1 + $0x638] sm:$0xff]  ;;  %v2155_v37 = vcombine.low %v201_v25, %v205_v26  ;;  %v2157_v38 = vcombine.low %v202_v27, %v206_v28  ;;  %v2212_v25 = vcombine.high %v257_v19, %v261_v20  ;;  %v265_v27 = vld [vmem:[%s3104_s1 + $0x7d0] sm:$0xff] }
  0xc4   :  { %v2166_v40 = vcombine.high %v210_v35, %v214_v36  ;;  %v269_v28 = vld [vmem:[%s3104_s1 + $0x7f0] sm:$0xff] }
  0xc5   :  { %1812 = vmatmul.mubr.bf16.vlgmr.msra.gmra.mrb[4].mxu0 %v2372_v63  ;;  %1894 = vmatmul.mubr.bf16.vlgmr.msra.gmra.mrb[4].mxu1 %v2372_v63  ;;  %v170_v63 = vld [vmem:[%s3104_s1 + $0x4d8] sm:$0xff] }
  0xc6   :  { %1821 = vmatpush1.bf16.msra.mxu0 %v2099_v44  ;;  %1903 = vmatpush1.bf16.msra.mxu1 %v2101_v45  ;;  %v2126_v0 = vcombine.high %v170_v63, %v174_v3  ;;  %v2125_v6 = vcombine.low %v170_v63, %v174_v3  ;;  %v218_v44 = vld [vmem:[%s3104_s1 + $0x658] sm:$0xff]  ;;  %v233_v63 = vld [vmem:[%s3104_s1 + $0x6d0] sm:$0xff] }
  0xc7   :  { %1822 = vmatprep.subr.bf16.mxu0 %v2108_v46  ;;  %1904 = vmatprep.subr.bf16.mxu1 %v2110_v47  ;;  %v222_v45 = vld [vmem:[%s3104_s1 + $0x678] sm:$0xff]  ;;  %v2163_v46 = vcombine.low %v209_v33, %v213_v34  ;;  %v2165_v47 = vcombine.low %v210_v35, %v214_v36  ;;  %v237_v3 = vld [vmem:[%s3104_s1 + $0x6f0] sm:$0xff]  ;;  %v2220_v33 = vcombine.high %v265_v27, %v269_v28 }
  0xc8   :  { %1852 = vmatprep.mubr.bf16.mxu0 %v2519_v30  ;;  %1934 = vmatprep.mubr.bf16.mxu1 %v2519_v30  ;;  %v178_v30 = vld [vmem:[%s3104_s1 + $0x518] sm:$0xff]  ;;  %v2174_v49 = vcombine.high %v218_v44, %v222_v45  ;;  %v2188_v1 = vcombine.high %v233_v63, %v237_v3  ;;  %v2219_v35 = vcombine.low %v265_v27, %v269_v28 }
  0xc9   :  { %v2134_v8 = vcombine.high %v178_v30, %v182_v4  ;;  %v2133_v14 = vcombine.low %v178_v30, %v182_v4  ;;  %v241_v30 = vld [vmem:[%s3104_s1 + $0x710] sm:$0xff] }
  0xca   :  { %1823 = vmatpush1.bf16.msra.mxu0 %v2107_v52  ;;  %1905 = vmatpush1.bf16.msra.mxu1 %v2109_v54  ;;  %v226_v52 = vld [vmem:[%s3104_s1 + $0x698] sm:$0xff]  ;;  %v245_v4 = vld [vmem:[%s3104_s1 + $0x730] sm:$0xff] }
  0xcb   :  { %1824 = vmatprep.subr.bf16.mxu0 %v2116_v55  ;;  %1906 = vmatprep.subr.bf16.mxu1 %v2118_v56  ;;  %v230_v54 = vld [vmem:[%s3104_s1 + $0x6b8] sm:$0xff]  ;;  %v2171_v55 = vcombine.low %v217_v41, %v221_v42  ;;  %v2173_v56 = vcombine.low %v218_v44, %v222_v45  ;;  %v2196_v9 = vcombine.high %v241_v30, %v245_v4  ;;  %v287_v41 = vsub.s32 3, %v2336_v43 }
  0xcc   :  { %v2182_v58 = vcombine.high %v226_v52, %v230_v54 }
  0xce   :  { %1825 = vmatpush1.bf16.msra.mxu0 %v2115_v60  ;;  %1907 = vmatpush1.bf16.msra.mxu1 %v2117_v61  ;;  %v234_v60 = vld [vmem:[%s3104_s1 + $0x6d8] sm:$0xff] }
  0xcf   :  { %1826 = vmatprep.subr.bf16.mxu0 %v2124_v62  ;;  %1908 = vmatprep.subr.bf16.mxu1 %v2126_v0  ;;  %v238_v61 = vld [vmem:[%s3104_s1 + $0x6f8] sm:$0xff]  ;;  %v2179_v62 = vcombine.low %v225_v50, %v229_v51  ;;  %v2181_v0 = vcombine.low %v226_v52, %v230_v54 }
  0xd0   :  { %v2190_v2 = vcombine.high %v234_v60, %v238_v61 }
  0xd2   :  { %1827 = vmatpush1.bf16.msra.mxu0 %v2123_v5  ;;  %1909 = vmatpush1.bf16.msra.mxu1 %v2125_v6  ;;  %v242_v5 = vld [vmem:[%s3104_s1 + $0x718] sm:$0xff] }
  0xd3   :  { %1828 = vmatprep.subr.bf16.mxu0 %v2132_v7  ;;  %1910 = vmatprep.subr.bf16.mxu1 %v2134_v8  ;;  %v246_v6 = vld [vmem:[%s3104_s1 + $0x738] sm:$0xff]  ;;  %v2187_v7 = vcombine.low %v233_v63, %v237_v3  ;;  %v2189_v8 = vcombine.low %v234_v60, %v238_v61  ;;  %v291_v60 = vsub.s32 4, %v2336_v43  ;;  %v299_v61 = vsub.s32 6, %v2336_v43 }
  0xd4   :  { %v2198_v10 = vcombine.high %v242_v5, %v246_v6 }
  0xd6   :  { %1829 = vmatpush1.bf16.msra.mxu0 %v2131_v13  ;;  %1911 = vmatpush1.bf16.msra.mxu1 %v2133_v14  ;;  %v250_v13 = vld [vmem:[%s3104_s1 + $0x758] sm:$0xff] }
  0xd7   :  { %1830 = vmatprep.subr.bf16.mxu0 %v2140_v15  ;;  %1912 = vmatprep.subr.bf16.mxu1 %v2142_v16  ;;  %v254_v14 = vld [vmem:[%s3104_s1 + $0x778] sm:$0xff]  ;;  %v2195_v15 = vcombine.low %v241_v30, %v245_v4  ;;  %v2197_v16 = vcombine.low %v242_v5, %v246_v6 }
  0xd8   :  { %v2206_v18 = vcombine.high %v250_v13, %v254_v14 }
  0xda   :  { %1831 = vmatpush1.bf16.msra.mxu0 %v2139_v59  ;;  %1913 = vmatpush1.bf16.msra.mxu1 %v2141_v21  ;;  %v258_v59 = vld [vmem:[%s3104_s1 + $0x798] sm:$0xff] }
  0xdb   :  { %1832 = vmatprep.subr.bf16.mxu0 %v2148_v23  ;;  %1914 = vmatprep.subr.bf16.mxu1 %v2150_v24  ;;  %v262_v21 = vld [vmem:[%s3104_s1 + $0x7b8] sm:$0xff]  ;;  %v2203_v23 = vcombine.low %v249_v11, %v253_v12  ;;  %v2205_v24 = vcombine.low %v250_v13, %v254_v14 }
  0xdc   :  { %v2214_v26 = vcombine.high %v258_v59, %v262_v21 }
  0xde   :  { %1833 = vmatpush1.bf16.msra.mxu0 %v2147_v53  ;;  %1915 = vmatpush1.bf16.msra.mxu1 %v2149_v29  ;;  %v266_v53 = vld [vmem:[%s3104_s1 + $0x7d8] sm:$0xff] }
  0xdf   :  { %1834 = vmatprep.subr.bf16.mxu0 %v2156_v31  ;;  %1916 = vmatprep.subr.bf16.mxu1 %v2158_v32  ;;  %v270_v29 = vld [vmem:[%s3104_s1 + $0x7f8] sm:$0xff]  ;;  %v2211_v31 = vcombine.low %v257_v19, %v261_v20  ;;  %v2213_v32 = vcombine.low %v258_v59, %v262_v21 }
  0xe0   :  { %v2222_v34 = vcombine.high %v266_v53, %v270_v29  ;;  %v2221_v36 = vcombine.low %v266_v53, %v270_v29 }
  0xe2   :  { %1835 = vmatpush1.bf16.msra.mxu0 %v2155_v37  ;;  %1917 = vmatpush1.bf16.msra.mxu1 %v2157_v38  ;;  %v275_v37 = vsub.s32 0, %v2336_v43  ;;  %v271_v38 = vld [vmem:[%s3106_s2] sm:$0xff] }
  0xe3   :  { %1836 = vmatprep.subr.bf16.mxu0 %v2164_v39  ;;  %1918 = vmatprep.subr.bf16.mxu1 %v2166_v40  ;;  %v283_v39 = vsub.s32 2, %v2336_v43  ;;  %v279_v40 = vsub.s32 1, %v2336_v43 }
  0xe4   :  { %v276_v42 = vrot.slane %v271_v38, %v275_v37 }
  0xe5   :  { %v284_v44 = vrot.slane %v271_v38, %v283_v39  ;;  %v280_v45 = vrot.slane %v271_v38, %v279_v40 }
  0xe6   :  { %1837 = vmatpush1.bf16.msra.mxu0 %v2163_v46  ;;  %1919 = vmatpush1.bf16.msra.mxu1 %v2165_v47  ;;  %v288_v46 = vrot.slane %v271_v38, %v287_v41 }
  0xe7   :  { %1838 = vmatprep.subr.bf16.mxu0 %v2172_v48  ;;  %1920 = vmatprep.subr.bf16.mxu1 %v2174_v49 }
  0xea   :  { %1839 = vmatpush1.bf16.msra.mxu0 %v2171_v55  ;;  %1921 = vmatpush1.bf16.msra.mxu1 %v2173_v56 }
  0xeb   :  { %1840 = vmatprep.subr.bf16.mxu0 %v2180_v57  ;;  %1922 = vmatprep.subr.bf16.mxu1 %v2182_v58 }
  0xee   :  { %1841 = vmatpush1.bf16.msra.mxu0 %v2179_v62  ;;  %1923 = vmatpush1.bf16.msra.mxu1 %v2181_v0  ;;  %v295_v62 = vsub.s32 5, %v2336_v43  ;;  %v303_v0 = vsub.s32 7, %v2336_v43 }
  0xef   :  { %1842 = vmatprep.subr.bf16.mxu0 %v2188_v1  ;;  %1924 = vmatprep.subr.bf16.mxu1 %v2190_v2  ;;  %v292_v1 = vrot.slane %v271_v38, %v291_v60  ;;  %v300_v2 = vrot.slane %v271_v38, %v299_v61 }
  0xf0   :  { %v296_v30 = vrot.slane %v271_v38, %v295_v62  ;;  %v304_v4 = vrot.slane %v271_v38, %v303_v0 }
  0xf2   :  { %1843 = vmatpush1.bf16.msra.mxu0 %v2187_v7  ;;  %1925 = vmatpush1.bf16.msra.mxu1 %v2189_v8 }
  0xf3   :  { %1844 = vmatprep.subr.bf16.mxu0 %v2196_v9  ;;  %1926 = vmatprep.subr.bf16.mxu1 %v2198_v10 }
  0xf6   :  { %1845 = vmatpush1.bf16.msra.mxu0 %v2195_v15  ;;  %1927 = vmatpush1.bf16.msra.mxu1 %v2197_v16 }
  0xf7   :  { %1846 = vmatprep.subr.bf16.mxu0 %v2204_v17  ;;  %1928 = vmatprep.subr.bf16.mxu1 %v2206_v18 }
  0xfa   :  { %1847 = vmatpush1.bf16.msra.mxu0 %v2203_v23  ;;  %1929 = vmatpush1.bf16.msra.mxu1 %v2205_v24 }
  0xfb   :  { %1848 = vmatprep.subr.bf16.mxu0 %v2212_v25  ;;  %1930 = vmatprep.subr.bf16.mxu1 %v2214_v26 }
  0xfe   :  { %1849 = vmatpush1.bf16.msra.mxu0 %v2211_v31  ;;  %1931 = vmatpush1.bf16.msra.mxu1 %v2213_v32 }
  0xff   :  { %1850 = vmatprep.subr.bf16.mxu0 %v2220_v33  ;;  %1932 = vmatprep.subr.bf16.mxu1 %v2222_v34 }
 0x102   :  { %1851 = vmatpush1.bf16.msra.mxu0 %v2219_v35  ;;  %1933 = vmatpush1.bf16.msra.mxu1 %v2221_v36 }
 0x105   :  { %1853 = vmatmul.mubr.bf16.vlgmr.msra.gmra.mrb[4].mxu0 %v2503_v22  ;;  %1935 = vmatmul.mubr.bf16.vlgmr.msra.gmra.mrb[4].mxu1 %v2503_v22 }
 0x158   :  { %v1690_v47 = vpop.f32.mrb[0].mxu0  ;;  %v1772_v49 = vpop.f32.mrb[0].mxu1 }
 0x159   :  { %v2223_v48 = vadd.f32 %v1690_v47, %v276_v42  ;;  %v1692_v22 = vpop.f32.mrb[1].mxu0  ;;  %v2225_v50 = vadd.f32 %v1772_v49, %v284_v44  ;;  %v1774_v52 = vpop.f32.mrb[1].mxu1 }
 0x15a   :  { %v2224_v51 = vadd.f32 %v1692_v22, %v280_v45  ;;  %v1694_v54 = vpop.f32.mrb[2].mxu0  ;;  %v2226_v55 = vadd.f32 %v1774_v52, %v288_v46  ;;  %v1776_v56 = vpop.f32.mrb[2].mxu1 }
 0x15b   :  { %v1695_v57 = vpop.f32.mrb[3].mxu0  ;;  %v1777_v63 = vpop.f32.mrb[3].mxu1 }
 0x15c   :  { %v1951_v58 = vcombine.low %v2223_v48, %v2224_v51  ;;  %v1952_v3 = vcombine.low %v2225_v50, %v2226_v55 }
 0x15e   :  { %1959 = vst [vmem:[%s3107_s3] sm:$0xff] %v1951_v58  ;;  %1960 = vst [vmem:[%s3107_s3 + $0x8] sm:$0xff] %v1952_v3 }
 0x1d8   :  { %v1854_v5 = vpop.f32.mrb[4].mxu0  ;;  %v1936_v7 = vpop.f32.mrb[4].mxu1 }
 0x1d9   :  { %v2227_v6 = vadd.f32 %v1854_v5, %v292_v1  ;;  %v1856_v8 = vpop.f32.mrb[5].mxu0  ;;  %v2229_v9 = vadd.f32 %v1936_v7, %v300_v2  ;;  %v1938_v11 = vpop.f32.mrb[5].mxu1 }
 0x1da   :  { %v2228_v10 = vadd.f32 %v1856_v8, %v296_v30  ;;  %v1858_v12 = vpop.f32.mrb[6].mxu0  ;;  %v2230_v13 = vadd.f32 %v1938_v11, %v304_v4  ;;  %v1940_v14 = vpop.f32.mrb[6].mxu1 }
 0x1db   :  { %v1859_v15 = vpop.f32.mrb[7].mxu0  ;;  %v1941_v17 = vpop.f32.mrb[7].mxu1 }
 0x1dc   :  { %v1953_v16 = vcombine.low %v2227_v6, %v2228_v10  ;;  %v1954_v18 = vcombine.low %v2229_v9, %v2230_v13 }
 0x1de   :  { %1961 = vst [vmem:[%s3107_s3 + $0x10] sm:$0xff] %v1953_v16  ;;  %1962 = vst [vmem:[%s3107_s3 + $0x18] sm:$0xff] %v1954_v18 }

// kernel: crnn_ser_forward.12
= control target key start
LH: loop header
LB: loop body
LE: loop exit
PB: predicated region body
PF: predicated region fallthrough
CT: control target
= control target key end

     0   :  { %s710_s9 = smov 0   ;;  %s838_s0 = inlined_call_operand.vmem [shape: f32[2,2,2,512], index: 0, kind: input, shape index: {}]   ;;  %s839_s1 = inlined_call_operand.vmem [shape: f32[2,128,512], index: 1, kind: input, shape index: {}]   ;;  %s840_s2 = inlined_call_operand.vmem [shape: f32[2,2,2,128], index: 2, kind: output, shape index: {}]  }
   0x1 LB: > { %s716_s10 = sadd.s32 4294967295, %s679_s9   ;;  %p528_p0 = scmp.ge.s32.totalorder %s679_s9, 1  ;;  %s679_s9 = sphi %s710_s9, %s12_s9  }
   0x2   : > { %p122_p1 = scmp.lt.s32.totalorder %s679_s9, 3 }
   0x4   : > { %p123_p2 = pnand %p528_p0, %p122_p1 }
   0x5   : > { %p149_p3 = scmp.lt.s32.totalorder (!%p123_p2), %s716_s10, 1  ;;  %v737_v0 = vmov (!%p123_p2), 0.0   ;;  %v739_v1 = vmov (!%p123_p2), 0.0   ;;  %s741_s24 = smov (!%p123_p2), 0  }
   0x6   : > { %126 = sbr.rel (%p123_p2) target bundleno = 323 (0x143), region = 28 }
   0xd   : > { %s150_s11 = scalar_select %p149_p3, %s716_s10, 1 }
   0xf   : > { %s543_s12 = sshll.u32 %s150_s11, 4  ;;  %s544_s13 = sshll.u32 %s150_s11, 9 }
  0x10   : > { %s725_s16 = scalar_lea.vmem %s838_s0, %s543_s12  ;;  %s730_s19 = scalar_lea.vmem %s839_s1, %s544_s13 }
  0x11   : > { %s545_s20 = sshll.u32 %s150_s11, 2 }
  0x12   : > { %s735_s23 = scalar_lea.vmem %s840_s2, %s545_s20 }
  0x13 LB: >> { %v180_v2 = vld [vmem:[%s730_s19 + $0x8] sm:$0xff]  ;;  %v182_v4 = vld [vmem:[%s730_s19 + $0x18] sm:$0xff]  ;;  %v179_v7 = vld [vmem:[%s730_s19] sm:$0xff]  ;;  %v693_v9 = vmov 0.0   ;;  %p172_p4 = scmp.eq.s32.totalorder %s716_s10, 0  ;;  %s173_s25 = ssub.s32 1, %s691_s24  ;;  %s691_s24 = sphi %s741_s24, %s169_s24   ;;  %v687_v1 = vphi %v739_v1, %v438_v1   ;;  %v683_v0 = vphi %v737_v0, %v436_v0  }
  0x14   : >> { %v184_v3 = vld [vmem:[%s730_s19 + $0x28] sm:$0xff]  ;;  %v186_v6 = vld [vmem:[%s730_s19 + $0x38] sm:$0xff]  ;;  %v183_v8 = vld [vmem:[%s730_s19 + $0x20] sm:$0xff]  ;;  %307 = vmatprep.mubr.f32.mxu0 %v693_v9  ;;  %378 = vmatprep.mubr.f32.mxu1 %v693_v9 }
  0x15   : >> { %v547_v5 = vpack.c.bf16 %v184_v3, %v180_v2  ;;  %v579_v10 = vpack.c.bf16 %v186_v6, %v182_v4  ;;  %v549_v11 = vpack.c.bf16 %v183_v8, %v179_v7  ;;  %v181_v12 = vld [vmem:[%s730_s19 + $0x10] sm:$0xff]  ;;  %v188_v14 = vld [vmem:[%s730_s19 + $0x48] sm:$0xff]  ;;  %v190_v17 = vld [vmem:[%s730_s19 + $0x58] sm:$0xff]  ;;  %s821_s26 = scalar_select %p172_p4, %s691_s24, %s173_s25 }
  0x16   : >> { %v185_v13 = vld [vmem:[%s730_s19 + $0x30] sm:$0xff]  ;;  %v192_v16 = vld [vmem:[%s730_s19 + $0x68] sm:$0xff]  ;;  %v194_v18 = vld [vmem:[%s730_s19 + $0x78] sm:$0xff]  ;;  %s169_s24 = sadd.s32 1, %s691_s24  }
  0x17   : >> { %548 = vmatprep.subr.bf16.mxu0 %v547_v5  ;;  %v581_v15 = vpack.c.bf16 %v185_v13, %v181_v12  ;;  %580 = vmatprep.subr.bf16.mxu1 %v579_v10  ;;  %v551_v19 = vpack.c.bf16 %v192_v16, %v188_v14  ;;  %v583_v20 = vpack.c.bf16 %v194_v18, %v190_v17  ;;  %v187_v21 = vld [vmem:[%s730_s19 + $0x40] sm:$0xff]  ;;  %v189_v23 = vld [vmem:[%s730_s19 + $0x50] sm:$0xff]  ;;  %v196_v26 = vld [vmem:[%s730_s19 + $0x88] sm:$0xff]  ;;  %s546_s27 = sshll.u32 %s821_s26, 3  ;;  %s540_s29 = sshll.u32 %s821_s26, 1 }
  0x18   : >> { %550 = vmatpush1.bf16.msra.mxu0 %v549_v11  ;;  %v191_v22 = vld [vmem:[%s730_s19 + $0x60] sm:$0xff]  ;;  %v193_v25 = vld [vmem:[%s730_s19 + $0x70] sm:$0xff]  ;;  %v200_v27 = vld [vmem:[%s730_s19 + $0xa8] sm:$0xff]  ;;  %s177_s28 = scalar_lea.vmem %s725_s16, %s546_s27  ;;  %s440_s30 = scalar_lea.vmem %s735_s23, %s540_s29 }
  0x19   : >> { %582 = vmatpush1.bf16.msra.mxu1 %v581_v15  ;;  %v553_v24 = vpack.c.bf16 %v191_v22, %v187_v21  ;;  %552 = vmatprep.subr.bf16.mxu0 %v551_v19  ;;  %v585_v28 = vpack.c.bf16 %v193_v25, %v189_v23  ;;  %v555_v29 = vpack.c.bf16 %v200_v27, %v196_v26  ;;  %v198_v30 = vld [vmem:[%s730_s19 + $0x98] sm:$0xff]  ;;  %v195_v32 = vld [vmem:[%s730_s19 + $0x80] sm:$0xff]  ;;  %v197_v35 = vld [vmem:[%s730_s19 + $0x90] sm:$0xff]  ;;  %p166_p5 = scmp.ge.s32.totalorder %s169_s24, 2  }
  0x1a   : >> { %584 = vmatprep.subr.bf16.mxu1 %v583_v20  ;;  %v202_v31 = vld [vmem:[%s730_s19 + $0xb8] sm:$0xff]  ;;  %v199_v34 = vld [vmem:[%s730_s19 + $0xa0] sm:$0xff]  ;;  %v201_v36 = vld [vmem:[%s730_s19 + $0xb0] sm:$0xff] }
  0x1b   : >> { %v587_v33 = vpack.c.bf16 %v202_v31, %v198_v30  ;;  %v557_v37 = vpack.c.bf16 %v199_v34, %v195_v32  ;;  %v204_v38 = vld [vmem:[%s730_s19 + $0xc8] sm:$0xff]  ;;  %v206_v40 = vld [vmem:[%s730_s19 + $0xd8] sm:$0xff]  ;;  %v589_v41 = vpack.c.bf16 %v201_v36, %v197_v35  ;;  %v203_v44 = vld [vmem:[%s730_s19 + $0xc0] sm:$0xff] }
  0x1c   : >> { %554 = vmatpush1.bf16.msra.mxu0 %v553_v24  ;;  %v208_v39 = vld [vmem:[%s730_s19 + $0xe8] sm:$0xff]  ;;  %v210_v43 = vld [vmem:[%s730_s19 + $0xf8] sm:$0xff]  ;;  %v207_v45 = vld [vmem:[%s730_s19 + $0xe0] sm:$0xff] }
  0x1d   : >> { %586 = vmatpush1.bf16.msra.mxu1 %v585_v28  ;;  %556 = vmatprep.subr.bf16.mxu0 %v555_v29  ;;  %v559_v42 = vpack.c.bf16 %v208_v39, %v204_v38  ;;  %v591_v46 = vpack.c.bf16 %v210_v43, %v206_v40  ;;  %v205_v47 = vld [vmem:[%s730_s19 + $0xd0] sm:$0xff]  ;;  %v212_v49 = vld [vmem:[%s730_s19 + $0x108] sm:$0xff]  ;;  %v214_v51 = vld [vmem:[%s730_s19 + $0x118] sm:$0xff]  ;;  %v561_v53 = vpack.c.bf16 %v207_v45, %v203_v44  ;;  %v394_v39 = vlaneseq }
  0x1e   : >> { %588 = vmatprep.subr.bf16.mxu1 %v587_v33  ;;  %v209_v48 = vld [vmem:[%s730_s19 + $0xf0] sm:$0xff]  ;;  %v216_v50 = vld [vmem:[%s730_s19 + $0x128] sm:$0xff]  ;;  %v218_v52 = vld [vmem:[%s730_s19 + $0x138] sm:$0xff] }
  0x1f   : >> { %v593_v54 = vpack.c.bf16 %v209_v48, %v205_v47  ;;  %v563_v55 = vpack.c.bf16 %v216_v50, %v212_v49  ;;  %v211_v56 = vld [vmem:[%s730_s19 + $0x100] sm:$0xff]  ;;  %v213_v58 = vld [vmem:[%s730_s19 + $0x110] sm:$0xff]  ;;  %v595_v59 = vpack.c.bf16 %v218_v52, %v214_v51  ;;  %v220_v61 = vld [vmem:[%s730_s19 + $0x148] sm:$0xff] }
  0x20   : >> { %558 = vmatpush1.bf16.msra.mxu0 %v557_v37  ;;  %v215_v57 = vld [vmem:[%s730_s19 + $0x120] sm:$0xff]  ;;  %v217_v60 = vld [vmem:[%s730_s19 + $0x130] sm:$0xff]  ;;  %v224_v62 = vld [vmem:[%s730_s19 + $0x168] sm:$0xff]  ;;  %v694_v37 = vmov 1983009808  }
  0x21   : >> { %590 = vmatpush1.bf16.msra.mxu1 %v589_v41  ;;  %560 = vmatprep.subr.bf16.mxu0 %v559_v42  ;;  %v222_v63 = vld [vmem:[%s730_s19 + $0x158] sm:$0xff]  ;;  %v565_v3 = vpack.c.bf16 %v215_v57, %v211_v56  ;;  %v597_v4 = vpack.c.bf16 %v217_v60, %v213_v58  ;;  %v567_v5 = vpack.c.bf16 %v224_v62, %v220_v61  ;;  %v219_v6 = vld [vmem:[%s730_s19 + $0x140] sm:$0xff]  ;;  %v221_v8 = vld [vmem:[%s730_s19 + $0x150] sm:$0xff]  ;;  %v392_v38 = vunpack.c.l.s4 %v694_v37 }
  0x22   : >> { %592 = vmatprep.subr.bf16.mxu1 %v591_v46  ;;  %v226_v2 = vld [vmem:[%s730_s19 + $0x178] sm:$0xff]  ;;  %v223_v7 = vld [vmem:[%s730_s19 + $0x160] sm:$0xff]  ;;  %v225_v10 = vld [vmem:[%s730_s19 + $0x170] sm:$0xff]  ;;  %v395_v41 = vshrl.u32 %v394_v39, 7 }
  0x23   : >> { %v599_v9 = vpack.c.bf16 %v226_v2, %v222_v63  ;;  %v228_v11 = vld [vmem:[%s730_s19 + $0x188] sm:$0xff]  ;;  %v230_v13 = vld [vmem:[%s730_s19 + $0x198] sm:$0xff]  ;;  %v569_v15 = vpack.c.bf16 %v223_v7, %v219_v6  ;;  %v601_v16 = vpack.c.bf16 %v225_v10, %v221_v8  ;;  %v227_v18 = vld [vmem:[%s730_s19 + $0x180] sm:$0xff]  ;;  %v393_v40 = vunpack.c.0.s8 %v392_v38 }
  0x24   : >> { %562 = vmatpush1.bf16.msra.mxu0 %v561_v53  ;;  %v232_v12 = vld [vmem:[%s730_s19 + $0x1a8] sm:$0xff]  ;;  %v234_v14 = vld [vmem:[%s730_s19 + $0x1b8] sm:$0xff]  ;;  %v231_v19 = vld [vmem:[%s730_s19 + $0x1a0] sm:$0xff] }
  0x25   : >> { %594 = vmatpush1.bf16.msra.mxu1 %v593_v54  ;;  %564 = vmatprep.subr.bf16.mxu0 %v563_v55  ;;  %v571_v17 = vpack.c.bf16 %v232_v12, %v228_v11  ;;  %v229_v20 = vld [vmem:[%s730_s19 + $0x190] sm:$0xff]  ;;  %v603_v21 = vpack.c.bf16 %v234_v14, %v230_v13  ;;  %v236_v23 = vld [vmem:[%s730_s19 + $0x1c8] sm:$0xff]  ;;  %v238_v25 = vld [vmem:[%s730_s19 + $0x1d8] sm:$0xff]  ;;  %v573_v27 = vpack.c.bf16 %v231_v19, %v227_v18 }
  0x26   : >> { %596 = vmatprep.subr.bf16.mxu1 %v595_v59  ;;  %v233_v22 = vld [vmem:[%s730_s19 + $0x1b0] sm:$0xff]  ;;  %v240_v24 = vld [vmem:[%s730_s19 + $0x1e8] sm:$0xff]  ;;  %v242_v26 = vld [vmem:[%s730_s19 + $0x1f8] sm:$0xff]  ;;  %v396_v43 = vsub.s32 %v393_v40, %v395_v41 }
  0x27   : >> { %v605_v28 = vpack.c.bf16 %v233_v22, %v229_v20  ;;  %v575_v29 = vpack.c.bf16 %v240_v24, %v236_v23  ;;  %v235_v30 = vld [vmem:[%s730_s19 + $0x1c0] sm:$0xff]  ;;  %v607_v32 = vpack.c.bf16 %v242_v26, %v238_v25  ;;  %v237_v33 = vld [vmem:[%s730_s19 + $0x1d0] sm:$0xff] }
  0x28   : >> { %566 = vmatpush1.bf16.msra.mxu0 %v565_v3  ;;  %v239_v31 = vld [vmem:[%s730_s19 + $0x1e0] sm:$0xff]  ;;  %v241_v34 = vld [vmem:[%s730_s19 + $0x1f0] sm:$0xff] }
  0x29   : >> { %598 = vmatpush1.bf16.msra.mxu1 %v597_v4  ;;  %568 = vmatprep.subr.bf16.mxu0 %v567_v5  ;;  %v577_v35 = vpack.c.bf16 %v239_v31, %v235_v30  ;;  %v609_v36 = vpack.c.bf16 %v241_v34, %v237_v33  ;;  %v178_v50 = vld [vmem:[%s177_s28] sm:$0xff] }
  0x2a   : >> { %600 = vmatprep.subr.bf16.mxu1 %v599_v9 }
  0x2c   : >> { %570 = vmatpush1.bf16.msra.mxu0 %v569_v15 }
  0x2d   : >> { %602 = vmatpush1.bf16.msra.mxu1 %v601_v16  ;;  %572 = vmatprep.subr.bf16.mxu0 %v571_v17 }
  0x2e   : >> { %604 = vmatprep.subr.bf16.mxu1 %v603_v21 }
  0x30   : >> { %574 = vmatpush1.bf16.msra.mxu0 %v573_v27 }
  0x31   : >> { %606 = vmatpush1.bf16.msra.mxu1 %v605_v28  ;;  %576 = vmatprep.subr.bf16.mxu0 %v575_v29 }
  0x32   : >> { %608 = vmatprep.subr.bf16.mxu1 %v607_v32 }
  0x34   : >> { %578 = vmatpush1.bf16.msra.mxu0 %v577_v35 }
  0x35   : >> { %610 = vmatpush1.bf16.msra.mxu1 %v609_v36 }
  0x37   : >> { %308 = vmatmul.mubr.f32.vlgmr.msra.gmra.mrb[0].mxu0 %v687_v1 }
  0x38   : >> { %379 = vmatmul.mubr.f32.vlgmr.msra.gmra.mrb[0].mxu1 %v687_v1 }
 0x10a   : >> { %v309_v42 = vpop.f32.mrb[0].mxu0 }
 0x10b   : >> { %v380_v44 = vpop.f32.mrb[0].mxu1  ;;  %v311_v45 = vpop.f32.mrb[1].mxu0 }
 0x10c   : >> { %v389_v46 = vcombine.low %v309_v42, %v311_v45  ;;  %v382_v47 = vpop.f32.mrb[1].mxu1 }
 0x10d   : >> { %v390_v1 = vcombine.low %v380_v44, %v382_v47 }
 0x10e   : >> { %v397_v48 = vrot.slane %v389_v46, %v396_v43 }
 0x10f   : >> { %v404_v49 = vrot.slane %v390_v1, %v396_v43 }
 0x111   : >> { %v405_v51 = vcombine.low %v397_v48, %v404_v49 }
 0x113   : >> { %v407_v52 = vadd.f32 %v405_v51, %v178_v50 }
 0x115   : >> { %v537_v53 = vmul.f32 -1.442695, %v407_v52  ;;  %v415_v54 = vrot.slane %v407_v52, 2  ;;  %v426_v56 = vrot.slane %v407_v52, 6  ;;  %v423_v59 = vrot.slane %v407_v52, 4 }
 0x117   : >> { %645 = vpow2.f32 %v537_v53  ;;  %v538_v55 = vmul.f32 -1.442695, %v415_v54  ;;  %v539_v57 = vmul.f32 -1.442695, %v426_v56 }
 0x119   : >> { %647 = vpow2.f32 %v538_v55 }
 0x11a   : >> { %649 = vpow2.f32 %v539_v57 }
 0x121   : >> { %v646_v58 = vpop.eup %645 }
 0x122   : >> { %v411_v60 = vadd.f32 1.0, %v646_v58 }
 0x123   : >> { %v648_v61 = vpop.eup %647 }
 0x124   : >> { %651 = vrcp.f32 %v411_v60  ;;  %v420_v62 = vadd.f32 1.0, %v648_v61  ;;  %v650_v63 = vpop.eup %649 }
 0x125   : >> { %653 = vtanh.f32 %v423_v59  ;;  %v431_v5 = vadd.f32 1.0, %v650_v63 }
 0x126   : >> { %655 = vrcp.f32 %v420_v62 }
 0x127   : >> { %657 = vrcp.f32 %v431_v5 }
 0x12e   : >> { %v652_v2 = vpop.eup %651 }
 0x12f   : >> { %v654_v3 = vpop.eup %653 }
 0x130   : >> { %v656_v4 = vpop.eup %655  ;;  %v435_v7 = vmul.f32 %v654_v3, %v652_v2 }
 0x131   : >> { %v434_v6 = vmul.f32 %v683_v0, %v656_v4  ;;  %v658_v8 = vpop.eup %657 }
 0x133   : >> { %v436_v0 = vadd.f32 %v435_v7, %v434_v6  }
 0x135   : >> { %659 = vtanh.f32 %v436_v0 }
 0x13c   : > { %168 = sbr.rel (!%p166_p5) target bundleno = 19 (0x13), region = 70 }
 0x13f   : >> { %v660_v9 = vpop.eup %659 }
 0x140   : >> { %v438_v1 = vmul.f32 %v660_v9, %v658_v8  }
 0x142   : >> { %441 = vst [vmem:[%s440_s30] sm:$0x3] %v438_v1 }
 0x143 PF: > { %s12_s9 = sadd.s32 1, %s679_s9  }
 0x144   : > { %p9_p6 = scmp.ge.s32.totalorder %s12_s9, 4  }
 0x146   :  { %11 = sbr.rel (!%p9_p6) target bundleno = 1 (0x1), region = 81 }

// kernel: crnn_ser_forward.13
= control target key start
LH: loop header
LB: loop body
LE: loop exit
PB: predicated region body
PF: predicated region fallthrough
CT: control target
= control target key end

     0   :  { %s381_s0 = inlined_call_operand.vmem [shape: f32[2,256], index: 0, kind: input, shape index: {}]   ;;  %s382_s1 = inlined_call_operand.vmem [shape: f32[256,8], index: 1, kind: input, shape index: {}]   ;;  %s383_s2 = inlined_call_operand.vmem [shape: f32[1,8], index: 2, kind: input, shape index: {}]   ;;  %s384_s3 = inlined_call_operand.hbm [shape: f32[2,8], index: 3, kind: output, shape index: {}]  }
   0x1   :  { %v32_v0 = vld [vmem:[%s382_s1 + $0x80] sm:$0xff]  ;;  %v33_v1 = vld [vmem:[%s382_s1 + $0x88] sm:$0xff]  ;;  %v34_v5 = vld [vmem:[%s382_s1 + $0x90] sm:$0xff] }
   0x2   :  { %v16_v2 = vld [vmem:[%s382_s1] sm:$0xff]  ;;  %v189_v3 = vpack.c.bf16 %v33_v1, %v32_v0  ;;  %v17_v4 = vld [vmem:[%s382_s1 + $0x8] sm:$0xff]  ;;  %v35_v6 = vld [vmem:[%s382_s1 + $0x98] sm:$0xff] }
   0x3   :  { %v191_v7 = vpack.c.bf16 %v17_v4, %v16_v2  ;;  %v193_v8 = vpack.c.bf16 %v35_v6, %v34_v5  ;;  %v18_v9 = vld [vmem:[%s382_s1 + $0x10] sm:$0xff]  ;;  %v19_v10 = vld [vmem:[%s382_s1 + $0x18] sm:$0xff]  ;;  %v36_v11 = vld [vmem:[%s382_s1 + $0xa0] sm:$0xff] }
   0x4   :  { %190 = vmatprep.subr.bf16.mxu0 %v189_v3  ;;  %v37_v12 = vld [vmem:[%s382_s1 + $0xa8] sm:$0xff]  ;;  %v195_v13 = vpack.c.bf16 %v19_v10, %v18_v9  ;;  %v20_v15 = vld [vmem:[%s382_s1 + $0x20] sm:$0xff]  ;;  %v38_v17 = vld [vmem:[%s382_s1 + $0xb0] sm:$0xff] }
   0x5   :  { %192 = vmatpush3.bf16.msra.mxu0 %v191_v7  ;;  %v197_v14 = vpack.c.bf16 %v37_v12, %v36_v11  ;;  %v21_v16 = vld [vmem:[%s382_s1 + $0x28] sm:$0xff]  ;;  %v39_v18 = vld [vmem:[%s382_s1 + $0xb8] sm:$0xff]  ;;  %v22_v21 = vld [vmem:[%s382_s1 + $0x30] sm:$0xff] }
   0x6   :  { %194 = vmatprep.subr.bf16.mxu0 %v193_v8  ;;  %v199_v19 = vpack.c.bf16 %v21_v16, %v20_v15  ;;  %v201_v20 = vpack.c.bf16 %v39_v18, %v38_v17  ;;  %v23_v22 = vld [vmem:[%s382_s1 + $0x38] sm:$0xff]  ;;  %v40_v23 = vld [vmem:[%s382_s1 + $0xc0] sm:$0xff]  ;;  %v41_v24 = vld [vmem:[%s382_s1 + $0xc8] sm:$0xff] }
   0x7   :  { %v153_v25 = vld.sshfl [vmem:[%s381_s0] sm:$0x33 pattern:$0x76325410] }
   0x8   :  { %v63_v26 = vcombine.high %v153_v25, %v153_v25 }
   0x9   :  { %196 = vmatpush3.bf16.msra.mxu0 %v195_v13 }
   0xa   :  { %198 = vmatprep.subr.bf16.mxu0 %v197_v14 }
   0xb   :  { %8 = vsyncpa [#allocation3], 0  ;;  %v203_v27 = vpack.c.bf16 %v23_v22, %v22_v21  ;;  %v205_v28 = vpack.c.bf16 %v41_v24, %v40_v23  ;;  %v24_v29 = vld [vmem:[%s382_s1 + $0x40] sm:$0xff]  ;;  %v25_v30 = vld [vmem:[%s382_s1 + $0x48] sm:$0xff]  ;;  %130 = vmatprep.mubr.f32.mxu0 %v63_v26  ;;  %s246_s25 = smov [#allocation2]   ;;  %vm136_vm0 = vcmask 58368  }
   0xc   :  { %v42_v31 = vld [vmem:[%s382_s1 + $0xd0] sm:$0xff]  ;;  %v43_v32 = vld [vmem:[%s382_s1 + $0xd8] sm:$0xff]  ;;  %v207_v33 = vpack.c.bf16 %v25_v30, %v24_v29  ;;  %v44_v37 = vld [vmem:[%s382_s1 + $0xe0] sm:$0xff]  ;;  %s144_s26 = sshll.u32 %s246_s25, 4  ;;  %s145_s26 = int_to_ptr.vmem [resolvable:$true] %s144_s26 }
   0xd   :  { %200 = vmatpush3.bf16.msra.mxu0 %v199_v19  ;;  %v209_v34 = vpack.c.bf16 %v43_v32, %v42_v31  ;;  %v26_v35 = vld [vmem:[%s382_s1 + $0x50] sm:$0xff]  ;;  %v27_v36 = vld [vmem:[%s382_s1 + $0x58] sm:$0xff]  ;;  %v45_v38 = vld [vmem:[%s382_s1 + $0xe8] sm:$0xff]  ;;  %s222_s27 = scalar_lea.vmem %s145_s26, 32  ;;  %p227_p1 = scmp.lt.s32.totalorder %s145_s26, %s145_s26 }
   0xe   :  { %202 = vmatprep.subr.bf16.mxu0 %v201_v20  ;;  %v211_v39 = vpack.c.bf16 %v27_v36, %v26_v35  ;;  %v213_v40 = vpack.c.bf16 %v45_v38, %v44_v37  ;;  %v28_v41 = vld [vmem:[%s382_s1 + $0x60] sm:$0xff]  ;;  %v29_v42 = vld [vmem:[%s382_s1 + $0x68] sm:$0xff]  ;;  %v46_v43 = vld [vmem:[%s382_s1 + $0xf0] sm:$0xff]  ;;  %p223_p0 = scmp.ne.s32.totalorder %s145_s26, %s222_s27  ;;  %p228_p2 = scmp.lt.s32.totalorder %s222_s27, %s222_s27 }
   0xf   :  { %v47_v44 = vld [vmem:[%s382_s1 + $0xf8] sm:$0xff]  ;;  %v215_v45 = vpack.c.bf16 %v29_v42, %v28_v41  ;;  %v30_v47 = vld [vmem:[%s382_s1 + $0x70] sm:$0xff]  ;;  %v152_v51 = vld [vmem:[%s383_s2] ss:$0 sm:$0xff] }
  0x10   :  { %v217_v46 = vpack.c.bf16 %v47_v44, %v46_v43  ;;  %v31_v48 = vld [vmem:[%s382_s1 + $0x78] sm:$0xff]  ;;  %p229_p3 = por %p228_p2, %p227_p1 }
  0x11   :  { %204 = vmatpush3.bf16.msra.mxu0 %v203_v27  ;;  %v219_v49 = vpack.c.bf16 %v31_v48, %v30_v47 }
  0x12   :  { %206 = vmatprep.subr.bf16.mxu0 %v205_v28  ;;  %p230_p4 = pnand %p229_p3, %p223_p0 }
  0x15   :  { %208 = vmatpush3.bf16.msra.mxu0 %v207_v33 }
  0x16   :  { %210 = vmatprep.subr.bf16.mxu0 %v209_v34 }
  0x19   :  { %212 = vmatpush3.bf16.msra.mxu0 %v211_v39 }
  0x1a   :  { %214 = vmatprep.subr.bf16.mxu0 %v213_v40 }
  0x1d   :  { %216 = vmatpush3.bf16.msra.mxu0 %v215_v45 }
  0x1e   :  { %218 = vmatprep.subr.bf16.mxu0 %v217_v46 }
  0x21   :  { %220 = vmatpush3.bf16.msra.mxu0 %v219_v49 }
  0x24   :  { %131 = vmatmul.mubr.f32.vlgmr.msra.gmra.mrb[0].mxu0 %v153_v25 }
  0xf7   :  { %v186_v50 = vpop.f32.mrb[0].mxu0 }
  0xf8   :  { %v187_v52 = vpop.f32.mrb[1].mxu0 }
  0xf9   :  { %v188_v53 = vadd.f32 %v187_v52, %v186_v50 }
  0xfb   :  { %v133_v54 = vadd.f32 %v188_v53, %v152_v51 }
  0xfd   :  { %137 = vst.msk [vmem:[#allocation2] sm:$0x3] %vm136_vm0, %v133_v54 }
  0xfe   :  { %233 = shalt.err (!%p230_p4)
}
  0xff   :  { %s234_s0 = scalar_lea.hbm %s384_s3, 32 }
 0x100   :  { %p235_p5 = scmp.ne.s32.totalorder %s384_s3, %s234_s0  ;;  %p238_p6 = scmp.lt.u32.totalorder %s234_s0, %s384_s3 }
 0x102   :  { %p240_p7 = pnand %p238_p6, %p235_p5 }
 0x104   :  { %243 = shalt.err (!%p240_p7)
}
 0x105   :  { %147 = dma.vmem_to_hbm [thread:$0]  %s145_s26, 32, %s384_s3, [#allocation3]  }
 0x106   :  { %244 = dma.done.wait [#allocation3], 32  }
 0x107   :  { %245 = vsyncadd [#allocation3], 4294967264 }
 0x108   :  { %151 = vsyncpa [#allocation3], 1 }

</bundles_post_ra>
